<compile_context>
chip_gen: v6e
topology: v6e:2x2x1
jax: 0.10.0
libtpu: 0.0.40
codegen_flags: <defaults>
</compile_context>

<pallas_src>
import functools

import jax
import jax.numpy as jnp
from jax.experimental import pallas as pl
from jax.experimental.pallas import tpu as pltpu

EPS = 1e-5
LANE = 128


def _round_up(x, m):
    return (x + m - 1) // m * m


# ----------------------------- MaxPool2d(2) ----------------------------------
def _maxpool_kernel(x_ref, o_ref):
    # x_ref: (Ho, 2, Wo, 2*C) -- even/odd H rows on dim 1, even/odd W columns
    # packed into the two lane halves.  o_ref: (Ho, Wo, C) bf16.
    c = x_ref.shape[-1] // 2
    m = jnp.maximum(x_ref[:, 0, :, :], x_ref[:, 1, :, :])       # (Ho, Wo, 2C)
    o_ref[...] = jnp.maximum(m[:, :, :c], m[:, :, c:]).astype(o_ref.dtype)


def maxpool2x2(x):
    # x: (N, H, W, Cp) f32 (channel-padded) -> (N, Ho, Wo, Cp) bf16
    N, H, W, C = x.shape
    Ho, Wo = H // 2, W // 2
    xr = x.reshape(N, Ho, 2, Wo, 2 * C)                         # free reshape
    return pl.pallas_call(
        _maxpool_kernel,
        out_shape=jax.ShapeDtypeStruct((N, Ho, Wo, C), jnp.bfloat16),
        grid=(N,),
        in_specs=[pl.BlockSpec((pl.Squeezed(), Ho, 2, Wo, 2 * C),
                               lambda n: (n, 0, 0, 0, 0))],
        out_specs=pl.BlockSpec((pl.Squeezed(), Ho, Wo, C),
                               lambda n: (n, 0, 0, 0)),
        compiler_params=pltpu.CompilerParams(dimension_semantics=("parallel",)),
    )(xr)


# --------------- Conv3x3 (pad=1) + bias + BN partial stats -------------------
def _conv_taps(slab_ref, w_ref, b_ref, y_ref, s_ref, q_ref, *, M, HW, Wo, halo):
    # slab_ref: (M + 2*halo, Cin_p) bf16 VMEM scratch holding the activation for
    # this step at rows [halo, halo+M); halo rows are never read unmasked.
    # Tap (dy, dx) for output q is slab[halo + q + (dy-1)*Wo + (dx-1)], masked
    # to zero where the read would cross an image row / image boundary.
    pix = jax.lax.broadcasted_iota(jnp.int32, (M, 1), 0)
    ql = pix % HW                      # pixel index within its image
    col = ql % Wo
    ok_row = [ql >= Wo, None, ql < (HW - Wo)]          # dy = 0, 1, 2
    ok_col = [col != 0, None, col != (Wo - 1)]         # dx = 0, 1, 2

    cout_p = w_ref.shape[2]
    acc = jnp.zeros((M, cout_p), jnp.float32)
    for dy in range(3):
        for dx in range(3):
            k = dy * 3 + dx
            start = halo + (dy - 1) * Wo + (dx - 1)
            t = slab_ref[pl.ds(start, M), :]           # (M, Cin_p) bf16
            if ok_row[dy] is not None and ok_col[dx] is not None:
                m = jnp.logical_and(ok_row[dy], ok_col[dx])
            elif ok_row[dy] is not None:
                m = ok_row[dy]
            elif ok_col[dx] is not None:
                m = ok_col[dx]
            else:
                m = None
            if m is not None:
                t = jnp.where(m, t, jnp.zeros_like(t))
            acc = acc + jnp.dot(t, w_ref[k], preferred_element_type=jnp.float32)

    y = acc + b_ref[...]                               # (M, Cout_p) f32
    y_ref[...] = y.astype(y_ref.dtype)                 # bf16 inter-stage store
    s_ref[...] = jnp.sum(y, axis=0, keepdims=True)     # BN partial sum (f32)
    q_ref[...] = jnp.sum(y * y, axis=0, keepdims=True) # BN partial sum of squares


def _fill_slab(slab_ref, data_bf16, *, M, halo):
    cin_p = slab_ref.shape[1]
    z = jnp.zeros((halo, cin_p), slab_ref.dtype)
    slab_ref[pl.ds(0, halo), :] = z                    # defensive: halo reads are masked
    slab_ref[pl.ds(halo + M, halo), :] = z
    slab_ref[pl.ds(halo, M), :] = data_bf16


def _conv_plain_kernel(a_ref, w_ref, b_ref, y_ref, s_ref, q_ref, slab_ref,
                       *, M, HW, Wo, halo):
    _fill_slab(slab_ref, a_ref[...], M=M, halo=halo)
    _conv_taps(slab_ref, w_ref, b_ref, y_ref, s_ref, q_ref,
               M=M, HW=HW, Wo=Wo, halo=halo)


def _conv_bnrelu_kernel(a_ref, sc_ref, sh_ref, w_ref, b_ref,
                        y_ref, s_ref, q_ref, slab_ref, *, M, HW, Wo, halo):
    # Fused prologue: BN-apply + ReLU of the previous stage's raw bf16 conv out.
    a = jnp.maximum(a_ref[...].astype(jnp.float32) * sc_ref[...] + sh_ref[...], 0.0)
    _fill_slab(slab_ref, a.astype(slab_ref.dtype), M=M, halo=halo)
    _conv_taps(slab_ref, w_ref, b_ref, y_ref, s_ref, q_ref,
               M=M, HW=HW, Wo=Wo, halo=halo)


def conv3x3_stage(a_flat, w9, b_row, *, HW, Wo, group, scale=None, shift=None):
    """One conv stage over the flattened batch.
    a_flat: (N*HW, Cin_p) bf16.  w9: (9, Cin_p, Cout_p) bf16.  b_row: (1, Cout_p) f32.
    Returns raw conv output (N*HW, Cout_p) bf16 + per-step BN partial sums (f32)."""
    R, cin_p = a_flat.shape
    cout_p = w9.shape[2]
    M = group * HW
    T = R // M
    halo = _round_up(Wo + 1, 8)
    kw = dict(M=M, HW=HW, Wo=Wo, halo=halo)

    out_shape = (jax.ShapeDtypeStruct((R, cout_p), jnp.bfloat16),
                 jax.ShapeDtypeStruct((T, cout_p), jnp.float32),
                 jax.ShapeDtypeStruct((T, cout_p), jnp.float32))
    out_specs = (pl.BlockSpec((M, cout_p), lambda t: (t, 0)),
                 pl.BlockSpec((1, cout_p), lambda t: (t, 0)),
                 pl.BlockSpec((1, cout_p), lambda t: (t, 0)))
    a_spec = pl.BlockSpec((M, cin_p), lambda t: (t, 0))
    w_spec = pl.BlockSpec((9, cin_p, cout_p), lambda t: (0, 0, 0))
    b_spec = pl.BlockSpec((1, cout_p), lambda t: (0, 0))
    scratch = [pltpu.VMEM((M + 2 * halo, cin_p), jnp.bfloat16)]
    params = pltpu.CompilerParams(dimension_semantics=("parallel",))

    if scale is None:
        kernel = functools.partial(_conv_plain_kernel, **kw)
        return pl.pallas_call(
            kernel, out_shape=out_shape, grid=(T,),
            in_specs=[a_spec, w_spec, b_spec], out_specs=out_specs,
            scratch_shapes=scratch, compiler_params=params,
        )(a_flat, w9, b_row)

    kernel = functools.partial(_conv_bnrelu_kernel, **kw)
    v_spec = pl.BlockSpec((1, cin_p), lambda t: (0, 0))
    return pl.pallas_call(
        kernel, out_shape=out_shape, grid=(T,),
        in_specs=[a_spec, v_spec, v_spec, w_spec, b_spec], out_specs=out_specs,
        scratch_shapes=scratch, compiler_params=params,
    )(a_flat, scale.reshape(1, cin_p).astype(jnp.float32),
      shift.reshape(1, cin_p).astype(jnp.float32), w9, b_row)


# ------------------- BatchNorm fold (tiny, plain JAX) ------------------------
def _fold_bn(s, q, gamma, beta, count):
    # s, q: (T, C) per-step partial sum / sum of squares.  Biased variance
    # (train-mode normalization).  Padded channels have gamma=0 -> scale=shift=0.
    mean = jnp.sum(s, axis=0) / count
    var = jnp.maximum(jnp.sum(q, axis=0) / count - mean * mean, 0.0)
    scale = gamma / jnp.sqrt(var + EPS)
    shift = beta - mean * scale
    return scale, shift


# ------------------------- Final BN-apply + ReLU -----------------------------
def _bn_relu_kernel(y_ref, sc_ref, sh_ref, o_ref):
    o_ref[...] = jnp.maximum(
        y_ref[...].astype(jnp.float32) * sc_ref[...] + sh_ref[...], 0.0)


def bn_relu_apply(y, scale, shift, *, M):
    R, cp = y.shape
    T = R // M
    return pl.pallas_call(
        _bn_relu_kernel,
        out_shape=jax.ShapeDtypeStruct((R, cp), jnp.float32),
        grid=(T,),
        in_specs=[pl.BlockSpec((M, cp), lambda t: (t, 0)),
                  pl.BlockSpec((1, cp), lambda t: (0, 0)),
                  pl.BlockSpec((1, cp), lambda t: (0, 0))],
        out_specs=pl.BlockSpec((M, cp), lambda t: (t, 0)),
        compiler_params=pltpu.CompilerParams(dimension_semantics=("parallel",)),
    )(y, scale.reshape(1, cp).astype(jnp.float32),
      shift.reshape(1, cp).astype(jnp.float32))


# ----------------------------- param prep ------------------------------------
def _prep_w(w, cin_p, cout_p):
    # (Cout, Cin, 3, 3) PyTorch layout -> zero-padded (9, Cin_p, Cout_p) bf16
    # with tap index k = dy*3 + dx matching the in-kernel tap order.
    cout, cin = w.shape[0], w.shape[1]
    wp = jnp.zeros((cout_p, cin_p, 3, 3), jnp.float32).at[:cout, :cin].set(w)
    return jnp.transpose(wp, (2, 3, 1, 0)).reshape(9, cin_p, cout_p).astype(jnp.bfloat16)


def _pad_vec(v, cp):
    return jnp.pad(v.astype(jnp.float32), (0, cp - v.shape[0]))


def _pick_group(n, hw, cin_p, cout_p, budget=6 * 1024 * 1024):
    # Largest image-group G (dividing N) whose per-step VMEM footprint stays in
    # budget: activation in (x2 buf) + slab + bf16 out (x2 buf) + f32 acc.
    per_row = 6 * cin_p + 8 * cout_p
    gmax = max(1, budget // max(1, per_row * hw))
    g = max(1, min(n, gmax))
    while n % g:
        g -= 1
    return g


# ------------------------------ Down.forward ---------------------------------
def down_forward(x_nchw, p):
    N, Cin, H, W = x_nchw.shape
    assert H % 2 == 0 and W % 2 == 0, "MaxPool2d(2) requires even H, W"
    Ho, Wo = H // 2, W // 2
    HW = Ho * Wo
    cnt = float(N * HW)

    cmid, cout = p["w1"].shape[0], p["w2"].shape[0]
    cin_p = _round_up(Cin, LANE)
    cmid_p = _round_up(cmid, LANE)
    cout_p = _round_up(cout, LANE)

    # NCHW -> NHWC + pad channels to the lane width (one XLA copy of the input).
    x = jnp.transpose(x_nchw, (0, 2, 3, 1)).astype(jnp.float32)
    x = jnp.pad(x, ((0, 0), (0, 0), (0, 0), (0, cin_p - Cin)))

    pooled = maxpool2x2(x)                                   # (N, Ho, Wo, cin_p) bf16
    a0 = pooled.reshape(N * HW, cin_p)                       # free reshape

    group = _pick_group(N, HW, max(cin_p, cmid_p), max(cmid_p, cout_p))
    M = group * HW

    w1 = _prep_w(p["w1"], cin_p, cmid_p)
    b1 = _pad_vec(p["b1"], cmid_p).reshape(1, cmid_p)
    w2 = _prep_w(p["w2"], cmid_p, cout_p)
    b2 = _pad_vec(p["b2"], cout_p).reshape(1, cout_p)

    # Stage 1: conv1 + bias (+ BN1 partial stats).
    y1, s1, q1 = conv3x3_stage(a0, w1, b1, HW=HW, Wo=Wo, group=group)
    sc1, sh1 = _fold_bn(s1, q1, _pad_vec(p["g1"], cmid_p), _pad_vec(p["be1"], cmid_p), cnt)

    # Stage 2: BN1-apply + ReLU fused as prologue, then conv2 + bias + stats.
    y2, s2, q2 = conv3x3_stage(y1, w2, b2, HW=HW, Wo=Wo, group=group,
                               scale=sc1, shift=sh1)
    sc2, sh2 = _fold_bn(s2, q2, _pad_vec(p["g2"], cout_p), _pad_vec(p["be2"], cout_p), cnt)

    a2 = bn_relu_apply(y2, sc2, sh2, M=M)                    # (N*HW, cout_p) f32
    out = a2[:, :cout].reshape(N, Ho, Wo, cout)              # strip channel padding
    return jnp.transpose(out, (0, 3, 1, 2))                  # NHWC -> NCHW


# ------------------------------ params / reference ---------------------------
def init_params(key, cin, cout):
    cmid = cout
    k1, k2, k3, k4 = jax.random.split(key, 4)
    return dict(
        w1=jax.random.normal(k1, (cmid, cin, 3, 3), jnp.float32) * 0.1,
        b1=jax.random.normal(k2, (cmid,), jnp.float32) * 0.1,
        g1=jnp.ones((cmid,), jnp.float32),
        be1=jnp.zeros((cmid,), jnp.float32),
        w2=jax.random.normal(k3, (cout, cmid, 3, 3), jnp.float32) * 0.1,
        b2=jax.random.normal(k4, (cout,), jnp.float32) * 0.1,
        g2=jnp.ones((cout,), jnp.float32),
        be2=jnp.zeros((cout,), jnp.float32),
    )


def down_reference(x_nchw, p):
    x = jnp.transpose(x_nchw, (0, 2, 3, 1)).astype(jnp.float32)
    pooled = jax.lax.reduce_window(x, -jnp.inf, jax.lax.max,
                                   (1, 2, 2, 1), (1, 2, 2, 1), "VALID")

    def conv(z, w, b):
        wh = jnp.transpose(w, (2, 3, 1, 0))  # HWIO
        return jax.lax.conv_general_dilated(
            z, wh, (1, 1), "SAME",
            dimension_numbers=("NHWC", "HWIO", "NHWC"),
            precision=jax.lax.Precision.HIGHEST) + b

    def bnr(z, g, be):
        m = jnp.mean(z, axis=(0, 1, 2), keepdims=True)
        v = jnp.mean((z - m) ** 2, axis=(0, 1, 2), keepdims=True)
        return jnp.maximum((z - m) / jnp.sqrt(v + EPS) * g + be, 0.0)

    a1 = bnr(conv(pooled, p["w1"], p["b1"]), p["g1"], p["be1"])
    a2 = bnr(conv(a1, p["w2"], p["b2"]), p["g2"], p["be2"])
    return jnp.transpose(a2, (0, 3, 1, 2))


if __name__ == "__main__":
    key = jax.random.PRNGKey(0)
    kx, kp = jax.random.split(key)
    N, Cin, H, W = 2, 4, 16, 16
    Cout = 8

    x = jax.random.normal(kx, (N, Cin, H, W), jnp.float32)
    params = init_params(kp, Cin, Cout)

    out = jax.block_until_ready(jax.jit(down_forward)(x, params))

    assert out.shape == (N, Cout, H // 2, W // 2), out.shape
    ref = down_reference(x, params)
    max_err = float(jnp.max(jnp.abs(out - ref)))
    # bf16 inter-stage activations + bf16 MXU operands (f32 accumulation) give
    # ~1e-2 absolute drift vs the all-f32 HIGHEST-precision reference.
    if max_err > 4e-2:
        raise SystemExit(f"numerical mismatch vs reference: max abs err {max_err}")

    print("KERNEL_OK")
</pallas_src>

<mosaic_0001>
module attributes {stable_mosaic.version = 11 : i64} {
  func.func @_maxpool_kernel(%arg0: i32, %arg1: memref<1x8x2x8x256xf32, #tpu.memory_space<vmem>>, %arg2: memref<1x8x8x128xbf16, #tpu.memory_space<vmem>>) attributes {dimension_semantics = [#tpu.dimension_semantics<parallel>], iteration_bounds = array<i64: 2>, scalar_prefetch = 0 : i64, scratch_operands = 0 : i64, tpu.core_type = #tpu.core_type<tc>, window_params = [{transform_indices = @transform_0, window_bounds = array<i64: 1, 8, 2, 8, 256>}, {transform_indices = @transform_1, window_bounds = array<i64: 1, 8, 8, 128>}]} {
    %c0 = arith.constant 0 : index
    %c0_0 = arith.constant 0 : index
    %c0_1 = arith.constant 0 : index
    %c0_2 = arith.constant 0 : index
    %c0_3 = arith.constant 0 : index
    %0 = vector.load %arg1[%c0, %c0_0, %c0_1, %c0_2, %c0_3] : memref<1x8x2x8x256xf32, #tpu.memory_space<vmem>>, vector<1x8x1x8x256xf32>
    %1 = vector.shape_cast %0 : vector<1x8x1x8x256xf32> to vector<8x8x256xf32>
    %c0_4 = arith.constant 0 : index
    %c0_5 = arith.constant 0 : index
    %c1 = arith.constant 1 : index
    %c0_6 = arith.constant 0 : index
    %c0_7 = arith.constant 0 : index
    %2 = vector.load %arg1[%c0_4, %c0_5, %c1, %c0_6, %c0_7] : memref<1x8x2x8x256xf32, #tpu.memory_space<vmem>>, vector<1x8x1x8x256xf32>
    %3 = vector.shape_cast %2 : vector<1x8x1x8x256xf32> to vector<8x8x256xf32>
    %4 = arith.maximumf %1, %3 : vector<8x8x256xf32>
    %5 = vector.extract_strided_slice %4 {offsets = [0, 0, 0], sizes = [8, 8, 128], strides = [1, 1, 1]} : vector<8x8x256xf32> to vector<8x8x128xf32>
    %6 = vector.extract_strided_slice %4 {offsets = [0, 0, 128], sizes = [8, 8, 128], strides = [1, 1, 1]} : vector<8x8x256xf32> to vector<8x8x128xf32>
    %7 = arith.maximumf %5, %6 : vector<8x8x128xf32>
    %8 = arith.truncf %7 : vector<8x8x128xf32> to vector<8x8x128xbf16>
    %c0_8 = arith.constant 0 : index
    %c0_9 = arith.constant 0 : index
    %c0_10 = arith.constant 0 : index
    %c0_11 = arith.constant 0 : index
    %9 = vector.load %arg2[%c0_8, %c0_9, %c0_10, %c0_11] : memref<1x8x8x128xbf16, #tpu.memory_space<vmem>>, vector<1x8x8x128xbf16>
    %10 = vector.shape_cast %9 : vector<1x8x8x128xbf16> to vector<8x8x128xbf16>
    %11 = vector.shape_cast %8 : vector<8x8x128xbf16> to vector<1x8x8x128xbf16>
    tpu.vector_store %arg2[%c0_8, %c0_9, %c0_10, %c0_11], %11 {strides = array<i32>} : memref<1x8x8x128xbf16, #tpu.memory_space<vmem>>, vector<1x8x8x128xbf16>,
    return
  }
  func.func @transform_0(%arg0: i32) -> (i32, i32, i32, i32, i32) {
    %c0_i32 = arith.constant 0 : i32
    %c0_i32_0 = arith.constant 0 : i32
    %c0_i32_1 = arith.constant 0 : i32
    %c0_i32_2 = arith.constant 0 : i32
    %c0_i32_3 = arith.constant 0 : i32
    return %arg0, %c0_i32, %c0_i32_0, %c0_i32_1, %c0_i32_2 : i32, i32, i32, i32, i32
  }
  func.func @transform_1(%arg0: i32) -> (i32, i32, i32, i32) {
    %c0_i32 = arith.constant 0 : i32
    %c0_i32_0 = arith.constant 0 : i32
    %c0_i32_1 = arith.constant 0 : i32
    %c0_i32_2 = arith.constant 0 : i32
    return %arg0, %c0_i32, %c0_i32_0, %c0_i32_1 : i32, i32, i32, i32
  }
}

module attributes {stable_mosaic.version = 11 : i64} {
  func.func @_conv_plain_kernel(%arg0: i32, %arg1: memref<128x128xbf16, #tpu.memory_space<vmem>>, %arg2: memref<9x128x128xbf16, #tpu.memory_space<vmem>>, %arg3: memref<1x128xf32, #tpu.memory_space<vmem>>, %arg4: memref<128x128xbf16, #tpu.memory_space<vmem>>, %arg5: memref<1x128xf32, #tpu.memory_space<vmem>>, %arg6: memref<1x128xf32, #tpu.memory_space<vmem>>, %arg7: memref<160x128xbf16, #tpu.memory_space<vmem>>) attributes {dimension_semantics = [#tpu.dimension_semantics<parallel>], iteration_bounds = array<i64: 1>, scalar_prefetch = 0 : i64, scratch_operands = 1 : i64, tpu.core_type = #tpu.core_type<tc>, window_params = [{transform_indices = @transform_0, window_bounds = array<i64: 128, 128>}, {pipeline_mode = #tpu.pipeline_mode<synchronous>, transform_indices = @transform_1, window_bounds = array<i64: 9, 128, 128>}, {pipeline_mode = #tpu.pipeline_mode<synchronous>, transform_indices = @transform_2, window_bounds = array<i64: 1, 128>}, {transform_indices = @transform_3, window_bounds = array<i64: 128, 128>}, {transform_indices = @transform_4, window_bounds = array<i64: 1, 128>}, {transform_indices = @transform_5, window_bounds = array<i64: 1, 128>}]} {
    %c0 = arith.constant 0 : index
    %c0_0 = arith.constant 0 : index
    %0 = vector.load %arg1[%c0, %c0_0] : memref<128x128xbf16, #tpu.memory_space<vmem>>, vector<128x128xbf16>
    %cst = arith.constant 0.000000e+00 : bf16
    %1 = vector.broadcast %cst : bf16 to vector<16x128xbf16>
    %c0_1 = arith.constant 0 : index
    %c0_2 = arith.constant 0 : index
    %2 = vector.load %arg7[%c0_1, %c0_2] : memref<160x128xbf16, #tpu.memory_space<vmem>>, vector<16x128xbf16>
    tpu.vector_store %arg7[%c0_1, %c0_2], %1 {strides = array<i32>} : memref<160x128xbf16, #tpu.memory_space<vmem>>, vector<16x128xbf16>,
    %c144 = arith.constant 144 : index
    %c0_3 = arith.constant 0 : index
    %3 = vector.load %arg7[%c144, %c0_3] : memref<160x128xbf16, #tpu.memory_space<vmem>>, vector<16x128xbf16>
    tpu.vector_store %arg7[%c144, %c0_3], %1 {strides = array<i32>} : memref<160x128xbf16, #tpu.memory_space<vmem>>, vector<16x128xbf16>,
    %c16 = arith.constant 16 : index
    %c0_4 = arith.constant 0 : index
    %4 = vector.load %arg7[%c16, %c0_4] : memref<160x128xbf16, #tpu.memory_space<vmem>>, vector<128x128xbf16>
    tpu.vector_store %arg7[%c16, %c0_4], %0 {strides = array<i32>} : memref<160x128xbf16, #tpu.memory_space<vmem>>, vector<128x128xbf16>,
    %5 = tpu.iota {dimensions = array<i32: 0>} : vector<128x1xi32>
    %c64_i32 = arith.constant 64 : i32
    %c0_i32 = arith.constant 0 : i32
    %6 = arith.cmpi eq, %c64_i32, %c0_i32 : i32
    %c1_i32 = arith.constant 1 : i32
    %7 = arith.select %6, %c1_i32, %c64_i32 : i32
    %8 = vector.broadcast %7 : i32 to vector<128x1xi32>
    %9 = arith.remsi %5, %8 : vector<128x1xi32>
    %c0_i32_5 = arith.constant 0 : i32
    %10 = vector.broadcast %c0_i32_5 : i32 to vector<128x1xi32>
    %11 = arith.cmpi ne, %9, %10 : vector<128x1xi32>
    %c0_i32_6 = arith.constant 0 : i32
    %12 = vector.broadcast %c0_i32_6 : i32 to vector<128x1xi32>
    %13 = arith.cmpi slt, %9, %12 : vector<128x1xi32>
    %c0_i32_7 = arith.constant 0 : i32
    %14 = arith.cmpi slt, %7, %c0_i32_7 : i32
    %15 = vector.broadcast %14 : i1 to vector<128x1xi1>
    %16 = vector.broadcast %15 : vector<128x1xi1> to vector<128x1xi1>
    %17 = arith.xori %13, %16 : vector<128x1xi1>
    %18 = arith.andi %17, %11 : vector<128x1xi1>
    %19 = vector.broadcast %7 : i32 to vector<128x1xi32>
    %20 = arith.addi %9, %19 : vector<128x1xi32>
    %21 = arith.select %18, %20, %9 : vector<128x1xi1>, vector<128x1xi32>
    %c8_i32 = arith.constant 8 : i32
    %c0_i32_8 = arith.constant 0 : i32
    %22 = arith.cmpi eq, %c8_i32, %c0_i32_8 : i32
    %c1_i32_9 = arith.constant 1 : i32
    %23 = arith.select %22, %c1_i32_9, %c8_i32 : i32
    %24 = vector.broadcast %23 : i32 to vector<128x1xi32>
    %25 = arith.remsi %21, %24 : vector<128x1xi32>
    %c0_i32_10 = arith.constant 0 : i32
    %26 = vector.broadcast %c0_i32_10 : i32 to vector<128x1xi32>
    %27 = arith.cmpi ne, %25, %26 : vector<128x1xi32>
    %c0_i32_11 = arith.constant 0 : i32
    %28 = vector.broadcast %c0_i32_11 : i32 to vector<128x1xi32>
    %29 = arith.cmpi slt, %25, %28 : vector<128x1xi32>
    %c0_i32_12 = arith.constant 0 : i32
    %30 = arith.cmpi slt, %23, %c0_i32_12 : i32
    %31 = vector.broadcast %30 : i1 to vector<128x1xi1>
    %32 = vector.broadcast %31 : vector<128x1xi1> to vector<128x1xi1>
    %33 = arith.xori %29, %32 : vector<128x1xi1>
    %34 = arith.andi %33, %27 : vector<128x1xi1>
    %35 = vector.broadcast %23 : i32 to vector<128x1xi32>
    %36 = arith.addi %25, %35 : vector<128x1xi32>
    %37 = arith.select %34, %36, %25 : vector<128x1xi1>, vector<128x1xi32>
    %c8_i32_13 = arith.constant 8 : i32
    %38 = vector.broadcast %c8_i32_13 : i32 to vector<128x1xi32>
    %39 = arith.cmpi sge, %21, %38 : vector<128x1xi32>
    %c56_i32 = arith.constant 56 : i32
    %40 = vector.broadcast %c56_i32 : i32 to vector<128x1xi32>
    %41 = arith.cmpi slt, %21, %40 : vector<128x1xi32>
    %c0_i32_14 = arith.constant 0 : i32
    %42 = vector.broadcast %c0_i32_14 : i32 to vector<128x1xi32>
    %43 = arith.cmpi ne, %37, %42 : vector<128x1xi32>
    %c7_i32 = arith.constant 7 : i32
    %44 = vector.broadcast %c7_i32 : i32 to vector<128x1xi32>
    %45 = arith.cmpi ne, %37, %44 : vector<128x1xi32>
    %cst_15 = arith.constant 0.000000e+00 : f32
    %46 = vector.broadcast %cst_15 : f32 to vector<128x128xf32>
    %c7 = arith.constant 7 : index
    %c0_16 = arith.constant 0 : index
    %47 = vector.load %arg7[%c7, %c0_16] : memref<160x128xbf16, #tpu.memory_space<vmem>>, vector<128x128xbf16>
    %48 = arith.andi %39, %43 : vector<128x1xi1>
    %cst_17 = arith.constant 0.000000e+00 : bf16
    %49 = vector.broadcast %cst_17 : bf16 to vector<128x128xbf16>
    %50 = vector.shape_cast %48 : vector<128x1xi1> to vector<128x1xi1>
    %51 = vector.broadcast %50 : vector<128x1xi1> to vector<128x128xi1>
    %52 = arith.select %51, %47, %49 : vector<128x128xi1>, vector<128x128xbf16>
    %c0_18 = arith.constant 0 : index
    %c0_19 = arith.constant 0 : index
    %c0_20 = arith.constant 0 : index
    %53 = vector.load %arg2[%c0_18, %c0_19, %c0_20] : memref<9x128x128xbf16, #tpu.memory_space<vmem>>, vector<1x128x128xbf16>
    %54 = vector.shape_cast %53 : vector<1x128x128xbf16> to vector<128x128xbf16>
    %cst_21 = arith.constant dense<0.000000e+00> : vector<128x128xf32>
    %55 = tpu.matmul %52, %54, %cst_21 {dimension_numbers = #tpu.dot_dimension_numbers<[1], [0], [0], [1], [0, 0, 1, 1], [], []>} : vector<128x128xbf16>, vector<128x128xbf16>, vector<128x128xf32> -> vector<128x128xf32>
    %56 = arith.addf %46, %55 : vector<128x128xf32>
    %c8 = arith.constant 8 : index
    %c0_22 = arith.constant 0 : index
    %57 = vector.load %arg7[%c8, %c0_22] : memref<160x128xbf16, #tpu.memory_space<vmem>>, vector<128x128xbf16>
    %cst_23 = arith.constant 0.000000e+00 : bf16
    %58 = vector.broadcast %cst_23 : bf16 to vector<128x128xbf16>
    %59 = vector.shape_cast %39 : vector<128x1xi1> to vector<128x1xi1>
    %60 = vector.broadcast %59 : vector<128x1xi1> to vector<128x128xi1>
    %61 = arith.select %60, %57, %58 : vector<128x128xi1>, vector<128x128xbf16>
    %c1 = arith.constant 1 : index
    %c0_24 = arith.constant 0 : index
    %c0_25 = arith.constant 0 : index
    %62 = vector.load %arg2[%c1, %c0_24, %c0_25] : memref<9x128x128xbf16, #tpu.memory_space<vmem>>, vector<1x128x128xbf16>
    %63 = vector.shape_cast %62 : vector<1x128x128xbf16> to vector<128x128xbf16>
    %cst_26 = arith.constant dense<0.000000e+00> : vector<128x128xf32>
    %64 = tpu.matmul %61, %63, %cst_26 {dimension_numbers = #tpu.dot_dimension_numbers<[1], [0], [0], [1], [0, 0, 1, 1], [], []>} : vector<128x128xbf16>, vector<128x128xbf16>, vector<128x128xf32> -> vector<128x128xf32>
    %65 = arith.addf %56, %64 : vector<128x128xf32>
    %c9 = arith.constant 9 : index
    %c0_27 = arith.constant 0 : index
    %66 = vector.load %arg7[%c9, %c0_27] : memref<160x128xbf16, #tpu.memory_space<vmem>>, vector<128x128xbf16>
    %67 = arith.andi %39, %45 : vector<128x1xi1>
    %cst_28 = arith.constant 0.000000e+00 : bf16
    %68 = vector.broadcast %cst_28 : bf16 to vector<128x128xbf16>
    %69 = vector.shape_cast %67 : vector<128x1xi1> to vector<128x1xi1>
    %70 = vector.broadcast %69 : vector<128x1xi1> to vector<128x128xi1>
    %71 = arith.select %70, %66, %68 : vector<128x128xi1>, vector<128x128xbf16>
    %c2 = arith.constant 2 : index
    %c0_29 = arith.constant 0 : index
    %c0_30 = arith.constant 0 : index
    %72 = vector.load %arg2[%c2, %c0_29, %c0_30] : memref<9x128x128xbf16, #tpu.memory_space<vmem>>, vector<1x128x128xbf16>
    %73 = vector.shape_cast %72 : vector<1x128x128xbf16> to vector<128x128xbf16>
    %cst_31 = arith.constant dense<0.000000e+00> : vector<128x128xf32>
    %74 = tpu.matmul %71, %73, %cst_31 {dimension_numbers = #tpu.dot_dimension_numbers<[1], [0], [0], [1], [0, 0, 1, 1], [], []>} : vector<128x128xbf16>, vector<128x128xbf16>, vector<128x128xf32> -> vector<128x128xf32>
    %75 = arith.addf %65, %74 : vector<128x128xf32>
    %c15 = arith.constant 15 : index
    %c0_32 = arith.constant 0 : index
    %76 = vector.load %arg7[%c15, %c0_32] : memref<160x128xbf16, #tpu.memory_space<vmem>>, vector<128x128xbf16>
    %cst_33 = arith.constant 0.000000e+00 : bf16
    %77 = vector.broadcast %cst_33 : bf16 to vector<128x128xbf16>
    %78 = vector.shape_cast %43 : vector<128x1xi1> to vector<128x1xi1>
    %79 = vector.broadcast %78 : vector<128x1xi1> to vector<128x128xi1>
    %80 = arith.select %79, %76, %77 : vector<128x128xi1>, vector<128x128xbf16>
    %c3 = arith.constant 3 : index
    %c0_34 = arith.constant 0 : index
    %c0_35 = arith.constant 0 : index
    %81 = vector.load %arg2[%c3, %c0_34, %c0_35] : memref<9x128x128xbf16, #tpu.memory_space<vmem>>, vector<1x128x128xbf16>
    %82 = vector.shape_cast %81 : vector<1x128x128xbf16> to vector<128x128xbf16>
    %cst_36 = arith.constant dense<0.000000e+00> : vector<128x128xf32>
    %83 = tpu.matmul %80, %82, %cst_36 {dimension_numbers = #tpu.dot_dimension_numbers<[1], [0], [0], [1], [0, 0, 1, 1], [], []>} : vector<128x128xbf16>, vector<128x128xbf16>, vector<128x128xf32> -> vector<128x128xf32>
    %84 = arith.addf %75, %83 : vector<128x128xf32>
    %c16_37 = arith.constant 16 : index
    %c0_38 = arith.constant 0 : index
    %85 = vector.load %arg7[%c16_37, %c0_38] : memref<160x128xbf16, #tpu.memory_space<vmem>>, vector<128x128xbf16>
    %c4 = arith.constant 4 : index
    %c0_39 = arith.constant 0 : index
    %c0_40 = arith.constant 0 : index
    %86 = vector.load %arg2[%c4, %c0_39, %c0_40] : memref<9x128x128xbf16, #tpu.memory_space<vmem>>, vector<1x128x128xbf16>
    %87 = vector.shape_cast %86 : vector<1x128x128xbf16> to vector<128x128xbf16>
    %cst_41 = arith.constant dense<0.000000e+00> : vector<128x128xf32>
    %88 = tpu.matmul %85, %87, %cst_41 {dimension_numbers = #tpu.dot_dimension_numbers<[1], [0], [0], [1], [0, 0, 1, 1], [], []>} : vector<128x128xbf16>, vector<128x128xbf16>, vector<128x128xf32> -> vector<128x128xf32>
    %89 = arith.addf %84, %88 : vector<128x128xf32>
    %c17 = arith.constant 17 : index
    %c0_42 = arith.constant 0 : index
    %90 = vector.load %arg7[%c17, %c0_42] : memref<160x128xbf16, #tpu.memory_space<vmem>>, vector<128x128xbf16>
    %cst_43 = arith.constant 0.000000e+00 : bf16
    %91 = vector.broadcast %cst_43 : bf16 to vector<128x128xbf16>
    %92 = vector.shape_cast %45 : vector<128x1xi1> to vector<128x1xi1>
    %93 = vector.broadcast %92 : vector<128x1xi1> to vector<128x128xi1>
    %94 = arith.select %93, %90, %91 : vector<128x128xi1>, vector<128x128xbf16>
    %c5 = arith.constant 5 : index
    %c0_44 = arith.constant 0 : index
    %c0_45 = arith.constant 0 : index
    %95 = vector.load %arg2[%c5, %c0_44, %c0_45] : memref<9x128x128xbf16, #tpu.memory_space<vmem>>, vector<1x128x128xbf16>
    %96 = vector.shape_cast %95 : vector<1x128x128xbf16> to vector<128x128xbf16>
    %cst_46 = arith.constant dense<0.000000e+00> : vector<128x128xf32>
    %97 = tpu.matmul %94, %96, %cst_46 {dimension_numbers = #tpu.dot_dimension_numbers<[1], [0], [0], [1], [0, 0, 1, 1], [], []>} : vector<128x128xbf16>, vector<128x128xbf16>, vector<128x128xf32> -> vector<128x128xf32>
    %98 = arith.addf %89, %97 : vector<128x128xf32>
    %c23 = arith.constant 23 : index
    %c0_47 = arith.constant 0 : index
    %99 = vector.load %arg7[%c23, %c0_47] : memref<160x128xbf16, #tpu.memory_space<vmem>>, vector<128x128xbf16>
    %100 = arith.andi %41, %43 : vector<128x1xi1>
    %cst_48 = arith.constant 0.000000e+00 : bf16
    %101 = vector.broadcast %cst_48 : bf16 to vector<128x128xbf16>
    %102 = vector.shape_cast %100 : vector<128x1xi1> to vector<128x1xi1>
    %103 = vector.broadcast %102 : vector<128x1xi1> to vector<128x128xi1>
    %104 = arith.select %103, %99, %101 : vector<128x128xi1>, vector<128x128xbf16>
    %c6 = arith.constant 6 : index
    %c0_49 = arith.constant 0 : index
    %c0_50 = arith.constant 0 : index
    %105 = vector.load %arg2[%c6, %c0_49, %c0_50] : memref<9x128x128xbf16, #tpu.memory_space<vmem>>, vector<1x128x128xbf16>
    %106 = vector.shape_cast %105 : vector<1x128x128xbf16> to vector<128x128xbf16>
    %cst_51 = arith.constant dense<0.000000e+00> : vector<128x128xf32>
    %107 = tpu.matmul %104, %106, %cst_51 {dimension_numbers = #tpu.dot_dimension_numbers<[1], [0], [0], [1], [0, 0, 1, 1], [], []>} : vector<128x128xbf16>, vector<128x128xbf16>, vector<128x128xf32> -> vector<128x128xf32>
    %108 = arith.addf %98, %107 : vector<128x128xf32>
    %c24 = arith.constant 24 : index
    %c0_52 = arith.constant 0 : index
    %109 = vector.load %arg7[%c24, %c0_52] : memref<160x128xbf16, #tpu.memory_space<vmem>>, vector<128x128xbf16>
    %cst_53 = arith.constant 0.000000e+00 : bf16
    %110 = vector.broadcast %cst_53 : bf16 to vector<128x128xbf16>
    %111 = vector.shape_cast %41 : vector<128x1xi1> to vector<128x1xi1>
    %112 = vector.broadcast %111 : vector<128x1xi1> to vector<128x128xi1>
    %113 = arith.select %112, %109, %110 : vector<128x128xi1>, vector<128x128xbf16>
    %c7_54 = arith.constant 7 : index
    %c0_55 = arith.constant 0 : index
    %c0_56 = arith.constant 0 : index
    %114 = vector.load %arg2[%c7_54, %c0_55, %c0_56] : memref<9x128x128xbf16, #tpu.memory_space<vmem>>, vector<1x128x128xbf16>
    %115 = vector.shape_cast %114 : vector<1x128x128xbf16> to vector<128x128xbf16>
    %cst_57 = arith.constant dense<0.000000e+00> : vector<128x128xf32>
    %116 = tpu.matmul %113, %115, %cst_57 {dimension_numbers = #tpu.dot_dimension_numbers<[1], [0], [0], [1], [0, 0, 1, 1], [], []>} : vector<128x128xbf16>, vector<128x128xbf16>, vector<128x128xf32> -> vector<128x128xf32>
    %117 = arith.addf %108, %116 : vector<128x128xf32>
    %c25 = arith.constant 25 : index
    %c0_58 = arith.constant 0 : index
    %118 = vector.load %arg7[%c25, %c0_58] : memref<160x128xbf16, #tpu.memory_space<vmem>>, vector<128x128xbf16>
    %119 = arith.andi %41, %45 : vector<128x1xi1>
    %cst_59 = arith.constant 0.000000e+00 : bf16
    %120 = vector.broadcast %cst_59 : bf16 to vector<128x128xbf16>
    %121 = vector.shape_cast %119 : vector<128x1xi1> to vector<128x1xi1>
    %122 = vector.broadcast %121 : vector<128x1xi1> to vector<128x128xi1>
    %123 = arith.select %122, %118, %120 : vector<128x128xi1>, vector<128x128xbf16>
    %c8_60 = arith.constant 8 : index
    %c0_61 = arith.constant 0 : index
    %c0_62 = arith.constant 0 : index
    %124 = vector.load %arg2[%c8_60, %c0_61, %c0_62] : memref<9x128x128xbf16, #tpu.memory_space<vmem>>, vector<1x128x128xbf16>
    %125 = vector.shape_cast %124 : vector<1x128x128xbf16> to vector<128x128xbf16>
    %cst_63 = arith.constant dense<0.000000e+00> : vector<128x128xf32>
    %126 = tpu.matmul %123, %125, %cst_63 {dimension_numbers = #tpu.dot_dimension_numbers<[1], [0], [0], [1], [0, 0, 1, 1], [], []>} : vector<128x128xbf16>, vector<128x128xbf16>, vector<128x128xf32> -> vector<128x128xf32>
    %127 = arith.addf %117, %126 : vector<128x128xf32>
    %c0_64 = arith.constant 0 : index
    %c0_65 = arith.constant 0 : index
    %128 = vector.load %arg3[%c0_64, %c0_65] : memref<1x128xf32, #tpu.memory_space<vmem>>, vector<1x128xf32>
    %129 = vector.broadcast %128 : vector<1x128xf32> to vector<128x128xf32>
    %130 = arith.addf %127, %129 : vector<128x128xf32>
    %131 = arith.truncf %130 : vector<128x128xf32> to vector<128x128xbf16>
    %c0_66 = arith.constant 0 : index
    %c0_67 = arith.constant 0 : index
    %132 = vector.load %arg4[%c0_66, %c0_67] : memref<128x128xbf16, #tpu.memory_space<vmem>>, vector<128x128xbf16>
    tpu.vector_store %arg4[%c0_66, %c0_67], %131 {strides = array<i32>} : memref<128x128xbf16, #tpu.memory_space<vmem>>, vector<128x128xbf16>,
    %cst_68 = arith.constant dense<0.000000e+00> : vector<128xf32>
    %133 = vector.multi_reduction <add>, %130, %cst_68 [0] : vector<128x128xf32> to vector<128xf32>
    %134 = vector.shape_cast %133 : vector<128xf32> to vector<1x128xf32>
    %c0_69 = arith.constant 0 : index
    %c0_70 = arith.constant 0 : index
    %135 = vector.load %arg5[%c0_69, %c0_70] : memref<1x128xf32, #tpu.memory_space<vmem>>, vector<1x128xf32>
    tpu.vector_store %arg5[%c0_69, %c0_70], %134 {strides = array<i32>} : memref<1x128xf32, #tpu.memory_space<vmem>>, vector<1x128xf32>,
    %136 = arith.mulf %130, %130 : vector<128x128xf32>
    %cst_71 = arith.constant dense<0.000000e+00> : vector<128xf32>
    %137 = vector.multi_reduction <add>, %136, %cst_71 [0] : vector<128x128xf32> to vector<128xf32>
    %138 = vector.shape_cast %137 : vector<128xf32> to vector<1x128xf32>
    %c0_72 = arith.constant 0 : index
    %c0_73 = arith.constant 0 : index
    %139 = vector.load %arg6[%c0_72, %c0_73] : memref<1x128xf32, #tpu.memory_space<vmem>>, vector<1x128xf32>
    tpu.vector_store %arg6[%c0_72, %c0_73], %138 {strides = array<i32>} : memref<1x128xf32, #tpu.memory_space<vmem>>, vector<1x128xf32>,
    return
  }
  func.func @transform_0(%arg0: i32) -> (i32, i32) {
    %c0_i32 = arith.constant 0 : i32
    %c0_i32_0 = arith.constant 0 : i32
    return %arg0, %c0_i32 : i32, i32
  }
  func.func @transform_1(%arg0: i32) -> (i32, i32, i32) {
    %c0_i32 = arith.constant 0 : i32
    %c0_i32_0 = arith.constant 0 : i32
    %c0_i32_1 = arith.constant 0 : i32
    %c0_i32_2 = arith.constant 0 : i32
    return %c0_i32, %c0_i32_0, %c0_i32_1 : i32, i32, i32
  }
  func.func @transform_2(%arg0: i32) -> (i32, i32) {
    %c0_i32 = arith.constant 0 : i32
    %c0_i32_0 = arith.constant 0 : i32
    %c0_i32_1 = arith.constant 0 : i32
    return %c0_i32, %c0_i32_0 : i32, i32
  }
  func.func @transform_3(%arg0: i32) -> (i32, i32) {
    %c0_i32 = arith.constant 0 : i32
    %c0_i32_0 = arith.constant 0 : i32
    return %arg0, %c0_i32 : i32, i32
  }
  func.func @transform_4(%arg0: i32) -> (i32, i32) {
    %c0_i32 = arith.constant 0 : i32
    %c0_i32_0 = arith.constant 0 : i32
    return %arg0, %c0_i32 : i32, i32
  }
  func.func @transform_5(%arg0: i32) -> (i32, i32) {
    %c0_i32 = arith.constant 0 : i32
    %c0_i32_0 = arith.constant 0 : i32
    return %arg0, %c0_i32 : i32, i32
  }
}

module attributes {stable_mosaic.version = 11 : i64} {
  func.func @_conv_bnrelu_kernel(%arg0: i32, %arg1: memref<128x128xbf16, #tpu.memory_space<vmem>>, %arg2: memref<1x128xf32, #tpu.memory_space<vmem>>, %arg3: memref<1x128xf32, #tpu.memory_space<vmem>>, %arg4: memref<9x128x128xbf16, #tpu.memory_space<vmem>>, %arg5: memref<1x128xf32, #tpu.memory_space<vmem>>, %arg6: memref<128x128xbf16, #tpu.memory_space<vmem>>, %arg7: memref<1x128xf32, #tpu.memory_space<vmem>>, %arg8: memref<1x128xf32, #tpu.memory_space<vmem>>, %arg9: memref<160x128xbf16, #tpu.memory_space<vmem>>) attributes {dimension_semantics = [#tpu.dimension_semantics<parallel>], iteration_bounds = array<i64: 1>, scalar_prefetch = 0 : i64, scratch_operands = 1 : i64, tpu.core_type = #tpu.core_type<tc>, window_params = [{transform_indices = @transform_0, window_bounds = array<i64: 128, 128>}, {pipeline_mode = #tpu.pipeline_mode<synchronous>, transform_indices = @transform_1, window_bounds = array<i64: 1, 128>}, {pipeline_mode = #tpu.pipeline_mode<synchronous>, transform_indices = @transform_2, window_bounds = array<i64: 1, 128>}, {pipeline_mode = #tpu.pipeline_mode<synchronous>, transform_indices = @transform_3, window_bounds = array<i64: 9, 128, 128>}, {pipeline_mode = #tpu.pipeline_mode<synchronous>, transform_indices = @transform_4, window_bounds = array<i64: 1, 128>}, {transform_indices = @transform_5, window_bounds = array<i64: 128, 128>}, {transform_indices = @transform_6, window_bounds = array<i64: 1, 128>}, {transform_indices = @transform_7, window_bounds = array<i64: 1, 128>}]} {
    %c0 = arith.constant 0 : index
    %c0_0 = arith.constant 0 : index
    %0 = vector.load %arg1[%c0, %c0_0] : memref<128x128xbf16, #tpu.memory_space<vmem>>, vector<128x128xbf16>
    %1 = arith.extf %0 : vector<128x128xbf16> to vector<128x128xf32>
    %c0_1 = arith.constant 0 : index
    %c0_2 = arith.constant 0 : index
    %2 = vector.load %arg2[%c0_1, %c0_2] : memref<1x128xf32, #tpu.memory_space<vmem>>, vector<1x128xf32>
    %3 = vector.broadcast %2 : vector<1x128xf32> to vector<128x128xf32>
    %4 = arith.mulf %1, %3 : vector<128x128xf32>
    %c0_3 = arith.constant 0 : index
    %c0_4 = arith.constant 0 : index
    %5 = vector.load %arg3[%c0_3, %c0_4] : memref<1x128xf32, #tpu.memory_space<vmem>>, vector<1x128xf32>
    %6 = vector.broadcast %5 : vector<1x128xf32> to vector<128x128xf32>
    %7 = arith.addf %4, %6 : vector<128x128xf32>
    %cst = arith.constant 0.000000e+00 : f32
    %8 = vector.broadcast %cst : f32 to vector<128x128xf32>
    %9 = arith.maximumf %7, %8 : vector<128x128xf32>
    %10 = arith.truncf %9 : vector<128x128xf32> to vector<128x128xbf16>
    %cst_5 = arith.constant 0.000000e+00 : bf16
    %11 = vector.broadcast %cst_5 : bf16 to vector<16x128xbf16>
    %c0_6 = arith.constant 0 : index
    %c0_7 = arith.constant 0 : index
    %12 = vector.load %arg9[%c0_6, %c0_7] : memref<160x128xbf16, #tpu.memory_space<vmem>>, vector<16x128xbf16>
    tpu.vector_store %arg9[%c0_6, %c0_7], %11 {strides = array<i32>} : memref<160x128xbf16, #tpu.memory_space<vmem>>, vector<16x128xbf16>,
    %c144 = arith.constant 144 : index
    %c0_8 = arith.constant 0 : index
    %13 = vector.load %arg9[%c144, %c0_8] : memref<160x128xbf16, #tpu.memory_space<vmem>>, vector<16x128xbf16>
    tpu.vector_store %arg9[%c144, %c0_8], %11 {strides = array<i32>} : memref<160x128xbf16, #tpu.memory_space<vmem>>, vector<16x128xbf16>,
    %c16 = arith.constant 16 : index
    %c0_9 = arith.constant 0 : index
    %14 = vector.load %arg9[%c16, %c0_9] : memref<160x128xbf16, #tpu.memory_space<vmem>>, vector<128x128xbf16>
    tpu.vector_store %arg9[%c16, %c0_9], %10 {strides = array<i32>} : memref<160x128xbf16, #tpu.memory_space<vmem>>, vector<128x128xbf16>,
    %15 = tpu.iota {dimensions = array<i32: 0>} : vector<128x1xi32>
    %c64_i32 = arith.constant 64 : i32
    %c0_i32 = arith.constant 0 : i32
    %16 = arith.cmpi eq, %c64_i32, %c0_i32 : i32
    %c1_i32 = arith.constant 1 : i32
    %17 = arith.select %16, %c1_i32, %c64_i32 : i32
    %18 = vector.broadcast %17 : i32 to vector<128x1xi32>
    %19 = arith.remsi %15, %18 : vector<128x1xi32>
    %c0_i32_10 = arith.constant 0 : i32
    %20 = vector.broadcast %c0_i32_10 : i32 to vector<128x1xi32>
    %21 = arith.cmpi ne, %19, %20 : vector<128x1xi32>
    %c0_i32_11 = arith.constant 0 : i32
    %22 = vector.broadcast %c0_i32_11 : i32 to vector<128x1xi32>
    %23 = arith.cmpi slt, %19, %22 : vector<128x1xi32>
    %c0_i32_12 = arith.constant 0 : i32
    %24 = arith.cmpi slt, %17, %c0_i32_12 : i32
    %25 = vector.broadcast %24 : i1 to vector<128x1xi1>
    %26 = vector.broadcast %25 : vector<128x1xi1> to vector<128x1xi1>
    %27 = arith.xori %23, %26 : vector<128x1xi1>
    %28 = arith.andi %27, %21 : vector<128x1xi1>
    %29 = vector.broadcast %17 : i32 to vector<128x1xi32>
    %30 = arith.addi %19, %29 : vector<128x1xi32>
    %31 = arith.select %28, %30, %19 : vector<128x1xi1>, vector<128x1xi32>
    %c8_i32 = arith.constant 8 : i32
    %c0_i32_13 = arith.constant 0 : i32
    %32 = arith.cmpi eq, %c8_i32, %c0_i32_13 : i32
    %c1_i32_14 = arith.constant 1 : i32
    %33 = arith.select %32, %c1_i32_14, %c8_i32 : i32
    %34 = vector.broadcast %33 : i32 to vector<128x1xi32>
    %35 = arith.remsi %31, %34 : vector<128x1xi32>
    %c0_i32_15 = arith.constant 0 : i32
    %36 = vector.broadcast %c0_i32_15 : i32 to vector<128x1xi32>
    %37 = arith.cmpi ne, %35, %36 : vector<128x1xi32>
    %c0_i32_16 = arith.constant 0 : i32
    %38 = vector.broadcast %c0_i32_16 : i32 to vector<128x1xi32>
    %39 = arith.cmpi slt, %35, %38 : vector<128x1xi32>
    %c0_i32_17 = arith.constant 0 : i32
    %40 = arith.cmpi slt, %33, %c0_i32_17 : i32
    %41 = vector.broadcast %40 : i1 to vector<128x1xi1>
    %42 = vector.broadcast %41 : vector<128x1xi1> to vector<128x1xi1>
    %43 = arith.xori %39, %42 : vector<128x1xi1>
    %44 = arith.andi %43, %37 : vector<128x1xi1>
    %45 = vector.broadcast %33 : i32 to vector<128x1xi32>
    %46 = arith.addi %35, %45 : vector<128x1xi32>
    %47 = arith.select %44, %46, %35 : vector<128x1xi1>, vector<128x1xi32>
    %c8_i32_18 = arith.constant 8 : i32
    %48 = vector.broadcast %c8_i32_18 : i32 to vector<128x1xi32>
    %49 = arith.cmpi sge, %31, %48 : vector<128x1xi32>
    %c56_i32 = arith.constant 56 : i32
    %50 = vector.broadcast %c56_i32 : i32 to vector<128x1xi32>
    %51 = arith.cmpi slt, %31, %50 : vector<128x1xi32>
    %c0_i32_19 = arith.constant 0 : i32
    %52 = vector.broadcast %c0_i32_19 : i32 to vector<128x1xi32>
    %53 = arith.cmpi ne, %47, %52 : vector<128x1xi32>
    %c7_i32 = arith.constant 7 : i32
    %54 = vector.broadcast %c7_i32 : i32 to vector<128x1xi32>
    %55 = arith.cmpi ne, %47, %54 : vector<128x1xi32>
    %cst_20 = arith.constant 0.000000e+00 : f32
    %56 = vector.broadcast %cst_20 : f32 to vector<128x128xf32>
    %c7 = arith.constant 7 : index
    %c0_21 = arith.constant 0 : index
    %57 = vector.load %arg9[%c7, %c0_21] : memref<160x128xbf16, #tpu.memory_space<vmem>>, vector<128x128xbf16>
    %58 = arith.andi %49, %53 : vector<128x1xi1>
    %cst_22 = arith.constant 0.000000e+00 : bf16
    %59 = vector.broadcast %cst_22 : bf16 to vector<128x128xbf16>
    %60 = vector.shape_cast %58 : vector<128x1xi1> to vector<128x1xi1>
    %61 = vector.broadcast %60 : vector<128x1xi1> to vector<128x128xi1>
    %62 = arith.select %61, %57, %59 : vector<128x128xi1>, vector<128x128xbf16>
    %c0_23 = arith.constant 0 : index
    %c0_24 = arith.constant 0 : index
    %c0_25 = arith.constant 0 : index
    %63 = vector.load %arg4[%c0_23, %c0_24, %c0_25] : memref<9x128x128xbf16, #tpu.memory_space<vmem>>, vector<1x128x128xbf16>
    %64 = vector.shape_cast %63 : vector<1x128x128xbf16> to vector<128x128xbf16>
    %cst_26 = arith.constant dense<0.000000e+00> : vector<128x128xf32>
    %65 = tpu.matmul %62, %64, %cst_26 {dimension_numbers = #tpu.dot_dimension_numbers<[1], [0], [0], [1], [0, 0, 1, 1], [], []>} : vector<128x128xbf16>, vector<128x128xbf16>, vector<128x128xf32> -> vector<128x128xf32>
    %66 = arith.addf %56, %65 : vector<128x128xf32>
    %c8 = arith.constant 8 : index
    %c0_27 = arith.constant 0 : index
    %67 = vector.load %arg9[%c8, %c0_27] : memref<160x128xbf16, #tpu.memory_space<vmem>>, vector<128x128xbf16>
    %cst_28 = arith.constant 0.000000e+00 : bf16
    %68 = vector.broadcast %cst_28 : bf16 to vector<128x128xbf16>
    %69 = vector.shape_cast %49 : vector<128x1xi1> to vector<128x1xi1>
    %70 = vector.broadcast %69 : vector<128x1xi1> to vector<128x128xi1>
    %71 = arith.select %70, %67, %68 : vector<128x128xi1>, vector<128x128xbf16>
    %c1 = arith.constant 1 : index
    %c0_29 = arith.constant 0 : index
    %c0_30 = arith.constant 0 : index
    %72 = vector.load %arg4[%c1, %c0_29, %c0_30] : memref<9x128x128xbf16, #tpu.memory_space<vmem>>, vector<1x128x128xbf16>
    %73 = vector.shape_cast %72 : vector<1x128x128xbf16> to vector<128x128xbf16>
    %cst_31 = arith.constant dense<0.000000e+00> : vector<128x128xf32>
    %74 = tpu.matmul %71, %73, %cst_31 {dimension_numbers = #tpu.dot_dimension_numbers<[1], [0], [0], [1], [0, 0, 1, 1], [], []>} : vector<128x128xbf16>, vector<128x128xbf16>, vector<128x128xf32> -> vector<128x128xf32>
    %75 = arith.addf %66, %74 : vector<128x128xf32>
    %c9 = arith.constant 9 : index
    %c0_32 = arith.constant 0 : index
    %76 = vector.load %arg9[%c9, %c0_32] : memref<160x128xbf16, #tpu.memory_space<vmem>>, vector<128x128xbf16>
    %77 = arith.andi %49, %55 : vector<128x1xi1>
    %cst_33 = arith.constant 0.000000e+00 : bf16
    %78 = vector.broadcast %cst_33 : bf16 to vector<128x128xbf16>
    %79 = vector.shape_cast %77 : vector<128x1xi1> to vector<128x1xi1>
    %80 = vector.broadcast %79 : vector<128x1xi1> to vector<128x128xi1>
    %81 = arith.select %80, %76, %78 : vector<128x128xi1>, vector<128x128xbf16>
    %c2 = arith.constant 2 : index
    %c0_34 = arith.constant 0 : index
    %c0_35 = arith.constant 0 : index
    %82 = vector.load %arg4[%c2, %c0_34, %c0_35] : memref<9x128x128xbf16, #tpu.memory_space<vmem>>, vector<1x128x128xbf16>
    %83 = vector.shape_cast %82 : vector<1x128x128xbf16> to vector<128x128xbf16>
    %cst_36 = arith.constant dense<0.000000e+00> : vector<128x128xf32>
    %84 = tpu.matmul %81, %83, %cst_36 {dimension_numbers = #tpu.dot_dimension_numbers<[1], [0], [0], [1], [0, 0, 1, 1], [], []>} : vector<128x128xbf16>, vector<128x128xbf16>, vector<128x128xf32> -> vector<128x128xf32>
    %85 = arith.addf %75, %84 : vector<128x128xf32>
    %c15 = arith.constant 15 : index
    %c0_37 = arith.constant 0 : index
    %86 = vector.load %arg9[%c15, %c0_37] : memref<160x128xbf16, #tpu.memory_space<vmem>>, vector<128x128xbf16>
    %cst_38 = arith.constant 0.000000e+00 : bf16
    %87 = vector.broadcast %cst_38 : bf16 to vector<128x128xbf16>
    %88 = vector.shape_cast %53 : vector<128x1xi1> to vector<128x1xi1>
    %89 = vector.broadcast %88 : vector<128x1xi1> to vector<128x128xi1>
    %90 = arith.select %89, %86, %87 : vector<128x128xi1>, vector<128x128xbf16>
    %c3 = arith.constant 3 : index
    %c0_39 = arith.constant 0 : index
    %c0_40 = arith.constant 0 : index
    %91 = vector.load %arg4[%c3, %c0_39, %c0_40] : memref<9x128x128xbf16, #tpu.memory_space<vmem>>, vector<1x128x128xbf16>
    %92 = vector.shape_cast %91 : vector<1x128x128xbf16> to vector<128x128xbf16>
    %cst_41 = arith.constant dense<0.000000e+00> : vector<128x128xf32>
    %93 = tpu.matmul %90, %92, %cst_41 {dimension_numbers = #tpu.dot_dimension_numbers<[1], [0], [0], [1], [0, 0, 1, 1], [], []>} : vector<128x128xbf16>, vector<128x128xbf16>, vector<128x128xf32> -> vector<128x128xf32>
    %94 = arith.addf %85, %93 : vector<128x128xf32>
    %c16_42 = arith.constant 16 : index
    %c0_43 = arith.constant 0 : index
    %95 = vector.load %arg9[%c16_42, %c0_43] : memref<160x128xbf16, #tpu.memory_space<vmem>>, vector<128x128xbf16>
    %c4 = arith.constant 4 : index
    %c0_44 = arith.constant 0 : index
    %c0_45 = arith.constant 0 : index
    %96 = vector.load %arg4[%c4, %c0_44, %c0_45] : memref<9x128x128xbf16, #tpu.memory_space<vmem>>, vector<1x128x128xbf16>
    %97 = vector.shape_cast %96 : vector<1x128x128xbf16> to vector<128x128xbf16>
    %cst_46 = arith.constant dense<0.000000e+00> : vector<128x128xf32>
    %98 = tpu.matmul %95, %97, %cst_46 {dimension_numbers = #tpu.dot_dimension_numbers<[1], [0], [0], [1], [0, 0, 1, 1], [], []>} : vector<128x128xbf16>, vector<128x128xbf16>, vector<128x128xf32> -> vector<128x128xf32>
    %99 = arith.addf %94, %98 : vector<128x128xf32>
    %c17 = arith.constant 17 : index
    %c0_47 = arith.constant 0 : index
    %100 = vector.load %arg9[%c17, %c0_47] : memref<160x128xbf16, #tpu.memory_space<vmem>>, vector<128x128xbf16>
    %cst_48 = arith.constant 0.000000e+00 : bf16
    %101 = vector.broadcast %cst_48 : bf16 to vector<128x128xbf16>
    %102 = vector.shape_cast %55 : vector<128x1xi1> to vector<128x1xi1>
    %103 = vector.broadcast %102 : vector<128x1xi1> to vector<128x128xi1>
    %104 = arith.select %103, %100, %101 : vector<128x128xi1>, vector<128x128xbf16>
    %c5 = arith.constant 5 : index
    %c0_49 = arith.constant 0 : index
    %c0_50 = arith.constant 0 : index
    %105 = vector.load %arg4[%c5, %c0_49, %c0_50] : memref<9x128x128xbf16, #tpu.memory_space<vmem>>, vector<1x128x128xbf16>
    %106 = vector.shape_cast %105 : vector<1x128x128xbf16> to vector<128x128xbf16>
    %cst_51 = arith.constant dense<0.000000e+00> : vector<128x128xf32>
    %107 = tpu.matmul %104, %106, %cst_51 {dimension_numbers = #tpu.dot_dimension_numbers<[1], [0], [0], [1], [0, 0, 1, 1], [], []>} : vector<128x128xbf16>, vector<128x128xbf16>, vector<128x128xf32> -> vector<128x128xf32>
    %108 = arith.addf %99, %107 : vector<128x128xf32>
    %c23 = arith.constant 23 : index
    %c0_52 = arith.constant 0 : index
    %109 = vector.load %arg9[%c23, %c0_52] : memref<160x128xbf16, #tpu.memory_space<vmem>>, vector<128x128xbf16>
    %110 = arith.andi %51, %53 : vector<128x1xi1>
    %cst_53 = arith.constant 0.000000e+00 : bf16
    %111 = vector.broadcast %cst_53 : bf16 to vector<128x128xbf16>
    %112 = vector.shape_cast %110 : vector<128x1xi1> to vector<128x1xi1>
    %113 = vector.broadcast %112 : vector<128x1xi1> to vector<128x128xi1>
    %114 = arith.select %113, %109, %111 : vector<128x128xi1>, vector<128x128xbf16>
    %c6 = arith.constant 6 : index
    %c0_54 = arith.constant 0 : index
    %c0_55 = arith.constant 0 : index
    %115 = vector.load %arg4[%c6, %c0_54, %c0_55] : memref<9x128x128xbf16, #tpu.memory_space<vmem>>, vector<1x128x128xbf16>
    %116 = vector.shape_cast %115 : vector<1x128x128xbf16> to vector<128x128xbf16>
    %cst_56 = arith.constant dense<0.000000e+00> : vector<128x128xf32>
    %117 = tpu.matmul %114, %116, %cst_56 {dimension_numbers = #tpu.dot_dimension_numbers<[1], [0], [0], [1], [0, 0, 1, 1], [], []>} : vector<128x128xbf16>, vector<128x128xbf16>, vector<128x128xf32> -> vector<128x128xf32>
    %118 = arith.addf %108, %117 : vector<128x128xf32>
    %c24 = arith.constant 24 : index
    %c0_57 = arith.constant 0 : index
    %119 = vector.load %arg9[%c24, %c0_57] : memref<160x128xbf16, #tpu.memory_space<vmem>>, vector<128x128xbf16>
    %cst_58 = arith.constant 0.000000e+00 : bf16
    %120 = vector.broadcast %cst_58 : bf16 to vector<128x128xbf16>
    %121 = vector.shape_cast %51 : vector<128x1xi1> to vector<128x1xi1>
    %122 = vector.broadcast %121 : vector<128x1xi1> to vector<128x128xi1>
    %123 = arith.select %122, %119, %120 : vector<128x128xi1>, vector<128x128xbf16>
    %c7_59 = arith.constant 7 : index
    %c0_60 = arith.constant 0 : index
    %c0_61 = arith.constant 0 : index
    %124 = vector.load %arg4[%c7_59, %c0_60, %c0_61] : memref<9x128x128xbf16, #tpu.memory_space<vmem>>, vector<1x128x128xbf16>
    %125 = vector.shape_cast %124 : vector<1x128x128xbf16> to vector<128x128xbf16>
    %cst_62 = arith.constant dense<0.000000e+00> : vector<128x128xf32>
    %126 = tpu.matmul %123, %125, %cst_62 {dimension_numbers = #tpu.dot_dimension_numbers<[1], [0], [0], [1], [0, 0, 1, 1], [], []>} : vector<128x128xbf16>, vector<128x128xbf16>, vector<128x128xf32> -> vector<128x128xf32>
    %127 = arith.addf %118, %126 : vector<128x128xf32>
    %c25 = arith.constant 25 : index
    %c0_63 = arith.constant 0 : index
    %128 = vector.load %arg9[%c25, %c0_63] : memref<160x128xbf16, #tpu.memory_space<vmem>>, vector<128x128xbf16>
    %129 = arith.andi %51, %55 : vector<128x1xi1>
    %cst_64 = arith.constant 0.000000e+00 : bf16
    %130 = vector.broadcast %cst_64 : bf16 to vector<128x128xbf16>
    %131 = vector.shape_cast %129 : vector<128x1xi1> to vector<128x1xi1>
    %132 = vector.broadcast %131 : vector<128x1xi1> to vector<128x128xi1>
    %133 = arith.select %132, %128, %130 : vector<128x128xi1>, vector<128x128xbf16>
    %c8_65 = arith.constant 8 : index
    %c0_66 = arith.constant 0 : index
    %c0_67 = arith.constant 0 : index
    %134 = vector.load %arg4[%c8_65, %c0_66, %c0_67] : memref<9x128x128xbf16, #tpu.memory_space<vmem>>, vector<1x128x128xbf16>
    %135 = vector.shape_cast %134 : vector<1x128x128xbf16> to vector<128x128xbf16>
    %cst_68 = arith.constant dense<0.000000e+00> : vector<128x128xf32>
    %136 = tpu.matmul %133, %135, %cst_68 {dimension_numbers = #tpu.dot_dimension_numbers<[1], [0], [0], [1], [0, 0, 1, 1], [], []>} : vector<128x128xbf16>, vector<128x128xbf16>, vector<128x128xf32> -> vector<128x128xf32>
    %137 = arith.addf %127, %136 : vector<128x128xf32>
    %c0_69 = arith.constant 0 : index
    %c0_70 = arith.constant 0 : index
    %138 = vector.load %arg5[%c0_69, %c0_70] : memref<1x128xf32, #tpu.memory_space<vmem>>, vector<1x128xf32>
    %139 = vector.broadcast %138 : vector<1x128xf32> to vector<128x128xf32>
    %140 = arith.addf %137, %139 : vector<128x128xf32>
    %141 = arith.truncf %140 : vector<128x128xf32> to vector<128x128xbf16>
    %c0_71 = arith.constant 0 : index
    %c0_72 = arith.constant 0 : index
    %142 = vector.load %arg6[%c0_71, %c0_72] : memref<128x128xbf16, #tpu.memory_space<vmem>>, vector<128x128xbf16>
    tpu.vector_store %arg6[%c0_71, %c0_72], %141 {strides = array<i32>} : memref<128x128xbf16, #tpu.memory_space<vmem>>, vector<128x128xbf16>,
    %cst_73 = arith.constant dense<0.000000e+00> : vector<128xf32>
    %143 = vector.multi_reduction <add>, %140, %cst_73 [0] : vector<128x128xf32> to vector<128xf32>
    %144 = vector.shape_cast %143 : vector<128xf32> to vector<1x128xf32>
    %c0_74 = arith.constant 0 : index
    %c0_75 = arith.constant 0 : index
    %145 = vector.load %arg7[%c0_74, %c0_75] : memref<1x128xf32, #tpu.memory_space<vmem>>, vector<1x128xf32>
    tpu.vector_store %arg7[%c0_74, %c0_75], %144 {strides = array<i32>} : memref<1x128xf32, #tpu.memory_space<vmem>>, vector<1x128xf32>,
    %146 = arith.mulf %140, %140 : vector<128x128xf32>
    %cst_76 = arith.constant dense<0.000000e+00> : vector<128xf32>
    %147 = vector.multi_reduction <add>, %146, %cst_76 [0] : vector<128x128xf32> to vector<128xf32>
    %148 = vector.shape_cast %147 : vector<128xf32> to vector<1x128xf32>
    %c0_77 = arith.constant 0 : index
    %c0_78 = arith.constant 0 : index
    %149 = vector.load %arg8[%c0_77, %c0_78] : memref<1x128xf32, #tpu.memory_space<vmem>>, vector<1x128xf32>
    tpu.vector_store %arg8[%c0_77, %c0_78], %148 {strides = array<i32>} : memref<1x128xf32, #tpu.memory_space<vmem>>, vector<1x128xf32>,
    return
  }
  func.func @transform_0(%arg0: i32) -> (i32, i32) {
    %c0_i32 = arith.constant 0 : i32
    %c0_i32_0 = arith.constant 0 : i32
    return %arg0, %c0_i32 : i32, i32
  }
  func.func @transform_1(%arg0: i32) -> (i32, i32) {
    %c0_i32 = arith.constant 0 : i32
    %c0_i32_0 = arith.constant 0 : i32
    %c0_i32_1 = arith.constant 0 : i32
    return %c0_i32, %c0_i32_0 : i32, i32
  }
  func.func @transform_2(%arg0: i32) -> (i32, i32) {
    %c0_i32 = arith.constant 0 : i32
    %c0_i32_0 = arith.constant 0 : i32
    %c0_i32_1 = arith.constant 0 : i32
    return %c0_i32, %c0_i32_0 : i32, i32
  }
  func.func @transform_3(%arg0: i32) -> (i32, i32, i32) {
    %c0_i32 = arith.constant 0 : i32
    %c0_i32_0 = arith.constant 0 : i32
    %c0_i32_1 = arith.constant 0 : i32
    %c0_i32_2 = arith.constant 0 : i32
    return %c0_i32, %c0_i32_0, %c0_i32_1 : i32, i32, i32
  }
  func.func @transform_4(%arg0: i32) -> (i32, i32) {
    %c0_i32 = arith.constant 0 : i32
    %c0_i32_0 = arith.constant 0 : i32
    %c0_i32_1 = arith.constant 0 : i32
    return %c0_i32, %c0_i32_0 : i32, i32
  }
  func.func @transform_5(%arg0: i32) -> (i32, i32) {
    %c0_i32 = arith.constant 0 : i32
    %c0_i32_0 = arith.constant 0 : i32
    return %arg0, %c0_i32 : i32, i32
  }
  func.func @transform_6(%arg0: i32) -> (i32, i32) {
    %c0_i32 = arith.constant 0 : i32
    %c0_i32_0 = arith.constant 0 : i32
    return %arg0, %c0_i32 : i32, i32
  }
  func.func @transform_7(%arg0: i32) -> (i32, i32) {
    %c0_i32 = arith.constant 0 : i32
    %c0_i32_0 = arith.constant 0 : i32
    return %arg0, %c0_i32 : i32, i32
  }
}

module attributes {stable_mosaic.version = 11 : i64} {
  func.func @_bn_relu_kernel(%arg0: i32, %arg1: memref<128x128xbf16, #tpu.memory_space<vmem>>, %arg2: memref<1x128xf32, #tpu.memory_space<vmem>>, %arg3: memref<1x128xf32, #tpu.memory_space<vmem>>, %arg4: memref<128x128xf32, #tpu.memory_space<vmem>>) attributes {dimension_semantics = [#tpu.dimension_semantics<parallel>], iteration_bounds = array<i64: 1>, scalar_prefetch = 0 : i64, scratch_operands = 0 : i64, tpu.core_type = #tpu.core_type<tc>, window_params = [{transform_indices = @transform_0, window_bounds = array<i64: 128, 128>}, {pipeline_mode = #tpu.pipeline_mode<synchronous>, transform_indices = @transform_1, window_bounds = array<i64: 1, 128>}, {pipeline_mode = #tpu.pipeline_mode<synchronous>, transform_indices = @transform_2, window_bounds = array<i64: 1, 128>}, {transform_indices = @transform_3, window_bounds = array<i64: 128, 128>}]} {
    %c0 = arith.constant 0 : index
    %c0_0 = arith.constant 0 : index
    %0 = vector.load %arg1[%c0, %c0_0] : memref<128x128xbf16, #tpu.memory_space<vmem>>, vector<128x128xbf16>
    %1 = arith.extf %0 : vector<128x128xbf16> to vector<128x128xf32>
    %c0_1 = arith.constant 0 : index
    %c0_2 = arith.constant 0 : index
    %2 = vector.load %arg2[%c0_1, %c0_2] : memref<1x128xf32, #tpu.memory_space<vmem>>, vector<1x128xf32>
    %3 = vector.broadcast %2 : vector<1x128xf32> to vector<128x128xf32>
    %4 = arith.mulf %1, %3 : vector<128x128xf32>
    %c0_3 = arith.constant 0 : index
    %c0_4 = arith.constant 0 : index
    %5 = vector.load %arg3[%c0_3, %c0_4] : memref<1x128xf32, #tpu.memory_space<vmem>>, vector<1x128xf32>
    %6 = vector.broadcast %5 : vector<1x128xf32> to vector<128x128xf32>
    %7 = arith.addf %4, %6 : vector<128x128xf32>
    %cst = arith.constant 0.000000e+00 : f32
    %8 = vector.broadcast %cst : f32 to vector<128x128xf32>
    %9 = arith.maximumf %7, %8 : vector<128x128xf32>
    %c0_5 = arith.constant 0 : index
    %c0_6 = arith.constant 0 : index
    %10 = vector.load %arg4[%c0_5, %c0_6] : memref<128x128xf32, #tpu.memory_space<vmem>>, vector<128x128xf32>
    tpu.vector_store %arg4[%c0_5, %c0_6], %9 {strides = array<i32>} : memref<128x128xf32, #tpu.memory_space<vmem>>, vector<128x128xf32>,
    return
  }
  func.func @transform_0(%arg0: i32) -> (i32, i32) {
    %c0_i32 = arith.constant 0 : i32
    %c0_i32_0 = arith.constant 0 : i32
    return %arg0, %c0_i32 : i32, i32
  }
  func.func @transform_1(%arg0: i32) -> (i32, i32) {
    %c0_i32 = arith.constant 0 : i32
    %c0_i32_0 = arith.constant 0 : i32
    %c0_i32_1 = arith.constant 0 : i32
    return %c0_i32, %c0_i32_0 : i32, i32
  }
  func.func @transform_2(%arg0: i32) -> (i32, i32) {
    %c0_i32 = arith.constant 0 : i32
    %c0_i32_0 = arith.constant 0 : i32
    %c0_i32_1 = arith.constant 0 : i32
    return %c0_i32, %c0_i32_0 : i32, i32
  }
  func.func @transform_3(%arg0: i32) -> (i32, i32) {
    %c0_i32 = arith.constant 0 : i32
    %c0_i32_0 = arith.constant 0 : i32
    return %arg0, %c0_i32 : i32, i32
  }
}

</mosaic_0001>

<bundles_post_ra>
// kernel: down_forward.4
= control target key start
LH: loop header
LB: loop body
LE: loop exit
PB: predicated region body
PF: predicated region fallthrough
CT: control target
= control target key end

     0   :  { %s323_s6 = smov 0   ;;  %s384_s0 = inlined_call_operand.vmem [shape: f32[2,8,2,8,256], index: 0, kind: input, shape index: {}]   ;;  %s385_s1 = inlined_call_operand.vmem [shape: bf16[2,8,8,128], index: 1, kind: output, shape index: {}]  }
   0x1 LB: > { %s245_s7 = sadd.s32 4294967295, %s311_s6   ;;  %p249_p0 = scmp.ge.s32.totalorder %s311_s6, 1  ;;  %s311_s6 = sphi %s323_s6, %s11_s6  }
   0x2   : > { %p87_p1 = scmp.lt.s32.totalorder %s311_s6, 3 }
   0x4   : > { %p88_p2 = pnand %p249_p0, %p87_p1 }
   0x5   : > { %p107_p3 = scmp.lt.s32.totalorder (!%p88_p2), %s245_s7, 1 }
   0x6   : > { %91 = sbr.rel (%p88_p2) target bundleno = 32 (0x20), region = 24 }
   0xb   : > { %s387_s7 = smov (!%p107_p3, %s245_s7), 1 }
   0xc   : > { %s272_s8 = sshll.u32 %s387_s7, 8  ;;  %s273_s12 = sshll.u32 %s387_s7, 5 }
   0xd   : > { %s337_s11 = scalar_lea.vmem %s384_s0, %s272_s8  ;;  %s361_s15 = scalar_lea.vmem %s385_s1, %s273_s12 }
   0xe   : > { %v117_v0 = vld [vmem:[%s337_s11] sm:$0xff]  ;;  %v118_v1 = vld [vmem:[%s337_s11 + $0x8] sm:$0xff]  ;;  %v254_v4 = vld [vmem:[%s337_s11 + $0x10] sm:$0xff] }
   0xf   : > { %v119_v2 = vld [vmem:[%s337_s11 + $0x20] sm:$0xff]  ;;  %v120_v3 = vld [vmem:[%s337_s11 + $0x28] sm:$0xff]  ;;  %v255_v5 = vld [vmem:[%s337_s11 + $0x18] sm:$0xff]  ;;  %v150_v8 = vmax.f32 %v117_v0, %v254_v4 }
  0x10   : > { %v256_v6 = vld [vmem:[%s337_s11 + $0x30] sm:$0xff]  ;;  %v257_v7 = vld [vmem:[%s337_s11 + $0x38] sm:$0xff]  ;;  %v151_v9 = vmax.f32 %v118_v1, %v255_v5  ;;  %v121_v10 = vld [vmem:[%s337_s11 + $0x40] sm:$0xff] }
  0x11   : > { %v152_v11 = vmax.f32 %v119_v2, %v256_v6  ;;  %v153_v12 = vmax.f32 %v120_v3, %v257_v7  ;;  %v122_v13 = vld [vmem:[%s337_s11 + $0x48] sm:$0xff]  ;;  %v123_v14 = vld [vmem:[%s337_s11 + $0x60] sm:$0xff]  ;;  %v258_v17 = vld [vmem:[%s337_s11 + $0x50] sm:$0xff] }
  0x12   : > { %v124_v15 = vld [vmem:[%s337_s11 + $0x68] sm:$0xff]  ;;  %v166_v16 = vmax.f32 %v150_v8, %v151_v9  ;;  %v259_v18 = vld [vmem:[%s337_s11 + $0x58] sm:$0xff]  ;;  %v260_v19 = vld [vmem:[%s337_s11 + $0x70] sm:$0xff]  ;;  %v154_v22 = vmax.f32 %v121_v10, %v258_v17 }
  0x13   : > { %v167_v20 = vmax.f32 %v152_v11, %v153_v12  ;;  %v261_v21 = vld [vmem:[%s337_s11 + $0x78] sm:$0xff]  ;;  %v155_v23 = vmax.f32 %v122_v13, %v259_v18  ;;  %v156_v24 = vmax.f32 %v123_v14, %v260_v19  ;;  %v125_v25 = vld [vmem:[%s337_s11 + $0x80] sm:$0xff]  ;;  %v126_v26 = vld [vmem:[%s337_s11 + $0x88] sm:$0xff] }
  0x14   : > { %v157_v27 = vmax.f32 %v124_v15, %v261_v21  ;;  %v127_v28 = vld [vmem:[%s337_s11 + $0xa0] sm:$0xff]  ;;  %v128_v29 = vld [vmem:[%s337_s11 + $0xa8] sm:$0xff]  ;;  %v262_v30 = vld [vmem:[%s337_s11 + $0x90] sm:$0xff] }
  0x15   : > { %v277_v31 = vpack.c.bf16 %v167_v20, %v166_v16  ;;  %v168_v32 = vmax.f32 %v154_v22, %v155_v23  ;;  %v263_v33 = vld [vmem:[%s337_s11 + $0x98] sm:$0xff]  ;;  %v264_v34 = vld [vmem:[%s337_s11 + $0xb0] sm:$0xff]  ;;  %v158_v36 = vmax.f32 %v125_v25, %v262_v30  ;;  %v129_v41 = vld [vmem:[%s337_s11 + $0xc0] sm:$0xff] }
  0x16   : > { %v265_v35 = vld [vmem:[%s337_s11 + $0xb8] sm:$0xff]  ;;  %v169_v37 = vmax.f32 %v156_v24, %v157_v27  ;;  %v159_v38 = vmax.f32 %v126_v26, %v263_v33  ;;  %v160_v39 = vmax.f32 %v127_v28, %v264_v34  ;;  %v130_v42 = vld [vmem:[%s337_s11 + $0xc8] sm:$0xff]  ;;  %v131_v43 = vld [vmem:[%s337_s11 + $0xe0] sm:$0xff] }
  0x17   : > { %v161_v40 = vmax.f32 %v128_v29, %v265_v35  ;;  %278 = vst [vmem:[%s361_s15] sm:$0xff] %v277_v31   ;;  %v132_v44 = vld [vmem:[%s337_s11 + $0xe8] sm:$0xff]  ;;  %v266_v45 = vld [vmem:[%s337_s11 + $0xd0] sm:$0xff]  ;;  %v267_v46 = vld [vmem:[%s337_s11 + $0xd8] sm:$0xff] }
  0x18   : > { %v282_v47 = vpack.c.bf16 %v169_v37, %v168_v32  ;;  %v170_v48 = vmax.f32 %v158_v36, %v159_v38  ;;  %v268_v50 = vld [vmem:[%s337_s11 + $0xf0] sm:$0xff]  ;;  %v269_v51 = vld [vmem:[%s337_s11 + $0xf8] sm:$0xff]  ;;  %v162_v52 = vmax.f32 %v129_v41, %v266_v45  ;;  %v163_v53 = vmax.f32 %v130_v42, %v267_v46 }
  0x19   : > { %v171_v49 = vmax.f32 %v160_v39, %v161_v40  ;;  %v164_v54 = vmax.f32 %v131_v43, %v268_v50  ;;  %v165_v55 = vmax.f32 %v132_v44, %v269_v51 }
  0x1a   : > { %294 = vst [vmem:[%s361_s15 + $0x8] sm:$0xff] %v282_v47   ;;  %v172_v57 = vmax.f32 %v162_v52, %v163_v53 }
  0x1b   : > { %v287_v56 = vpack.c.bf16 %v171_v49, %v170_v48  ;;  %v173_v58 = vmax.f32 %v164_v54, %v165_v55 }
  0x1d   : > { %295 = vst [vmem:[%s361_s15 + $0x10] sm:$0xff] %v287_v56   ;;  %v292_v59 = vpack.c.bf16 %v173_v58, %v172_v57 }
  0x1f   : > { %296 = vst [vmem:[%s361_s15 + $0x18] sm:$0xff] %v292_v59  }
  0x20 PF: > { %s11_s6 = sadd.s32 1, %s311_s6  }
  0x21   : > { %p8_p4 = scmp.ge.s32.totalorder %s11_s6, 4  }
  0x23   :  { %10 = sbr.rel (!%p8_p4) target bundleno = 1 (0x1), region = 55 }

// kernel: down_forward.7
= control target key start
LH: loop header
LB: loop body
LE: loop exit
PB: predicated region body
PF: predicated region fallthrough
CT: control target
= control target key end

     0   :  { %s303_s0 = inlined_call_operand.vmem [shape: bf16[128,128], index: 0, kind: input, shape index: {}]   ;;  %s304_s1 = inlined_call_operand.vmem [shape: f32[1,128], index: 1, kind: input, shape index: {}]   ;;  %s305_s2 = inlined_call_operand.vmem [shape: f32[1,128], index: 2, kind: input, shape index: {}]   ;;  %s306_s3 = inlined_call_operand.vmem [shape: f32[128,128], index: 3, kind: output, shape index: {}]  }
   0x1   :  { %v131_v0 = vld [vmem:[%s303_s0] sm:$0xff]   ;;  %v162_v4 = vld [vmem:[%s303_s0 + $0x8] sm:$0xff]   ;;  %v163_v5 = vld [vmem:[%s303_s0 + $0x10] sm:$0xff]  }
   0x2   :  { %v195_v1 = vld [vmem:[%s304_s1] ss:$0 sm:$0xff]  ;;  %v132_v2 = vunpack.c.l.bf16 %v131_v0  ;;  %v133_v3 = vunpack.c.h.bf16 %v131_v0  ;;  %v164_v6 = vld [vmem:[%s303_s0 + $0x18] sm:$0xff]   ;;  %v136_v8 = vunpack.c.l.bf16 %v162_v4  ;;  %v137_v9 = vunpack.c.h.bf16 %v162_v4  ;;  %v166_v33 = vld [vmem:[%s303_s0 + $0x28] sm:$0xff]  }
   0x3   :  { %v209_v7 = vld [vmem:[%s305_s2] ss:$0 sm:$0xff]  ;;  %v140_v10 = vunpack.c.l.bf16 %v163_v5  ;;  %v141_v11 = vunpack.c.h.bf16 %v163_v5  ;;  %v144_v14 = vunpack.c.l.bf16 %v164_v6  ;;  %v145_v15 = vunpack.c.h.bf16 %v164_v6  ;;  %v167_v34 = vld [vmem:[%s303_s0 + $0x30] sm:$0xff]   ;;  %v168_v39 = vld [vmem:[%s303_s0 + $0x38] sm:$0xff]  }
   0x4   :  { %v53_v12 = vmul.f32 %v132_v2, %v195_v1  ;;  %v54_v13 = vmul.f32 %v133_v3, %v195_v1  ;;  %v55_v16 = vmul.f32 %v136_v8, %v195_v1  ;;  %v56_v17 = vmul.f32 %v137_v9, %v195_v1  ;;  %v165_v28 = vld [vmem:[%s303_s0 + $0x20] sm:$0xff]  }
   0x5   :  { %v57_v18 = vmul.f32 %v140_v10, %v195_v1  ;;  %v58_v19 = vmul.f32 %v141_v11, %v195_v1  ;;  %v59_v22 = vmul.f32 %v144_v14, %v195_v1  ;;  %v60_v23 = vmul.f32 %v145_v15, %v195_v1 }
   0x6   :  { %v76_v20 = vadd.f32 %v209_v7, %v53_v12  ;;  %v77_v21 = vadd.f32 %v209_v7, %v54_v13  ;;  %v78_v24 = vadd.f32 %v209_v7, %v55_v16  ;;  %v79_v25 = vadd.f32 %v209_v7, %v56_v17 }
   0x7   :  { %v80_v26 = vadd.f32 %v209_v7, %v57_v18  ;;  %v81_v27 = vadd.f32 %v209_v7, %v58_v19  ;;  %v82_v31 = vadd.f32 %v209_v7, %v59_v22  ;;  %v83_v32 = vadd.f32 %v209_v7, %v60_v23 }
   0x8   :  { %v92_v29 = vmax.f32 %v76_v20, 0.0  ;;  %v93_v30 = vmax.f32 %v77_v21, 0.0  ;;  %v94_v35 = vmax.f32 %v78_v24, 0.0  ;;  %v95_v36 = vmax.f32 %v79_v25, 0.0 }
   0x9   :  { %v96_v37 = vmax.f32 %v80_v26, 0.0  ;;  %v97_v38 = vmax.f32 %v81_v27, 0.0  ;;  %v98_v40 = vmax.f32 %v82_v31, 0.0  ;;  %v99_v41 = vmax.f32 %v83_v32, 0.0 }
   0xa   :  { %108 = vst [vmem:[%s306_s3] sm:$0xff] %v92_v29  ;;  %109 = vst [vmem:[%s306_s3 + $0x8] sm:$0xff] %v93_v30  ;;  %v148_v42 = vunpack.c.l.bf16 %v165_v28  ;;  %v149_v43 = vunpack.c.h.bf16 %v165_v28  ;;  %v152_v44 = vunpack.c.l.bf16 %v166_v33  ;;  %v153_v45 = vunpack.c.h.bf16 %v166_v33 }
   0xb   :  { %110 = vst [vmem:[%s306_s3 + $0x10] sm:$0xff] %v94_v35  ;;  %111 = vst [vmem:[%s306_s3 + $0x18] sm:$0xff] %v95_v36  ;;  %v156_v46 = vunpack.c.l.bf16 %v167_v34  ;;  %v157_v47 = vunpack.c.h.bf16 %v167_v34  ;;  %v160_v50 = vunpack.c.l.bf16 %v168_v39  ;;  %v161_v51 = vunpack.c.h.bf16 %v168_v39 }
   0xc   :  { %112 = vst [vmem:[%s306_s3 + $0x20] sm:$0xff] %v96_v37  ;;  %113 = vst [vmem:[%s306_s3 + $0x28] sm:$0xff] %v97_v38  ;;  %v61_v48 = vmul.f32 %v148_v42, %v195_v1  ;;  %v62_v49 = vmul.f32 %v149_v43, %v195_v1  ;;  %v63_v52 = vmul.f32 %v152_v44, %v195_v1 }
   0xd   :  { %114 = vst [vmem:[%s306_s3 + $0x30] sm:$0xff] %v98_v40  ;;  %115 = vst [vmem:[%s306_s3 + $0x38] sm:$0xff] %v99_v41  ;;  %v64_v53 = vmul.f32 %v153_v45, %v195_v1  ;;  %v65_v54 = vmul.f32 %v156_v46, %v195_v1  ;;  %v66_v55 = vmul.f32 %v157_v47, %v195_v1 }
   0xe   :  { %v84_v56 = vadd.f32 %v209_v7, %v61_v48  ;;  %v85_v57 = vadd.f32 %v209_v7, %v62_v49  ;;  %v67_v58 = vmul.f32 %v160_v50, %v195_v1  ;;  %v68_v59 = vmul.f32 %v161_v51, %v195_v1 }
   0xf   :  { %v86_v60 = vadd.f32 %v209_v7, %v63_v52  ;;  %v87_v61 = vadd.f32 %v209_v7, %v64_v53  ;;  %v88_v62 = vadd.f32 %v209_v7, %v65_v54  ;;  %v89_v63 = vadd.f32 %v209_v7, %v66_v55 }
  0x10   :  { %v100_v0 = vmax.f32 %v84_v56, 0.0  ;;  %v101_v2 = vmax.f32 %v85_v57, 0.0  ;;  %v90_v3 = vadd.f32 %v209_v7, %v67_v58  ;;  %v91_v4 = vadd.f32 %v209_v7, %v68_v59 }
  0x11   :  { %v102_v5 = vmax.f32 %v86_v60, 0.0  ;;  %v103_v6 = vmax.f32 %v87_v61, 0.0  ;;  %v104_v8 = vmax.f32 %v88_v62, 0.0  ;;  %v105_v9 = vmax.f32 %v89_v63, 0.0 }
  0x12   :  { %116 = vst [vmem:[%s306_s3 + $0x40] sm:$0xff] %v100_v0  ;;  %117 = vst [vmem:[%s306_s3 + $0x48] sm:$0xff] %v101_v2  ;;  %v106_v1 = vmax.f32 %v90_v3, 0.0  ;;  %v107_v10 = vmax.f32 %v91_v4, 0.0 }
  0x13   :  { %118 = vst [vmem:[%s306_s3 + $0x50] sm:$0xff] %v102_v5  ;;  %119 = vst [vmem:[%s306_s3 + $0x58] sm:$0xff] %v103_v6 }
  0x14   :  { %120 = vst [vmem:[%s306_s3 + $0x60] sm:$0xff] %v104_v8  ;;  %121 = vst [vmem:[%s306_s3 + $0x68] sm:$0xff] %v105_v9 }
  0x15   :  { %122 = vst [vmem:[%s306_s3 + $0x70] sm:$0xff] %v106_v1  ;;  %123 = vst [vmem:[%s306_s3 + $0x78] sm:$0xff] %v107_v10 }

// kernel: down_forward.6
= control target key start
LH: loop header
LB: loop body
LE: loop exit
PB: predicated region body
PF: predicated region fallthrough
CT: control target
= control target key end

     0   :  { %v204_v0 = vlaneseq  ;;  %v7935_v2 = vmov 0   ;;  %vm766_vm0 = vsmask.f32 3328  ;;  %vm6099_vm6 = vmmov 0   ;;  %s7927_s3 = inlined_call_operand.vmem [shape: bf16[9,128,128], index: 3, kind: input, shape index: {}]   ;;  %s7928_s0 = inlined_call_operand.vmem [shape: bf16[128,128], index: 0, kind: input, shape index: {}]   ;;  %s7929_s1 = inlined_call_operand.vmem [shape: f32[1,128], index: 1, kind: input, shape index: {}]   ;;  %s7930_s2 = inlined_call_operand.vmem [shape: f32[1,128], index: 2, kind: input, shape index: {}]   ;;  %s7931_s4 = inlined_call_operand.vmem [shape: f32[1,128], index: 4, kind: input, shape index: {}]   ;;  %s7932_s5 = inlined_call_operand.vmem [shape: bf16[128,128], index: 5, kind: output, shape index: {0}]   ;;  %s7933_s6 = inlined_call_operand.vmem [shape: f32[1,128], index: 6, kind: output, shape index: {1}]   ;;  %s7934_s7 = inlined_call_operand.vmem [shape: f32[1,128], index: 7, kind: output, shape index: {2}]  }
   0x1   :  { %v6003_v1 = vld [vmem:[%s7927_s3 + $0x78] sm:$0xff]   ;;  %128 = vst [vmem:[#allocation2] sm:$0xf] %v7935_v2  ;;  %129 = vst [vmem:[#allocation2 + $0x4] sm:$0xf] %v7935_v2  ;;  %v6005_v5 = vld [vmem:[%s7927_s3 + $0x70] sm:$0xff]  }
   0x2   :  { %130 = vst [vmem:[#allocation2 + $0x48] sm:$0xf] %v7935_v2  ;;  %131 = vst [vmem:[#allocation2 + $0x4c] sm:$0xf] %v7935_v2  ;;  %v6004_v3 = vld [vmem:[%s7927_s3 + $0x38] sm:$0xff]   ;;  %v6151_v4 = vshrl.u32 %v204_v0, 7  ;;  %5696 = vmatprep.subr.bf16.mxu0 %v6003_v1 }
   0x3   :  { %5728 = vmatprep.subr.bf16.mxu1 %v6004_v3  ;;  %5697 = vmatpush3.bf16.msra.mxu0 %v6003_v1  ;;  %v6006_v6 = vld [vmem:[%s7927_s3 + $0x30] sm:$0xff]   ;;  %v6007_v8 = vld [vmem:[%s7927_s3 + $0x68] sm:$0xff]   ;;  %v6009_v12 = vld [vmem:[%s7927_s3 + $0x60] sm:$0xff]   ;;  %v7993_v33 = vmov 0  ;;  %vm767_vm10 = vsmask.f32 7440 }
   0x4   :  { %v206_v7 = vadd.s32 8, %v6151_v4  ;;  %5729 = vmatpush3.bf16.msra.mxu1 %v6004_v3  ;;  %5698 = vmatprep.subr.bf16.mxu0 %v6005_v5  ;;  %v207_v9 = vadd.s32 16, %v6151_v4  ;;  %v6008_v10 = vld [vmem:[%s7927_s3 + $0x28] sm:$0xff]   ;;  %v208_v11 = vadd.s32 24, %v6151_v4  ;;  %v6010_v15 = vld [vmem:[%s7927_s3 + $0x20] sm:$0xff]   ;;  %v6011_v17 = vld [vmem:[%s7927_s3 + $0x58] sm:$0xff]  }
   0x5   :  { %5730 = vmatprep.subr.bf16.mxu1 %v6006_v6  ;;  %v6012_v20 = vld [vmem:[%s7927_s3 + $0x18] sm:$0xff]   ;;  %v6013_v22 = vld [vmem:[%s7927_s3 + $0x50] sm:$0xff]   ;;  %v5419_v23 = vld [vmem:[%s7928_s0] sm:$0xff]  }
   0x6   :  { %v232_v13 = vand.u32 63, %v206_v7  ;;  %v239_v14 = vand.u32 63, %v207_v9  ;;  %v246_v16 = vand.u32 63, %v208_v11  ;;  %v5530_v24 = vld [vmem:[%s7928_s0 + $0x8] sm:$0xff]   ;;  %v6198_v25 = vld [vmem:[%s7929_s1] ss:$0 sm:$0xff]  ;;  %v5420_v27 = vunpack.c.l.bf16 %v5419_v23  ;;  %vm6216_vm7 = vmpackc.low %vm6099_vm6, %vm6099_vm6 }
   0x7   :  { %5699 = vmatpush3.bf16.msra.mxu0 %v6005_v5  ;;  %v6014_v26 = vld [vmem:[%s7927_s3 + $0x10] sm:$0xff]   ;;  %v5421_v28 = vunpack.c.h.bf16 %v5419_v23  ;;  %v5424_v29 = vunpack.c.l.bf16 %v5530_v24  ;;  %v5425_v30 = vunpack.c.h.bf16 %v5530_v24  ;;  %v6015_v31 = vld [vmem:[%s7927_s3 + $0x48] sm:$0xff]   ;;  %v6211_v32 = vld [vmem:[%s7930_s2] ss:$0 sm:$0xff]  ;;  %v7994_v33 = vsel %vm6216_vm7, 4294967295, %v7993_v33 }
   0x8   :  { %5731 = vmatpush3.bf16.msra.mxu1 %v6006_v6  ;;  %5700 = vmatprep.subr.bf16.mxu0 %v6007_v8  ;;  %v6177_v18 = vand.u32 7, %v232_v13  ;;  %v6179_v19 = vand.u32 7, %v239_v14  ;;  %v6184_v21 = vand.u32 7, %v246_v16  ;;  %7995 = vst [vmem:[#allocation3_spill] sm:$0xff] %v7994_v33  ;;  %v65_v34 = vmul.f32 %v5420_v27, %v6198_v25  ;;  %v6016_v40 = vld [vmem:[%s7927_s3 + $0x8] sm:$0xff]   ;;  %v6017_v45 = vld [vmem:[%s7927_s3 + $0x40] sm:$0xff]   ;;  %vm6264_vm12 = vmor %vm766_vm0, %vm767_vm10 }
   0x9   :  { %5732 = vmatprep.subr.bf16.mxu1 %v6008_v10  ;;  %v66_v35 = vmul.f32 %v5421_v28, %v6198_v25  ;;  %v67_v36 = vmul.f32 %v5424_v29, %v6198_v25  ;;  %v68_v37 = vmul.f32 %v5425_v30, %v6198_v25  ;;  %v6233_v38 = vsel %vm6216_vm7, 65537, %v7935_v2  ;;  %v6018_v50 = vld [vmem:[%s7927_s3] sm:$0xff]   ;;  %v6293_v16 = vld [vmem:[%s7927_s3 + $0xb8] sm:$0xff]  }
   0xa   :  { %vm638_vm1 = vcmp.ne.s32.totalorder %v6177_v18, 0  ;;  %vm639_vm2 = vcmp.ne.s32.totalorder %v6179_v19, 0  ;;  %vm640_vm3 = vcmp.ne.s32.totalorder %v6184_v21, 0  ;;  %vm654_vm4 = vcmp.ne.s32.totalorder %v6177_v18, 7  ;;  %v669_v55 = vld [vmem:[#allocation2] sm:$0x8] }
   0xb   :  { %5701 = vmatpush3.bf16.msra.mxu0 %v6007_v8  ;;  %vm655_vm5 = vcmp.ne.s32.totalorder %v6179_v19, 7  ;;  %vm735_vm8 = vmpackc.low %vm638_vm1, %vm638_vm1  ;;  %v88_v41 = vadd.f32 %v6211_v32, %v65_v34  ;;  %v89_v42 = vadd.f32 %v6211_v32, %v66_v35  ;;  %v90_v43 = vadd.f32 %v6211_v32, %v67_v36  ;;  %v6260_v0 = vld [vmem:[#allocation2 + $0x4] sm:$0xf]  ;;  %v6274_v8 = vld [vmem:[%s7928_s0 + $0x10] sm:$0xff]  }
   0xc   :  { %5733 = vmatpush3.bf16.msra.mxu1 %v6008_v10  ;;  %5702 = vmatprep.subr.bf16.mxu0 %v6009_v12  ;;  %vm736_vm9 = vmpackc.low %vm639_vm2, %vm639_vm2  ;;  %v751_v39 = vsel %vm735_vm8, 65537, %v7935_v2  ;;  %v91_v44 = vadd.f32 %v6211_v32, %v68_v37  ;;  %v770_v48 = vshll.u32 %v6233_v38, 16  ;;  %v773_v49 = vshrl.u32 %v6233_v38, 16  ;;  %v6309_v24 = vld [vmem:[%s7927_s3 + $0xf8] sm:$0xff]   ;;  %v6074_v1 = vld [vmem:[%s7927_s3 + $0x1c0] sm:$0xff]  }
   0xd   :  { %5734 = vmatprep.subr.bf16.mxu1 %v6010_v15  ;;  %vm737_vm11 = vmpackc.low %vm640_vm3, %vm640_vm3  ;;  %v752_v46 = vsel %vm736_vm9, 65537, %v7935_v2  ;;  %v104_v51 = vmax.f32 %v88_v41, 0.0  ;;  %v105_v52 = vmax.f32 %v89_v42, 0.0  ;;  %v106_v53 = vmax.f32 %v90_v43, 0.0 }
   0xe   :  { %v753_v47 = vsel %vm737_vm11, 65537, %v7935_v2  ;;  %v107_v54 = vmax.f32 %v91_v44, 0.0  ;;  %v6258_v56 = vrot.slane %v770_v48, 5  ;;  %v775_v57 = vrot.slane %v773_v49, 4  ;;  %vm6280_vm14 = vmpackc.low %vm654_vm4, %vm654_vm4 }
   0xf   :  { %5703 = vmatpush3.bf16.msra.mxu0 %v6009_v12  ;;  %v779_v58 = vshll.u32 %v751_v39, 16  ;;  %v783_v59 = vshrl.u32 %v751_v39, 16  ;;  %v5453_v60 = vpack.c.bf16 %v105_v52, %v104_v51  ;;  %v789_v62 = vshll.u32 %v752_v46, 16  ;;  %vm6301_vm15 = vmpackc.low %vm655_vm5, %vm655_vm5 }
  0x10   :  { %5735 = vmatpush3.bf16.msra.mxu1 %v6010_v15  ;;  %5704 = vmatprep.subr.bf16.mxu0 %v6011_v17  ;;  %7996 = vst [vmem:[#allocation4_spill] sm:$0xff] %v6258_v56  ;;  %v5458_v61 = vpack.c.bf16 %v107_v54, %v106_v53  ;;  %v793_v63 = vshrl.u32 %v752_v46, 16  ;;  %v776_v3 = vor.u32 %v775_v57, %v6258_v56  ;;  %v799_v7 = vshll.u32 %v753_v47, 16 }
  0x11   :  { %5736 = vmatprep.subr.bf16.mxu1 %v6012_v20  ;;  %v6269_v5 = vrot.slane %v779_v58, 5  ;;  %v785_v6 = vrot.slane %v783_v59, 4  ;;  %5537 = vst [vmem:[#allocation2 + $0x8] sm:$0xff] %v5453_v60   ;;  %v791_v9 = vrot.slane %v789_v62, 5  ;;  %v803_v11 = vshrl.u32 %v753_v47, 16 }
  0x12   :  { %5538 = vst [vmem:[#allocation2 + $0x10] sm:$0xff] %v5458_v61   ;;  %v795_v10 = vrot.slane %v793_v63, 4  ;;  %vm928_vm13 = vcmp.ne.s16.totalorder %v6258_v56, 0  ;;  %v6284_v13 = vrot.slane %v776_v3, 4  ;;  %v6288_v15 = vadd.s32 32, %v6151_v4 }
  0x13   :  { %5705 = vmatpush3.bf16.msra.mxu0 %v6011_v17  ;;  %v786_v14 = vor.u32 %v785_v6, %v6269_v5  ;;  %v945_v18 = vsel %vm928_vm13, %v669_v55, 0  ;;  %v5428_v23 = vunpack.c.l.bf16 %v6274_v8  ;;  %v6318_v19 = vsel %vm6280_vm14, 65537, %v7935_v2 }
  0x14   :  { %5737 = vmatpush3.bf16.msra.mxu1 %v6012_v20  ;;  %5706 = vmatprep.subr.bf16.mxu0 %v6013_v22  ;;  %8001 = vst [vmem:[#allocation5_spill] sm:$0xff] %v6284_v13  ;;  %v796_v17 = vor.u32 %v795_v10, %v791_v9  ;;  %v1026_v20 = vsel %vm6216_vm7, %v6260_v0, 0  ;;  %v6320_v28 = vrot.slane %v773_v49, 7  ;;  %v6322_v30 = vrot.slane %v799_v7, 5 }
  0x15   :  { %5738 = vmatprep.subr.bf16.mxu1 %v6014_v26  ;;  %v787_v27 = vrot.slane %v786_v14, 4  ;;  %vm6100_vm1 = vmmov 1   ;;  %v8004_v36 = vmov 0  ;;  %v6336_v37 = vsel %vm6301_vm15, 65537, %v7935_v2 }
  0x16   :  { %v797_v29 = vrot.slane %v796_v17, 4  ;;  %vm6329_vm2 = vmpackc.low %vm6100_vm1, %vm6100_vm1  ;;  %v6341_v39 = vor.u32 %v6320_v28, %v770_v48  ;;  %v1638_v43 = vshrl.u32 %v6318_v19, 16  ;;  %vm7939_vm4 = vsmask.f32 4352  ;;  %v5532_v17 = vld [vmem:[%s7928_s0 + $0x18] sm:$0xff]  }
  0x17   :  { %5707 = vmatpush3.bf16.msra.mxu0 %v6013_v22  ;;  %v792_v34 = vsel %vm6264_vm12, %v787_v27, %v791_v9  ;;  %v8005_v36 = vsel %vm6329_vm2, 4294967295, %v8004_v36  ;;  %v5429_v47 = vunpack.c.h.bf16 %v6274_v8  ;;  %v69_v48 = vmul.f32 %v5428_v23, %v6198_v25 }
  0x18   :  { %5739 = vmatpush3.bf16.msra.mxu1 %v6014_v26  ;;  %5708 = vmatprep.subr.bf16.mxu0 %v6015_v31  ;;  %v782_v26 = vsel %vm6264_vm12, %v6284_v13, %v6269_v5  ;;  %8006 = vst [vmem:[#allocation6_spill] sm:$0xff] %v8005_v36  ;;  %8007 = vst [vmem:[#allocation7_spill] sm:$0xff] %v6341_v39  ;;  %vm6347_vm3 = vcmp.ne.s16.totalorder %v792_v34, 0  ;;  %v671_v38 = vld [vmem:[#allocation2 + $0x8] sm:$0xf]  ;;  %v210_v22 = vadd.s32 40, %v6151_v4 }
  0x19   :  { %5740 = vmatprep.subr.bf16.mxu1 %v6016_v40  ;;  %vm929_vm0 = vcmp.ne.s16.totalorder %v782_v26, 0  ;;  %v672_v44 = vld [vmem:[#allocation2 + $0xc] sm:$0xf]  ;;  %v947_v49 = vsel %vm6347_vm3, %v671_v38, 0  ;;  %v1027_v51 = vsel %vm6329_vm2, %v671_v38, 0  ;;  %v70_v3 = vmul.f32 %v5429_v47, %v6198_v25 }
  0x1a   :  { %v946_v35 = vsel %vm929_vm0, %v6260_v0, 0  ;;  %v1531_v53 = vld [vmem:[#allocation2 + $0xc] sm:$0xf]  ;;  %v5107_v54 = vcombine.low %v1026_v20, %v1027_v51  ;;  %v1532_v58 = vld [vmem:[#allocation2 + $0x10] sm:$0xf]  ;;  %v92_v12 = vadd.f32 %v6211_v32, %v69_v48  ;;  %v253_v23 = vand.u32 63, %v6288_v15 }
  0x1b   :  { %5709 = vmatpush3.bf16.msra.mxu0 %v6015_v31  ;;  %v6324_v31 = vrot.slane %v803_v11, 4  ;;  %v5123_v42 = vcombine.low %v945_v18, %v946_v35  ;;  %v2348_v59 = vsel %vm6347_vm3, %v1531_v53, 0  ;;  %v2900_v60 = vld [vmem:[#allocation2 + $0x10] sm:$0xf]  ;;  %v2901_v62 = vld [vmem:[#allocation2 + $0x14] sm:$0xf]  ;;  %v93_v14 = vadd.f32 %v6211_v32, %v70_v3 }
  0x1c   :  { %5741 = vmatpush3.bf16.msra.mxu1 %v6016_v40  ;;  %5710 = vmatprep.subr.bf16.mxu0 %v6017_v45  ;;  %v802_v40 = vsel %vm6264_vm12, %v797_v29, %v6322_v30  ;;  %v3713_v63 = vsel %vm6347_vm3, %v2900_v60, 0  ;;  %v108_v29 = vmax.f32 %v92_v12, 0.0  ;;  %v6388_v35 = vld [vmem:[#allocation2 + $0x10] sm:$0xf]  ;;  %v260_v41 = vand.u32 63, %v210_v22 }
  0x1d   :  { %5742 = vmatprep.subr.bf16.mxu1 %v6018_v50  ;;  %vm6353_vm5 = vcmp.ne.s16.totalorder %v802_v40, 0  ;;  %v1297_v52 = vshrl.u32 %v5123_v42, 16  ;;  %v1300_v57 = vshll.u32 %v5123_v42, 16  ;;  %5712 = vmatprep.mubr.bf16.mxu0 %v5107_v54  ;;  %v806_v26 = vor.u32 %v6324_v31, %v6322_v30 }
  0x1e   :  { %v2349_v61 = vsel %vm6353_vm5, %v1532_v58, 0  ;;  %v3714_v9 = vsel %vm6353_vm5, %v2901_v62, 0  ;;  %v109_v34 = vmax.f32 %v93_v14, 0.0  ;;  %v6392_v42 = vand.u32 7, %v253_v23  ;;  %v674_v62 = vld [vmem:[#allocation2 + $0x14] sm:$0xf] }
  0x1f   :  { %5711 = vmatpush3.bf16.msra.mxu0 %v6017_v45  ;;  %v1299_v0 = vrot.slane %v1297_v52, 3  ;;  %v6373_v8 = vcombine.low %v2348_v59, %v2349_v61  ;;  %v6377_v10 = vcombine.low %v3713_v63, %v3714_v9  ;;  %v1302_v11 = vrot.slane %v1300_v57, 4  ;;  %v6023_v61 = vld [vmem:[%s7927_s3 + $0xa8] sm:$0xff]  }
  0x20   :  { %5743 = vmatpush3.bf16.msra.mxu1 %v6018_v50  ;;  %5760 = vmatprep.subr.bf16.mxu0 %v6293_v16  ;;  %v948_v50 = vsel %vm6353_vm5, %v672_v44, 0  ;;  %v1028_v38 = vsel %vm6329_vm2, %v672_v44, 0  ;;  %v5463_v45 = vpack.c.bf16 %v109_v34, %v108_v29  ;;  %v1029_v15 = vsel %vm6329_vm2, %v6388_v35, 0  ;;  %v6021_v44 = vld [vmem:[%s7927_s3 + $0xb0] sm:$0xff]   ;;  %v6435_v14 = vld [vmem:[%s7928_s0 + $0x28] sm:$0xff]  }
  0x21   :  { %5792 = vmatprep.subr.bf16.mxu1 %v6309_v24  ;;  %v5124_v55 = vcombine.low %v947_v49, %v948_v50  ;;  %8012 = vst [vmem:[#allocation8_spill] sm:$0xff] %v6377_v10  ;;  %v1303_v27 = vor.u32 %v1302_v11, %v1299_v0  ;;  %v5432_v47 = vunpack.c.l.bf16 %v5532_v17  ;;  %v5433_v30 = vunpack.c.h.bf16 %v5532_v17  ;;  %v1533_v0 = vld [vmem:[#allocation2 + $0x14] sm:$0xf]  ;;  %v6816_v10 = vld [vmem:[#allocation2 + $0x8] sm:$0xf] }
  0x22   :  { %v6400_v31 = vrot.slane %v6320_v28, 4  ;;  %v6404_v49 = vand.u32 7, %v260_v41  ;;  %vm641_vm6 = vcmp.ne.s32.totalorder %v6392_v42, 0  ;;  %5539 = vst [vmem:[#allocation2 + $0x18] sm:$0xff] %v5463_v45   ;;  %v5108_v50 = vcombine.low %v1028_v38, %v1029_v15  ;;  %v6025_v45 = vld [vmem:[%s7927_s3 + $0xa0] sm:$0xff]  }
  0x23   :  { %v1305_v6 = vshrl.u32 %v5124_v55, 16  ;;  %v1308_v7 = vshll.u32 %v5124_v55, 16  ;;  %vm738_vm8 = vmpackc.low %vm641_vm6, %vm641_vm6  ;;  %v71_v51 = vmul.f32 %v5432_v47, %v6198_v25  ;;  %v72_v28 = vmul.f32 %v5433_v30, %v6198_v25 }
  0x24   :  { %8013 = vst [vmem:[#allocation9_spill] sm:$0xff] %v6400_v31  ;;  %v211_v52 = vadd.s32 48, %v6151_v4  ;;  %v6415_v53 = vrot.slane %v1638_v43, 7  ;;  %vm642_vm9 = vcmp.ne.s32.totalorder %v6404_v49, 0  ;;  %v754_v54 = vsel %vm738_vm8, 65537, %v7935_v2  ;;  %5713 = vmatmul.mubr.bf16.vlgmr.msra.gmra.mxu0 %v5108_v50  ;;  %v6427_v43 = vld [vmem:[%s7928_s0 + $0x20] sm:$0xff]  }
  0x25   :  { %v1307_v18 = vrot.slane %v1305_v6, 3  ;;  %v1310_v20 = vrot.slane %v1308_v7, 4  ;;  %v212_v55 = vadd.s32 56, %v6151_v4  ;;  %vm739_vm10 = vmpackc.low %vm642_vm9, %vm642_vm9  ;;  %v807_v57 = vrot.slane %v806_v26, 4  ;;  %5761 = vmatpush3.bf16.msra.mxu0 %v6293_v16 }
  0x26   :  { %v809_v58 = vshll.u32 %v754_v54, 16  ;;  %v813_v59 = vshrl.u32 %v754_v54, 16  ;;  %v94_v60 = vadd.f32 %v6211_v32, %v71_v51  ;;  %v755_v63 = vsel %vm739_vm10, 65537, %v7935_v2  ;;  %5762 = vmatprep.subr.bf16.mxu0 %v6021_v44 }
  0x27   :  { %v6390_v40 = vor.u32 %v1310_v20, %v1307_v18  ;;  %v95_v3 = vadd.f32 %v6211_v32, %v72_v28  ;;  %v267_v6 = vand.u32 63, %v211_v52  ;;  %v819_v11 = vshll.u32 %v755_v63, 16 }
  0x28   :  { %v811_v7 = vrot.slane %v809_v58, 5  ;;  %v815_v9 = vrot.slane %v813_v59, 4  ;;  %v110_v12 = vmax.f32 %v94_v60, 0.0  ;;  %v274_v18 = vand.u32 63, %v212_v55 }
  0x29   :  { %v1312_v48 = vsel %vm7939_vm4, %v1303_v27, %v6390_v40  ;;  %v111_v17 = vmax.f32 %v95_v3, 0.0  ;;  %v6437_v20 = vand.u32 7, %v267_v6  ;;  %v823_v22 = vshrl.u32 %v755_v63, 16  ;;  %v2902_v34 = vld [vmem:[#allocation2 + $0x18] sm:$0xf]  ;;  %5763 = vmatpush3.bf16.msra.mxu0 %v6021_v44 }
  0x2a   :  { %5744 = vmatprep.mubr.bf16.mxu1 %v1312_v48  ;;  %v812_v16 = vsel %vm6264_vm12, %v807_v57, %v811_v7  ;;  %v816_v23 = vor.u32 %v815_v9, %v811_v7  ;;  %v821_v26 = vrot.slane %v819_v11, 5  ;;  %v1030_v27 = vsel %vm6329_vm2, %v674_v62, 0  ;;  %v6456_v48 = vld [vmem:[#allocation2 + $0x18] sm:$0xf]  ;;  %5764 = vmatprep.subr.bf16.mxu0 %v6023_v61  ;;  %v2903_v51 = vld [vmem:[#allocation2 + $0x1c] sm:$0xf] }
  0x2b   :  { %vm6443_vm11 = vcmp.ne.s16.totalorder %v812_v16, 0  ;;  %v5468_v41 = vpack.c.bf16 %v111_v17, %v110_v12  ;;  %v6447_v38 = vand.u32 7, %v274_v18  ;;  %v5436_v15 = vunpack.c.l.bf16 %v6427_v43  ;;  %v6464_v28 = vld [vmem:[#allocation2 + $0x18] sm:$0xf]  ;;  %v6470_v55 = vld [vmem:[#allocation2 + $0x1c] sm:$0xf] }
  0x2c   :  { %v817_v47 = vrot.slane %v816_v23, 4  ;;  %v949_v30 = vsel %vm6443_vm11, %v6388_v35, 0  ;;  %v2350_v50 = vsel %vm6443_vm11, %v1533_v0, 0  ;;  %v3715_v44 = vsel %vm6443_vm11, %v2902_v34, 0  ;;  %v6027_v9 = vld [vmem:[%s7927_s3 + $0x98] sm:$0xff]  }
  0x2d   :  { %5540 = vst [vmem:[#allocation2 + $0x20] sm:$0xff] %v5468_v41   ;;  %vm643_vm13 = vcmp.ne.s32.totalorder %v6437_v20, 0  ;;  %vm644_vm14 = vcmp.ne.s32.totalorder %v6447_v38, 0  ;;  %v5437_v52 = vunpack.c.h.bf16 %v6427_v43  ;;  %v5440_v35 = vunpack.c.l.bf16 %v6435_v14  ;;  %5765 = vmatpush3.bf16.msra.mxu0 %v6023_v61 }
  0x2e   :  { %v822_v54 = vsel %vm6264_vm12, %v817_v47, %v821_v26  ;;  %vm740_vm15 = vmpackc.low %vm643_vm13, %vm643_vm13  ;;  %v825_v57 = vrot.slane %v823_v22, 4  ;;  %v1031_v58 = vsel %vm6329_vm2, %v6464_v28, 0  ;;  %v214_v59 = vadd.s32 72, %v6151_v4  ;;  %5766 = vmatprep.subr.bf16.mxu0 %v6025_v45 }
  0x2f   :  { %vm933_vm0 = vcmp.ne.s16.totalorder %v822_v54, 0  ;;  %vm741_vm1 = vmpackc.low %vm644_vm14, %vm644_vm14  ;;  %v756_v60 = vsel %vm740_vm15, 65537, %v7935_v2  ;;  %v5109_v43 = vcombine.low %v1030_v27, %v1031_v58  ;;  %v1032_v63 = vsel %vm6329_vm2, %v6470_v55, 0 }
  0x30   :  { %v950_v0 = vsel %vm933_vm0, %v674_v62, 0  ;;  %v2351_v3 = vsel %vm933_vm0, %v6456_v48, 0  ;;  %v3716_v6 = vsel %vm933_vm0, %v2903_v51, 0  ;;  %v757_v7 = vsel %vm741_vm1, 65537, %v7935_v2 }
  0x31   :  { %v5125_v11 = vcombine.low %v949_v30, %v950_v0  ;;  %v6485_v12 = vcombine.low %v2350_v50, %v2351_v3  ;;  %v6487_v17 = vcombine.low %v3715_v44, %v3716_v6  ;;  %v826_v18 = vor.u32 %v825_v57, %v821_v26  ;;  %5716 = vmatprep.mubr.bf16.mxu0 %v5109_v43  ;;  %v6029_v26 = vld [vmem:[%s7927_s3 + $0x90] sm:$0xff]  }
  0x32   :  { %v829_v22 = vshll.u32 %v756_v60, 16  ;;  %v833_v61 = vshrl.u32 %v756_v60, 16  ;;  %v839_v62 = vshll.u32 %v757_v7, 16  ;;  %v288_v16 = vand.u32 63, %v214_v59  ;;  %5767 = vmatpush3.bf16.msra.mxu0 %v6025_v45 }
  0x33   :  { %8016 = vst [vmem:[#allocation10_spill] sm:$0xff] %v6487_v17  ;;  %v1314_v23 = vshrl.u32 %v5125_v11, 16  ;;  %v1317_v27 = vshll.u32 %v5125_v11, 16  ;;  %v827_v29 = vrot.slane %v826_v18, 4  ;;  %v843_v34 = vshrl.u32 %v757_v7, 16  ;;  %5768 = vmatprep.subr.bf16.mxu0 %v6027_v9  ;;  %v6022_v7 = vld [vmem:[%s7927_s3 + $0xf0] sm:$0xff]  }
  0x34   :  { %v831_v41 = vrot.slane %v829_v22, 5  ;;  %v835_v47 = vrot.slane %v833_v61, 4  ;;  %v841_v51 = vrot.slane %v839_v62, 5  ;;  %v6489_v54 = vand.u32 7, %v288_v16  ;;  %v6499_v59 = vld [vmem:[#allocation2 + $0x20] sm:$0xf] }
  0x35   :  { %v1316_v30 = vrot.slane %v1314_v23, 3  ;;  %v1319_v50 = vrot.slane %v1317_v27, 4  ;;  %v5441_v44 = vunpack.c.h.bf16 %v6435_v14  ;;  %v73_v57 = vmul.f32 %v5436_v15, %v6198_v25  ;;  %v6031_v62 = vld [vmem:[%s7927_s3 + $0x88] sm:$0xff]   ;;  %v1529_v17 = vld [vmem:[#allocation2 + $0x4] sm:$0xf] }
  0x36   :  { %v832_v58 = vsel %vm6264_vm12, %v827_v29, %v831_v41  ;;  %v836_v45 = vor.u32 %v835_v47, %v831_v41  ;;  %vm646_vm3 = vcmp.ne.s32.totalorder %v6489_v54, 0  ;;  %v845_v60 = vrot.slane %v843_v34, 4  ;;  %5769 = vmatpush3.bf16.msra.mxu0 %v6027_v9 }
  0x37   :  { %v6501_v43 = vor.u32 %v1319_v50, %v1316_v30  ;;  %vm6503_vm5 = vcmp.ne.s16.totalorder %v832_v58, 0  ;;  %v8017_v0 = vmov 0  ;;  %vm743_vm6 = vmpackc.low %vm646_vm3, %vm646_vm3  ;;  %v1033_v15 = vsel %vm6329_vm2, %v6499_v59, 0  ;;  %5770 = vmatprep.subr.bf16.mxu0 %v6029_v26  ;;  %v6026_v58 = vld [vmem:[%s7927_s3 + $0xe0] sm:$0xff]  }
  0x38   :  { %v8018_v0 = vsel %vm6503_vm5, 4294967295, %v8017_v0  ;;  %v74_v3 = vmul.f32 %v5437_v52, %v6198_v25  ;;  %vm657_vm8 = vcmp.ne.s32.totalorder %v6392_v42, 7  ;;  %v6516_v11 = vrot.slane %v836_v45, 4 }
  0x39   :  { %8019 = vst [vmem:[#allocation11_spill] sm:$0xff] %v8018_v0  ;;  %v951_v18 = vsel %vm6503_vm5, %v6464_v28, 0  ;;  %v1321_v52 = vsel %vm7939_vm4, %v6390_v40, %v6501_v43  ;;  %v6525_v9 = vsel %vm743_vm6, 65537, %v7935_v2  ;;  %v846_v22 = vor.u32 %v845_v60, %v841_v51  ;;  %v6024_v40 = vld [vmem:[%s7927_s3 + $0xe8] sm:$0xff]   ;;  %vm6580_vm11 = vmpackc.low %vm657_vm8, %vm657_vm8  ;;  %v6876_v0 = vld [vmem:[#allocation2 + $0x10] sm:$0xf] }
  0x3a   :  { %8020 = vst [vmem:[#allocation12_spill] sm:$0xff] %v6516_v11  ;;  %v5110_v61 = vcombine.low %v1032_v63, %v1033_v15  ;;  %5745 = vmatmul.mubr.bf16.vlgmr.msra.gmra.mxu1 %v1321_v52  ;;  %v842_v16 = vsel %vm6264_vm12, %v6516_v11, %v841_v51  ;;  %v859_v28 = vshll.u32 %v6525_v9, 16  ;;  %v75_v23 = vmul.f32 %v5440_v35, %v6198_v25  ;;  %v6553_v35 = vld [vmem:[#allocation2 + $0x24] sm:$0xf] }
  0x3b   :  { %v76_v63 = vmul.f32 %v5441_v44, %v6198_v25  ;;  %5793 = vmatpush3.bf16.msra.mxu1 %v6309_v24  ;;  %vm6542_vm9 = vcmp.ne.s16.totalorder %v842_v16, 0  ;;  %v6546_v29 = vrot.slane %v846_v22, 4  ;;  %v96_v34 = vadd.f32 %v6211_v32, %v73_v57  ;;  %5771 = vmatpush3.bf16.msra.mxu0 %v6029_v26  ;;  %8058 = vst [vmem:[#allocation17_spill] sm:$0xff] %v6876_v0 }
  0x3c   :  { %5717 = vmatmul.mubr.bf16.gmra.mxu0 %v5110_v61  ;;  %v97_v41 = vadd.f32 %v6211_v32, %v74_v3  ;;  %5794 = vmatprep.subr.bf16.mxu1 %v6022_v7  ;;  %v952_v14 = vsel %vm6542_vm9, %v6470_v55, 0  ;;  %v6555_v47 = vrot.slane %v859_v28, 5  ;;  %v98_v24 = vadd.f32 %v6211_v32, %v75_v23  ;;  %v6033_v55 = vld [vmem:[%s7927_s3 + $0x80] sm:$0xff]   ;;  %v5535_v28 = vld [vmem:[%s7928_s0 + $0x30] sm:$0xff]  }
  0x3d   :  { %v5126_v51 = vcombine.low %v951_v18, %v952_v14  ;;  %v852_v30 = vsel %vm6264_vm12, %v6546_v29, %v6258_v56  ;;  %v99_v50 = vadd.f32 %v6211_v32, %v76_v63  ;;  %v112_v44 = vmax.f32 %v96_v34, 0.0  ;;  %5772 = vmatprep.subr.bf16.mxu0 %v6031_v62 }
  0x3e   :  { %v862_v57 = vsel %vm6264_vm12, %v6284_v13, %v6555_v47  ;;  %vm6570_vm10 = vcmp.ne.s16.totalorder %v852_v30, 0  ;;  %v113_v45 = vmax.f32 %v97_v41, 0.0  ;;  %v114_v60 = vmax.f32 %v98_v24, 0.0 }
  0x3f   :  { %5795 = vmatpush3.bf16.msra.mxu1 %v6022_v7  ;;  %v1323_v3 = vshrl.u32 %v5126_v51, 16  ;;  %v1326_v18 = vshll.u32 %v5126_v51, 16  ;;  %vm937_vm13 = vcmp.ne.s16.totalorder %v862_v57, 0  ;;  %v953_v52 = vsel %vm6570_vm10, %v6499_v59, 0  ;;  %5773 = vmatpush3.bf16.msra.mxu0 %v6031_v62  ;;  %v6596_v59 = vld [vmem:[%s7927_s3 + $0x138] sm:$0xff]  }
  0x40   :  { %v954_v22 = vsel %vm937_vm13, %v6553_v35, 0  ;;  %5796 = vmatprep.subr.bf16.mxu1 %v6024_v40  ;;  %v115_v61 = vmax.f32 %v99_v50, 0.0  ;;  %v5473_v16 = vpack.c.bf16 %v113_v45, %v112_v44  ;;  %v215_v42 = vadd.s32 80, %v6151_v4  ;;  %5774 = vmatprep.subr.bf16.mxu0 %v6033_v55  ;;  %v6028_v57 = vld [vmem:[%s7927_s3 + $0xd8] sm:$0xff]  }
  0x41   :  { %v1325_v7 = vrot.slane %v1323_v3, 3  ;;  %v1328_v23 = vrot.slane %v1326_v18, 4  ;;  %v5127_v63 = vcombine.low %v953_v52, %v954_v22  ;;  %v216_v34 = vadd.s32 88, %v6151_v4 }
  0x42   :  { %v6601_v41 = vsel %vm6580_vm11, 65537, %v7935_v2  ;;  %5541 = vst [vmem:[#allocation2 + $0x28] sm:$0xff] %v5473_v16   ;;  %v5478_v14 = vpack.c.bf16 %v115_v61, %v114_v60  ;;  %v295_v24 = vand.u32 63, %v215_v42  ;;  %v863_v62 = vshrl.u32 %v6525_v9, 16 }
  0x43   :  { %v1329_v51 = vor.u32 %v1328_v23, %v1325_v7  ;;  %v1332_v30 = vshrl.u32 %v5127_v63, 16  ;;  %v1335_v50 = vshll.u32 %v5127_v63, 16  ;;  %5797 = vmatpush3.bf16.msra.mxu1 %v6024_v40  ;;  %v302_v44 = vand.u32 63, %v216_v34  ;;  %5775 = vmatpush3.bf16.msra.mxu0 %v6033_v55 }
  0x44   :  { %5798 = vmatprep.subr.bf16.mxu1 %v6026_v58  ;;  %5542 = vst [vmem:[#allocation2 + $0x30] sm:$0xff] %v5478_v14   ;;  %v6607_v26 = vand.u32 7, %v295_v24  ;;  %v865_v45 = vrot.slane %v863_v62, 4  ;;  %v5444_v15 = vunpack.c.l.bf16 %v5535_v28  ;;  %v5445_v3 = vunpack.c.h.bf16 %v5535_v28  ;;  %5824 = vmatprep.subr.bf16.mxu0 %v6596_v59 }
  0x45   :  { %v1330_v9 = vsel %vm7939_vm4, %v6501_v43, %v1329_v51  ;;  %v1334_v60 = vrot.slane %v1332_v30, 3  ;;  %v1337_v18 = vrot.slane %v1335_v50, 4  ;;  %v6611_v52 = vand.u32 7, %v302_v44 }
  0x46   :  { %5748 = vmatprep.mubr.bf16.mxu1 %v1330_v9  ;;  %vm647_vm14 = vcmp.ne.s32.totalorder %v6607_v26, 0  ;;  %v866_v40 = vor.u32 %v865_v45, %v6555_v47  ;;  %v1034_v22 = vsel %vm6216_vm7, %v6553_v35, 0  ;;  %v77_v55 = vmul.f32 %v5444_v15, %v6198_v25  ;;  %v6640_v45 = vld [vmem:[#allocation2 + $0x1c] sm:$0xf] }
  0x47   :  { %v6620_v61 = vor.u32 %v1337_v18, %v1334_v60  ;;  %5799 = vmatpush3.bf16.msra.mxu1 %v6026_v58  ;;  %vm648_vm15 = vcmp.ne.s32.totalorder %v6611_v52, 0  ;;  %vm744_vm0 = vmpackc.low %vm647_vm14, %vm647_vm14  ;;  %v78_v43 = vmul.f32 %v5445_v3, %v6198_v25  ;;  %v217_v16 = vadd.s32 96, %v6151_v4  ;;  %v6030_v58 = vld [vmem:[%s7927_s3 + $0xd0] sm:$0xff]   ;;  %v6032_v60 = vld [vmem:[%s7927_s3 + $0xc8] sm:$0xff]  }
  0x48   :  { %vm745_vm1 = vmpackc.low %vm648_vm15, %vm648_vm15  ;;  %v760_v42 = vsel %vm744_vm0, 65537, %v7935_v2  ;;  %v867_v28 = vrot.slane %v866_v40, 4  ;;  %v100_v7 = vadd.f32 %v6211_v32, %v77_v55  ;;  %v218_v35 = vadd.s32 104, %v6151_v4  ;;  %5800 = vmatprep.subr.bf16.mxu1 %v6028_v57  ;;  %v6645_v18 = vld [vmem:[#allocation2 + $0x20] sm:$0xf] }
  0x49   :  { %v1339_v23 = vsel %vm7939_vm4, %v1329_v51, %v6620_v61  ;;  %v6633_v63 = vld [vmem:[#allocation2 + $0x28] sm:$0xf]  ;;  %v761_v34 = vsel %vm745_vm1, 65537, %v7935_v2  ;;  %v869_v14 = vshll.u32 %v760_v42, 16  ;;  %v101_v24 = vadd.f32 %v6211_v32, %v78_v43 }
  0x4a   :  { %5749 = vmatmul.mubr.bf16.gmra.mxu1 %v1339_v23  ;;  %v873_v62 = vshrl.u32 %v760_v42, 16  ;;  %v879_v30 = vshll.u32 %v761_v34, 16  ;;  %v1035_v50 = vsel %vm6329_vm2, %v6633_v63, 0  ;;  %v116_v44 = vmax.f32 %v100_v7, 0.0 }
  0x4b   :  { %v871_v15 = vrot.slane %v869_v14, 5  ;;  %v5111_v3 = vcombine.low %v1034_v22, %v1035_v50  ;;  %v117_v51 = vmax.f32 %v101_v24, 0.0  ;;  %v309_v9 = vand.u32 63, %v217_v16  ;;  %5801 = vmatpush3.bf16.msra.mxu1 %v6028_v57  ;;  %v680_v57 = vld [vmem:[#allocation2 + $0x2c] sm:$0xf] }
  0x4c   :  { %v875_v40 = vrot.slane %v873_v62, 4  ;;  %v881_v55 = vrot.slane %v879_v30, 5  ;;  %v316_v43 = vand.u32 63, %v218_v35  ;;  %v883_v42 = vshrl.u32 %v761_v34, 16  ;;  %5802 = vmatprep.subr.bf16.mxu1 %v6030_v58  ;;  %v5536_v34 = vld [vmem:[%s7928_s0 + $0x38] sm:$0xff]  }
  0x4d   :  { %v872_v23 = vsel %vm6264_vm12, %v867_v28, %v871_v15  ;;  %5720 = vmatprep.mubr.bf16.mxu0 %v5111_v3  ;;  %v5483_v22 = vpack.c.bf16 %v117_v51, %v116_v44  ;;  %v6650_v16 = vand.u32 7, %v309_v9  ;;  %v6668_v50 = vld [vmem:[#allocation2 + $0x30] sm:$0xf]  ;;  %v1036_v44 = vsel %vm6329_vm2, %v680_v57, 0  ;;  %v6034_v9 = vld [vmem:[%s7927_s3 + $0xc0] sm:$0xff]  }
  0x4e   :  { %v876_v14 = vor.u32 %v875_v40, %v871_v15  ;;  %vm6652_vm3 = vcmp.ne.s16.totalorder %v872_v23, 0  ;;  %v6656_v62 = vand.u32 7, %v316_v43  ;;  %v885_v35 = vrot.slane %v883_v42, 4  ;;  %v6774_v11 = vld [vmem:[#allocation2 + $0x34] sm:$0xf] }
  0x4f   :  { %5543 = vst [vmem:[#allocation2 + $0x38] sm:$0xff] %v5483_v22   ;;  %vm649_vm6 = vcmp.ne.s32.totalorder %v6650_v16, 0  ;;  %5803 = vmatpush3.bf16.msra.mxu1 %v6030_v58  ;;  %v955_v3 = vsel %vm6652_vm3, %v6633_v63, 0  ;;  %vm656_vm11 = vcmp.ne.s32.totalorder %v6184_v21, 7  ;;  %v1037_v58 = vsel %vm6329_vm2, %v6668_v50, 0 }
  0x50   :  { %v877_v15 = vrot.slane %v876_v14, 4  ;;  %vm650_vm8 = vcmp.ne.s32.totalorder %v6656_v62, 0  ;;  %vm746_vm10 = vmpackc.low %vm649_vm6, %vm649_vm6  ;;  %v886_v51 = vor.u32 %v885_v35, %v881_v55  ;;  %5804 = vmatprep.subr.bf16.mxu1 %v6032_v60  ;;  %v5448_v43 = vunpack.c.l.bf16 %v5536_v34 }
  0x51   :  { %vm747_vm13 = vmpackc.low %vm650_vm8, %vm650_vm8  ;;  %v762_v40 = vsel %vm746_vm10, 65537, %v7935_v2  ;;  %v5449_v63 = vunpack.c.h.bf16 %v5536_v34  ;;  %v5112_v30 = vcombine.low %v1036_v44, %v1037_v58  ;;  %v1650_v27 = vshll.u32 %v6336_v37, 16 }
  0x52   :  { %v882_v42 = vsel %vm6264_vm12, %v877_v15, %v881_v55  ;;  %v763_v23 = vsel %vm747_vm13, 65537, %v7935_v2  ;;  %v887_v22 = vrot.slane %v886_v51, 4  ;;  %v889_v14 = vshll.u32 %v762_v40, 16  ;;  %v6698_v15 = vld [vmem:[%s7927_s3 + $0x178] sm:$0xff]   ;;  %vm6728_vm0 = vmpackc.low %vm656_vm11, %vm656_vm11 }
  0x53   :  { %vm6687_vm14 = vcmp.ne.s16.totalorder %v882_v42, 0  ;;  %v893_v7 = vshrl.u32 %v762_v40, 16  ;;  %v899_v28 = vshll.u32 %v763_v23, 16  ;;  %5805 = vmatpush3.bf16.msra.mxu1 %v6032_v60  ;;  %v79_v34 = vmul.f32 %v5448_v43, %v6198_v25  ;;  %5721 = vmatmul.mubr.bf16.gmra.mxu0 %v5112_v30 }
  0x54   :  { %v956_v6 = vsel %vm6687_vm14, %v680_v57, 0  ;;  %v891_v46 = vrot.slane %v889_v14, 5  ;;  %v80_v55 = vmul.f32 %v5449_v63, %v6198_v25  ;;  %5806 = vmatprep.subr.bf16.mxu1 %v6034_v9  ;;  %v219_v60 = vadd.s32 112, %v6151_v4 }
  0x55   :  { %v5128_v51 = vcombine.low %v955_v3, %v956_v6  ;;  %v895_v42 = vrot.slane %v893_v7, 4  ;;  %v901_v40 = vrot.slane %v899_v28, 5  ;;  %v102_v44 = vadd.f32 %v6211_v32, %v79_v34  ;;  %v6710_v6 = vld [vmem:[#allocation2 + $0x2c] sm:$0xf]  ;;  %v682_v7 = vld [vmem:[#allocation2 + $0x34] sm:$0xf] }
  0x56   :  { %v892_v57 = vsel %vm6264_vm12, %v887_v22, %v891_v46  ;;  %v103_v58 = vadd.f32 %v6211_v32, %v80_v55  ;;  %v220_v25 = vadd.s32 120, %v6151_v4  ;;  %v323_v55 = vand.u32 63, %v219_v60 }
  0x57   :  { %v1341_v43 = vshrl.u32 %v5128_v51, 16  ;;  %v1344_v63 = vshll.u32 %v5128_v51, 16  ;;  %v896_v14 = vor.u32 %v895_v42, %v891_v46  ;;  %vm6706_vm15 = vcmp.ne.s16.totalorder %v892_v57, 0  ;;  %5807 = vmatpush3.bf16.msra.mxu1 %v6034_v9  ;;  %v6716_v46 = vld [vmem:[#allocation2 + $0x38] sm:$0xf] }
  0x58   :  { %v957_v28 = vsel %vm6706_vm15, %v6668_v50, 0  ;;  %v118_v30 = vmax.f32 %v102_v44, 0.0  ;;  %5856 = vmatprep.subr.bf16.mxu1 %v6698_v15  ;;  %v119_v34 = vmax.f32 %v103_v58, 0.0  ;;  %v330_v51 = vand.u32 63, %v220_v25 }
  0x59   :  { %v1343_v32 = vrot.slane %v1341_v43, 3  ;;  %v1346_v3 = vrot.slane %v1344_v63, 4  ;;  %v897_v22 = vrot.slane %v896_v14, 4  ;;  %v903_v42 = vshrl.u32 %v763_v23, 16 }
  0x5a   :  { %v1038_v9 = vsel %vm6329_vm2, %v682_v7, 0  ;;  %v5488_v50 = vpack.c.bf16 %v119_v34, %v118_v30  ;;  %v1039_v44 = vsel %vm6329_vm2, %v6716_v46, 0  ;;  %v6736_v60 = vand.u32 7, %v323_v55 }
  0x5b   :  { %v1347_v57 = vor.u32 %v1346_v3, %v1343_v32  ;;  %v902_v33 = vsel %vm6264_vm12, %v897_v22, %v901_v40  ;;  %v6738_v25 = vand.u32 7, %v330_v51  ;;  %v905_v43 = vrot.slane %v903_v42, 4  ;;  %v6749_v32 = vld [vmem:[#allocation2 + $0x3c] sm:$0xf] }
  0x5c   :  { %vm6732_vm1 = vcmp.ne.s16.totalorder %v902_v33, 0  ;;  %5544 = vst [vmem:[#allocation2 + $0x40] sm:$0xff] %v5488_v50   ;;  %v5113_v33 = vcombine.low %v1038_v9, %v1039_v44  ;;  %vm651_vm6 = vcmp.ne.s32.totalorder %v6736_v60, 0  ;;  %v8037_v22 = vmov 0  }
  0x5d   :  { %v1348_v21 = vsel %vm7939_vm4, %v6620_v61, %v1347_v57  ;;  %v958_v14 = vsel %vm6732_vm1, %v682_v7, 0  ;;  %vm652_vm8 = vcmp.ne.s32.totalorder %v6738_v25, 0  ;;  %v906_v3 = vor.u32 %v905_v43, %v901_v40  ;;  %vm748_vm10 = vmpackc.low %vm651_vm6, %vm651_vm6 }
  0x5e   :  { %5752 = vmatprep.mubr.bf16.mxu1 %v1348_v21  ;;  %v5129_v30 = vcombine.low %v957_v28, %v958_v14  ;;  %5724 = vmatprep.mubr.bf16.mxu0 %v5113_v33  ;;  %v1040_v61 = vsel %vm6329_vm2, %v6749_v32, 0  ;;  %v6757_v7 = vsel %vm6728_vm0, 65537, %v8037_v22  ;;  %vm1626_vm11 = vsmask.f32 256  ;;  %vm749_vm4 = vmpackc.low %vm652_vm8, %vm652_vm8 }
  0x5f   :  { %vm1627_vm13 = vsmask.f32 4368  ;;  %v764_v55 = vsel %vm748_vm10, 65537, %v8037_v22  ;;  %v8038_v40 = vshll.u32 %v6318_v19, 16  ;;  %v765_v42 = vsel %vm749_vm4, 65537, %v8037_v22 }
  0x60   :  { %v1350_v28 = vshrl.u32 %v5129_v30, 16  ;;  %v1353_v34 = vshll.u32 %v5129_v30, 16  ;;  %v907_v9 = vrot.slane %v906_v3, 4  ;;  %v909_v50 = vshll.u32 %v764_v55, 16  ;;  %vm6767_vm0 = vmor %vm1626_vm11, %vm1627_vm13 }
  0x61   :  { %v6763_v51 = vor.u32 %v8038_v40, %v6415_v53  ;;  %v913_v44 = vshrl.u32 %v764_v55, 16  ;;  %v919_v21 = vshll.u32 %v765_v42, 16  ;;  %v923_v14 = vshrl.u32 %v765_v42, 16 }
  0x62   :  { %v1352_v58 = vrot.slane %v1350_v28, 3  ;;  %v1355_v43 = vrot.slane %v1353_v34, 4  ;;  %v8040_v33 = vmov 0  ;;  %v911_v30 = vrot.slane %v909_v50, 5 }
  0x63   :  { %8039 = vst [vmem:[#allocation13_spill] sm:$0xff] %v6763_v51  ;;  %v8041_v33 = vsel %vm6767_vm0, 4294967295, %v8040_v33  ;;  %v915_v63 = vrot.slane %v913_v44, 4  ;;  %v1645_v19 = vrot.slane %v6415_v53, 4  ;;  %v8042_v40 = vshrl.u32 %v6336_v37, 16 }
  0x64   :  { %v6776_v3 = vor.u32 %v1355_v43, %v1352_v58  ;;  %v921_v28 = vrot.slane %v919_v21, 5  ;;  %v925_v34 = vrot.slane %v923_v14, 4  ;;  %v8043_v55 = vsel %vm6542_vm9, %v6645_v18, 0  ;;  %v6802_v14 = vld [vmem:[#allocation2 + $0x3c] sm:$0xf] }
  0x65   :  { %v1649_v13 = vrot.slane %v8042_v40, 7  ;;  %v8044_v42 = vsel %vm6503_vm5, %v6640_v45, 0  ;;  %v912_v53 = vsel %vm6264_vm12, %v907_v9, %v911_v30  ;;  %v916_v44 = vor.u32 %v915_v63, %v911_v30  ;;  %v685_v40 = vld [vmem:[#allocation2 + $0x40] sm:$0xf] }
  0x66   :  { %v6786_v50 = vcombine.low %v8044_v42, %v8043_v55  ;;  %v1644_v58 = vsel %vm6767_vm0, %v6400_v31, %v6763_v51  ;;  %vm8045_vm9 = vsmask.f32 4352  ;;  %vm6798_vm6 = vcmp.ne.s16.totalorder %v912_v53, 0  ;;  %v6804_v63 = vld [vmem:[#allocation2 + $0x40] sm:$0xf] }
  0x67   :  { %v1357_v43 = vsel %vm8045_vm9, %v1347_v57, %v6776_v3  ;;  %v926_v9 = vor.u32 %v925_v34, %v921_v28  ;;  %v1041_v30 = vsel %vm6329_vm2, %v685_v40, 0  ;;  %v6811_v55 = vrot.slane %v916_v44, 4 }
  0x68   :  { %5753 = vmatmul.mubr.bf16.gmra.mxu1 %v1357_v43  ;;  %v959_v57 = vsel %vm6798_vm6, %v6716_v46, 0  ;;  %v1654_v42 = vrot.slane %v1649_v13, 4  ;;  %v5114_v56 = vcombine.low %v1040_v61, %v1041_v30  ;;  %v1652_v34 = vor.u32 %v1650_v27, %v1649_v13  ;;  %v2105_v13 = vld [vmem:[#allocation2 + $0x44] sm:$0xf] }
  0x69   :  { %8048 = vst [vmem:[#allocation14_spill] sm:$0xff] %v6811_v55  ;;  %v927_v53 = vrot.slane %v926_v9, 4  ;;  %v1656_v36 = vshrl.u32 %v6757_v7, 16  ;;  %v922_v37 = vsel %vm6264_vm12, %v6811_v55, %v921_v28  ;;  %v1659_v44 = vshll.u32 %v6757_v7, 16 }
  0x6a   :  { %vm1772_vm8 = vcmp.ne.s16.totalorder %v6341_v39, 0  ;;  %vm6824_vm10 = vcmp.ne.s16.totalorder %v1644_v58, 0  ;;  %vm6828_vm11 = vcmp.ne.s16.totalorder %v922_v37, 0  ;;  %5725 = vmatmul.mubr.bf16.gmra.mxu0 %v5114_v56  ;;  %v6834_v61 = vsel %vm6767_vm0, %v1645_v19, %v1652_v34 }
  0x6b   :  { %vm944_vm13 = vcmp.ne.s16.totalorder %v927_v53, 0  ;;  %v6836_v28 = vrot.slane %v1656_v36, 7  ;;  %v960_v7 = vsel %vm6828_vm11, %v6749_v32, 0  ;;  %vm7952_vm9 = vcmp.ne.s16.totalorder %v6834_v61, 0 }
  0x6c   :  { %v961_v56 = vsel %vm944_vm13, %v685_v40, 0  ;;  %v5130_v9 = vcombine.low %v959_v57, %v960_v7  ;;  %v6848_v37 = vsel %vm944_vm13, %v2105_v13, 0  ;;  %v1789_v36 = vsel %vm1772_vm8, %v1529_v17, 0  ;;  %v6860_v57 = vld [vmem:[#allocation2 + $0xc] sm:$0xf] }
  0x6d   :  { %v5131_v30 = vcombine.low %v961_v56, %v961_v56  ;;  %v1661_v19 = vor.u32 %v1659_v44, %v6836_v28  ;;  %v1790_v32 = vsel %vm6824_vm10, %v6816_v10, 0  ;;  %8054 = vst [vmem:[#allocation16_spill] sm:$0xff] %v6860_v57  ;;  %v1791_v44 = vsel %vm7952_vm9, %v6860_v57, 0 }
  0x6e   :  { %v1359_v53 = vshrl.u32 %v5130_v9, 16  ;;  %v1362_v34 = vshll.u32 %v5130_v9, 16  ;;  %v5156_v17 = vcombine.low %v1789_v36, %v1790_v32  ;;  %v225_v13 = vand.u32 63, %v6151_v4 }
  0x6f   :  { %v1368_v58 = vshrl.u32 %v5131_v30, 16  ;;  %v1371_v27 = vshll.u32 %v5131_v30, 16  ;;  %v6858_v40 = vsel %vm6767_vm0, %v1654_v42, %v1661_v19  ;;  %vm8055_vm8 = vcmp.ne.s32.totalorder %v6404_v49, 7 }
  0x70   :  { %8053 = vst [vmem:[#allocation15_spill] sm:$0xff] %v6858_v40  ;;  %v1361_v43 = vrot.slane %v1359_v53, 3  ;;  %v1364_v7 = vrot.slane %v1362_v34, 4  ;;  %vm6869_vm10 = vmpackc.low %vm8055_vm8, %vm8055_vm8  ;;  %vm7961_vm13 = vcmp.ne.s16.totalorder %v6858_v40, 0  ;;  %v1868_v42 = vshrl.u32 %v5156_v17, 16 }
  0x71   :  { %v1370_v56 = vrot.slane %v1368_v58, 3  ;;  %v1373_v9 = vrot.slane %v1371_v27, 4  ;;  %v1870_v19 = vshll.u32 %v5156_v17, 16  ;;  %v6874_v55 = vand.u32 7, %v225_v13 }
  0x72   :  { %v1365_v36 = vor.u32 %v1364_v7, %v1361_v43  ;;  %v1792_v58 = vsel %vm7961_vm13, %v6876_v0, 0  ;;  %v2432_v49 = vshrl.u32 %v6373_v8, 16  ;;  %v2435_v34 = vshll.u32 %v6373_v8, 16 }
  0x73   :  { %v1374_v32 = vor.u32 %v1373_v9, %v1370_v56  ;;  %v5157_v27 = vcombine.low %v1791_v44, %v1792_v58  ;;  %v1872_v53 = vrot.slane %v1870_v19, 1  ;;  %vm637_vm8 = vcmp.ne.s32.totalorder %v6874_v55, 0  ;;  %v2104_v58 = vld [vmem:[#allocation2 + $0x4] sm:$0x8] }
  0x74   :  { %vm8059_vm9 = vsmask.f32 4352  ;;  %vm2138_vm7 = vmpackc.low %vm637_vm8, %vm637_vm8  ;;  %v2434_v43 = vrot.slane %v2432_v49, 3  ;;  %v1615_v7 = vsel %vm6869_vm10, 65537, %v8037_v22  ;;  %v2437_v51 = vrot.slane %v2435_v34, 4 }
  0x75   :  { %v1366_v17 = vsel %vm8059_vm9, %v6776_v3, %v1365_v36  ;;  %vm8060_vm4 = vmmov %vm8059_vm9  ;;  %v1873_v56 = vor.u32 %v1872_v53, %v1868_v42  ;;  %v1875_v9 = vshll.u32 %v5157_v27, 16  ;;  %v1879_v44 = vshrl.u32 %v5157_v27, 16 }
  0x76   :  { %v1375_v13 = vsel %vm8060_vm4, %v1365_v36, %v1374_v32  ;;  %5756 = vmatprep.mubr.bf16.mxu1 %v1366_v17  ;;  %v2154_v19 = vsel %vm2138_vm7, 65537, %v8037_v22  ;;  %v1663_v3 = vrot.slane %v6836_v28, 4  ;;  %v8061_v32 = vshrl.u32 %v6601_v41, 16 }
  0x77   :  { %5757 = vmatmul.mubr.bf16.gmra.mxu1 %v1375_v13  ;;  %v2171_v8 = vshll.u32 %v2154_v19, 16  ;;  %v2174_v0 = vshrl.u32 %v2154_v19, 16  ;;  %v1877_v36 = vrot.slane %v1875_v9, 1  ;;  %v1668_v30 = vshll.u32 %v6601_v41, 16 }
  0x78   :  { %v1667_v49 = vrot.slane %v8061_v32, 7  ;;  %v1674_v57 = vshrl.u32 %v1615_v7, 16  ;;  %v6897_v27 = vor.u32 %v2437_v51, %v2434_v43  ;;  %v1677_v53 = vshll.u32 %v1615_v7, 16 }
  0x79   :  { %v6895_v17 = vrot.slane %v2171_v8, 5  ;;  %v2176_v42 = vrot.slane %v2174_v0, 4  ;;  %vm8062_vm7 = vsmask.f32 7424  ;;  %v6900_v40 = vor.u32 %v1879_v44, %v1877_v36 }
  0x7a   :  { %v1878_v13 = vsel %vm8062_vm7, %v1873_v56, %v1877_v36  ;;  %v1670_v34 = vor.u32 %v1668_v30, %v1667_v49  ;;  %v1672_v19 = vrot.slane %v1667_v49, 4  ;;  %v1676_v9 = vrot.slane %v1674_v57, 7  ;;  %v6914_v57 = vld [vmem:[#allocation2 + $0x14] sm:$0xf] }
  0x7b   :  { %5776 = vmatprep.mubr.bf16.mxu0 %v1878_v13  ;;  %v2177_v28 = vor.u32 %v2176_v42, %v6895_v17  ;;  %vm7960_vm4 = vcmp.ne.s16.totalorder %v6895_v17, 0  ;;  %v2441_v41 = vshrl.u32 %v6485_v12, 16  ;;  %v2444_v43 = vshll.u32 %v6485_v12, 16 }
  0x7c   :  { %v2346_v0 = vsel %vm7960_vm4, %v2104_v58, 0  ;;  %v6909_v51 = vsel %vm6767_vm0, %v1663_v3, %v1670_v34  ;;  %vm659_vm9 = vcmp.ne.s32.totalorder %v6437_v20, 7  ;;  %v1679_v56 = vor.u32 %v1677_v53, %v1676_v9 }
  0x7d   :  { %8063 = vst [vmem:[#allocation18_spill] sm:$0xff] %v6909_v51  ;;  %v2178_v7 = vrot.slane %v2177_v28, 4  ;;  %vm7962_vm10 = vcmp.ne.s16.totalorder %v6909_v51, 0  ;;  %v2443_v44 = vrot.slane %v2441_v41, 3  ;;  %vm1600_vm8 = vmpackc.low %vm659_vm9, %vm659_vm9  ;;  %v2446_v8 = vrot.slane %v2444_v43, 4 }
  0x7e   :  { %v1793_v58 = vsel %vm7962_vm10, %v6914_v57, 0  ;;  %vm660_vm7 = vcmp.ne.s32.totalorder %v6447_v38, 7  ;;  %v1616_v3 = vsel %vm1600_vm8, 65537, %v8037_v22  ;;  %v6927_v12 = vsel %vm6767_vm0, %v1672_v19, %v1679_v56 }
  0x7f   :  { %v2183_v20 = vsel %vm6264_vm12, %v2178_v7, %v6269_v5  ;;  %8064 = vst [vmem:[#allocation19_spill] sm:$0xff] %v6927_v12  ;;  %vm1601_vm9 = vmpackc.low %vm660_vm7, %vm660_vm7  ;;  %v1681_v36 = vrot.slane %v1676_v9, 4  ;;  %v1683_v32 = vshrl.u32 %v1616_v3, 16  ;;  %vm7963_vm10 = vcmp.ne.s16.totalorder %v6927_v12, 0 }
  0x80   :  { %vm6929_vm13 = vcmp.ne.s16.totalorder %v2183_v20, 0  ;;  %v2447_v38 = vor.u32 %v2446_v8, %v2443_v44  ;;  %v1617_v30 = vsel %vm1601_vm9, 65537, %v8037_v22  ;;  %v1794_v42 = vsel %vm7963_vm10, %v6456_v48, 0 }
  0x81   :  { %v2347_v5 = vsel %vm6929_vm13, %v6816_v10, 0  ;;  %v6941_v53 = vrot.slane %v1683_v32, 7  ;;  %v1686_v13 = vshll.u32 %v1616_v3, 16  ;;  %v5158_v19 = vcombine.low %v1793_v58, %v1794_v42 }
  0x82   :  { %v5189_v34 = vcombine.low %v2346_v0, %v2347_v5  ;;  %vm8068_vm8 = vsmask.f32 4352  ;;  %v1692_v9 = vshrl.u32 %v1617_v30, 16  ;;  %v1695_v7 = vshll.u32 %v1617_v30, 16  ;;  %v6037_v30 = vld [vmem:[%s7927_s3 + $0x130] sm:$0xff]  }
  0x83   :  { %8067 = vst [vmem:[#allocation20_spill] sm:$0xff] %v6941_v53  ;;  %v2448_v28 = vsel %vm8068_vm8, %v6897_v27, %v2447_v38  ;;  %v1688_v41 = vor.u32 %v1686_v13, %v6941_v53  ;;  %v7967_v43 = vrot.slane %v6941_v53, 4  ;;  %v2450_v56 = vshrl.u32 %v6786_v50, 16 }
  0x84   :  { %v2424_v44 = vshrl.u32 %v5189_v34, 16  ;;  %v2427_v8 = vshll.u32 %v5189_v34, 16  ;;  %v1883_v20 = vshll.u32 %v5158_v19, 16  ;;  %v6948_v48 = vrot.slane %v1692_v9, 7 }
  0x85   :  { %v6952_v0 = vsel %vm6767_vm0, %v1681_v36, %v1688_v41  ;;  %v1887_v58 = vshrl.u32 %v5158_v19, 16  ;;  %v2452_v3 = vrot.slane %v2450_v56, 3  ;;  %v2453_v32 = vshll.u32 %v6786_v50, 16 }
  0x86   :  { %8069 = vst [vmem:[#allocation21_spill] sm:$0xff] %v6952_v0  ;;  %v2426_v5 = vrot.slane %v2424_v44, 3  ;;  %v2429_v42 = vrot.slane %v2427_v8, 4  ;;  %v1885_v13 = vrot.slane %v1883_v20, 1  ;;  %v1697_v34 = vor.u32 %v1695_v7, %v6948_v48 }
  0x87   :  { %vm7971_vm7 = vcmp.ne.s16.totalorder %v6952_v0, 0  ;;  %v2455_v9 = vrot.slane %v2453_v32, 4  ;;  %vm662_vm9 = vcmp.ne.s32.totalorder %v6489_v54, 7  ;;  %v7968_v36 = vrot.slane %v6948_v48, 4  ;;  %v7003_v32 = vld [vmem:[#allocation2 + $0x24] sm:$0xf] }
  0x88   :  { %v2430_v19 = vor.u32 %v2429_v42, %v2426_v5  ;;  %vm8070_vm8 = vsmask.f32 7424  ;;  %v6968_v41 = vsel %vm6767_vm0, %v7967_v43, %v1697_v34  ;;  %v1795_v7 = vsel %vm7971_vm7, %v6640_v45, 0  ;;  %vm1603_vm10 = vmpackc.low %vm662_vm9, %vm662_vm9  ;;  %v6038_v45 = vld [vmem:[%s7927_s3 + $0x170] sm:$0xff]   ;;  %v6039_v42 = vld [vmem:[%s7927_s3 + $0x128] sm:$0xff]  }
  0x89   :  { %v1886_v50 = vsel %vm8070_vm8, %v6900_v40, %v1885_v13  ;;  %vm7966_vm4 = vcmp.ne.s16.totalorder %v6968_v41, 0  ;;  %v1889_v54 = vor.u32 %v1887_v58, %v1885_v13  ;;  %v6974_v56 = vor.u32 %v2455_v9, %v2452_v3  ;;  %v6992_v3 = vld [vmem:[#allocation2 + $0x30] sm:$0xf] }
  0x8a   :  { %5777 = vmatmul.mubr.bf16.vlgmr.msra.gmra.mxu0 %v1886_v50  ;;  %v1619_v44 = vsel %vm1603_vm10, 65537, %v8037_v22  ;;  %vm665_vm8 = vcmp.ne.s32.totalorder %v6650_v16, 7  ;;  %vm8071_vm2 = vsmask.f32 4352  ;;  %v1796_v8 = vsel %vm7966_vm4, %v6645_v18, 0 }
  0x8b   :  { %v2439_v40 = vsel %vm8071_vm2, %v2430_v19, %v6897_v27  ;;  %5825 = vmatpush3.bf16.msra.mxu0 %v6596_v59  ;;  %v1707_v20 = vsel %vm6767_vm0, %v7968_v36, %v6341_v39  ;;  %v1710_v58 = vshrl.u32 %v1619_v44, 16  ;;  %vm8072_vm2 = vcmp.ne.s32.totalorder %v6607_v26, 7  ;;  %v6041_v59 = vld [vmem:[%s7927_s3 + $0x120] sm:$0xff]  }
  0x8c   :  { %vm6997_vm10 = vmpackc.low %vm8072_vm2, %vm8072_vm2  ;;  %5808 = vmatprep.mubr.bf16.mxu1 %v2439_v40  ;;  %5826 = vmatprep.subr.bf16.mxu0 %v6037_v30  ;;  %v5159_v27 = vcombine.low %v1795_v7, %v1796_v8  ;;  %vm8075_vm9 = vsmask.f32 4352  ;;  %v1713_v5 = vshll.u32 %v1619_v44, 16  ;;  %vm1780_vm4 = vcmp.ne.s16.totalorder %v1707_v20, 0 }
  0x8d   :  { %v2457_v18 = vsel %vm8075_vm9, %v2447_v38, %v6974_v56  ;;  %5809 = vmatmul.mubr.bf16.vlgmr.msra.gmra.mxu1 %v2448_v28  ;;  %v1712_v26 = vrot.slane %v1710_v58, 7  ;;  %v1797_v13 = vsel %vm1780_vm4, %v7003_v32, 0  ;;  %v213_v34 = vadd.s32 64, %v6151_v4 }
  0x8e   :  { %vm664_vm2 = vcmp.ne.s32.totalorder %v6611_v52, 7  ;;  %5857 = vmatpush3.bf16.msra.mxu1 %v6698_v15  ;;  %v1891_v9 = vshll.u32 %v5159_v27, 16  ;;  %5812 = vmatprep.mubr.bf16.mxu1 %v2457_v18  ;;  %v1895_v38 = vshrl.u32 %v5159_v27, 16  ;;  %v1620_v19 = vsel %vm6997_vm10, 65537, %v8037_v22  ;;  %v6040_v52 = vld [vmem:[%s7927_s3 + $0x168] sm:$0xff]  }
  0x8f   :  { %vm1605_vm9 = vmpackc.low %vm664_vm2, %vm664_vm2  ;;  %v2357_v28 = vsel %vm6687_vm14, %v6992_v3, 0  ;;  %5858 = vmatprep.subr.bf16.mxu1 %v6038_v45  ;;  %5827 = vmatpush3.bf16.msra.mxu0 %v6037_v30  ;;  %v7018_v50 = vor.u32 %v1713_v5, %v1712_v26  ;;  %v281_v4 = vand.u32 63, %v213_v34  ;;  %v1717_v7 = vrot.slane %v1712_v26, 4  ;;  %v7038_v34 = vld [vmem:[#allocation2 + $0x28] sm:$0xf] }
  0x90   :  { %v1621_v15 = vsel %vm1605_vm9, 65537, %v8037_v22  ;;  %v1893_v44 = vrot.slane %v1891_v9, 1  ;;  %5828 = vmatprep.subr.bf16.mxu0 %v6039_v42  ;;  %v1719_v40 = vshrl.u32 %v1620_v19, 16  ;;  %v1722_v8 = vshll.u32 %v1620_v19, 16 }
  0x91   :  { %v1728_v20 = vshrl.u32 %v1621_v15, 16  ;;  %v1716_v30 = vsel %vm6767_vm0, %v6400_v31, %v7018_v50  ;;  %v7028_v58 = vand.u32 7, %v281_v4  ;;  %v1731_v27 = vshll.u32 %v1621_v15, 16  ;;  %v6042_v15 = vld [vmem:[%s7927_s3 + $0x160] sm:$0xff]  }
  0x92   :  { %v8076_v18 = vsel %vm6652_vm3, %v6710_v6, 0  ;;  %5859 = vmatpush3.bf16.msra.mxu1 %v6038_v45  ;;  %vm8077_vm4 = vsmask.f32 7424  ;;  %vm1781_vm10 = vcmp.ne.s16.totalorder %v1716_v30, 0  ;;  %v1897_v9 = vor.u32 %v1895_v38, %v1893_v44 }
  0x93   :  { %v5194_v5 = vcombine.low %v8076_v18, %v2357_v28  ;;  %v1894_v26 = vsel %vm8077_vm4, %v1889_v54, %v1893_v44  ;;  %v1721_v19 = vrot.slane %v1719_v40, 7  ;;  %v1798_v4 = vsel %vm1781_vm10, %v7038_v34, 0  ;;  %5860 = vmatprep.subr.bf16.mxu1 %v6040_v52  ;;  %5829 = vmatpush3.bf16.msra.mxu0 %v6039_v42  ;;  %vm7060_vm10 = vmpackc.low %vm665_vm8, %vm665_vm8 }
  0x94   :  { %5780 = vmatprep.mubr.bf16.mxu0 %v1894_v26  ;;  %vm645_vm2 = vcmp.ne.s32.totalorder %v7028_v58, 0  ;;  %v7045_v43 = vrot.slane %v1728_v20, 7  ;;  %v5160_v28 = vcombine.low %v1797_v13, %v1798_v4  ;;  %5830 = vmatprep.subr.bf16.mxu0 %v6041_v59  ;;  %vm666_vm4 = vcmp.ne.s32.totalorder %v6656_v62, 7  ;;  %v6043_v20 = vld [vmem:[%s7927_s3 + $0x118] sm:$0xff]  }
  0x95   :  { %v2468_v45 = vshrl.u32 %v5194_v5, 16  ;;  %vm2146_vm9 = vmpackc.low %vm645_vm2, %vm645_vm2  ;;  %v1724_v54 = vor.u32 %v1722_v8, %v1721_v19  ;;  %v1726_v30 = vrot.slane %v1721_v19, 4  ;;  %v2471_v38 = vshll.u32 %v5194_v5, 16 }
  0x96   :  { %v2162_v44 = vsel %vm2146_vm9, 65537, %v8037_v22  ;;  %v1733_v40 = vor.u32 %v1731_v27, %v7045_v43  ;;  %v1899_v26 = vshll.u32 %v5160_v28, 16  ;;  %5861 = vmatpush3.bf16.msra.mxu1 %v6040_v52  ;;  %v1903_v5 = vshrl.u32 %v5160_v28, 16  ;;  %vm7078_vm9 = vmpackc.low %vm666_vm4, %vm666_vm4 }
  0x97   :  { %v2470_v18 = vrot.slane %v2468_v45, 3  ;;  %v2250_v36 = vshll.u32 %v2162_v44, 16  ;;  %v2254_v13 = vshrl.u32 %v2162_v44, 16  ;;  %v7055_v42 = vsel %vm6767_vm0, %v1717_v7, %v1724_v54  ;;  %5862 = vmatprep.subr.bf16.mxu1 %v6042_v15  ;;  %v6044_v7 = vld [vmem:[%s7927_s3 + $0x158] sm:$0xff]   ;;  %5831 = vmatpush3.bf16.msra.mxu0 %v6041_v59  ;;  %v6045_v54 = vld [vmem:[%s7927_s3 + $0x110] sm:$0xff]   ;;  %v6047_v45 = vld [vmem:[%s7927_s3 + $0x108] sm:$0xff]  }
  0x98   :  { %8078 = vst [vmem:[#allocation22_spill] sm:$0xff] %v7055_v42  ;;  %v7066_v27 = vsel %vm6767_vm0, %v1726_v30, %v1733_v40  ;;  %vm7970_vm2 = vcmp.ne.s16.totalorder %v7055_v42, 0  ;;  %v2473_v52 = vrot.slane %v2471_v38, 4  ;;  %v1901_v19 = vrot.slane %v1899_v26, 1  ;;  %5832 = vmatprep.subr.bf16.mxu0 %v6043_v20 }
  0x99   :  { %8081 = vst [vmem:[#allocation23_spill] sm:$0xff] %v7066_v27  ;;  %v7072_v16 = vrot.slane %v2250_v36, 5  ;;  %v2256_v4 = vrot.slane %v2254_v13, 4  ;;  %vm7969_vm8 = vcmp.ne.s16.totalorder %v7066_v27, 0  ;;  %v7084_v28 = vcombine.low %v6848_v37, %v6848_v37  ;;  %v7112_v13 = vld [vmem:[#allocation2 + $0x38] sm:$0xf] }
  0x9a   :  { %v1799_v36 = vsel %vm7970_vm2, %v6710_v6, 0  ;;  %v1800_v59 = vsel %vm7969_vm8, %v6992_v3, 0  ;;  %v1622_v62 = vsel %vm7060_vm10, 65537, %v8037_v22  ;;  %vm8084_vm4 = vsmask.f32 7424  ;;  %5863 = vmatpush3.bf16.msra.mxu1 %v6042_v15 }
  0x9b   :  { %v1902_v37 = vsel %vm8084_vm4, %v1897_v9, %v1901_v19  ;;  %v2253_v6 = vsel %vm6264_vm12, %v6546_v29, %v7072_v16  ;;  %v2257_v30 = vor.u32 %v2256_v4, %v7072_v16  ;;  %v7104_v38 = vcombine.low %v1799_v36, %v1800_v59  ;;  %5864 = vmatprep.subr.bf16.mxu1 %v6044_v7  ;;  %v6046_v29 = vld [vmem:[%s7927_s3 + $0x150] sm:$0xff]  }
  0x9c   :  { %5781 = vmatmul.mubr.bf16.gmra.mxu0 %v1902_v37  ;;  %vm7106_vm8 = vcmp.ne.s16.totalorder %v2253_v6, 0  ;;  %v1905_v40 = vor.u32 %v1903_v5, %v1901_v19  ;;  %v7110_v26 = vor.u32 %v2473_v52, %v2470_v18  ;;  %v1623_v9 = vsel %vm7078_vm9, 65537, %v8037_v22  ;;  %vm8090_vm9 = vmmov %vm8084_vm4 }
  0x9d   :  { %v2258_v15 = vrot.slane %v2257_v30, 4  ;;  %v1907_v8 = vshll.u32 %v7104_v38, 16  ;;  %v1735_v4 = vrot.slane %v7045_v43, 4  ;;  %v1737_v36 = vshrl.u32 %v1622_v62, 16  ;;  %5833 = vmatpush3.bf16.msra.mxu0 %v6043_v20 }
  0x9e   :  { %v2354_v18 = vsel %vm7106_vm8, %v7003_v32, 0  ;;  %v1740_v5 = vshll.u32 %v1622_v62, 16  ;;  %v1746_v52 = vshrl.u32 %v1623_v9, 16  ;;  %v1749_v19 = vshll.u32 %v1623_v9, 16  ;;  %5834 = vmatprep.subr.bf16.mxu0 %v6045_v54  ;;  %5865 = vmatpush3.bf16.msra.mxu1 %v6044_v7 }
  0x9f   :  { %v2263_v59 = vsel %vm6264_vm12, %v2258_v15, %v6555_v47  ;;  %v1909_v37 = vrot.slane %v1907_v8, 1  ;;  %v1739_v43 = vrot.slane %v1737_v36, 7  ;;  %v2359_v20 = vsel %vm6732_vm1, %v7112_v13, 0  ;;  %5866 = vmatprep.subr.bf16.mxu1 %v6046_v29  ;;  %v6048_v47 = vld [vmem:[%s7927_s3 + $0x148] sm:$0xff]  }
  0xa0   :  { %vm7134_vm10 = vcmp.ne.s16.totalorder %v2263_v59, 0  ;;  %v7138_v6 = vrot.slane %v1746_v52, 7  ;;  %v8089_v30 = vsel %vm6706_vm15, %v6774_v11, 0  ;;  %vm667_vm8 = vcmp.ne.s32.totalorder %v6736_v60, 7 }
  0xa1   :  { %v5195_v44 = vcombine.low %v8089_v30, %v2359_v20  ;;  %v2355_v7 = vsel %vm7134_vm10, %v7038_v34, 0  ;;  %v1910_v9 = vsel %vm8090_vm9, %v1905_v40, %v1909_v37  ;;  %v1742_v15 = vor.u32 %v1740_v5, %v1739_v43  ;;  %5835 = vmatpush3.bf16.msra.mxu0 %v6045_v54  ;;  %vm1608_vm4 = vmpackc.low %vm667_vm8, %vm667_vm8  ;;  %v6049_v20 = vld [vmem:[%s7927_s3 + $0x100] sm:$0xff]  }
  0xa2   :  { %v1744_v8 = vrot.slane %v1739_v43, 4  ;;  %v5193_v36 = vcombine.low %v2354_v18, %v2355_v7  ;;  %5784 = vmatprep.mubr.bf16.mxu0 %v1910_v9  ;;  %v1751_v52 = vor.u32 %v1749_v19, %v7138_v6  ;;  %v1911_v60 = vshrl.u32 %v7104_v38, 16  ;;  %5836 = vmatprep.subr.bf16.mxu0 %v6047_v45 }
  0xa3   :  { %v2477_v59 = vshrl.u32 %v5195_v44, 16  ;;  %v7159_v30 = vsel %vm6767_vm0, %v1735_v4, %v1742_v15  ;;  %v2480_v40 = vshll.u32 %v5195_v44, 16  ;;  %5867 = vmatpush3.bf16.msra.mxu1 %v6046_v29  ;;  %vm668_vm8 = vcmp.ne.s32.totalorder %v6738_v25, 7  ;;  %v6050_v4 = vld [vmem:[%s7927_s3 + $0x140] sm:$0xff]   ;;  %v7182_v15 = vld [vmem:[%s7927_s3 + $0x1b8] sm:$0xff]  }
  0xa4   :  { %v1624_v54 = vsel %vm1608_vm4, 65537, %v8037_v22  ;;  %v2459_v18 = vshrl.u32 %v5193_v36, 16  ;;  %v2462_v5 = vshll.u32 %v5193_v36, 16  ;;  %v7165_v38 = vsel %vm6767_vm0, %v1744_v8, %v1751_v52  ;;  %vm1609_vm2 = vmpackc.low %vm668_vm8, %vm668_vm8  ;;  %5868 = vmatprep.subr.bf16.mxu1 %v6048_v47 }
  0xa5   :  { %vm7979_vm9 = vcmp.ne.s16.totalorder %v7159_v30, 0  ;;  %vm7978_vm7 = vcmp.ne.s16.totalorder %v7165_v38, 0  ;;  %v2479_v29 = vrot.slane %v2477_v59, 3  ;;  %v2482_v19 = vrot.slane %v2480_v40, 4  ;;  %5837 = vmatpush3.bf16.msra.mxu0 %v6047_v45 }
  0xa6   :  { %v1801_v25 = vsel %vm7979_vm9, %v6774_v11, 0  ;;  %v2461_v43 = vrot.slane %v2459_v18, 3  ;;  %v2464_v44 = vrot.slane %v2462_v5, 4  ;;  %v1802_v7 = vsel %vm7978_vm7, %v7112_v13, 0  ;;  %5838 = vmatprep.subr.bf16.mxu0 %v6049_v20 }
  0xa7   :  { %v1625_v9 = vsel %vm1609_vm2, 65537, %v8037_v22  ;;  %v5162_v8 = vcombine.low %v1801_v25, %v1802_v7  ;;  %v1913_v36 = vor.u32 %v1911_v60, %v1909_v37  ;;  %v2483_v11 = vor.u32 %v2482_v19, %v2479_v29  ;;  %5869 = vmatpush3.bf16.msra.mxu1 %v6048_v47  ;;  %v7192_v37 = vld [vmem:[%s7927_s3 + $0x1f8] sm:$0xff]  }
  0xa8   :  { %v1755_v52 = vshrl.u32 %v1624_v54, 16  ;;  %v2465_v45 = vor.u32 %v2464_v44, %v2461_v43  ;;  %v1758_v59 = vshll.u32 %v1624_v54, 16  ;;  %v1764_v40 = vshrl.u32 %v1625_v9, 16  ;;  %5870 = vmatprep.subr.bf16.mxu1 %v6050_v4 }
  0xa9   :  { %v1767_v18 = vshll.u32 %v1625_v9, 16  ;;  %v1915_v5 = vshll.u32 %v5162_v8, 16  ;;  %vm8091_vm4 = vsmask.f32 4352  ;;  %v1753_v39 = vrot.slane %v7138_v6, 4  ;;  %5839 = vmatpush3.bf16.msra.mxu0 %v6049_v20 }
  0xaa   :  { %v2484_v53 = vsel %vm8091_vm4, %v7110_v26, %v2483_v11  ;;  %v7187_v31 = vrot.slane %v1755_v52, 7  ;;  %vm8093_vm2 = vmmov %vm8091_vm4  ;;  %v1766_v54 = vrot.slane %v1764_v40, 7  ;;  %v8095_v25 = vsel %vm6828_vm11, %v6804_v63, 0  ;;  %5888 = vmatprep.subr.bf16.mxu0 %v7182_v15  ;;  %v1545_v40 = vld [vmem:[#allocation2 + $0x44] sm:$0x1] }
  0xab   :  { %v2466_v47 = vsel %vm8093_vm2, %v6974_v56, %v2465_v45  ;;  %vm8094_vm8 = vmmov %vm8093_vm2  ;;  %v8096_v6 = vsel %vm6798_vm6, %v6802_v14, 0  ;;  %v1917_v29 = vrot.slane %v1915_v5, 1  ;;  %5871 = vmatpush3.bf16.msra.mxu1 %v6050_v4  ;;  %vm8097_vm11 = vsmask.f32 7424 }
  0xac   :  { %8092 = vst [vmem:[#allocation24_spill] sm:$0xff] %v7187_v31  ;;  %v2475_v60 = vsel %vm8094_vm8, %v2465_v45, %v7110_v26  ;;  %v5196_v20 = vcombine.low %v8096_v6, %v8095_v25  ;;  %5813 = vmatmul.mubr.bf16.gmra.mxu1 %v2466_v47  ;;  %v1760_v19 = vor.u32 %v1758_v59, %v7187_v31  ;;  %v7981_v56 = vrot.slane %v7187_v31, 4 }
  0xad   :  { %v2495_v26 = vshrl.u32 %v7084_v28, 16  ;;  %5816 = vmatprep.mubr.bf16.mxu1 %v2475_v60  ;;  %v1769_v43 = vor.u32 %v1767_v18, %v1766_v54  ;;  %v1771_v7 = vrot.slane %v1766_v54, 4  ;;  %v1918_v9 = vsel %vm8097_vm11, %v1913_v36, %v1917_v29  ;;  %5920 = vmatprep.subr.bf16.mxu1 %v7192_v37 }
  0xae   :  { %v2486_v46 = vshrl.u32 %v5196_v20, 16  ;;  %v2489_v44 = vshll.u32 %v5196_v20, 16  ;;  %v7213_v52 = vsel %vm6767_vm0, %v1753_v39, %v1760_v19  ;;  %v1919_v45 = vshrl.u32 %v5162_v8, 16  ;;  %5785 = vmatmul.mubr.bf16.gmra.mxu0 %v1918_v9  ;;  %v7249_v9 = vld [vmem:[#allocation2 + $0x20] sm:$0xf]  ;;  %v6067_v8 = vld [vmem:[%s7927_s3 + $0x190] sm:$0xff]  }
  0xaf   :  { %8098 = vst [vmem:[#allocation25_spill] sm:$0xff] %v7213_v52  ;;  %v2497_v5 = vrot.slane %v2495_v26, 3  ;;  %v7220_v59 = vsel %vm6767_vm0, %v7981_v56, %v1769_v43  ;;  %vm7977_vm4 = vcmp.ne.s16.totalorder %v7213_v52, 0  ;;  %vm7227_vm8 = vcmp.ne.s16.totalorder %v1771_v7, 0  ;;  %v7239_v26 = vld [vmem:[#allocation2 + $0x10] sm:$0xf] }
  0xb0   :  { %v2488_v4 = vrot.slane %v2486_v46, 3  ;;  %v2491_v36 = vrot.slane %v2489_v44, 4  ;;  %vm7980_vm2 = vcmp.ne.s16.totalorder %v7220_v59, 0  ;;  %v1803_v39 = vsel %vm7977_vm4, %v6802_v14, 0  ;;  %v8103_v43 = vld [vmem:[#allocation15_spill] sm:$0xff] }
  0xb1   :  { %v2498_v18 = vshll.u32 %v7084_v28, 16  ;;  %v1804_v47 = vsel %vm7980_vm2, %v6804_v63, 0  ;;  %v1805_v54 = vsel %vm7227_vm8, %v1545_v40, 0  ;;  %vm653_vm11 = vcmp.ne.s32.totalorder %v6874_v55, 7  ;;  %v7244_v63 = vld [vmem:[#allocation2 + $0x14] sm:$0xf] }
  0xb2   :  { %v2492_v60 = vor.u32 %v2491_v36, %v2488_v4  ;;  %v5163_v25 = vcombine.low %v1803_v39, %v1804_v47  ;;  %v5164_v6 = vcombine.low %v1805_v54, %v1805_v54  ;;  %v1921_v14 = vor.u32 %v1919_v45, %v1917_v29  ;;  %vm2947_vm7 = vmpackc.low %vm653_vm11, %vm653_vm11  ;;  %v7252_v40 = vld [vmem:[#allocation2 + $0x18] sm:$0xf]  ;;  %v7257_v36 = vld [vmem:[#allocation2 + $0x1c] sm:$0xf] }
  0xb3   :  { %v2500_v20 = vrot.slane %v2498_v18, 4  ;;  %vm8101_vm4 = vsmask.f32 4352  ;;  %vm8102_vm9 = vcmp.ne.s16.totalorder %v6834_v61, 0  ;;  %vm8104_vm2 = vcmp.ne.s16.totalorder %v8103_v43, 0 }
  0xb4   :  { %v2493_v19 = vsel %vm8101_vm4, %v2483_v11, %v2492_v60  ;;  %v3141_v28 = vsel %vm8102_vm9, %v7239_v26, 0  ;;  %v3142_v46 = vsel %vm8104_vm2, %v7244_v63, 0  ;;  %5817 = vmatmul.mubr.bf16.gmra.mxu1 %v2484_v53  ;;  %v1923_v44 = vshll.u32 %v5163_v25, 16  ;;  %v7262_v47 = vld [vmem:[#allocation2 + $0x24] sm:$0xf] }
  0xb5   :  { %v1927_v7 = vshrl.u32 %v5163_v25, 16  ;;  %v1931_v55 = vshll.u32 %v5164_v6, 16  ;;  %v2501_v29 = vor.u32 %v2500_v20, %v2497_v5  ;;  %5820 = vmatprep.mubr.bf16.mxu1 %v2493_v19  ;;  %v2963_v11 = vsel %vm2947_vm7, 65537, %v8037_v22 }
  0xb6   :  { %v5255_v45 = vcombine.low %v3141_v28, %v3142_v46  ;;  %vm8105_vm9 = vcmp.ne.s16.totalorder %v6909_v51, 0  ;;  %vm8106_vm4 = vcmp.ne.s16.totalorder %v6927_v12, 0  ;;  %v1925_v39 = vrot.slane %v1923_v44, 1  ;;  %v8108_v28 = vld [vmem:[#allocation16_spill] sm:$0xff] }
  0xb7   :  { %v3143_v4 = vsel %vm8105_vm9, %v7252_v40, 0  ;;  %v3144_v53 = vsel %vm8106_vm4, %v7257_v36, 0  ;;  %v1933_v5 = vrot.slane %v1931_v55, 1  ;;  %v2980_v18 = vshrl.u32 %v2963_v11, 16 }
  0xb8   :  { %v2983_v54 = vshll.u32 %v2963_v11, 16  ;;  %v3224_v25 = vshll.u32 %v5255_v45, 16  ;;  %v5256_v6 = vcombine.low %v3143_v4, %v3144_v53  ;;  %vm8107_vm7 = vsmask.f32 7424  ;;  %v7279_v53 = vld [vmem:[#allocation2 + $0xc] sm:$0xf] }
  0xb9   :  { %v1926_v20 = vsel %vm8107_vm7, %v1921_v14, %v1925_v39  ;;  %v1929_v19 = vor.u32 %v1927_v7, %v1925_v39  ;;  %v5222_v46 = vcombine.low %v6816_v10, %v8108_v28  ;;  %v2982_v56 = vrot.slane %v2980_v18, 7  ;;  %vm8112_vm4 = vmmov %vm8107_vm7  ;;  %v2898_v14 = vld [vmem:[#allocation2 + $0x8] sm:$0xf]  ;;  %v8113_v18 = vld [vmem:[#allocation13_spill] sm:$0xff] }
  0xba   :  { %5788 = vmatprep.mubr.bf16.mxu0 %v1926_v20  ;;  %vm8109_vm2 = vsmask.f32 4352  ;;  %v3232_v12 = vshll.u32 %v5256_v6, 16  ;;  %vm8110_vm11 = vcmp.ne.s16.totalorder %v6952_v0, 0  ;;  %vm8111_vm9 = vcmp.ne.s16.totalorder %v6968_v41, 0 }
  0xbb   :  { %v2502_v31 = vsel %vm8109_vm2, %v2492_v60, %v2501_v29  ;;  %v3145_v44 = vsel %vm8110_vm11, %v7249_v9, 0  ;;  %v3146_v55 = vsel %vm8111_vm9, %v7262_v47, 0  ;;  %v1934_v11 = vsel %vm8112_vm4, %v1929_v19, %v1933_v5  ;;  %v7291_v5 = vld [vmem:[#allocation2 + $0x30] sm:$0xf]  ;;  %v6090_v19 = vld [vmem:[#allocation2 + $0x18] sm:$0xf] }
  0xbc   :  { %v7275_v7 = vor.u32 %v2983_v54, %v2982_v56  ;;  %v2986_v4 = vrot.slane %v2982_v56, 4  ;;  %v7277_v10 = vcombine.low %v3145_v44, %v3146_v55  ;;  %5789 = vmatmul.mubr.bf16.gmra.mxu0 %v1934_v11  ;;  %v7281_v60 = vrot.slane %v3224_v25, 1  ;;  %5821 = vmatmul.mubr.bf16.gmra.mxu1 %v2502_v31  ;;  %v8114_v31 = vld [vmem:[#allocation17_spill] sm:$0xff]  ;;  %v7298_v25 = vld [vmem:[#allocation2 + $0x34] sm:$0xf] }
  0xbd   :  { %v3228_v29 = vshrl.u32 %v5255_v45, 16  ;;  %v3236_v39 = vshrl.u32 %v5256_v6, 16  ;;  %5840 = vmatprep.mubr.bf16.mxu0 %v5222_v46  ;;  %vm661_vm2 = vcmp.ne.s32.totalorder %v7028_v58, 7  ;;  %v5223_v54 = vcombine.low %v8114_v31, %v6914_v57  ;;  %v6091_v58 = vld [vmem:[#allocation2 + $0x1c] sm:$0xf] }
  0xbe   :  { %v7286_v41 = vsel %vm6767_vm0, %v2986_v4, %v8113_v18  ;;  %vm7989_vm7 = vcmp.ne.s16.totalorder %v7275_v7, 0  ;;  %v3240_v56 = vshll.u32 %v7277_v10, 16  ;;  %vm2955_vm9 = vmpackc.low %vm661_vm2, %vm661_vm2  ;;  %v3234_v20 = vrot.slane %v3232_v12, 1  ;;  %v7311_v31 = vld [vmem:[#allocation2 + $0x38] sm:$0xf] }
  0xbf   :  { %vm7988_vm11 = vcmp.ne.s16.totalorder %v7286_v41, 0  ;;  %v3139_v45 = vsel %vm7989_vm7, %v2898_v14, 0  ;;  %v5224_v28 = vcombine.low %v6090_v19, %v6091_v58  ;;  %v2971_v46 = vsel %vm2955_vm9, 65537, %v8037_v22  ;;  %v6055_v22 = vld [vmem:[%s7927_s3 + $0x1b0] sm:$0xff]  }
  0xc0   :  { %v3140_v6 = vsel %vm7988_vm11, %v7279_v53, 0  ;;  %v3230_v55 = vor.u32 %v3228_v29, %v7281_v60  ;;  %v3051_v11 = vshrl.u32 %v2971_v46, 16  ;;  %v3054_v14 = vshll.u32 %v2971_v46, 16 }
  0xc1   :  { %v5254_v44 = vcombine.low %v3139_v45, %v3140_v6  ;;  %v3238_v4 = vor.u32 %v3236_v39, %v3234_v20  ;;  %v3242_v57 = vrot.slane %v3240_v56, 1  ;;  %vm8115_vm4 = vcmp.ne.s16.totalorder %v7055_v42, 0  ;;  %v6092_v45 = vld [vmem:[#allocation2 + $0x20] sm:$0xf]  ;;  %v7317_v56 = vld [vmem:[#allocation2 + $0x3c] sm:$0xf] }
  0xc2   :  { %v3149_v18 = vsel %vm8115_vm4, %v7291_v5, 0  ;;  %vm8116_vm2 = vcmp.ne.s16.totalorder %v7066_v27, 0  ;;  %v3053_v29 = vrot.slane %v3051_v11, 7  ;;  %v5225_v39 = vcombine.low %v6092_v45, %v7003_v32  ;;  %v7319_v6 = vld [vmem:[#allocation2 + $0x40] sm:$0xf] }
  0xc3   :  { %v3150_v12 = vsel %vm8116_vm2, %v7298_v25, 0  ;;  %v3217_v19 = vshrl.u32 %v5254_v44, 16  ;;  %v3219_v58 = vshll.u32 %v5254_v44, 16  ;;  %v7325_v44 = vld [vmem:[#allocation2 + $0x44] sm:$0xf]  ;;  %vm8119_vm2 = vcmp.ne.s16.totalorder %v7159_v30, 0 }
  0xc4   :  { %5841 = vmatmul.mubr.bf16.vlgmr.msra.gmra.mxu0 %v5223_v54  ;;  %v7321_v0 = vor.u32 %v3054_v14, %v3053_v29  ;;  %v3058_v51 = vrot.slane %v3053_v29, 4  ;;  %v7323_v27 = vcombine.low %v3149_v18, %v3150_v12  ;;  %vm8117_vm9 = vsmask.f32 7424  ;;  %v7330_v11 = vld [vmem:[#allocation2 + $0x28] sm:$0xf]  ;;  %v6056_v12 = vld [vmem:[%s7927_s3 + $0x1f0] sm:$0xff]  }
  0xc5   :  { %v3221_v46 = vrot.slane %v3219_v58, 1  ;;  %v3235_v42 = vsel %vm8117_vm9, %v3230_v55, %v3234_v20  ;;  %5889 = vmatpush3.bf16.msra.mxu0 %v7182_v15  ;;  %5844 = vmatprep.mubr.bf16.mxu0 %v5224_v28  ;;  %vm8118_vm4 = vmmov %vm8117_vm9  ;;  %v7332_v45 = vld [vmem:[#allocation2 + $0x2c] sm:$0xf]  ;;  %v3244_v54 = vshrl.u32 %v7277_v10, 16  ;;  %v3151_v14 = vsel %vm8119_vm2, %v7311_v31, 0 }
  0xc6   :  { %v3243_v32 = vsel %vm8118_vm4, %v3238_v4, %v3242_v57  ;;  %5890 = vmatprep.subr.bf16.mxu0 %v6055_v22  ;;  %v8120_v20 = vrot.slane %v6948_v48, 4  ;;  %v7346_v28 = vsel %vm6767_vm0, %v3058_v51, %v7018_v50  ;;  %v6059_v10 = vld [vmem:[%s7927_s3 + $0x1a8] sm:$0xff]   ;;  %vm8121_vm9 = vcmp.ne.s16.totalorder %v7165_v38, 0 }
  0xc7   :  { %v3222_v18 = vor.u32 %v3221_v46, %v3217_v19  ;;  %v3152_v55 = vsel %vm8121_vm9, %v7317_v56, 0  ;;  %vm3131_vm2 = vcmp.ne.s16.totalorder %v7346_v28, 0  ;;  %vm8122_vm11 = vcmp.ne.s16.totalorder %v7213_v52, 0  ;;  %v3453_v50 = vld [vmem:[#allocation2 + $0x8] sm:$0x8] }
  0xc8   :  { %v3057_v15 = vsel %vm6767_vm0, %v8120_v20, %v7321_v0  ;;  %v3153_v48 = vsel %vm8122_vm11, %v7319_v6, 0  ;;  %vm8123_vm7 = vcmp.ne.s16.totalorder %v7220_v59, 0  ;;  %vm8124_vm0 = vsmask.f32 7424  ;;  %v6093_v46 = vld [vmem:[#allocation2 + $0x2c] sm:$0xf] }
  0xc9   :  { %vm3130_vm4 = vcmp.ne.s16.totalorder %v3057_v15, 0  ;;  %v3154_v51 = vsel %vm8123_vm7, %v7325_v44, 0  ;;  %v3227_v4 = vsel %vm8124_vm0, %v3222_v18, %v7281_v60  ;;  %v3148_v58 = vsel %vm3131_vm2, %v7332_v45, 0  ;;  %5891 = vmatpush3.bf16.msra.mxu0 %v6055_v22 }
  0xca   :  { %v3147_v19 = vsel %vm3130_vm4, %v7330_v11, 0  ;;  %v3256_v29 = vshll.u32 %v7323_v27, 16  ;;  %5872 = vmatprep.mubr.bf16.mxu1 %v3227_v4  ;;  %v5226_v20 = vcombine.low %v7038_v34, %v6093_v46  ;;  %v5260_v15 = vcombine.low %v3151_v14, %v3152_v55  ;;  %5892 = vmatprep.subr.bf16.mxu0 %v6059_v10  ;;  %v6061_v4 = vld [vmem:[%s7927_s3 + $0x1a0] sm:$0xff]   ;;  %v8127_v46 = vld [vmem:[#allocation8_spill] sm:$0xff] }
  0xcb   :  { %v5258_v59 = vcombine.low %v3147_v19, %v3148_v58  ;;  %5873 = vmatmul.mubr.bf16.vlgmr.msra.gmra.mxu1 %v3235_v42  ;;  %v7381_v22 = vcombine.low %v3153_v48, %v3154_v51  ;;  %vm8126_vm0 = vcmp.ne.s16.totalorder %v6895_v17, 0  ;;  %v3246_v55 = vor.u32 %v3244_v54, %v3242_v57  ;;  %v6060_v48 = vld [vmem:[%s7927_s3 + $0x1e8] sm:$0xff]   ;;  %v6094_v58 = vld [vmem:[#allocation2 + $0x34] sm:$0xf] }
  0xcc   :  { %v3711_v34 = vsel %vm8126_vm0, %v3453_v50, 0  ;;  %5921 = vmatpush3.bf16.msra.mxu1 %v7192_v37  ;;  %5876 = vmatprep.mubr.bf16.mxu1 %v3243_v32  ;;  %v3258_v51 = vrot.slane %v3256_v29, 1  ;;  %v5227_v17 = vcombine.low %v6992_v3, %v6094_v58  ;;  %v3712_v50 = vsel %vm6929_vm13, %v7279_v53, 0  ;;  %v2914_v54 = vld [vmem:[#allocation2 + $0x48] sm:$0x1]  ;;  %v6065_v3 = vld [vmem:[%s7927_s3 + $0x198] sm:$0xff]  }
  0xcd   :  { %v3248_v19 = vshll.u32 %v5258_v59, 16  ;;  %v3252_v42 = vshrl.u32 %v5258_v59, 16  ;;  %5922 = vmatprep.subr.bf16.mxu1 %v6056_v12  ;;  %5845 = vmatmul.mubr.bf16.gmra.mxu0 %v5225_v39  ;;  %v3797_v37 = vshrl.u32 %v8127_v46, 16  ;;  %v3264_v57 = vshll.u32 %v5260_v15, 16  ;;  %v6095_v58 = vld [vmem:[#allocation2 + $0x3c] sm:$0xf] }
  0xce   :  { %5893 = vmatpush3.bf16.msra.mxu0 %v6059_v10  ;;  %5848 = vmatprep.mubr.bf16.mxu0 %v5226_v20  ;;  %v5287_v39 = vcombine.low %v3711_v34, %v3712_v50  ;;  %v3800_v59 = vshll.u32 %v8127_v46, 16  ;;  %v3260_v29 = vshrl.u32 %v7323_v27, 16  ;;  %v5228_v49 = vcombine.low %v7112_v13, %v6095_v58  ;;  %v6062_v27 = vld [vmem:[%s7927_s3 + $0x1e0] sm:$0xff]   ;;  %v8129_v13 = vld [vmem:[#allocation10_spill] sm:$0xff] }
  0xcf   :  { %v3250_v32 = vrot.slane %v3248_v19, 1  ;;  %5894 = vmatprep.subr.bf16.mxu0 %v6061_v4  ;;  %v3268_v14 = vshrl.u32 %v5260_v15, 16  ;;  %v3272_v19 = vshll.u32 %v7381_v22, 16  ;;  %vm8128_vm13 = vsmask.f32 7424 }
  0xd0   :  { %5923 = vmatpush3.bf16.msra.mxu1 %v6056_v12  ;;  %v3789_v34 = vshrl.u32 %v5287_v39, 16  ;;  %v3792_v50 = vshll.u32 %v5287_v39, 16  ;;  %v3155_v46 = vsel %vm7227_vm8, %v2914_v54, 0  ;;  %v3799_v52 = vrot.slane %v3797_v37, 3  ;;  %vm8130_vm7 = vmmov %vm8128_vm13 }
  0xd1   :  { %v3251_v10 = vsel %vm8128_vm13, %v3246_v55, %v3250_v32  ;;  %v3254_v20 = vor.u32 %v3252_v42, %v3250_v32  ;;  %5924 = vmatprep.subr.bf16.mxu1 %v6060_v48  ;;  %v3802_v18 = vrot.slane %v3800_v59, 4  ;;  %v3806_v15 = vshrl.u32 %v8129_v13, 16  ;;  %vm8134_vm11 = vmmov %vm8130_vm7 }
  0xd2   :  { %5895 = vmatpush3.bf16.msra.mxu0 %v6061_v4  ;;  %v3266_v58 = vrot.slane %v3264_v57, 1  ;;  %v3791_v55 = vrot.slane %v3789_v34, 3  ;;  %v3794_v42 = vrot.slane %v3792_v50, 4  ;;  %v3725_v32 = vsel %vm6798_vm6, %v7319_v6, 0  ;;  %v8132_v34 = vld [vmem:[#allocation12_spill] sm:$0xff]  ;;  %vm8136_vm4 = vmmov %vm8130_vm7 }
  0xd3   :  { %v3259_v12 = vsel %vm8130_vm7, %v3254_v20, %v3258_v51  ;;  %5877 = vmatmul.mubr.bf16.gmra.mxu1 %v3251_v10  ;;  %v3262_v39 = vor.u32 %v3260_v29, %v3258_v51  ;;  %5896 = vmatprep.subr.bf16.mxu0 %v6065_v3  ;;  %v3808_v37 = vrot.slane %v3806_v15, 3  ;;  %v3809_v54 = vshll.u32 %v8129_v13, 16  ;;  %v8131_v20 = vld [vmem:[#allocation4_spill] sm:$0xff]  ;;  %v6096_v29 = vld [vmem:[#allocation2 + $0x40] sm:$0xf] }
  0xd4   :  { %5925 = vmatpush3.bf16.msra.mxu1 %v6060_v48  ;;  %5880 = vmatprep.mubr.bf16.mxu1 %v3259_v12  ;;  %v3270_v4 = vor.u32 %v3268_v14, %v3266_v58  ;;  %v3274_v57 = vrot.slane %v3272_v19, 1  ;;  %v5262_v59 = vcombine.low %v3155_v46, %v3155_v46  ;;  %v3608_v50 = vsel %vm6264_vm12, %v8132_v34, %v8131_v20  ;;  %v6066_v51 = vld [vmem:[%s7927_s3 + $0x1d8] sm:$0xff]   ;;  %v6097_v10 = vld [vmem:[#allocation2 + $0x44] sm:$0xf] }
  0xd5   :  { %5926 = vmatprep.subr.bf16.mxu1 %v6062_v27  ;;  %5849 = vmatmul.mubr.bf16.gmra.mxu0 %v5227_v17  ;;  %v5229_v15 = vcombine.low %v6096_v29, %v6097_v10  ;;  %v3803_v13 = vor.u32 %v3802_v18, %v3799_v52  ;;  %v3811_v48 = vrot.slane %v3809_v54, 4  ;;  %vm3701_vm8 = vcmp.ne.s16.totalorder %v3608_v50, 0  ;;  %v8133_v12 = vld [vmem:[#allocation5_spill] sm:$0xff]  ;;  %v6071_v52 = vld [vmem:[%s7927_s3 + $0x188] sm:$0xff]  }
  0xd6   :  { %5897 = vmatpush3.bf16.msra.mxu0 %v6065_v3  ;;  %5852 = vmatprep.mubr.bf16.mxu0 %v5228_v49  ;;  %v3276_v14 = vshrl.u32 %v7381_v22, 16  ;;  %v3795_v19 = vor.u32 %v3794_v42, %v3791_v55  ;;  %v3718_v46 = vsel %vm3701_vm8, %v7262_v47, 0  ;;  %v3618_v17 = vsel %vm6264_vm12, %v8133_v12, %v7072_v16  ;;  %v6068_v42 = vld [vmem:[%s7927_s3 + $0x1d0] sm:$0xff]  }
  0xd7   :  { %v3267_v34 = vsel %vm8134_vm11, %v3262_v39, %v3266_v58  ;;  %5898 = vmatprep.subr.bf16.mxu0 %v6067_v8  ;;  %v3812_v18 = vor.u32 %v3811_v48, %v3808_v37  ;;  %v8135_v22 = vsel %vm6503_vm5, %v7249_v9, 0  ;;  %vm3702_vm9 = vcmp.ne.s16.totalorder %v3618_v17, 0  ;;  %v6072_v17 = vld [vmem:[%s7927_s3 + $0x1c8] sm:$0xff]  }
  0xd8   :  { %v5290_v3 = vcombine.low %v8135_v22, %v3718_v46  ;;  %5927 = vmatpush3.bf16.msra.mxu1 %v6062_v27  ;;  %v3275_v49 = vsel %vm8136_vm4, %v3270_v4, %v3274_v57  ;;  %v3280_v55 = vshll.u32 %v5262_v59, 16  ;;  %v3719_v16 = vsel %vm3702_vm9, %v7330_v11, 0  ;;  %v8139_v4 = vld [vmem:[#allocation6_spill] sm:$0xff] }
  0xd9   :  { %v3720_v58 = vsel %vm7134_vm10, %v7332_v45, 0  ;;  %5928 = vmatprep.subr.bf16.mxu1 %v6066_v51  ;;  %vm8137_vm0 = vsmask.f32 4352  ;;  %vm8140_vm13 = vnez %v8139_v4  ;;  %v3722_v50 = vsel %vm6687_vm14, %v7298_v25, 0  ;;  %vm8145_vm14 = vmmov %vm8136_vm4 }
  0xda   :  { %v7449_v60 = vsel %vm8137_vm0, %v3803_v13, %v3812_v18  ;;  %v3815_v39 = vshrl.u32 %v5290_v3, 16  ;;  %v3818_v37 = vshll.u32 %v5290_v3, 16  ;;  %v5291_v27 = vcombine.low %v3719_v16, %v3720_v58  ;;  %5899 = vmatpush3.bf16.msra.mxu0 %v6067_v8  ;;  %vm8138_vm5 = vmmov %vm8137_vm0  ;;  %v6073_v8 = vld [vmem:[%s7927_s3 + $0x180] sm:$0xff]  }
  0xdb   :  { %v3804_v54 = vsel %vm8138_vm5, %v3795_v19, %v3803_v13  ;;  %v4085_v59 = vsel %vm8140_vm13, %v7279_v53, 0  ;;  %v4086_v62 = vsel %vm8140_vm13, %v7239_v26, 0  ;;  %5881 = vmatmul.mubr.bf16.gmra.mxu1 %v3267_v34  ;;  %5900 = vmatprep.subr.bf16.mxu0 %v6071_v52  ;;  %v3278_v53 = vor.u32 %v3276_v14, %v3274_v57  ;;  %vm8147_vm6 = vmmov %vm8137_vm0 }
  0xdc   :  { %v3817_v29 = vrot.slane %v3815_v39, 3  ;;  %v3820_v10 = vrot.slane %v3818_v37, 4  ;;  %v3824_v13 = vshrl.u32 %v5291_v27, 16  ;;  %v3827_v48 = vshll.u32 %v5291_v27, 16  ;;  %5929 = vmatpush3.bf16.msra.mxu1 %v6066_v51  ;;  %5884 = vmatprep.mubr.bf16.mxu1 %v3275_v49  ;;  %v8143_v49 = vld [vmem:[#allocation14_spill] sm:$0xff]  ;;  %vm8148_vm10 = vmmov %vm8137_vm0 }
  0xdd   :  { %v3282_v19 = vrot.slane %v3280_v55, 1  ;;  %v8141_v26 = vsel %vm6652_vm3, %v7291_v5, 0  ;;  %v3724_v46 = vsel %vm6732_vm1, %v7317_v56, 0  ;;  %5930 = vmatprep.subr.bf16.mxu1 %v6068_v42  ;;  %5853 = vmatmul.mubr.bf16.gmra.mxu0 %v5229_v15  ;;  %v8142_v24 = vsel %vm6706_vm15, %v7311_v31, 0  ;;  %v7485_v55 = vld [vmem:[%s7927_s3 + $0x238] sm:$0xff]   ;;  %vm8144_vm3 = vmmov %vm8137_vm0 }
  0xde   :  { %v5292_v35 = vcombine.low %v8141_v26, %v3722_v50  ;;  %v3821_v34 = vor.u32 %v3820_v10, %v3817_v29  ;;  %v3826_v51 = vrot.slane %v3824_v13, 3  ;;  %v3829_v22 = vrot.slane %v3827_v48, 4  ;;  %5901 = vmatpush3.bf16.msra.mxu0 %v6071_v52  ;;  %5904 = vmatprep.mubr.bf16.mxu0 %v3804_v54  ;;  %v7515_v10 = vld [vmem:[#allocation2 + $0x48] sm:$0xf]  ;;  %vm8153_vm9 = vmmov %vm8137_vm0 }
  0xdf   :  { %v5293_v57 = vcombine.low %v8142_v24, %v3724_v46  ;;  %v5320_v14 = vcombine.low %v4085_v59, %v4086_v62  ;;  %v3688_v15 = vsel %vm6264_vm12, %v8143_v49, %v8131_v20  ;;  %5902 = vmatprep.subr.bf16.mxu0 %v6073_v8  ;;  %v3283_v39 = vsel %vm8145_vm14, %v3278_v53, %v3282_v19  ;;  %vm8146_vm12 = vmmov %vm8137_vm0  ;;  %v4327_v53 = vld [vmem:[#allocation2 + $0xc] sm:$0xf]  ;;  %v4328_v19 = vld [vmem:[#allocation2 + $0x10] sm:$0xf] }
  0xe0   :  { %v3833_v3 = vshrl.u32 %v5292_v35, 16  ;;  %v3836_v23 = vshll.u32 %v5292_v35, 16  ;;  %v3822_v2 = vsel %vm8144_vm3, %v3812_v18, %v3821_v34  ;;  %v3830_v16 = vor.u32 %v3829_v22, %v3826_v51  ;;  %5931 = vmatpush3.bf16.msra.mxu1 %v6068_v42  ;;  %v4329_v51 = vld [vmem:[#allocation2 + $0x14] sm:$0xf]  ;;  %v4330_v22 = vld [vmem:[#allocation2 + $0x18] sm:$0xf] }
  0xe1   :  { %v3842_v58 = vshrl.u32 %v5293_v57, 16  ;;  %v3845_v52 = vshll.u32 %v5293_v57, 16  ;;  %vm3709_vm15 = vcmp.ne.s16.totalorder %v3688_v15, 0  ;;  %5932 = vmatprep.subr.bf16.mxu1 %v6072_v17  ;;  %v4087_v42 = vsel %vm8140_vm13, %v7244_v63, 0  ;;  %v8151_v57 = vld [vmem:[#allocation9_spill] sm:$0xff] }
  0xe2   :  { %v3835_v37 = vrot.slane %v3833_v3, 3  ;;  %v3838_v27 = vrot.slane %v3836_v23, 4  ;;  %v7493_v20 = vsel %vm8146_vm12, %v3821_v34, %v3830_v16  ;;  %v3726_v18 = vsel %vm3709_vm15, %v7325_v44, 0  ;;  %5903 = vmatpush3.bf16.msra.mxu0 %v6073_v8  ;;  %v7510_v8 = vld [vmem:[%s7927_s3 + $0x230] sm:$0xff]   ;;  %v4335_v49 = vld [vmem:[#allocation2 + $0x2c] sm:$0xf] }
  0xe3   :  { %v3844_v54 = vrot.slane %v3842_v58, 3  ;;  %v3847_v59 = vrot.slane %v3845_v52, 4  ;;  %v5294_v50 = vcombine.low %v3725_v32, %v3726_v18  ;;  %5885 = vmatmul.mubr.bf16.gmra.mxu1 %v3283_v39  ;;  %v4088_v29 = vsel %vm8140_vm13, %v7252_v40, 0  ;;  %5952 = vmatprep.subr.bf16.mxu0 %v7485_v55  ;;  %v8158_v52 = vld [vmem:[#allocation3_spill] sm:$0xff]  ;;  %v4331_v18 = vld [vmem:[#allocation2 + $0x1c] sm:$0xf] }
  0xe4   :  { %v3839_v62 = vor.u32 %v3838_v27, %v3835_v37  ;;  %v4089_v63 = vsel %vm8140_vm13, %v7257_v36, 0  ;;  %vm3710_vm1 = vcmp.ne.s16.totalorder %v8133_v12, 0  ;;  %5933 = vmatpush3.bf16.msra.mxu1 %v6072_v17  ;;  %5936 = vmatprep.mubr.bf16.mxu1 %v5320_v14  ;;  %v4090_v40 = vsel %vm8140_vm13, %v7249_v9, 0  ;;  %v4337_v37 = vld [vmem:[#allocation2 + $0x34] sm:$0xf] }
  0xe5   :  { %v3848_v21 = vor.u32 %v3847_v59, %v3844_v54  ;;  %v3851_v13 = vshrl.u32 %v5294_v50, 16  ;;  %v3854_v48 = vshll.u32 %v5294_v50, 16  ;;  %5934 = vmatprep.subr.bf16.mxu1 %v6074_v1  ;;  %5905 = vmatmul.mubr.bf16.vlgmr.msra.gmra.mxu0 %v7449_v60  ;;  %v3727_v9 = vsel %vm3710_vm1, %v7515_v10, 0  ;;  %v7534_v60 = vld [vmem:[%s7927_s3 + $0x228] sm:$0xff]   ;;  %v4338_v27 = vld [vmem:[#allocation2 + $0x38] sm:$0xf] }
  0xe6   :  { %v3840_v32 = vsel %vm8147_vm6, %v3830_v16, %v3839_v62  ;;  %5953 = vmatpush3.bf16.msra.mxu0 %v7485_v55  ;;  %5908 = vmatprep.mubr.bf16.mxu0 %v3822_v2  ;;  %v5321_v46 = vcombine.low %v4087_v42, %v4088_v29  ;;  %v5322_v17 = vcombine.low %v4089_v63, %v4090_v40  ;;  %vm8149_vm7 = vcmp.ne.s16.totalorder %v7275_v7, 0  ;;  %v4336_v7 = vld [vmem:[#allocation2 + $0x30] sm:$0xf]  ;;  %v4332_v42 = vld [vmem:[#allocation2 + $0x20] sm:$0xf] }
  0xe7   :  { %v7524_v36 = vsel %vm8148_vm10, %v3839_v62, %v3848_v21  ;;  %v3853_v26 = vrot.slane %v3851_v13, 3  ;;  %v3856_v35 = vrot.slane %v3854_v48, 4  ;;  %5954 = vmatprep.subr.bf16.mxu0 %v7510_v8  ;;  %v4584_v24 = vsel %vm8149_vm7, %v4327_v53, 0  ;;  %v8160_v62 = vld [vmem:[#allocation22_spill] sm:$0xff]  ;;  %v8162_v29 = vld [vmem:[#allocation23_spill] sm:$0xff]  ;;  %v8165_v13 = vld [vmem:[#allocation20_spill] sm:$0xff] }
  0xe8   :  { %5935 = vmatpush3.bf16.msra.mxu1 %v6074_v1  ;;  %vm8150_vm8 = vcmp.ne.s16.totalorder %v7286_v41, 0  ;;  %vm8152_vm11 = vnez %v8041_v33  ;;  %v5295_v3 = vcombine.low %v3727_v9, %v3727_v9  ;;  %vm8156_vm0 = vcmp.ne.s16.totalorder %v6834_v61, 0  ;;  %v4333_v40 = vld [vmem:[#allocation2 + $0x24] sm:$0xf] }
  0xe9   :  { %v7536_v34 = vor.u32 %v3856_v35, %v3853_v26  ;;  %v4585_v12 = vsel %vm8150_vm8, %v4328_v19, 0  ;;  %v4502_v14 = vsel %vm8152_vm11, %v8151_v57, %v7321_v0  ;;  %5984 = vmatprep.subr.bf16.mxu1 %v7485_v55  ;;  %v7560_v0 = vld [vmem:[%s7927_s3 + $0x220] sm:$0xff]   ;;  %v4586_v41 = vsel %vm8156_vm0, %v4329_v51, 0  ;;  %v4334_v26 = vld [vmem:[#allocation2 + $0x28] sm:$0xf]  ;;  %v8169_v51 = vld [vmem:[#allocation19_spill] sm:$0xff] }
  0xea   :  { %5955 = vmatpush3.bf16.msra.mxu0 %v7510_v8  ;;  %vm7552_vm4 = vcmp.ne.s16.totalorder %v4502_v14, 0  ;;  %vm8157_vm5 = vcmp.ne.s16.totalorder %v8103_v43, 0  ;;  %v7566_v16 = vcombine.low %v4584_v24, %v4585_v12  ;;  %v4091_v58 = vsel %vm8140_vm13, %v7262_v47, 0 }
  0xeb   :  { %v7550_v23 = vsel %vm8153_vm9, %v3848_v21, %v7536_v34  ;;  %5937 = vmatmul.mubr.bf16.vlgmr.msra.gmra.mxu1 %v5321_v46  ;;  %5956 = vmatprep.subr.bf16.mxu0 %v7534_v60  ;;  %v4587_v2 = vsel %vm8157_vm5, %v4330_v22, 0  ;;  %vm8159_vm3 = vnez %v8158_v52  ;;  %v4093_v61 = vsel %vm8140_vm13, %v7332_v45, 0  ;;  %v8167_v46 = vld [vmem:[#allocation18_spill] sm:$0xff] }
  0xec   :  { %5992 = vmatpush3.bf16.msra.mxu1 %v7485_v55  ;;  %5940 = vmatprep.mubr.bf16.mxu1 %v5322_v17  ;;  %v4092_v39 = vsel %vm8159_vm3, %v7330_v11, 0  ;;  %v4094_v43 = vsel %vm8140_vm13, %v7291_v5, 0  ;;  %v3860_v55 = vshrl.u32 %v5295_v3, 16  ;;  %v4592_v47 = vsel %vm7552_vm4, %v4335_v49, 0  ;;  %v7591_v5 = vld [vmem:[%s7927_s3 + $0x218] sm:$0xff]   ;;  %v8171_v49 = vld [vmem:[#allocation21_spill] sm:$0xff] }
  0xed   :  { %5985 = vmatprep.subr.bf16.mxu1 %v7510_v8  ;;  %5909 = vmatmul.mubr.bf16.gmra.mxu0 %v7493_v20  ;;  %v4593_v11 = vsel %vm3131_vm2, %v4336_v7, 0  ;;  %v3863_v45 = vshll.u32 %v5295_v3, 16  ;;  %v7593_v1 = vcombine.low %v4586_v41, %v4587_v2  ;;  %v5323_v20 = vcombine.low %v4091_v58, %v4092_v39  ;;  %v8173_v41 = vld [vmem:[#allocation24_spill] sm:$0xff]  ;;  %v4340_v58 = vld [vmem:[#allocation2 + $0x40] sm:$0xf] }
  0xee   :  { %5957 = vmatpush3.bf16.msra.mxu0 %v7534_v60  ;;  %5912 = vmatprep.mubr.bf16.mxu0 %v3840_v32  ;;  %v5324_v54 = vcombine.low %v4093_v61, %v4094_v43  ;;  %v4095_v28 = vsel %vm8140_vm13, %v7298_v25, 0  ;;  %v4664_v59 = vshll.u32 %v7566_v16, 16  ;;  %vm8161_vm2 = vcmp.ne.s16.totalorder %v8160_v62, 0  ;;  %v8164_v32 = vld [vmem:[#allocation7_spill] sm:$0xff] }
  0xef   :  { %5958 = vmatprep.subr.bf16.mxu0 %v7560_v0  ;;  %v4594_v50 = vsel %vm8161_vm2, %v4337_v37, 0  ;;  %vm8163_vm14 = vcmp.ne.s16.totalorder %v8162_v29, 0  ;;  %v7605_v21 = vcombine.low %v4592_v47, %v4593_v11  ;;  %v8166_v48 = vrot.slane %v8165_v13, 4  ;;  %v7654_v37 = vld [vmem:[%s7927_s3 + $0x208] sm:$0xff]   ;;  %v4341_v47 = vld [vmem:[#allocation2 + $0x44] sm:$0xf] }
  0xf0   :  { %5993 = vmatpush3.bf16.msra.mxu1 %v7510_v8  ;;  %v4595_v63 = vsel %vm8163_vm14, %v4338_v27, 0  ;;  %v4096_v8 = vsel %vm8140_vm13, %v7311_v31, 0  ;;  %v4097_v53 = vsel %vm8140_vm13, %v7317_v56, 0  ;;  %v3862_v19 = vrot.slane %v3860_v55, 3  ;;  %v7629_v31 = vld [vmem:[%s7927_s3 + $0x210] sm:$0xff]  }
  0xf1   :  { %v4493_v25 = vsel %vm8152_vm11, %v8166_v48, %v8164_v32  ;;  %5986 = vmatprep.subr.bf16.mxu1 %v7534_v60  ;;  %v3865_v35 = vrot.slane %v3863_v45, 4  ;;  %v4669_v9 = vshll.u32 %v7593_v1, 16  ;;  %vm8168_vm12 = vcmp.ne.s16.totalorder %v8167_v46, 0  ;;  %v4342_v11 = vld [vmem:[#allocation2 + $0x48] sm:$0xf] }
  0xf2   :  { %vm4574_vm15 = vcmp.ne.s16.totalorder %v4493_v25, 0  ;;  %5959 = vmatpush3.bf16.msra.mxu0 %v7560_v0  ;;  %v4588_v17 = vsel %vm8168_vm12, %v4331_v18, 0  ;;  %vm8170_vm1 = vcmp.ne.s16.totalorder %v8169_v51, 0  ;;  %v4098_v56 = vsel %vm8140_vm13, %v7319_v6, 0 }
  0xf3   :  { %v4589_v22 = vsel %vm8170_vm1, %v4332_v42, 0  ;;  %5941 = vmatmul.mubr.bf16.gmra.mxu1 %v5323_v20  ;;  %5960 = vmatprep.subr.bf16.mxu0 %v7591_v5  ;;  %v4662_v24 = vshrl.u32 %v7566_v16, 16  ;;  %v4666_v12 = vrot.slane %v4664_v59, 1  ;;  %v7635_v14 = vcombine.low %v4594_v50, %v4595_v63  ;;  %v8178_v42 = vld [vmem:[#allocation25_spill] sm:$0xff] }
  0xf4   :  { %5994 = vmatpush3.bf16.msra.mxu1 %v7534_v60  ;;  %5944 = vmatprep.mubr.bf16.mxu1 %v5324_v54  ;;  %v4693_v3 = vshll.u32 %v7605_v21, 16  ;;  %vm8172_vm6 = vcmp.ne.s16.totalorder %v8171_v49, 0  ;;  %v4591_v15 = vsel %vm4574_vm15, %v4334_v26, 0  ;;  %v8174_v2 = vrot.slane %v8173_v41, 4  ;;  %v4339_v60 = vld [vmem:[#allocation2 + $0x3c] sm:$0xf] }
  0xf5   :  { %v4590_v7 = vsel %vm8172_vm6, %v4333_v40, 0  ;;  %5987 = vmatprep.subr.bf16.mxu1 %v7560_v0  ;;  %5913 = vmatmul.mubr.bf16.gmra.mxu0 %v7524_v36  ;;  %v5354_v16 = vcombine.low %v4588_v17, %v4589_v22  ;;  %v5325_v39 = vcombine.low %v4095_v28, %v4096_v8  ;;  %v5326_v61 = vcombine.low %v4097_v53, %v4098_v56  ;;  %v5714_v28 = vpop.f32.mrf.mxu0  ;;  %v4343_v8 = vld [vmem:[#allocation2 + $0x4c] sm:$0x1] }
  0xf6   :  { %v4565_v6 = vsel %vm8152_vm11, %v8174_v2, %v8164_v32  ;;  %5961 = vmatpush3.bf16.msra.mxu0 %v7591_v5  ;;  %5916 = vmatprep.mubr.bf16.mxu0 %v7550_v23  ;;  %v3866_v43 = vor.u32 %v3865_v35, %v3862_v19  ;;  %v4671_v33 = vrot.slane %v4669_v9, 1  ;;  %v4667_v55 = vor.u32 %v4666_v12, %v4662_v24  ;;  %vm8177_vm11 = vmmov %vm8153_vm9 }
  0xf7   :  { %5962 = vmatprep.subr.bf16.mxu0 %v7629_v31  ;;  %v4697_v36 = vshrl.u32 %v7605_v21, 16  ;;  %v7658_v27 = vcombine.low %v4590_v7, %v4591_v15  ;;  %vm4582_vm10 = vcmp.ne.s16.totalorder %v4565_v6, 0  ;;  %v7661_v23 = vrot.slane %v4693_v3, 1  ;;  %v1189_v13 = vpop.f32.mrf.mxu0 }
  0xf8   :  { %5995 = vmatpush3.bf16.msra.mxu1 %v7560_v0  ;;  %v4701_v45 = vshll.u32 %v7635_v14, 16  ;;  %vm8175_vm7 = vcmp.ne.s16.totalorder %v7159_v30, 0  ;;  %vm8176_vm8 = vcmp.ne.s16.totalorder %v7165_v38, 0  ;;  %v4677_v59 = vshll.u32 %v5354_v16, 16  ;;  %v6082_v30 = vld [vmem:[%s7927_s3 + $0x200] sm:$0xff]  }
  0xf9   :  { %v4596_v20 = vsel %vm8175_vm7, %v4339_v60, 0  ;;  %v4597_v54 = vsel %vm8176_vm8, %v4340_v58, 0  ;;  %5988 = vmatprep.subr.bf16.mxu1 %v7591_v5  ;;  %v3867_v18 = vsel %vm8177_vm11, %v7536_v34, %v3866_v43  ;;  %v4673_v0 = vshrl.u32 %v7593_v1, 16  ;;  %v5715_v35 = vpop.f32.mrf.mxu0 }
  0xfa   :  { %5963 = vmatpush3.bf16.msra.mxu0 %v7629_v31  ;;  %vm8179_vm9 = vcmp.ne.s16.totalorder %v8178_v42, 0  ;;  %v4599_v50 = vsel %vm4582_vm10, %v4342_v11, 0  ;;  %vm8180_vm4 = vsmask.f32 7424  ;;  %v5358_v29 = vcombine.low %v4596_v20, %v4597_v54  ;;  %v5746_v26 = vpop.f32.mrf.mxu1 }
  0xfb   :  { %v4598_v62 = vsel %vm8179_vm9, %v4341_v47, 0  ;;  %5945 = vmatmul.mubr.bf16.gmra.mxu1 %v5325_v39  ;;  %5964 = vmatprep.subr.bf16.mxu0 %v7654_v37  ;;  %v4672_v38 = vsel %vm8180_vm4, %v4667_v55, %v4671_v33  ;;  %v4681_v63 = vshrl.u32 %v5354_v16, 16  ;;  %v4685_v21 = vshll.u32 %v7658_v27, 16  ;;  %vm8181_vm0 = vmmov %vm8180_vm4  ;;  %v1192_v7 = vpop.f32.mrf.mxu0 }
  0xfc   :  { %5996 = vmatpush3.bf16.msra.mxu1 %v7591_v5  ;;  %5948 = vmatprep.mubr.bf16.mxu1 %v5326_v61  ;;  %v4099_v34 = vsel %vm8140_vm13, %v7325_v44, 0  ;;  %v4100_v1 = vsel %vm8159_vm3, %v7515_v10, 0  ;;  %v4699_v40 = vor.u32 %v4697_v36, %v7661_v23  ;;  %v4703_v32 = vrot.slane %v4701_v45, 1  ;;  %vm8182_vm5 = vmmov %vm8181_vm0  ;;  %v1466_v56 = vpop.f32.mrf.mxu1 }
  0xfd   :  { %5989 = vmatprep.subr.bf16.mxu1 %v7629_v31  ;;  %5917 = vmatmul.mubr.bf16.gmra.mxu0 %v3867_v18  ;;  %v4679_v48 = vrot.slane %v4677_v59, 1  ;;  %v5359_v25 = vcombine.low %v4598_v62, %v4599_v50  ;;  %v4675_v5 = vor.u32 %v4673_v0, %v4671_v33  ;;  %vm4583_vm13 = vcmp.ne.s16.totalorder %v8151_v57, 0  ;;  %vm8183_vm3 = vmmov %vm8181_vm0  ;;  %v5718_v43 = vpop.f32.mrf.mxu0 }
  0xfe   :  { %5965 = vmatpush3.bf16.msra.mxu0 %v7654_v37  ;;  %5968 = vmatprep.mubr.bf16.mxu0 %v4672_v38  ;;  %v5327_v44 = vcombine.low %v4099_v34, %v4100_v1  ;;  %v4709_v4 = vshll.u32 %v5358_v29, 16  ;;  %v4687_v52 = vrot.slane %v4685_v21, 1  ;;  %v4704_v53 = vsel %vm8181_vm0, %v4699_v40, %v4703_v32  ;;  %v5747_v49 = vpop.f32.mrf.mxu1  ;;  %vm8184_vm2 = vmmov %vm8181_vm0 }
  0xff   :  { %5966 = vmatprep.subr.bf16.mxu0 %v6082_v30  ;;  %v4683_v10 = vor.u32 %v4681_v63, %v4679_v48  ;;  %v4705_v19 = vshrl.u32 %v7635_v14, 16  ;;  %v4713_v9 = vshrl.u32 %v5358_v29, 16  ;;  %v4717_v46 = vshll.u32 %v5359_v25, 16  ;;  %vm8185_vm14 = vmmov %vm8181_vm0 }
 0x100   :  { %5997 = vmatpush3.bf16.msra.mxu1 %v7629_v31  ;;  %v4600_v17 = vsel %vm4583_vm13, %v4343_v8, 0  ;;  %v7696_v51 = vadd.f32 %v5746_v26, %v5714_v28  ;;  %v4680_v57 = vsel %vm8182_vm5, %v4675_v5, %v4679_v48  ;;  %v4689_v22 = vshrl.u32 %v7658_v27, 16  ;;  %v1469_v16 = vpop.f32.mrf.mxu1  ;;  %vm8186_vm15 = vmmov %vm8181_vm0  ;;  %v1205_v27 = vpop.f32.mrf.mxu0 }
 0x101   :  { %5990 = vmatprep.subr.bf16.mxu1 %v7654_v37  ;;  %v4711_v31 = vrot.slane %v4709_v4, 1  ;;  %v4688_v24 = vsel %vm8183_vm3, %v4683_v10, %v4687_v52  ;;  %v7701_v12 = vadd.f32 %v1466_v56, %v1189_v13  ;;  %v4707_v14 = vor.u32 %v4705_v19, %v4703_v32  ;;  %vm8187_vm12 = vmmov %vm8181_vm0 }
 0x102   :  { %5967 = vmatpush3.bf16.msra.mxu0 %v6082_v30  ;;  %v5360_v3 = vcombine.low %v4600_v17, %v4600_v17  ;;  %v4719_v41 = vrot.slane %v4717_v46, 1  ;;  %v1478_v2 = vadd.f32 %v5747_v49, %v5715_v35  ;;  %v4691_v6 = vor.u32 %v4689_v22, %v4687_v52  ;;  %v5719_v45 = vpop.f32.mrf.mxu0 }
 0x103   :  { %5949 = vmatmul.mubr.bf16.gmra.mxu1 %v5327_v44  ;;  %v4715_v15 = vor.u32 %v4713_v9, %v4711_v31  ;;  %v1470_v60 = vadd.f32 %v1469_v16, %v1192_v7  ;;  %v4712_v58 = vsel %vm8184_vm2, %v4707_v14, %v4711_v31  ;;  %v4721_v39 = vshrl.u32 %v5359_v25, 16 }
 0x104   :  { %5998 = vmatpush3.bf16.msra.mxu1 %v7654_v37  ;;  %5976 = vmatprep.mubr.bf16.mxu1 %v4704_v53  ;;  %v4725_v61 = vshll.u32 %v5360_v3, 16  ;;  %v4696_v33 = vsel %vm8186_vm15, %v4691_v6, %v7661_v23  ;;  %v1208_v18 = vpop.f32.mrf.mxu0 }
 0x105   :  { %5991 = vmatprep.subr.bf16.mxu1 %v6082_v30  ;;  %5969 = vmatmul.mubr.bf16.vlgmr.msra.gmra.mxu0 %v4680_v57  ;;  %v4720_v37 = vsel %vm8185_vm14, %v4715_v15, %v4719_v41  ;;  %v4723_v55 = vor.u32 %v4721_v39, %v4719_v41 }
 0x106   :  { %5972 = vmatprep.mubr.bf16.mxu0 %v4688_v24  ;;  %v4727_v36 = vrot.slane %v4725_v61, 1 }
 0x108   :  { %5999 = vmatpush3.bf16.msra.mxu1 %v6082_v30  ;;  %v4728_v47 = vsel %vm8187_vm12, %v4723_v55, %v4727_v36 }
 0x10a   :  { %v5750_v11 = vpop.f32.mrf.mxu1 }
 0x10b   :  { %5977 = vmatmul.mubr.bf16.vlgmr.msra.gmra.mxu1 %v4712_v58  ;;  %v1491_v20 = vadd.f32 %v5750_v11, %v5718_v43 }
 0x10c   :  { %5980 = vmatprep.mubr.bf16.mxu1 %v4720_v37  ;;  %v1482_v54 = vpop.f32.mrf.mxu1 }
 0x10d   :  { %5973 = vmatmul.mubr.bf16.gmra.mxu0 %v4696_v33  ;;  %v1483_v28 = vadd.f32 %v1482_v54, %v1205_v27 }
 0x10e   :  { %v5751_v59 = vpop.f32.mrf.mxu1 }
 0x10f   :  { %v1494_v0 = vadd.f32 %v5751_v59, %v5719_v45 }
 0x110   :  { %v1485_v42 = vpop.f32.mrf.mxu1 }
 0x111   :  { %v1486_v62 = vadd.f32 %v1485_v42, %v1208_v18 }
 0x113   :  { %5981 = vmatmul.mubr.bf16.gmra.mxu1 %v4728_v47  ;;  %v5722_v23 = vpop.f32.mrf.mxu0 }
 0x115   :  { %v1221_v50 = vpop.f32.mrf.mxu0 }
 0x117   :  { %v5723_v30 = vpop.f32.mrf.mxu0 }
 0x119   :  { %v1224_v34 = vpop.f32.mrf.mxu0 }
 0x128   :  { %v5754_v38 = vpop.f32.mrf.mxu1 }
 0x129   :  { %v1507_v29 = vadd.f32 %v5754_v38, %v5722_v23 }
 0x12a   :  { %v1498_v63 = vpop.f32.mrf.mxu1  ;;  %v5726_v48 = vpop.f32.mrf.mxu0 }
 0x12b   :  { %v1499_v21 = vadd.f32 %v1498_v63, %v1221_v50 }
 0x12c   :  { %v5755_v1 = vpop.f32.mrf.mxu1  ;;  %v1237_v25 = vpop.f32.mrf.mxu0 }
 0x12d   :  { %v1510_v40 = vadd.f32 %v5755_v1, %v5723_v30 }
 0x12e   :  { %v1501_v32 = vpop.f32.mrf.mxu1  ;;  %v5727_v8 = vpop.f32.mrf.mxu0 }
 0x12f   :  { %v1502_v13 = vadd.f32 %v1501_v32, %v1224_v34 }
 0x130   :  { %v1240_v53 = vpop.f32.mrf.mxu0 }
 0x137   :  { %v5758_v5 = vpop.f32.mrf.mxu1 }
 0x138   :  { %v1523_v44 = vadd.f32 %v5758_v5, %v5726_v48 }
 0x139   :  { %v1514_v4 = vpop.f32.mrf.mxu1 }
 0x13a   :  { %v1515_v10 = vadd.f32 %v1514_v4, %v1237_v25 }
 0x13b   :  { %v5759_v52 = vpop.f32.mrf.mxu1 }
 0x13c   :  { %v1526_v19 = vadd.f32 %v5759_v52, %v5727_v8 }
 0x13d   :  { %v1517_v26 = vpop.f32.mrf.mxu1 }
 0x13e   :  { %v1518_v35 = vadd.f32 %v1517_v26, %v1240_v53 }
 0x14a   :  { %v5778_v9 = vpop.f32.mrf.mxu0 }
 0x14b   :  { %v2090_v46 = vadd.f32 %v5778_v9, %v7696_v51 }
 0x14c   :  { %v2025_v17 = vpop.f32.mrf.mxu0 }
 0x14d   :  { %v5810_v57 = vpop.f32.mrf.mxu1  ;;  %v2088_v22 = vadd.f32 %v2025_v17, %v7701_v12 }
 0x14e   :  { %v7711_v56 = vadd.f32 %v5810_v57, %v2090_v46  ;;  %v5779_v31 = vpop.f32.mrf.mxu0 }
 0x14f   :  { %v2593_v24 = vpop.f32.mrf.mxu1  ;;  %v2091_v14 = vadd.f32 %v5779_v31, %v1478_v2 }
 0x150   :  { %v7713_v3 = vadd.f32 %v2593_v24, %v2088_v22  ;;  %v2028_v49 = vpop.f32.mrf.mxu0 }
 0x151   :  { %v5811_v7 = vpop.f32.mrf.mxu1  ;;  %v2089_v15 = vadd.f32 %v2028_v49, %v1470_v60 }
 0x152   :  { %v7715_v41 = vadd.f32 %v5811_v7, %v2091_v14 }
 0x153   :  { %v2596_v6 = vpop.f32.mrf.mxu1 }
 0x154   :  { %v7717_v16 = vadd.f32 %v2596_v6, %v2089_v15 }
 0x15c   :  { %v5782_v51 = vpop.f32.mrf.mxu0 }
 0x15d   :  { %v2094_v58 = vadd.f32 %v5782_v51, %v1491_v20 }
 0x15e   :  { %v2041_v39 = vpop.f32.mrf.mxu0 }
 0x15f   :  { %v2092_v61 = vadd.f32 %v2041_v39, %v1483_v28 }
 0x160   :  { %v5783_v12 = vpop.f32.mrf.mxu0 }
 0x161   :  { %v2095_v43 = vadd.f32 %v5783_v12, %v1494_v0 }
 0x162   :  { %v2044_v37 = vpop.f32.mrf.mxu0 }
 0x163   :  { %v2093_v33 = vadd.f32 %v2044_v37, %v1486_v62 }
 0x16c   :  { %v5814_v55 = vpop.f32.mrf.mxu1 }
 0x16d   :  { %v7719_v2 = vadd.f32 %v5814_v55, %v2094_v58 }
 0x16e   :  { %v2609_v36 = vpop.f32.mrf.mxu1  ;;  %v5786_v60 = vpop.f32.mrf.mxu0 }
 0x16f   :  { %v7721_v27 = vadd.f32 %v2609_v36, %v2092_v61  ;;  %v2098_v11 = vadd.f32 %v5786_v60, %v1507_v29 }
 0x170   :  { %v5815_v47 = vpop.f32.mrf.mxu1  ;;  %v2057_v54 = vpop.f32.mrf.mxu0 }
 0x171   :  { %v7723_v45 = vadd.f32 %v5815_v47, %v2095_v43  ;;  %v2096_v20 = vadd.f32 %v2057_v54, %v1499_v21 }
 0x172   :  { %v2612_v59 = vpop.f32.mrf.mxu1  ;;  %v5787_v28 = vpop.f32.mrf.mxu0 }
 0x173   :  { %v7725_v18 = vadd.f32 %v2612_v59, %v2093_v33  ;;  %v2099_v42 = vadd.f32 %v5787_v28, %v1510_v40 }
 0x174   :  { %v5818_v0 = vpop.f32.mrf.mxu1  ;;  %v2060_v23 = vpop.f32.mrf.mxu0 }
 0x175   :  { %v7727_v62 = vadd.f32 %v5818_v0, %v2098_v11  ;;  %v2097_v30 = vadd.f32 %v2060_v23, %v1502_v13 }
 0x176   :  { %v2625_v50 = vpop.f32.mrf.mxu1 }
 0x177   :  { %v7729_v38 = vadd.f32 %v2625_v50, %v2096_v20 }
 0x178   :  { %v5819_v63 = vpop.f32.mrf.mxu1 }
 0x179   :  { %v7731_v34 = vadd.f32 %v5819_v63, %v2099_v42 }
 0x17a   :  { %v2628_v29 = vpop.f32.mrf.mxu1 }
 0x17b   :  { %v7733_v1 = vadd.f32 %v2628_v29, %v2097_v30 }
 0x17c   :  { %v5790_v32 = vpop.f32.mrf.mxu0  ;;  %v5822_v48 = vpop.f32.mrf.mxu1 }
 0x17d   :  { %v2102_v21 = vadd.f32 %v5790_v32, %v1523_v44 }
 0x17e   :  { %v2073_v25 = vpop.f32.mrf.mxu0  ;;  %v2641_v8 = vpop.f32.mrf.mxu1 }
 0x17f   :  { %v7735_v5 = vadd.f32 %v5822_v48, %v2102_v21  ;;  %v2100_v40 = vadd.f32 %v2073_v25, %v1515_v10 }
 0x180   :  { %v5791_v4 = vpop.f32.mrf.mxu0  ;;  %v5823_v53 = vpop.f32.mrf.mxu1 }
 0x181   :  { %v7737_v52 = vadd.f32 %v2641_v8, %v2100_v40  ;;  %v2103_v13 = vadd.f32 %v5791_v4, %v1526_v19 }
 0x182   :  { %v2076_v26 = vpop.f32.mrf.mxu0  ;;  %v2644_v17 = vpop.f32.mrf.mxu1 }
 0x183   :  { %v7739_v9 = vadd.f32 %v5823_v53, %v2103_v13  ;;  %v2101_v46 = vadd.f32 %v2076_v26, %v1518_v35 }
 0x184   :  { %v5842_v57 = vpop.f32.mrf.mxu0 }
 0x185   :  { %v7741_v22 = vadd.f32 %v2644_v17, %v2101_v46 }
 0x186   :  { %v2819_v44 = vpop.f32.mrf.mxu0 }
 0x187   :  { %8188 = vst [vmem:[#allocation15_spill] sm:$0xff] %v7741_v22 }
 0x188   :  { %v5843_v31 = vpop.f32.mrf.mxu0 }
 0x18a   :  { %v2822_v14 = vpop.f32.mrf.mxu0 }
 0x18b   :  { %v5874_v24 = vpop.f32.mrf.mxu1 }
 0x18d   :  { %v3374_v49 = vpop.f32.mrf.mxu1  ;;  %v5846_v10 = vpop.f32.mrf.mxu0 }
 0x18f   :  { %v7743_v7 = vpop.f32.mrf.mxu1  ;;  %v2835_v15 = vpop.f32.mrf.mxu0 }
 0x191   :  { %v7745_v6 = vpop.f32.mrf.mxu1  ;;  %v5847_v19 = vpop.f32.mrf.mxu0 }
 0x193   :  { %v7747_v51 = vpop.f32.mrf.mxu1  ;;  %v2838_v58 = vpop.f32.mrf.mxu0 }
 0x195   :  { %v7749_v35 = vpop.f32.mrf.mxu1  ;;  %v5850_v39 = vpop.f32.mrf.mxu0 }
 0x197   :  { %v7751_v61 = vpop.f32.mrf.mxu1  ;;  %v2851_v12 = vpop.f32.mrf.mxu0 }
 0x199   :  { %v7753_v43 = vpop.f32.mrf.mxu1  ;;  %v5851_v37 = vpop.f32.mrf.mxu0 }
 0x19b   :  { %v7755_v33 = vpop.f32.mrf.mxu1  ;;  %v2854_v55 = vpop.f32.mrf.mxu0 }
 0x19d   :  { %v7757_v36 = vpop.f32.mrf.mxu1  ;;  %v5854_v60 = vpop.f32.mrf.mxu0 }
 0x19f   :  { %v7759_v47 = vpop.f32.mrf.mxu1  ;;  %v2867_v11 = vpop.f32.mrf.mxu0 }
 0x1a1   :  { %v7761_v54 = vpop.f32.mrf.mxu1  ;;  %v5855_v59 = vpop.f32.mrf.mxu0 }
 0x1a3   :  { %v7763_v20 = vpop.f32.mrf.mxu1  ;;  %v7765_v28 = vpop.f32.mrf.mxu0 }
 0x1a4   :  { %8189 = vst [vmem:[#allocation16_spill] sm:$0xff] %v7765_v28 }
 0x1a5   :  { %v7767_v0 = vpop.f32.mrf.mxu1  ;;  %v5906_v42 = vpop.f32.mrf.mxu0 }
 0x1a6   :  { %8190 = vst [vmem:[#allocation13_spill] sm:$0xff] %v7767_v0 }
 0x1a7   :  { %v7769_v23 = vpop.f32.mrf.mxu1  ;;  %v3958_v50 = vpop.f32.mrf.mxu0 }
 0x1a8   :  { %8191 = vst [vmem:[#allocation17_spill] sm:$0xff] %v7769_v23 }
 0x1a9   :  { %v7771_v30 = vpop.f32.mrf.mxu1  ;;  %v5907_v63 = vpop.f32.mrf.mxu0 }
 0x1aa   :  { %8192 = vst [vmem:[#allocation11_spill] sm:$0xff] %v7771_v30 }
 0x1ab   :  { %v5938_v29 = vpop.f32.mrf.mxu1  ;;  %v3961_v32 = vpop.f32.mrf.mxu0 }
 0x1ad   :  { %v4248_v21 = vpop.f32.mrf.mxu1  ;;  %v5910_v48 = vpop.f32.mrf.mxu0 }
 0x1af   :  { %v7773_v25 = vpop.f32.mrf.mxu1  ;;  %v3974_v40 = vpop.f32.mrf.mxu0 }
 0x1b0   :  { %8193 = vst [vmem:[#allocation8_spill] sm:$0xff] %v7773_v25 }
 0x1b1   :  { %v7775_v8 = vpop.f32.mrf.mxu1  ;;  %v7777_v4 = vpop.f32.mrf.mxu0 }
 0x1b2   :  { %8194 = vst [vmem:[#allocation10_spill] sm:$0xff] %v7775_v8  ;;  %8195 = vst [vmem:[#allocation4_spill] sm:$0xff] %v7777_v4  ;;  %v2884_v8 = vadd.f32 %v5842_v57, %v7711_v56  ;;  %v2887_v57 = vadd.f32 %v2838_v58, %v7725_v18 }
 0x1b3   :  { %v7779_v13 = vpop.f32.mrf.mxu1  ;;  %v7781_v53 = vpop.f32.mrf.mxu0 }
 0x1b4   :  { %8196 = vst [vmem:[#allocation12_spill] sm:$0xff] %v7779_v13  ;;  %8197 = vst [vmem:[#allocation5_spill] sm:$0xff] %v7781_v53  ;;  %v2882_v13 = vadd.f32 %v2819_v44, %v7713_v3  ;;  %v3439_v56 = vadd.f32 %v5874_v24, %v2884_v8  ;;  %v2892_v44 = vadd.f32 %v5850_v39, %v7727_v62 }
 0x1b5   :  { %v7783_v26 = vpop.f32.mrf.mxu1  ;;  %v5914_v46 = vpop.f32.mrf.mxu0 }
 0x1b6   :  { %8198 = vst [vmem:[#allocation6_spill] sm:$0xff] %v7783_v26  ;;  %v2885_v26 = vadd.f32 %v5843_v31, %v7715_v41  ;;  %v3437_v3 = vadd.f32 %v3374_v49, %v2882_v13  ;;  %v2890_v41 = vadd.f32 %v2851_v12, %v7729_v38  ;;  %v4023_v49 = vadd.f32 %v5906_v42, %v3439_v56  ;;  %v8204_v12 = vld [vmem:[#allocation15_spill] sm:$0xff] }
 0x1b7   :  { %v7785_v17 = vpop.f32.mrf.mxu1  ;;  %v7787_v30 = vpop.f32.mrf.mxu0 }
 0x1b8   :  { %8199 = vst [vmem:[#allocation14_spill] sm:$0xff] %v7785_v17  ;;  %8200 = vst [vmem:[#allocation9_spill] sm:$0xff] %v7787_v30  ;;  %v2883_v17 = vadd.f32 %v2822_v14, %v7717_v16  ;;  %v2888_v30 = vadd.f32 %v5846_v10, %v7719_v2  ;;  %v2893_v16 = vadd.f32 %v5851_v37, %v7731_v34  ;;  %v8205_v37 = vld [vmem:[#allocation16_spill] sm:$0xff] }
 0x1b9   :  { %v7789_v23 = vpop.f32.mrf.mxu1  ;;  %v5915_v0 = vpop.f32.mrf.mxu0  ;;  %v2891_v2 = vadd.f32 %v2854_v55, %v7733_v1  ;;  %v3440_v14 = vadd.f32 %v7743_v7, %v2885_v26  ;;  %v4021_v18 = vadd.f32 %v3958_v50, %v3437_v3  ;;  %v2894_v1 = vadd.f32 %v2867_v11, %v7737_v52  ;;  %v8206_v11 = vld [vmem:[#allocation13_spill] sm:$0xff]  ;;  %v8209_v8 = vld [vmem:[#allocation4_spill] sm:$0xff] }
 0x1ba   :  { %8201 = vst [vmem:[#allocation3_spill] sm:$0xff] %v7789_v23  ;;  %v2886_v23 = vadd.f32 %v2835_v15, %v7721_v27  ;;  %v2896_v27 = vadd.f32 %v5854_v60, %v7735_v5  ;;  %v3438_v24 = vadd.f32 %v7745_v6, %v2883_v17  ;;  %v3443_v62 = vadd.f32 %v7747_v51, %v2888_v30 }
 0x1bb   :  { %v7791_v25 = vpop.f32.mrf.mxu1  ;;  %v7793_v28 = vpop.f32.mrf.mxu0  ;;  %v3442_v15 = vadd.f32 %v7753_v43, %v2887_v57  ;;  %v2897_v7 = vadd.f32 %v5855_v59, %v7739_v9  ;;  %v4024_v58 = vadd.f32 %v5907_v63, %v3440_v14  ;;  %v3445_v6 = vadd.f32 %v7757_v36, %v2890_v41  ;;  %v8210_v26 = vld [vmem:[#allocation5_spill] sm:$0xff]  ;;  %v8213_v57 = vld [vmem:[#allocation10_spill] sm:$0xff] }
 0x1bc   :  { %8202 = vst [vmem:[#allocation22_spill] sm:$0xff] %v7791_v25  ;;  %8203 = vst [vmem:[#allocation23_spill] sm:$0xff] %v7793_v28  ;;  %v2889_v25 = vadd.f32 %v5847_v19, %v7723_v45  ;;  %v3441_v38 = vadd.f32 %v7749_v35, %v2886_v23  ;;  %v3447_v19 = vadd.f32 %v7755_v33, %v2892_v44 }
 0x1bd   :  { %v7797_v4 = vpop.f32.mrf.mxu1  ;;  %v7799_v53 = vpop.f32.mrf.mxu0  ;;  %v3448_v39 = vadd.f32 %v7759_v47, %v2893_v16  ;;  %v3446_v51 = vadd.f32 %v7761_v54, %v2891_v2  ;;  %v3451_v35 = vadd.f32 %v7763_v20, %v2896_v27  ;;  %v2895_v55 = vadd.f32 %v8205_v37, %v8204_v12  ;;  %v8207_v54 = vld [vmem:[#allocation17_spill] sm:$0xff]  ;;  %v8208_v20 = vld [vmem:[#allocation8_spill] sm:$0xff] }
 0x1be   :  { %v3444_v34 = vadd.f32 %v7751_v61, %v2889_v25  ;;  %v4313_v43 = vadd.f32 %v5938_v29, %v4023_v49  ;;  %v4311_v60 = vadd.f32 %v4248_v21, %v4021_v18  ;;  %v4022_v33 = vadd.f32 %v3961_v32, %v3438_v24  ;;  %v8215_v27 = vld [vmem:[#allocation12_spill] sm:$0xff]  ;;  %v8216_v24 = vld [vmem:[#allocation6_spill] sm:$0xff] }
 0x1bf   :  { %v7806_v22 = vpop.f32.mrf.mxu1  ;;  %v7808_v28 = vpop.f32.mrf.mxu0  ;;  %v3449_v9 = vadd.f32 %v8206_v11, %v2894_v1  ;;  %v4027_v59 = vadd.f32 %v5910_v48, %v3443_v62  ;;  %v4025_v42 = vadd.f32 %v3974_v40, %v3441_v38  ;;  %v4031_v36 = vadd.f32 %v5914_v46, %v3447_v19  ;;  %v8211_v21 = vld [vmem:[#allocation9_spill] sm:$0xff]  ;;  %v8212_v46 = vld [vmem:[#allocation11_spill] sm:$0xff] }
 0x1c0   :  { %v3452_v50 = vadd.f32 %v8207_v54, %v2897_v7  ;;  %v4314_v30 = vadd.f32 %v8208_v20, %v4024_v58  ;;  %v4028_v13 = vadd.f32 %v8209_v8, %v3444_v34  ;;  %v4026_v29 = vadd.f32 %v8210_v26, %v3442_v15  ;;  %v7850_v48 = vld [vmem:[%s7931_s4] ss:$0 sm:$0xff]  ;;  %v8218_v58 = vld [vmem:[#allocation14_spill] sm:$0xff] }
 0x1c1   :  { %v7816_v31 = vpop.f32.mrf.mxu1  ;;  %v7818_v45 = vpop.f32.mrf.mxu0  ;;  %v4029_v32 = vadd.f32 %v8211_v21, %v3445_v6  ;;  %v4032_v17 = vadd.f32 %v5915_v0, %v3448_v39  ;;  %v3450_v3 = vadd.f32 %v8212_v46, %v2895_v55  ;;  %v4312_v44 = vadd.f32 %v8213_v57, %v4022_v33  ;;  %v8219_v39 = vld [vmem:[#allocation3_spill] sm:$0xff] }
 0x1c2   :  { %v4317_v14 = vadd.f32 %v8215_v27, %v4027_v59  ;;  %v4315_v49 = vadd.f32 %v8216_v24, %v4025_v42  ;;  %v4035_v62 = vadd.f32 %v7799_v53, %v3451_v35  ;;  %v4318_v6 = vadd.f32 %v8218_v58, %v4028_v13 }
 0x1c3   :  { %v5950_v10 = vpop.f32.mrf.mxu1  ;;  %v4009_v5 = vpop.f32.mrf.mxu0  ;;  %v8214_v41 = vld [vmem:[#allocation23_spill] sm:$0xff]  ;;  %v8217_v0 = vld [vmem:[#allocation22_spill] sm:$0xff]  ;;  %v4322_v12 = vadd.f32 %v7806_v22, %v4032_v17  ;;  %v4033_v35 = vadd.f32 %v7808_v28, %v3449_v9  ;;  %v4036_v11 = vadd.f32 %v7818_v45, %v3452_v50 }
 0x1c4   :  { %v4030_v16 = vadd.f32 %v8214_v41, %v3446_v51  ;;  %v4321_v18 = vadd.f32 %v8217_v0, %v4031_v36  ;;  %v4316_v51 = vadd.f32 %v8219_v39, %v4026_v29  ;;  %v4325_v33 = vadd.f32 %v5950_v10, %v4035_v62 }
 0x1c5   :  { %v7833_v61 = vpop.f32.mrf.mxu1  ;;  %v5970_v52 = vpop.f32.mrf.mxu0  ;;  %v4034_v59 = vadd.f32 %v4009_v5, %v3450_v3 }
 0x1c6   :  { %v4884_v63 = vadd.f32 %v5970_v52, %v4313_v43  ;;  %v4319_v52 = vadd.f32 %v7797_v4, %v4029_v32  ;;  %v4320_v53 = vadd.f32 %v7816_v31, %v4030_v16  ;;  %v4323_v27 = vadd.f32 %v7833_v61, %v4033_v35 }
 0x1c7   :  { %v7838_v23 = vpop.f32.mrf.mxu1  ;;  %v4819_v47 = vpop.f32.mrf.mxu0 }
 0x1c8   :  { %v4882_v25 = vadd.f32 %v4819_v47, %v4311_v60  ;;  %v4907_v1 = vadd.f32 %v7850_v48, %v4884_v63 }
 0x1c9   :  { %v7845_v56 = vpop.f32.mrf.mxu1  ;;  %v5971_v40 = vpop.f32.mrf.mxu0 }
 0x1ca   :  { %v4885_v2 = vadd.f32 %v5971_v40, %v4314_v30  ;;  %v4905_v15 = vadd.f32 %v7850_v48, %v4882_v25  ;;  %v5025_v45 = vmul.f32 %v4907_v1, %v4907_v1 }
 0x1cb   :  { %v5978_v38 = vpop.f32.mrf.mxu1  ;;  %v4822_v34 = vpop.f32.mrf.mxu0 }
 0x1cc   :  { %v4908_v19 = vadd.f32 %v7850_v48, %v4885_v2  ;;  %v4883_v7 = vadd.f32 %v4822_v34, %v4312_v44  ;;  %v4892_v43 = vadd.f32 %v5978_v38, %v4321_v18  ;;  %v5023_v54 = vmul.f32 %v4905_v15, %v4905_v15 }
 0x1cd   :  { %v4851_v37 = vpop.f32.mrf.mxu1  ;;  %v5974_v55 = vpop.f32.mrf.mxu0 }
 0x1ce   :  { %v5498_v60 = vpack.c.bf16 %v4908_v19, %v4907_v1  ;;  %v4906_v36 = vadd.f32 %v7850_v48, %v4883_v7  ;;  %v4890_v4 = vadd.f32 %v4851_v37, %v4319_v52  ;;  %v4888_v10 = vadd.f32 %v5974_v55, %v4317_v14 }
 0x1cf   :  { %v5979_v42 = vpop.f32.mrf.mxu1  ;;  %v4835_v47 = vpop.f32.mrf.mxu0  ;;  %v7874_v5 = vadd.f32 %v7850_v48, %v4892_v43  ;;  %v5026_v17 = vmul.f32 %v4908_v19, %v4908_v19  ;;  %v4326_v14 = vadd.f32 %v7838_v23, %v4036_v11 }
 0x1d0   :  { %5545 = vst [vmem:[%s7932_s5 + $0x8] sm:$0xff] %v5498_v60   ;;  %v4893_v22 = vadd.f32 %v5979_v42, %v4322_v12  ;;  %v4886_v31 = vadd.f32 %v4835_v47, %v4315_v49  ;;  %v5493_v20 = vpack.c.bf16 %v4906_v36, %v4905_v15  ;;  %v5001_v28 = vadd.f32 %v4906_v36, %v4905_v15 }
 0x1d1   :  { %v5024_v9 = vmul.f32 %v4906_v36, %v4906_v36  ;;  %v4854_v30 = vpop.f32.mrf.mxu1  ;;  %v5975_v63 = vpop.f32.mrf.mxu0  ;;  %v4913_v32 = vadd.f32 %v7850_v48, %v4890_v4  ;;  %v4911_v57 = vadd.f32 %v7850_v48, %v4888_v10 }
 0x1d2   :  { %v7877_v50 = vadd.f32 %v7850_v48, %v4893_v22  ;;  %v4891_v25 = vadd.f32 %v4854_v30, %v4320_v53  ;;  %5494 = vst [vmem:[%s7932_s5] sm:$0xff] %v5493_v20   ;;  %v5002_v8 = vadd.f32 %v5001_v28, %v4907_v1  ;;  %v4909_v29 = vadd.f32 %v7850_v48, %v4886_v31 }
 0x1d3   :  { %v5039_v13 = vadd.f32 %v5024_v9, %v5023_v54  ;;  %v5982_v26 = vpop.f32.mrf.mxu1  ;;  %v4889_v21 = vadd.f32 %v5975_v63, %v4318_v6  ;;  %v4838_v2 = vpop.f32.mrf.mxu0  ;;  %v4324_v1 = vadd.f32 %v7845_v56, %v4034_v59  ;;  %v5029_v43 = vmul.f32 %v4911_v57, %v4911_v57 }
 0x1d4   :  { %v5518_v40 = vpack.c.bf16 %v7877_v50, %v7874_v5  ;;  %v4914_v46 = vadd.f32 %v7850_v48, %v4891_v25  ;;  %v5003_v44 = vadd.f32 %v5002_v8, %v4908_v19  ;;  %v4896_v49 = vadd.f32 %v5982_v26, %v4325_v33 }
 0x1d5   :  { %v5040_v3 = vadd.f32 %v5039_v13, %v5025_v45  ;;  %v4867_v41 = vpop.f32.mrf.mxu1  ;;  %v4912_v16 = vadd.f32 %v7850_v48, %v4889_v21  ;;  %v5027_v18 = vmul.f32 %v4909_v29, %v4909_v29  ;;  %v4887_v15 = vadd.f32 %v4838_v2, %v4316_v51 }
 0x1d6   :  { %5549 = vst [vmem:[%s7932_s5 + $0x28] sm:$0xff] %v5518_v40   ;;  %v5513_v24 = vpack.c.bf16 %v4914_v46, %v4913_v32  ;;  %v5004_v0 = vadd.f32 %v5003_v44, %v4909_v29  ;;  %v4894_v19 = vadd.f32 %v4867_v41, %v4323_v27  ;;  %v4919_v58 = vadd.f32 %v7850_v48, %v4896_v49 }
 0x1d7   :  { %v5041_v62 = vadd.f32 %v5040_v3, %v5026_v17  ;;  %v5508_v38 = vpack.c.bf16 %v4912_v16, %v4911_v57  ;;  %v5983_v34 = vpop.f32.mrf.mxu1  ;;  %v4910_v39 = vadd.f32 %v7850_v48, %v4887_v15  ;;  %v5030_v59 = vmul.f32 %v4912_v16, %v4912_v16 }
 0x1d8   :  { %5548 = vst [vmem:[%s7932_s5 + $0x20] sm:$0xff] %v5513_v24   ;;  %v4897_v61 = vadd.f32 %v5983_v34, %v4326_v14  ;;  %v4917_v55 = vadd.f32 %v7850_v48, %v4894_v19  ;;  %v5031_v36 = vmul.f32 %v4913_v32, %v4913_v32  ;;  %v5032_v4 = vmul.f32 %v4914_v46, %v4914_v46 }
 0x1d9   :  { %v5042_v23 = vadd.f32 %v5041_v62, %v5027_v18  ;;  %5547 = vst [vmem:[%s7932_s5 + $0x18] sm:$0xff] %v5508_v38   ;;  %v4870_v7 = vpop.f32.mrf.mxu1  ;;  %v5503_v12 = vpack.c.bf16 %v4910_v39, %v4909_v29  ;;  %v5005_v37 = vadd.f32 %v5004_v0, %v4910_v39  ;;  %v5028_v51 = vmul.f32 %v4910_v39, %v4910_v39 }
 0x1da   :  { %v4920_v6 = vadd.f32 %v7850_v48, %v4897_v61  ;;  %v4895_v56 = vadd.f32 %v4870_v7, %v4324_v1  ;;  %v5033_v20 = vmul.f32 %v7874_v5, %v7874_v5  ;;  %v5034_v30 = vmul.f32 %v7877_v50, %v7877_v50 }
 0x1db   :  { %5546 = vst [vmem:[%s7932_s5 + $0x10] sm:$0xff] %v5503_v12   ;;  %v5006_v35 = vadd.f32 %v5005_v37, %v4911_v57  ;;  %v5043_v60 = vadd.f32 %v5042_v23, %v5028_v51  ;;  %v5035_v45 = vmul.f32 %v4917_v55, %v4917_v55  ;;  %v5037_v21 = vmul.f32 %v4919_v58, %v4919_v58 }
 0x1dc   :  { %v5528_v52 = vpack.c.bf16 %v4920_v6, %v4919_v58  ;;  %v4918_v53 = vadd.f32 %v7850_v48, %v4895_v56  ;;  %v5038_v40 = vmul.f32 %v4920_v6, %v4920_v6 }
 0x1dd   :  { %v5007_v11 = vadd.f32 %v5006_v35, %v4912_v16  ;;  %v5044_v42 = vadd.f32 %v5043_v60, %v5029_v43 }
 0x1de   :  { %5551 = vst [vmem:[%s7932_s5 + $0x38] sm:$0xff] %v5528_v52   ;;  %v5523_v33 = vpack.c.bf16 %v4918_v53, %v4917_v55  ;;  %v5036_v13 = vmul.f32 %v4918_v53, %v4918_v53 }
 0x1df   :  { %v5008_v48 = vadd.f32 %v5007_v11, %v4913_v32  ;;  %v5045_v47 = vadd.f32 %v5044_v42, %v5030_v59 }
 0x1e0   :  { %5550 = vst [vmem:[%s7932_s5 + $0x30] sm:$0xff] %v5523_v33  }
 0x1e1   :  { %v5009_v54 = vadd.f32 %v5008_v48, %v4914_v46  ;;  %v5046_v22 = vadd.f32 %v5045_v47, %v5031_v36 }
 0x1e3   :  { %v5010_v31 = vadd.f32 %v5009_v54, %v7874_v5  ;;  %v5047_v28 = vadd.f32 %v5046_v22, %v5032_v4 }
 0x1e5   :  { %v5011_v9 = vadd.f32 %v5010_v31, %v7877_v50  ;;  %v5048_v10 = vadd.f32 %v5047_v28, %v5033_v20 }
 0x1e7   :  { %v5012_v63 = vadd.f32 %v5011_v9, %v4917_v55  ;;  %v5049_v25 = vadd.f32 %v5048_v10, %v5034_v30 }
 0x1e9   :  { %v5013_v8 = vadd.f32 %v5012_v63, %v4918_v53  ;;  %v5050_v26 = vadd.f32 %v5049_v25, %v5035_v45 }
 0x1eb   :  { %v5014_v29 = vadd.f32 %v5013_v8, %v4919_v58  ;;  %v5051_v32 = vadd.f32 %v5050_v26, %v5036_v13 }
 0x1ed   :  { %v5015_v17 = vadd.f32 %v5014_v29, %v4920_v6  ;;  %v5052_v46 = vadd.f32 %v5051_v32, %v5037_v21 }
 0x1ef   :  { %v5016_v5 = vrot.slane %v5015_v17, 4  ;;  %v5053_v3 = vadd.f32 %v5052_v46, %v5038_v40 }
 0x1f1   :  { %v5017_v57 = vadd.f32 %v5016_v5, %v5015_v17  ;;  %v5054_v44 = vrot.slane %v5053_v3, 4 }
 0x1f3   :  { %v5018_v41 = vrot.slane %v5017_v57, 2  ;;  %v5055_v16 = vadd.f32 %v5054_v44, %v5053_v3 }
 0x1f5   :  { %v5019_v50 = vadd.f32 %v5018_v41, %v5017_v57  ;;  %v5056_v2 = vrot.slane %v5055_v16, 2 }
 0x1f7   :  { %v5020_v27 = vrot.slane %v5019_v50, 1  ;;  %v5057_v14 = vadd.f32 %v5056_v2, %v5055_v16 }
 0x1f9   :  { %v5021_v24 = vadd.f32 %v5020_v27, %v5019_v50  ;;  %v5058_v49 = vrot.slane %v5057_v14, 1 }
 0x1fb   :  { %5022 = vst [vmem:[%s7933_s6] sm:$0x1] %v5021_v24  ;;  %v5059_v0 = vadd.f32 %v5058_v49, %v5057_v14 }
 0x1fd   :  { %5060 = vst [vmem:[%s7934_s7] sm:$0x1] %v5059_v0 }

// kernel: down_forward.5
= control target key start
LH: loop header
LB: loop body
LE: loop exit
PB: predicated region body
PF: predicated region fallthrough
CT: control target
= control target key end

     0   :  { %v56_v0 = vlaneseq  ;;  %v7553_v2 = vmov 0   ;;  %vm5828_vm3 = vmmov 0   ;;  %v7614_v26 = vmov 0  ;;  %s7547_s1 = inlined_call_operand.vmem [shape: bf16[9,128,128], index: 1, kind: input, shape index: {}]   ;;  %s7548_s0 = inlined_call_operand.vmem [shape: bf16[128,128], index: 0, kind: input, shape index: {}]   ;;  %s7549_s2 = inlined_call_operand.vmem [shape: f32[1,128], index: 2, kind: input, shape index: {}]   ;;  %s7550_s3 = inlined_call_operand.vmem [shape: bf16[128,128], index: 3, kind: output, shape index: {0}]   ;;  %s7551_s4 = inlined_call_operand.vmem [shape: f32[1,128], index: 4, kind: output, shape index: {1}]   ;;  %s7552_s5 = inlined_call_operand.vmem [shape: f32[1,128], index: 5, kind: output, shape index: {2}]  }
   0x1   :  { %v5734_v1 = vld [vmem:[%s7547_s1 + $0x78] sm:$0xff]   ;;  %36 = vst [vmem:[#allocation2] sm:$0xf] %v7553_v2  ;;  %37 = vst [vmem:[#allocation2 + $0x4] sm:$0xf] %v7553_v2  ;;  %v5736_v5 = vld [vmem:[%s7547_s1 + $0x70] sm:$0xff]  }
   0x2   :  { %38 = vst [vmem:[#allocation2 + $0x48] sm:$0xf] %v7553_v2  ;;  %39 = vst [vmem:[#allocation2 + $0x4c] sm:$0xf] %v7553_v2  ;;  %v5735_v3 = vld [vmem:[%s7547_s1 + $0x38] sm:$0xff]   ;;  %v5870_v4 = vshrl.u32 %v56_v0, 7  ;;  %5427 = vmatprep.subr.bf16.mxu0 %v5734_v1 }
   0x3   :  { %5459 = vmatprep.subr.bf16.mxu1 %v5735_v3  ;;  %5428 = vmatpush3.bf16.msra.mxu0 %v5734_v1  ;;  %v5737_v6 = vld [vmem:[%s7547_s1 + $0x30] sm:$0xff]   ;;  %v5738_v8 = vld [vmem:[%s7547_s1 + $0x68] sm:$0xff]   ;;  %v5740_v13 = vld [vmem:[%s7547_s1 + $0x60] sm:$0xff]   ;;  %vm618_vm5 = vsmask.f32 3328  ;;  %vm5829_vm12 = vmmov 1  }
   0x4   :  { %v58_v7 = vadd.s32 8, %v5870_v4  ;;  %5460 = vmatpush3.bf16.msra.mxu1 %v5735_v3  ;;  %5429 = vmatprep.subr.bf16.mxu0 %v5736_v5  ;;  %v59_v9 = vadd.s32 16, %v5870_v4  ;;  %v5739_v10 = vld [vmem:[%s7547_s1 + $0x28] sm:$0xff]   ;;  %v60_v11 = vadd.s32 24, %v5870_v4  ;;  %v5741_v15 = vld [vmem:[%s7547_s1 + $0x20] sm:$0xff]   ;;  %v5742_v18 = vld [vmem:[%s7547_s1 + $0x58] sm:$0xff]  }
   0x5   :  { %5461 = vmatprep.subr.bf16.mxu1 %v5737_v6  ;;  %v5743_v20 = vld [vmem:[%s7547_s1 + $0x18] sm:$0xff]   ;;  %v5744_v22 = vld [vmem:[%s7547_s1 + $0x50] sm:$0xff]   ;;  %v20_v23 = vld [vmem:[%s7548_s0] sm:$0xff]   ;;  %vm619_vm7 = vsmask.f32 7440  ;;  %v7618_v46 = vmov 0 }
   0x6   :  { %v84_v12 = vand.u32 63, %v58_v7  ;;  %v91_v14 = vand.u32 63, %v59_v9  ;;  %v98_v16 = vand.u32 63, %v60_v11  ;;  %v22_v24 = vld [vmem:[%s7548_s0 + $0x8] sm:$0xff]   ;;  %v5745_v25 = vld [vmem:[%s7547_s1 + $0x10] sm:$0xff]   ;;  %40 = vst [vmem:[#allocation2 + $0x8] sm:$0xff] %v20_v23   ;;  %vm5920_vm4 = vmpackc.low %vm5828_vm3, %vm5828_vm3 }
   0x7   :  { %5430 = vmatpush3.bf16.msra.mxu0 %v5736_v5  ;;  %42 = vst [vmem:[#allocation2 + $0x10] sm:$0xff] %v22_v24   ;;  %v7615_v26 = vsel %vm5920_vm4, 4294967295, %v7614_v26  ;;  %v5746_v27 = vld [vmem:[%s7547_s1 + $0x48] sm:$0xff]   ;;  %v5933_v28 = vsel %vm5920_vm4, 65537, %v7553_v2  ;;  %v24_v29 = vld [vmem:[%s7548_s0 + $0x10] sm:$0xff]   ;;  %vm5962_vm13 = vmpackc.low %vm5829_vm12, %vm5829_vm12  ;;  %v61_v62 = vadd.s32 32, %v5870_v4 }
   0x8   :  { %5462 = vmatpush3.bf16.msra.mxu1 %v5737_v6  ;;  %5431 = vmatprep.subr.bf16.mxu0 %v5738_v8  ;;  %v5893_v17 = vand.u32 7, %v84_v12  ;;  %v5898_v19 = vand.u32 7, %v91_v14  ;;  %v5903_v21 = vand.u32 7, %v98_v16  ;;  %7616 = vst [vmem:[#allocation3_spill] sm:$0xff] %v7615_v26  ;;  %v5747_v30 = vld [vmem:[%s7547_s1 + $0x8] sm:$0xff]   ;;  %v622_v32 = vshll.u32 %v5933_v28, 16  ;;  %vm5975_vm14 = vmor %vm618_vm5, %vm619_vm7 }
   0x9   :  { %5463 = vmatprep.subr.bf16.mxu1 %v5739_v10  ;;  %v625_v33 = vshrl.u32 %v5933_v28, 16  ;;  %44 = vst [vmem:[#allocation2 + $0x18] sm:$0xff] %v24_v29   ;;  %v5949_v34 = vld [vmem:[#allocation2 + $0x4] sm:$0xf]  ;;  %v7619_v46 = vsel %vm5962_vm13, 4294967295, %v7618_v46  ;;  %v62_v9 = vadd.s32 40, %v5870_v4 }
   0xa   :  { %vm490_vm0 = vcmp.ne.s32.totalorder %v5893_v17, 0  ;;  %vm491_vm1 = vcmp.ne.s32.totalorder %v5898_v19, 0  ;;  %vm492_vm2 = vcmp.ne.s32.totalorder %v5903_v21, 0  ;;  %vm506_vm8 = vcmp.ne.s32.totalorder %v5893_v17, 7  ;;  %7620 = vst [vmem:[#allocation5_spill] sm:$0xff] %v7619_v46  ;;  %v5748_v47 = vld [vmem:[%s7547_s1 + $0x40] sm:$0xff]  }
   0xb   :  { %5432 = vmatpush3.bf16.msra.mxu0 %v5738_v8  ;;  %vm587_vm6 = vmpackc.low %vm490_vm0, %vm490_vm0  ;;  %vm507_vm10 = vcmp.ne.s32.totalorder %v5898_v19, 7  ;;  %v5958_v39 = vrot.slane %v622_v32, 5  ;;  %v627_v40 = vrot.slane %v625_v33, 4  ;;  %v878_v51 = vsel %vm5920_vm4, %v5949_v34, 0  ;;  %v521_v52 = vld [vmem:[#allocation2] sm:$0x8] }
   0xc   :  { %5464 = vmatpush3.bf16.msra.mxu1 %v5739_v10  ;;  %5433 = vmatprep.subr.bf16.mxu0 %v5740_v13  ;;  %vm588_vm9 = vmpackc.low %vm491_vm1, %vm491_vm1  ;;  %v603_v31 = vsel %vm587_vm6, 65537, %v7553_v2  ;;  %v5749_v57 = vld [vmem:[%s7547_s1] sm:$0xff]   ;;  %v1484_v8 = vrot.slane %v625_v33, 7  ;;  %v6010_v10 = vld [vmem:[%s7547_s1 + $0xb8] sm:$0xff]   ;;  %v105_v23 = vand.u32 63, %v61_v62 }
   0xd   :  { %5465 = vmatprep.subr.bf16.mxu1 %v5741_v15  ;;  %vm589_vm11 = vmpackc.low %vm492_vm2, %vm492_vm2  ;;  %v604_v35 = vsel %vm588_vm9, 65537, %v7553_v2  ;;  %v631_v36 = vshll.u32 %v603_v31, 16  ;;  %v635_v37 = vshrl.u32 %v603_v31, 16  ;;  %7617 = vst [vmem:[#allocation4_spill] sm:$0xff] %v5958_v39  ;;  %v628_v48 = vor.u32 %v627_v40, %v5958_v39  ;;  %v523_v53 = vld [vmem:[#allocation2 + $0x8] sm:$0xf] }
   0xe   :  { %v605_v38 = vsel %vm589_vm11, 65537, %v7553_v2  ;;  %v641_v41 = vshll.u32 %v604_v35, 16  ;;  %v645_v44 = vshrl.u32 %v604_v35, 16  ;;  %vm780_vm15 = vcmp.ne.s16.totalorder %v5958_v39, 0  ;;  %vm5993_vm0 = vmpackc.low %vm506_vm8, %vm506_vm8  ;;  %v6000_v5 = vld [vmem:[#allocation2 + $0xc] sm:$0xf] }
   0xf   :  { %5434 = vmatpush3.bf16.msra.mxu0 %v5740_v13  ;;  %v5960_v42 = vrot.slane %v631_v36, 5  ;;  %v637_v43 = vrot.slane %v635_v37, 4  ;;  %v651_v45 = vshll.u32 %v605_v38, 16  ;;  %v655_v50 = vshrl.u32 %v605_v38, 16  ;;  %v6018_v14 = vld [vmem:[#allocation2 + $0xc] sm:$0xf]  ;;  %vm6023_vm2 = vmpackc.low %vm507_vm10, %vm507_vm10 }
  0x10   :  { %5466 = vmatpush3.bf16.msra.mxu1 %v5741_v15  ;;  %5435 = vmatprep.subr.bf16.mxu0 %v5742_v18  ;;  %v643_v49 = vrot.slane %v641_v41, 5  ;;  %v647_v56 = vrot.slane %v645_v44, 4  ;;  %v5984_v58 = vrot.slane %v628_v48, 4  ;;  %v879_v60 = vsel %vm5962_vm13, %v523_v53, 0  ;;  %v6035_v17 = vld [vmem:[%s7547_s1 + $0xf8] sm:$0xff]   ;;  %v7132_v54 = vld [vmem:[%s7547_s1 + $0x230] sm:$0xff]  }
  0x11   :  { %5467 = vmatprep.subr.bf16.mxu1 %v5743_v20  ;;  %v638_v55 = vor.u32 %v637_v43, %v5960_v42  ;;  %v5986_v59 = vrot.slane %v651_v45, 5  ;;  %v5998_v1 = vrot.slane %v655_v50, 4  ;;  %v4941_v3 = vcombine.low %v878_v51, %v879_v60  ;;  %v26_v24 = vld [vmem:[%s7548_s0 + $0x18] sm:$0xff]   ;;  %v2752_v31 = vld [vmem:[#allocation2 + $0x10] sm:$0xf] }
  0x12   :  { %7623 = vst [vmem:[#allocation6_spill] sm:$0xff] %v5984_v58  ;;  %v648_v0 = vor.u32 %v647_v56, %v643_v49  ;;  %v634_v6 = vsel %vm5975_vm14, %v5984_v58, %v5960_v42  ;;  %v797_v7 = vsel %vm780_vm15, %v521_v52, 0  ;;  %v6030_v16 = vsel %vm5993_vm0, 65537, %v7553_v2  ;;  %46 = vst [vmem:[#allocation2 + $0x20] sm:$0xff] %v26_v24   ;;  %v2753_v35 = vld [vmem:[#allocation2 + $0x14] sm:$0xf] }
  0x13   :  { %5436 = vmatpush3.bf16.msra.mxu0 %v5742_v18  ;;  %v639_v63 = vrot.slane %v638_v55, 4  ;;  %vm6014_vm1 = vcmp.ne.s16.totalorder %v634_v6, 0  ;;  %5443 = vmatprep.mubr.bf16.mxu0 %v4941_v3  ;;  %vm7576_vm5 = vsmask.f32 4352  ;;  %v1490_v33 = vshrl.u32 %v6030_v16, 16  ;;  %v5752_v6 = vld [vmem:[%s7547_s1 + $0xb0] sm:$0xff]  }
  0x14   :  { %5468 = vmatpush3.bf16.msra.mxu1 %v5743_v20  ;;  %5437 = vmatprep.subr.bf16.mxu0 %v5744_v22  ;;  %v649_v12 = vrot.slane %v648_v0, 4  ;;  %v798_v19 = vsel %vm6014_vm1, %v5949_v34, 0  ;;  %v6044_v20 = vld [vmem:[#allocation2 + $0x10] sm:$0xf]  ;;  %v112_v50 = vand.u32 63, %v62_v9  ;;  %v6091_v55 = vand.u32 7, %v105_v23 }
  0x15   :  { %5469 = vmatprep.subr.bf16.mxu1 %v5745_v25  ;;  %v644_v11 = vsel %vm5975_vm14, %v639_v63, %v643_v49  ;;  %v6093_v56 = vld [vmem:[#allocation2 + $0x10] sm:$0xf]  ;;  %v880_v60 = vsel %vm5962_vm13, %v6000_v5, 0  ;;  %v6119_v23 = vld [vmem:[#allocation2 + $0x18] sm:$0xf] }
  0x16   :  { %vm6037_vm3 = vcmp.ne.s16.totalorder %v644_v11, 0  ;;  %v881_v61 = vsel %vm5962_vm13, %v6093_v56, 0  ;;  %vm493_vm7 = vcmp.ne.s32.totalorder %v6091_v55, 0 }
  0x17   :  { %5438 = vmatpush3.bf16.msra.mxu0 %v5744_v22  ;;  %v6048_v22 = vor.u32 %v1484_v8, %v622_v32  ;;  %v799_v29 = vsel %vm6037_vm3, %v523_v53, 0  ;;  %v6067_v32 = vsel %vm6023_vm2, 65537, %v7553_v2  ;;  %v2200_v34 = vsel %vm6037_vm3, %v6018_v14, 0  ;;  %vm590_vm9 = vmpackc.low %vm493_vm7, %vm493_vm7 }
  0x18   :  { %5470 = vmatpush3.bf16.msra.mxu1 %v5745_v25  ;;  %5439 = vmatprep.subr.bf16.mxu0 %v5746_v27  ;;  %v654_v25 = vsel %vm5975_vm14, %v649_v12, %v5986_v59  ;;  %v3565_v44 = vsel %vm6037_vm3, %v2752_v31, 0  ;;  %v6089_v53 = vrot.slane %v1484_v8, 4  ;;  %v4942_v3 = vcombine.low %v880_v60, %v881_v61  ;;  %v6114_v8 = vld [vmem:[#allocation2 + $0x14] sm:$0xf]  ;;  %v28_v31 = vld [vmem:[%s7548_s0 + $0x20] sm:$0xff]  }
  0x19   :  { %5471 = vmatprep.subr.bf16.mxu1 %v5747_v30  ;;  %7632 = vst [vmem:[#allocation7_spill] sm:$0xff] %v6048_v22  ;;  %vm6060_vm6 = vcmp.ne.s16.totalorder %v654_v25, 0  ;;  %v606_v9 = vsel %vm590_vm9, 65537, %v7553_v2  ;;  %v64_v12 = vadd.s32 56, %v5870_v4  ;;  %48 = vst [vmem:[#allocation2 + $0x28] sm:$0xff] %v28_v31   ;;  %v66_v60 = vadd.s32 72, %v5870_v4 }
  0x1a   :  { %v800_v36 = vsel %vm6060_vm6, %v6000_v5, 0  ;;  %v2201_v40 = vsel %vm6060_vm6, %v6044_v20, 0  ;;  %v3566_v45 = vsel %vm6060_vm6, %v2753_v35, 0  ;;  %v63_v5 = vadd.s32 48, %v5870_v4  ;;  %v5754_v35 = vld [vmem:[%s7547_s1 + $0xa8] sm:$0xff]  }
  0x1b   :  { %5440 = vmatpush3.bf16.msra.mxu0 %v5746_v27  ;;  %v658_v27 = vor.u32 %v5998_v1, %v5986_v59  ;;  %v4958_v41 = vcombine.low %v799_v29, %v800_v36  ;;  %v6080_v43 = vcombine.low %v2200_v34, %v2201_v40  ;;  %v6097_v59 = vand.u32 7, %v112_v50  ;;  %v6123_v29 = vld [vmem:[#allocation2 + $0x14] sm:$0xf]  ;;  %v2754_v36 = vld [vmem:[#allocation2 + $0x18] sm:$0xf] }
  0x1c   :  { %5472 = vmatpush3.bf16.msra.mxu1 %v5747_v30  ;;  %5441 = vmatprep.subr.bf16.mxu0 %v5748_v47  ;;  %v4957_v30 = vcombine.low %v797_v7, %v798_v19  ;;  %v661_v15 = vshll.u32 %v606_v9, 16  ;;  %v665_v18 = vshrl.u32 %v606_v9, 16  ;;  %v119_v19 = vand.u32 63, %v63_v5 }
  0x1d   :  { %5473 = vmatprep.subr.bf16.mxu1 %v5749_v57  ;;  %v1157_v51 = vshrl.u32 %v4958_v41, 16  ;;  %v1160_v52 = vshll.u32 %v4958_v41, 16  ;;  %vm494_vm8 = vcmp.ne.s32.totalorder %v6097_v59, 0  ;;  %v659_v11 = vrot.slane %v658_v27, 4 }
  0x1e   :  { %v1149_v37 = vshrl.u32 %v4957_v30, 16  ;;  %v1152_v38 = vshll.u32 %v4957_v30, 16  ;;  %vm591_vm10 = vmpackc.low %vm494_vm8, %vm494_vm8  ;;  %v126_v30 = vand.u32 63, %v64_v12  ;;  %v882_v27 = vsel %vm5962_vm13, %v6114_v8, 0 }
  0x1f   :  { %5442 = vmatpush3.bf16.msra.mxu0 %v5748_v47  ;;  %v6087_v47 = vcombine.low %v3565_v44, %v3566_v45  ;;  %v1159_v63 = vrot.slane %v1157_v51, 3  ;;  %v1162_v0 = vrot.slane %v1160_v52, 4  ;;  %v607_v13 = vsel %vm591_vm10, 65537, %v7553_v2  ;;  %v6155_v51 = vld [vmem:[#allocation2 + $0x18] sm:$0xf] }
  0x20   :  { %5474 = vmatpush3.bf16.msra.mxu1 %v5749_v57  ;;  %5491 = vmatprep.subr.bf16.mxu0 %v6010_v10  ;;  %v1151_v48 = vrot.slane %v1149_v37, 3  ;;  %v1154_v49 = vrot.slane %v1152_v38, 4  ;;  %v6095_v57 = vrot.slane %v1490_v33, 7  ;;  %v671_v25 = vshll.u32 %v607_v13, 16 }
  0x21   :  { %5523 = vmatprep.subr.bf16.mxu1 %v6035_v17  ;;  %7635 = vst [vmem:[#allocation8_spill] sm:$0xff] %v6087_v47  ;;  %v6112_v7 = vor.u32 %v1162_v0, %v1159_v63  ;;  %v663_v28 = vrot.slane %v661_v15, 5  ;;  %v667_v33 = vrot.slane %v665_v18, 4  ;;  %v6132_v34 = vand.u32 7, %v119_v19  ;;  %v2755_v18 = vld [vmem:[#allocation2 + $0x1c] sm:$0xf] }
  0x22   :  { %v1155_v62 = vor.u32 %v1154_v49, %v1151_v48  ;;  %5444 = vmatmul.mubr.bf16.vlgmr.msra.gmra.mxu0 %v4942_v3  ;;  %v6137_v37 = vand.u32 7, %v126_v30  ;;  %v675_v38 = vshrl.u32 %v607_v13, 16  ;;  %v883_v40 = vsel %vm5962_vm13, %v6119_v23, 0  ;;  %v5756_v48 = vld [vmem:[%s7547_s1 + $0xa0] sm:$0xff]   ;;  %v30_v49 = vld [vmem:[%s7548_s0 + $0x28] sm:$0xff]  }
  0x23   :  { %5492 = vmatpush3.bf16.msra.mxu0 %v6010_v10  ;;  %v673_v10 = vrot.slane %v671_v25, 5  ;;  %v664_v41 = vsel %vm5975_vm14, %v659_v11, %v663_v28  ;;  %v668_v44 = vor.u32 %v667_v33, %v663_v28  ;;  %vm495_vm11 = vcmp.ne.s32.totalorder %v6132_v34, 0  ;;  %50 = vst [vmem:[#allocation2 + $0x30] sm:$0xff] %v30_v49   ;;  %v5758_v33 = vld [vmem:[%s7547_s1 + $0x98] sm:$0xff]  }
  0x24   :  { %v1164_v24 = vsel %vm7576_vm5, %v1155_v62, %v6112_v7  ;;  %5493 = vmatprep.subr.bf16.mxu0 %v5752_v6  ;;  %v4943_v45 = vcombine.low %v882_v27, %v883_v40  ;;  %vm6151_vm12 = vcmp.ne.s16.totalorder %v664_v41, 0  ;;  %vm496_vm15 = vcmp.ne.s32.totalorder %v6137_v37, 0  ;;  %vm592_vm0 = vmpackc.low %vm495_vm11, %vm495_vm11 }
  0x25   :  { %5475 = vmatprep.mubr.bf16.mxu1 %v1164_v24  ;;  %v677_v52 = vrot.slane %v675_v38, 4  ;;  %v669_v61 = vrot.slane %v668_v44, 4  ;;  %v801_v62 = vsel %vm6151_vm12, %v6093_v56, 0  ;;  %v2202_v63 = vsel %vm6151_vm12, %v6123_v29, 0  ;;  %vm593_vm1 = vmpackc.low %vm496_vm15, %vm496_vm15  ;;  %v32_v56 = vld [vmem:[%s7548_s0 + $0x30] sm:$0xff]  }
  0x26   :  { %v3567_v0 = vsel %vm6151_vm12, %v2754_v36, 0  ;;  %5447 = vmatprep.mubr.bf16.mxu0 %v4943_v45  ;;  %v608_v3 = vsel %vm592_vm0, 65537, %v7553_v2  ;;  %v140_v9 = vand.u32 63, %v66_v60  ;;  %52 = vst [vmem:[#allocation2 + $0x38] sm:$0xff] %v32_v56   ;;  %vm509_vm8 = vcmp.ne.s32.totalorder %v6091_v55, 7 }
  0x27   :  { %5494 = vmatpush3.bf16.msra.mxu0 %v5752_v6  ;;  %v609_v6 = vsel %vm593_vm1, 65537, %v7553_v2  ;;  %v678_v5 = vor.u32 %v677_v52, %v673_v10  ;;  %v674_v11 = vsel %vm5975_vm14, %v669_v61, %v673_v10  ;;  %v681_v12 = vshll.u32 %v608_v3, 16  ;;  %v528_v52 = vld [vmem:[#allocation2 + $0x1c] sm:$0xf]  ;;  %vm6245_vm10 = vmpackc.low %vm509_vm8, %vm509_vm8 }
  0x28   :  { %5495 = vmatprep.subr.bf16.mxu0 %v5754_v35  ;;  %v685_v13 = vshrl.u32 %v608_v3, 16  ;;  %v691_v15 = vshll.u32 %v609_v6, 16  ;;  %vm785_vm2 = vcmp.ne.s16.totalorder %v674_v11, 0  ;;  %v6174_v24 = vand.u32 7, %v140_v9 }
  0x29   :  { %v679_v19 = vrot.slane %v678_v5, 4  ;;  %v695_v25 = vshrl.u32 %v609_v6, 16  ;;  %v802_v30 = vsel %vm785_vm2, %v6114_v8, 0  ;;  %v2203_v27 = vsel %vm785_vm2, %v6155_v51, 0  ;;  %v529_v6 = vld [vmem:[#allocation2 + $0x20] sm:$0xf] }
  0x2a   :  { %v3568_v31 = vsel %vm785_vm2, %v2755_v18, 0  ;;  %v683_v28 = vrot.slane %v681_v12, 5  ;;  %v4959_v10 = vcombine.low %v801_v62, %v802_v30  ;;  %v6181_v36 = vcombine.low %v2202_v63, %v2203_v27  ;;  %v5760_v62 = vld [vmem:[%s7547_s1 + $0x90] sm:$0xff]   ;;  %v34_v5 = vld [vmem:[%s7548_s0 + $0x38] sm:$0xff]   ;;  %v6218_v18 = vld [vmem:[#allocation2 + $0x24] sm:$0xf] }
  0x2b   :  { %5496 = vmatpush3.bf16.msra.mxu0 %v5754_v35  ;;  %v6183_v38 = vcombine.low %v3567_v0, %v3568_v31  ;;  %v687_v40 = vrot.slane %v685_v13, 4  ;;  %v693_v41 = vrot.slane %v691_v15, 5  ;;  %vm498_vm3 = vcmp.ne.s32.totalorder %v6174_v24, 0  ;;  %54 = vst [vmem:[#allocation2 + $0x40] sm:$0xff] %v34_v5   ;;  %v5762_v30 = vld [vmem:[%s7547_s1 + $0x88] sm:$0xff]  }
  0x2c   :  { %5497 = vmatprep.subr.bf16.mxu0 %v5756_v48  ;;  %v684_v35 = vsel %vm5975_vm14, %v679_v19, %v683_v28  ;;  %v697_v8 = vrot.slane %v695_v25, 4  ;;  %v1166_v44 = vshrl.u32 %v4959_v10, 16  ;;  %v1169_v45 = vshll.u32 %v4959_v10, 16  ;;  %vm595_vm7 = vmpackc.low %vm498_vm3, %vm498_vm3  ;;  %v5755_v5 = vld [vmem:[%s7547_s1 + $0xe8] sm:$0xff]   ;;  %v534_v1 = vld [vmem:[#allocation2 + $0x34] sm:$0xf] }
  0x2d   :  { %7638 = vst [vmem:[#allocation9_spill] sm:$0xff] %v6183_v38  ;;  %v688_v49 = vor.u32 %v687_v40, %v683_v28  ;;  %vm6188_vm6 = vcmp.ne.s16.totalorder %v684_v35, 0  ;;  %v611_v61 = vsel %vm595_vm7, 65537, %v7553_v2  ;;  %v884_v56 = vsel %vm5962_vm13, %v528_v52, 0 }
  0x2e   :  { %v803_v60 = vsel %vm6188_vm6, %v6119_v23, 0  ;;  %v1168_v63 = vrot.slane %v1166_v44, 3  ;;  %v1171_v0 = vrot.slane %v1169_v45, 4  ;;  %v5753_v23 = vld [vmem:[%s7547_s1 + $0xf0] sm:$0xff]   ;;  %v711_v9 = vshll.u32 %v611_v61, 16 }
  0x2f   :  { %5498 = vmatpush3.bf16.msra.mxu0 %v5756_v48  ;;  %v6200_v3 = vrot.slane %v688_v49, 4  ;;  %v698_v48 = vor.u32 %v697_v8, %v693_v41  ;;  %v885_v11 = vsel %vm5962_vm13, %v529_v6, 0  ;;  %v67_v12 = vadd.s32 80, %v5870_v4 }
  0x30   :  { %5499 = vmatprep.subr.bf16.mxu0 %v5758_v33  ;;  %v6213_v13 = vor.u32 %v1171_v0, %v1168_v63  ;;  %v4944_v25 = vcombine.low %v884_v56, %v885_v11  ;;  %v6229_v31 = vrot.slane %v711_v9, 5  ;;  %v68_v28 = vadd.s32 88, %v5870_v4 }
  0x31   :  { %7641 = vst [vmem:[#allocation10_spill] sm:$0xff] %v6200_v3  ;;  %v694_v15 = vsel %vm5975_vm14, %v6200_v3, %v693_v41  ;;  %v6220_v19 = vrot.slane %v698_v48, 4  ;;  %v147_v10 = vand.u32 63, %v67_v12  ;;  %v715_v63 = vshrl.u32 %v611_v61, 16 }
  0x32   :  { %vm6225_vm9 = vcmp.ne.s16.totalorder %v694_v15, 0  ;;  %7644 = vst [vmem:[#allocation11_spill] sm:$0xff] %v6229_v31  ;;  %5448 = vmatmul.mubr.bf16.gmra.mxu0 %v4944_v25  ;;  %v154_v49 = vand.u32 63, %v68_v28  ;;  %v886_v11 = vsel %vm5920_vm4, %v6218_v18, 0 }
  0x33   :  { %5500 = vmatpush3.bf16.msra.mxu0 %v5758_v33  ;;  %v1173_v33 = vsel %vm7576_vm5, %v6112_v7, %v6213_v13  ;;  %v804_v35 = vsel %vm6225_vm9, %v528_v52, 0  ;;  %v704_v41 = vsel %vm5975_vm14, %v6220_v19, %v5958_v39  ;;  %v714_v7 = vsel %vm5975_vm14, %v5984_v58, %v6229_v31 }
  0x34   :  { %5501 = vmatprep.subr.bf16.mxu0 %v5760_v62  ;;  %5476 = vmatmul.mubr.bf16.vlgmr.msra.gmra.mxu1 %v1173_v33  ;;  %v4960_v44 = vcombine.low %v803_v60, %v804_v35  ;;  %vm6253_vm11 = vcmp.ne.s16.totalorder %v704_v41, 0  ;;  %vm789_vm12 = vcmp.ne.s16.totalorder %v714_v7, 0  ;;  %v6260_v52 = vand.u32 7, %v147_v10  ;;  %v5764_v10 = vld [vmem:[%s7547_s1 + $0x80] sm:$0xff]  }
  0x35   :  { %5524 = vmatpush3.bf16.msra.mxu1 %v6035_v17  ;;  %v805_v55 = vsel %vm6253_vm11, %v529_v6, 0  ;;  %v806_v48 = vsel %vm789_vm12, %v6218_v18, 0  ;;  %v6266_v9 = vand.u32 7, %v154_v49  ;;  %v6271_v17 = vsel %vm6245_vm10, 65537, %v7553_v2  ;;  %v5757_v35 = vld [vmem:[%s7547_s1 + $0xe0] sm:$0xff]  }
  0x36   :  { %5525 = vmatprep.subr.bf16.mxu1 %v5753_v23  ;;  %v1175_v60 = vshrl.u32 %v4960_v44, 16  ;;  %v1178_v0 = vshll.u32 %v4960_v44, 16  ;;  %v4961_v6 = vcombine.low %v805_v55, %v806_v48  ;;  %vm499_vm15 = vcmp.ne.s32.totalorder %v6260_v52, 0  ;;  %v6286_v18 = vld [vmem:[#allocation2 + $0x28] sm:$0xf]  ;;  %v6297_v48 = vld [vmem:[%s7547_s1 + $0x138] sm:$0xff]  }
  0x37   :  { %5502 = vmatpush3.bf16.msra.mxu0 %v5760_v62  ;;  %v717_v61 = vrot.slane %v715_v63, 4  ;;  %vm500_vm0 = vcmp.ne.s32.totalorder %v6266_v9, 0  ;;  %vm596_vm1 = vmpackc.low %vm499_vm15, %vm499_vm15  ;;  %v532_v55 = vld [vmem:[#allocation2 + $0x2c] sm:$0xf]  ;;  %vm508_vm11 = vcmp.ne.s32.totalorder %v5903_v21, 7 }
  0x38   :  { %5503 = vmatprep.subr.bf16.mxu0 %v5762_v30  ;;  %v1177_v62 = vrot.slane %v1175_v60, 3  ;;  %v1180_v56 = vrot.slane %v1178_v0, 4  ;;  %v1184_v12 = vshrl.u32 %v4961_v6, 16  ;;  %v1187_v15 = vshll.u32 %v4961_v6, 16  ;;  %vm597_vm2 = vmpackc.low %vm500_vm0, %vm500_vm0 }
  0x39   :  { %5526 = vmatpush3.bf16.msra.mxu1 %v5753_v23  ;;  %v612_v25 = vsel %vm596_vm1, 65537, %v7553_v2  ;;  %v718_v28 = vor.u32 %v717_v61, %v6229_v31  ;;  %v613_v23 = vsel %vm597_vm2, 65537, %v7553_v2  ;;  %v887_v0 = vsel %vm5962_vm13, %v6286_v18, 0 }
  0x3a   :  { %v1181_v33 = vor.u32 %v1180_v56, %v1177_v62  ;;  %5527 = vmatprep.subr.bf16.mxu1 %v5755_v5  ;;  %v721_v41 = vshll.u32 %v612_v25, 16  ;;  %v725_v8 = vshrl.u32 %v612_v25, 16  ;;  %v1186_v44 = vrot.slane %v1184_v12, 3  ;;  %v6305_v56 = vld [vmem:[#allocation2 + $0x1c] sm:$0xf] }
  0x3b   :  { %5504 = vmatpush3.bf16.msra.mxu0 %v5762_v30  ;;  %v1189_v7 = vrot.slane %v1187_v15, 4  ;;  %v719_v45 = vrot.slane %v718_v28, 4  ;;  %v731_v30 = vshll.u32 %v613_v23, 16  ;;  %v4945_v61 = vcombine.low %v886_v11, %v887_v0  ;;  %v6310_v28 = vld [vmem:[#allocation2 + $0x30] sm:$0xf] }
  0x3c   :  { %5505 = vmatprep.subr.bf16.mxu0 %v5764_v10  ;;  %v1182_v49 = vsel %vm7576_vm5, %v6213_v13, %v1181_v33  ;;  %v723_v63 = vrot.slane %v721_v41, 5  ;;  %v727_v60 = vrot.slane %v725_v8, 4  ;;  %v69_v62 = vadd.s32 96, %v5870_v4  ;;  %v5759_v13 = vld [vmem:[%s7547_s1 + $0xd8] sm:$0xff]   ;;  %v6330_v0 = vld [vmem:[#allocation2 + $0x20] sm:$0xf] }
  0x3d   :  { %5479 = vmatprep.mubr.bf16.mxu1 %v1182_v49  ;;  %v6299_v6 = vor.u32 %v1189_v7, %v1186_v44  ;;  %5528 = vmatpush3.bf16.msra.mxu1 %v5755_v5  ;;  %v70_v25 = vadd.s32 104, %v5870_v4  ;;  %v735_v41 = vshrl.u32 %v613_v23, 16  ;;  %v888_v44 = vsel %vm5962_vm13, %v532_v55, 0 }
  0x3e   :  { %5529 = vmatprep.subr.bf16.mxu1 %v5757_v35  ;;  %v724_v12 = vsel %vm5975_vm14, %v719_v45, %v723_v63  ;;  %v728_v15 = vor.u32 %v727_v60, %v723_v63  ;;  %5451 = vmatprep.mubr.bf16.mxu0 %v4945_v61  ;;  %v161_v8 = vand.u32 63, %v69_v62  ;;  %v733_v23 = vrot.slane %v731_v30, 5 }
  0x3f   :  { %5506 = vmatpush3.bf16.msra.mxu0 %v5764_v10  ;;  %v1191_v5 = vsel %vm7576_vm5, %v1181_v33, %v6299_v6  ;;  %vm6314_vm3 = vcmp.ne.s16.totalorder %v724_v12, 0  ;;  %v168_v33 = vand.u32 63, %v70_v25  ;;  %v737_v63 = vrot.slane %v735_v41, 4 }
  0x40   :  { %5555 = vmatprep.subr.bf16.mxu0 %v6297_v48  ;;  %5480 = vmatmul.mubr.bf16.gmra.mxu1 %v1191_v5  ;;  %v729_v45 = vrot.slane %v728_v15, 4  ;;  %v807_v10 = vsel %vm6314_vm3, %v6286_v18, 0  ;;  %v6325_v49 = vand.u32 7, %v161_v8  ;;  %v889_v60 = vsel %vm5962_vm13, %v6310_v28, 0  ;;  %v5761_v18 = vld [vmem:[%s7547_s1 + $0xd0] sm:$0xff]  }
  0x41   :  { %5530 = vmatpush3.bf16.msra.mxu1 %v5757_v35  ;;  %v4946_v62 = vcombine.low %v888_v44, %v889_v60  ;;  %v71_v35 = vadd.s32 112, %v5870_v4  ;;  %v72_v30 = vadd.s32 120, %v5870_v4  ;;  %v6346_v25 = vand.u32 7, %v168_v33 }
  0x42   :  { %v734_v61 = vsel %vm5975_vm14, %v729_v45, %v733_v23  ;;  %5531 = vmatprep.subr.bf16.mxu1 %v5759_v13  ;;  %vm501_vm8 = vcmp.ne.s32.totalorder %v6325_v49, 0  ;;  %v738_v5 = vor.u32 %v737_v63, %v733_v23  ;;  %v7663_v31 = vmov 0 }
  0x43   :  { %vm6342_vm7 = vcmp.ne.s16.totalorder %v734_v61, 0  ;;  %vm598_vm10 = vmpackc.low %vm501_vm8, %vm501_vm8  ;;  %5452 = vmatmul.mubr.bf16.gmra.mxu0 %v4946_v62  ;;  %v175_v8 = vand.u32 63, %v71_v35  ;;  %v182_v44 = vand.u32 63, %v72_v30  ;;  %vm502_vm12 = vcmp.ne.s32.totalorder %v6346_v25, 0  ;;  %v6362_v35 = vld [vmem:[#allocation2 + $0x2c] sm:$0xf] }
  0x44   :  { %v808_v41 = vsel %vm6342_vm7, %v532_v55, 0  ;;  %v614_v33 = vsel %vm598_vm10, 65537, %v7553_v2  ;;  %v5763_v55 = vld [vmem:[%s7547_s1 + $0xc8] sm:$0xff]   ;;  %vm599_vm15 = vmpackc.low %vm502_vm12, %vm502_vm12  ;;  %v739_v23 = vrot.slane %v738_v5, 4 }
  0x45   :  { %v4962_v60 = vcombine.low %v807_v10, %v808_v41  ;;  %5532 = vmatpush3.bf16.msra.mxu1 %v5759_v13  ;;  %v741_v63 = vshll.u32 %v614_v33, 16  ;;  %v745_v61 = vshrl.u32 %v614_v33, 16  ;;  %v6360_v62 = vand.u32 7, %v175_v8 }
  0x46   :  { %5533 = vmatprep.subr.bf16.mxu1 %v5761_v18  ;;  %v615_v41 = vsel %vm599_vm15, 65537, %v7553_v2  ;;  %v6365_v12 = vand.u32 7, %v182_v44  ;;  %v7655_v44 = vmov 0   ;;  %vm6416_vm15 = vmpackc.low %vm508_vm11, %vm508_vm11 }
  0x47   :  { %7653 = vst [vmem:[#allocation12_spill] sm:$0xff] %v6360_v62  ;;  %v1193_v30 = vshrl.u32 %v4962_v60, 16  ;;  %v1196_v10 = vshll.u32 %v4962_v60, 16  ;;  %v743_v13 = vrot.slane %v741_v63, 5  ;;  %v747_v45 = vrot.slane %v745_v61, 4  ;;  %v5765_v61 = vld [vmem:[%s7547_s1 + $0xc0] sm:$0xff]  }
  0x48   :  { %7654 = vst [vmem:[#allocation13_spill] sm:$0xff] %v6365_v12  ;;  %v751_v7 = vshll.u32 %v615_v41, 16  ;;  %vm503_vm0 = vcmp.ne.s32.totalorder %v6360_v62, 0  ;;  %vm504_vm1 = vcmp.ne.s32.totalorder %v6365_v12, 0  ;;  %v755_v8 = vshrl.u32 %v615_v41, 16 }
  0x49   :  { %v1195_v40 = vrot.slane %v1193_v30, 3  ;;  %v1198_v5 = vrot.slane %v1196_v10, 4  ;;  %5534 = vmatpush3.bf16.msra.mxu1 %v5761_v18  ;;  %vm600_vm2 = vmpackc.low %vm503_vm0, %vm503_vm0  ;;  %v744_v60 = vsel %vm5975_vm14, %v739_v23, %v743_v13  ;;  %v748_v33 = vor.u32 %v747_v45, %v743_v13  ;;  %v6381_v10 = vld [vmem:[#allocation2 + $0x38] sm:$0xf] }
  0x4a   :  { %v753_v2 = vrot.slane %v751_v7, 5  ;;  %vm601_vm8 = vmpackc.low %vm504_vm1, %vm504_vm1  ;;  %v616_v63 = vsel %vm600_vm2, 65537, %v7655_v44  ;;  %5535 = vmatprep.subr.bf16.mxu1 %v5763_v55  ;;  %vm6377_vm10 = vcmp.ne.s16.totalorder %v744_v60, 0  ;;  %v757_v45 = vrot.slane %v755_v8, 4  ;;  %v6395_v60 = vld [vmem:[#allocation2 + $0x34] sm:$0xf] }
  0x4b   :  { %v6375_v30 = vor.u32 %v1198_v5, %v1195_v40  ;;  %v617_v23 = vsel %vm601_vm8, 65537, %v7655_v44  ;;  %v749_v41 = vrot.slane %v748_v33, 4  ;;  %v809_v13 = vsel %vm6377_vm10, %v6310_v28, 0  ;;  %v536_v7 = vld [vmem:[#allocation2 + $0x3c] sm:$0xf] }
  0x4c   :  { %v890_v40 = vsel %vm5962_vm13, %v534_v1, 0  ;;  %v758_v26 = vor.u32 %v757_v45, %v753_v2  ;;  %v761_v8 = vshll.u32 %v616_v63, 16  ;;  %v765_v58 = vshrl.u32 %v616_v63, 16 }
  0x4d   :  { %v1200_v5 = vsel %vm7576_vm5, %v6299_v6, %v6375_v30  ;;  %5536 = vmatpush3.bf16.msra.mxu1 %v5763_v55  ;;  %v754_v33 = vsel %vm5975_vm14, %v749_v41, %v753_v2  ;;  %v771_v3 = vshll.u32 %v617_v23, 16  ;;  %v891_v28 = vsel %vm5962_vm13, %v6381_v10, 0  ;;  %v6405_v6 = vld [vmem:[%s7547_s1 + $0x178] sm:$0xff]  }
  0x4e   :  { %5483 = vmatprep.mubr.bf16.mxu1 %v1200_v5  ;;  %v775_v39 = vshrl.u32 %v617_v23, 16  ;;  %5537 = vmatprep.subr.bf16.mxu1 %v5765_v61  ;;  %vm6407_vm12 = vcmp.ne.s16.totalorder %v754_v33, 0  ;;  %v759_v55 = vrot.slane %v758_v26, 4  ;;  %v763_v45 = vrot.slane %v761_v8, 5  ;;  %v6411_v41 = vld [vmem:[#allocation2 + $0x3c] sm:$0xf] }
  0x4f   :  { %v767_v2 = vrot.slane %v765_v58, 4  ;;  %7660 = vst [vmem:[#allocation14_spill] sm:$0xff] %v6411_v41  ;;  %v537_v5 = vld [vmem:[#allocation2 + $0x40] sm:$0xf]  ;;  %v810_v38 = vsel %vm6407_vm12, %v534_v1, 0  ;;  %v773_v33 = vrot.slane %v771_v3, 5  ;;  %v4947_v47 = vcombine.low %v890_v40, %v891_v28 }
  0x50   :  { %v777_v12 = vrot.slane %v775_v39, 4  ;;  %v4963_v62 = vcombine.low %v809_v13, %v810_v38  ;;  %v764_v26 = vsel %vm5975_vm14, %v759_v55, %v763_v45  ;;  %v892_v8 = vsel %vm5962_vm13, %v536_v7, 0  ;;  %v6433_v1 = vld [vmem:[#allocation2 + $0x40] sm:$0xf]  ;;  %v1957_v40 = vld [vmem:[#allocation2 + $0x44] sm:$0xf] }
  0x51   :  { %v768_v58 = vor.u32 %v767_v2, %v763_v45  ;;  %5538 = vmatpush3.bf16.msra.mxu1 %v5765_v61  ;;  %vm6429_vm11 = vcmp.ne.s16.totalorder %v764_v26, 0  ;;  %5455 = vmatprep.mubr.bf16.mxu0 %v4947_v47  ;;  %v893_v38 = vsel %vm5962_vm13, %v537_v5, 0  ;;  %v1465_v28 = vsel %vm6416_vm15, 65537, %v7655_v44 }
  0x52   :  { %v7664_v31 = vsel %vm6429_vm11, 4294967295, %v7663_v31  ;;  %v778_v39 = vor.u32 %v777_v12, %v773_v33  ;;  %5587 = vmatprep.subr.bf16.mxu1 %v6405_v6  ;;  %v1202_v3 = vshrl.u32 %v4963_v62, 16  ;;  %v1205_v13 = vshll.u32 %v4963_v62, 16  ;;  %v6482_v12 = vld [vmem:[#allocation2 + $0x8] sm:$0xf] }
  0x53   :  { %7665 = vst [vmem:[#allocation15_spill] sm:$0xff] %v7664_v31  ;;  %v6438_v61 = vrot.slane %v768_v58, 4  ;;  %v811_v47 = vsel %vm6429_vm11, %v6381_v10, 0  ;;  %v4948_v45 = vcombine.low %v892_v8, %v893_v38  ;;  %vm1478_vm1 = vsmask.f32 256 }
  0x54   :  { %v779_v55 = vrot.slane %v778_v39, 4  ;;  %v1204_v62 = vrot.slane %v1202_v3, 3  ;;  %v1207_v2 = vrot.slane %v1205_v13, 4  ;;  %vm1479_vm15 = vsmask.f32 4368 }
  0x55   :  { %7666 = vst [vmem:[#allocation16_spill] sm:$0xff] %v6438_v61  ;;  %v774_v26 = vsel %vm5975_vm14, %v6438_v61, %v773_v33  ;;  %5456 = vmatmul.mubr.bf16.gmra.mxu0 %v4948_v45  ;;  %v7669_v10 = vshll.u32 %v6030_v16, 16  ;;  %vm6467_vm0 = vmor %vm1478_vm1, %vm1479_vm15  ;;  %v1502_v33 = vshll.u32 %v6067_v32, 16  ;;  %v1508_v61 = vshrl.u32 %v1465_v28, 16 }
  0x56   :  { %vm6453_vm2 = vcmp.ne.s16.totalorder %v774_v26, 0  ;;  %vm796_vm8 = vcmp.ne.s16.totalorder %v779_v55, 0  ;;  %v1208_v8 = vor.u32 %v1207_v2, %v1204_v62  ;;  %v1381_v2 = vld [vmem:[#allocation2 + $0x4] sm:$0xf]  ;;  %v7674_v26 = vshrl.u32 %v6067_v32, 16 }
  0x57   :  { %v6460_v58 = vor.u32 %v7669_v10, %v6095_v57  ;;  %v812_v39 = vsel %vm6453_vm2, %v536_v7, 0  ;;  %v813_v38 = vsel %vm796_vm8, %v537_v5, 0  ;;  %v2214_v45 = vsel %vm796_vm8, %v1957_v40, 0 }
  0x58   :  { %v4964_v13 = vcombine.low %v811_v47, %v812_v39  ;;  %v4965_v55 = vcombine.low %v813_v38, %v813_v38  ;;  %v1209_v7 = vsel %vm7576_vm5, %v6375_v30, %v1208_v8  ;;  %v6477_v62 = vcombine.low %v2214_v45, %v2214_v45 }
  0x59   :  { %7670 = vst [vmem:[#allocation17_spill] sm:$0xff] %v6460_v58  ;;  %v1496_v16 = vsel %vm6467_vm0, %v6089_v53, %v6460_v58  ;;  %v1497_v5 = vrot.slane %v6095_v57, 4  ;;  %v1501_v10 = vrot.slane %v7674_v26, 7  ;;  %5484 = vmatmul.mubr.bf16.gmra.mxu1 %v1209_v7  ;;  %v1511_v30 = vshll.u32 %v1465_v28, 16 }
  0x5a   :  { %7673 = vst [vmem:[#allocation18_spill] sm:$0xff] %v6477_v62  ;;  %v1211_v47 = vshrl.u32 %v4964_v13, 16  ;;  %v1214_v39 = vshll.u32 %v4964_v13, 16  ;;  %v1220_v40 = vshrl.u32 %v4965_v55, 16  ;;  %v1223_v38 = vshll.u32 %v4965_v55, 16 }
  0x5b   :  { %v1506_v21 = vrot.slane %v1501_v10, 4  ;;  %v1504_v57 = vor.u32 %v1502_v33, %v1501_v10  ;;  %v1510_v41 = vrot.slane %v1508_v61, 7  ;;  %vm1624_vm1 = vcmp.ne.s16.totalorder %v6048_v22, 0 }
  0x5c   :  { %v1213_v45 = vrot.slane %v1211_v47, 3  ;;  %v1216_v46 = vrot.slane %v1214_v39, 4  ;;  %v1222_v58 = vrot.slane %v1220_v40, 3  ;;  %v1225_v62 = vrot.slane %v1223_v38, 4 }
  0x5d   :  { %vm1625_vm8 = vcmp.ne.s16.totalorder %v1496_v16, 0  ;;  %v1641_v26 = vsel %vm1624_vm1, %v1381_v2, 0  ;;  %v6489_v32 = vsel %vm6467_vm0, %v1497_v5, %v1504_v57  ;;  %v1513_v31 = vor.u32 %v1511_v30, %v1510_v41 }
  0x5e   :  { %v1217_v7 = vor.u32 %v1216_v46, %v1213_v45  ;;  %v1226_v13 = vor.u32 %v1225_v62, %v1222_v58  ;;  %v1642_v55 = vsel %vm1625_vm8, %v6482_v12, 0  ;;  %7675 = vst [vmem:[#allocation19_spill] sm:$0xff] %v6489_v32  ;;  %vm7598_vm15 = vsmask.f32 7424 }
  0x5f   :  { %v4990_v28 = vcombine.low %v1641_v26, %v1642_v55  ;;  %vm7676_vm5 = vcmp.ne.s32.totalorder %v6097_v59, 7  ;;  %vm7679_vm13 = vsmask.f32 4352  ;;  %vm7584_vm1 = vcmp.ne.s16.totalorder %v6489_v32, 0 }
  0x60   :  { %vm6494_vm4 = vmpackc.low %vm7676_vm5, %vm7676_vm5  ;;  %v1218_v46 = vsel %vm7679_vm13, %v1208_v8, %v1217_v7  ;;  %v77_v33 = vand.u32 63, %v5870_v4  ;;  %v6504_v16 = vsel %vm6467_vm0, %v1506_v21, %v1513_v31  ;;  %v1643_v59 = vsel %vm7584_vm1, %v6018_v14, 0 }
  0x61   :  { %vm7680_vm11 = vmmov %vm7679_vm13  ;;  %5487 = vmatprep.mubr.bf16.mxu1 %v1218_v46  ;;  %7681 = vst [vmem:[#allocation20_spill] sm:$0xff] %v6504_v16  ;;  %v1720_v62 = vshrl.u32 %v4990_v28, 16  ;;  %v1722_v2 = vshll.u32 %v4990_v28, 16  ;;  %vm7583_vm13 = vcmp.ne.s16.totalorder %v6504_v16, 0  ;;  %v2284_v5 = vshrl.u32 %v6080_v43, 16 }
  0x62   :  { %v1227_v58 = vsel %vm7680_vm11, %v1217_v7, %v1226_v13  ;;  %v6510_v8 = vand.u32 7, %v77_v33  ;;  %v2287_v10 = vshll.u32 %v6080_v43, 16  ;;  %v1644_v31 = vsel %vm7583_vm13, %v6044_v20, 0 }
  0x63   :  { %5488 = vmatmul.mubr.bf16.gmra.mxu1 %v1227_v58  ;;  %v1724_v21 = vrot.slane %v1722_v2, 1  ;;  %v1467_v14 = vsel %vm6494_vm4, 65537, %v7655_v44  ;;  %v1515_v47 = vrot.slane %v1510_v41, 4  ;;  %v4991_v39 = vcombine.low %v1643_v59, %v1644_v31  ;;  %v1956_v41 = vld [vmem:[#allocation2 + $0x4] sm:$0x8] }
  0x64   :  { %vm489_vm5 = vcmp.ne.s32.totalorder %v6510_v8, 0  ;;  %v2286_v40 = vrot.slane %v2284_v5, 3  ;;  %v2289_v38 = vrot.slane %v2287_v10, 4  ;;  %v7682_v45 = vshrl.u32 %v6271_v17, 16 }
  0x65   :  { %v1725_v30 = vor.u32 %v1724_v21, %v1720_v62  ;;  %vm1990_vm11 = vmpackc.low %vm489_vm5, %vm489_vm5  ;;  %v1520_v57 = vshll.u32 %v6271_v17, 16  ;;  %v1526_v7 = vshrl.u32 %v1467_v14, 16  ;;  %v1727_v20 = vshll.u32 %v4991_v39, 16 }
  0x66   :  { %v1519_v43 = vrot.slane %v7682_v45, 7  ;;  %v1731_v13 = vshrl.u32 %v4991_v39, 16  ;;  %v2006_v26 = vsel %vm1990_vm11, 65537, %v7655_v44  ;;  %v6525_v55 = vor.u32 %v2289_v38, %v2286_v40 }
  0x67   :  { %v2023_v28 = vshll.u32 %v2006_v26, 16  ;;  %v2026_v61 = vshrl.u32 %v2006_v26, 16  ;;  %v1729_v33 = vrot.slane %v1727_v20, 1  ;;  %v1528_v59 = vrot.slane %v1526_v7, 7 }
  0x68   :  { %v1522_v46 = vor.u32 %v1520_v57, %v1519_v43  ;;  %v1524_v58 = vrot.slane %v1519_v43, 4  ;;  %v1529_v62 = vshll.u32 %v1467_v14, 16  ;;  %v2293_v2 = vshrl.u32 %v6181_v36, 16 }
  0x69   :  { %v6528_v5 = vrot.slane %v2023_v28, 5  ;;  %v2028_v17 = vrot.slane %v2026_v61, 4  ;;  %v2296_v31 = vshll.u32 %v6181_v36, 16  ;;  %v1730_v21 = vsel %vm7598_vm15, %v1725_v30, %v1729_v33  ;;  %v5790_v61 = vld [vmem:[%s7547_s1 + $0x1e8] sm:$0xff]  }
  0x6a   :  { %v6532_v10 = vsel %vm6467_vm0, %v1515_v47, %v1522_v46  ;;  %v1733_v39 = vor.u32 %v1731_v13, %v1729_v33  ;;  %v1531_v40 = vor.u32 %v1529_v62, %v1528_v59  ;;  %5507 = vmatprep.mubr.bf16.mxu0 %v1730_v21  ;;  %v2295_v45 = vrot.slane %v2293_v2, 3 }
  0x6b   :  { %7683 = vst [vmem:[#allocation21_spill] sm:$0xff] %v6532_v10  ;;  %vm7585_vm4 = vcmp.ne.s16.totalorder %v6532_v10, 0  ;;  %v2029_v14 = vor.u32 %v2028_v17, %v6528_v5  ;;  %vm7586_vm8 = vcmp.ne.s16.totalorder %v6528_v5, 0  ;;  %v2298_v30 = vrot.slane %v2296_v31, 4 }
  0x6c   :  { %v1645_v38 = vsel %vm7585_vm4, %v6123_v29, 0  ;;  %v2198_v47 = vsel %vm7586_vm8, %v1956_v41, 0  ;;  %v6546_v36 = vsel %vm6467_vm0, %v1524_v58, %v1531_v40  ;;  %vm511_vm5 = vcmp.ne.s32.totalorder %v6132_v34, 7 }
  0x6d   :  { %7684 = vst [vmem:[#allocation22_spill] sm:$0xff] %v6546_v36  ;;  %v2030_v43 = vrot.slane %v2029_v14, 4  ;;  %vm7587_vm11 = vcmp.ne.s16.totalorder %v6546_v36, 0  ;;  %vm512_vm13 = vcmp.ne.s32.totalorder %v6137_v37, 7  ;;  %vm1452_vm1 = vmpackc.low %vm511_vm5, %vm511_vm5  ;;  %v1533_v57 = vrot.slane %v1528_v59, 4 }
  0x6e   :  { %vm515_vm4 = vcmp.ne.s32.totalorder %v6260_v52, 7  ;;  %v1646_v29 = vsel %vm7587_vm11, %v6155_v51, 0  ;;  %v2299_v7 = vor.u32 %v2298_v30, %v2295_v45  ;;  %vm1453_vm8 = vmpackc.low %vm512_vm13, %vm512_vm13  ;;  %v1468_v20 = vsel %vm1452_vm1, 65537, %v7655_v44  ;;  %v5772_v52 = vld [vmem:[%s7547_s1 + $0x120] sm:$0xff]  }
  0x6f   :  { %v7685_v34 = vsel %vm6225_vm9, %v6330_v0, 0  ;;  %v7686_v37 = vsel %vm6188_vm6, %v6305_v56, 0  ;;  %v2035_v26 = vsel %vm5975_vm14, %v2030_v43, %v5960_v42  ;;  %v4992_v41 = vcombine.low %v1645_v38, %v1646_v29  ;;  %v5768_v29 = vld [vmem:[%s7547_s1 + $0x130] sm:$0xff]  }
  0x70   :  { %v5026_v13 = vcombine.low %v7686_v37, %v7685_v34  ;;  %v1469_v51 = vsel %vm1453_vm8, 65537, %v7655_v44  ;;  %v1535_v28 = vshrl.u32 %v1468_v20, 16  ;;  %vm6568_vm13 = vcmp.ne.s16.totalorder %v2035_v26, 0 }
  0x71   :  { %vm7689_vm1 = vsmask.f32 4352  ;;  %v1538_v46 = vshll.u32 %v1468_v20, 16  ;;  %v1544_v58 = vshrl.u32 %v1469_v51, 16  ;;  %v2199_v33 = vsel %vm6568_vm13, %v6482_v12, 0 }
  0x72   :  { %v2300_v27 = vsel %vm7689_vm1, %v6525_v55, %v2299_v7  ;;  %v1735_v59 = vshll.u32 %v4992_v41, 16  ;;  %v6577_v62 = vrot.slane %v1535_v28, 7  ;;  %v1547_v42 = vshll.u32 %v1469_v51, 16 }
  0x73   :  { %v5023_v2 = vcombine.low %v2198_v47, %v2199_v33  ;;  %v6579_v17 = vrot.slane %v1544_v58, 7  ;;  %v1739_v31 = vshrl.u32 %v4992_v41, 16  ;;  %v2302_v21 = vshrl.u32 %v5026_v13, 16  ;;  %v5769_v58 = vld [vmem:[%s7547_s1 + $0x170] sm:$0xff]  }
  0x74   :  { %7690 = vst [vmem:[#allocation23_spill] sm:$0xff] %v6577_v62  ;;  %v1737_v40 = vrot.slane %v1735_v59, 1  ;;  %v1540_v14 = vor.u32 %v1538_v46, %v6577_v62  ;;  %v7593_v38 = vrot.slane %v6577_v62, 4  ;;  %v2305_v45 = vshll.u32 %v5026_v13, 16 }
  0x75   :  { %v2276_v30 = vshrl.u32 %v5023_v2, 16  ;;  %v2279_v43 = vshll.u32 %v5023_v2, 16  ;;  %v1549_v47 = vor.u32 %v1547_v42, %v6579_v17  ;;  %v2304_v20 = vrot.slane %v2302_v21, 3  ;;  %v6621_v2 = vld [vmem:[#allocation2 + $0x24] sm:$0xf] }
  0x76   :  { %v1738_v34 = vsel %vm7598_vm15, %v1733_v39, %v1737_v40  ;;  %v6591_v37 = vsel %vm6467_vm0, %v1533_v57, %v1540_v14  ;;  %v1741_v26 = vor.u32 %v1739_v31, %v1737_v40  ;;  %v2307_v41 = vrot.slane %v2305_v45, 4 }
  0x77   :  { %7691 = vst [vmem:[#allocation24_spill] sm:$0xff] %v6591_v37  ;;  %v2278_v13 = vrot.slane %v2276_v30, 3  ;;  %v2281_v51 = vrot.slane %v2279_v43, 4  ;;  %5508 = vmatmul.mubr.bf16.vlgmr.msra.gmra.mxu0 %v1738_v34  ;;  %v6597_v28 = vsel %vm6467_vm0, %v7593_v38, %v1549_v47  ;;  %vm7588_vm8 = vcmp.ne.s16.totalorder %v6591_v37, 0 }
  0x78   :  { %5556 = vmatpush3.bf16.msra.mxu0 %v6297_v48  ;;  %vm7589_vm5 = vcmp.ne.s16.totalorder %v6597_v28, 0  ;;  %v1647_v39 = vsel %vm7588_vm8, %v6305_v56, 0  ;;  %v6605_v57 = vor.u32 %v2307_v41, %v2304_v20  ;;  %vm514_vm1 = vcmp.ne.s32.totalorder %v6174_v24, 7  ;;  %v5770_v56 = vld [vmem:[%s7547_s1 + $0x128] sm:$0xff]  }
  0x79   :  { %v2282_v46 = vor.u32 %v2281_v51, %v2278_v13  ;;  %5557 = vmatprep.subr.bf16.mxu0 %v5768_v29  ;;  %v1648_v48 = vsel %vm7589_vm5, %v6330_v0, 0  ;;  %vm1455_vm11 = vmpackc.low %vm514_vm1, %vm514_vm1  ;;  %v7594_v33 = vrot.slane %v6579_v17, 4  ;;  %v65_v59 = vadd.s32 64, %v5870_v4  ;;  %v5771_v51 = vld [vmem:[%s7547_s1 + $0x168] sm:$0xff]  }
  0x7a   :  { %v4993_v24 = vcombine.low %v1647_v39, %v1648_v48  ;;  %vm7692_vm8 = vsmask.f32 4352  ;;  %v1471_v31 = vsel %vm1455_vm11, 65537, %v7655_v44  ;;  %vm516_vm9 = vcmp.ne.s32.totalorder %v6266_v9, 7  ;;  %vm6628_vm1 = vmpackc.low %vm515_vm4, %vm515_vm4 }
  0x7b   :  { %v2309_v42 = vsel %vm7692_vm8, %v2299_v7, %v6605_v57  ;;  %vm7695_vm5 = vmmov %vm7692_vm8  ;;  %v1559_v7 = vsel %vm6467_vm0, %v7594_v33, %v6048_v22  ;;  %v1562_v21 = vshrl.u32 %v1471_v31, 16  ;;  %v1565_v40 = vshll.u32 %v1471_v31, 16  ;;  %v5777_v31 = vld [vmem:[%s7547_s1 + $0x150] sm:$0xff]  }
  0x7c   :  { %v2291_v4 = vsel %vm7695_vm5, %v2282_v46, %v6525_v55  ;;  %vm1457_vm11 = vmpackc.low %vm516_vm9, %vm516_vm9  ;;  %5558 = vmatpush3.bf16.msra.mxu0 %v5768_v29  ;;  %v1743_v9 = vshll.u32 %v4993_v24, 16  ;;  %vm1632_vm4 = vcmp.ne.s16.totalorder %v1559_v7, 0  ;;  %v1747_v14 = vshrl.u32 %v4993_v24, 16  ;;  %v6642_v55 = vld [vmem:[#allocation2 + $0x30] sm:$0xf] }
  0x7d   :  { %5539 = vmatprep.mubr.bf16.mxu1 %v2291_v4  ;;  %v133_v45 = vand.u32 63, %v65_v59  ;;  %v1564_v30 = vrot.slane %v1562_v21, 7  ;;  %v1649_v43 = vsel %vm1632_vm4, %v6621_v2, 0  ;;  %5559 = vmatprep.subr.bf16.mxu0 %v5770_v56  ;;  %v1472_v47 = vsel %vm6628_vm1, 65537, %v7655_v44  ;;  %v6658_v24 = vld [vmem:[#allocation2 + $0x28] sm:$0xf] }
  0x7e   :  { %5540 = vmatmul.mubr.bf16.vlgmr.msra.gmra.mxu1 %v2300_v27  ;;  %v1473_v20 = vsel %vm1457_vm11, 65537, %v7655_v44  ;;  %v1745_v29 = vrot.slane %v1743_v9, 1  ;;  %v1571_v41 = vshrl.u32 %v1472_v47, 16  ;;  %v1574_v13 = vshll.u32 %v1472_v47, 16 }
  0x7f   :  { %5588 = vmatpush3.bf16.msra.mxu1 %v6405_v6  ;;  %5543 = vmatprep.mubr.bf16.mxu1 %v2309_v42  ;;  %v6650_v34 = vand.u32 7, %v133_v45  ;;  %v6652_v27 = vor.u32 %v1565_v40, %v1564_v30  ;;  %v1569_v39 = vrot.slane %v1564_v30, 4  ;;  %v1580_v46 = vshrl.u32 %v1473_v20, 16  ;;  %v5773_v45 = vld [vmem:[%s7547_s1 + $0x160] sm:$0xff]  }
  0x80   :  { %5589 = vmatprep.subr.bf16.mxu1 %v5769_v58  ;;  %v1583_v48 = vshll.u32 %v1473_v20, 16  ;;  %v1746_v59 = vsel %vm7598_vm15, %v1741_v26, %v1745_v29  ;;  %v1749_v6 = vor.u32 %v1747_v14, %v1745_v29  ;;  %5560 = vmatpush3.bf16.msra.mxu0 %v5770_v56  ;;  %v1573_v42 = vrot.slane %v1571_v41, 7 }
  0x81   :  { %vm497_vm9 = vcmp.ne.s32.totalorder %v6650_v34, 0  ;;  %vm7696_vm8 = vcmp.ne.s32.totalorder %v6325_v49, 7  ;;  %5511 = vmatprep.mubr.bf16.mxu0 %v1746_v59  ;;  %v1568_v26 = vsel %vm6467_vm0, %v6089_v53, %v6652_v27  ;;  %5561 = vmatprep.subr.bf16.mxu0 %v5772_v52  ;;  %v6672_v0 = vrot.slane %v1580_v46, 7  ;;  %v5774_v49 = vld [vmem:[%s7547_s1 + $0x118] sm:$0xff]  }
  0x82   :  { %vm6664_vm5 = vmpackc.low %vm7696_vm8, %vm7696_vm8  ;;  %v2209_v56 = vsel %vm6342_vm7, %v6642_v55, 0  ;;  %vm518_vm11 = vcmp.ne.s32.totalorder %v6346_v25, 7  ;;  %vm1633_vm4 = vcmp.ne.s16.totalorder %v1568_v26, 0  ;;  %v1576_v7 = vor.u32 %v1574_v13, %v1573_v42 }
  0x83   :  { %vm1998_vm1 = vmpackc.low %vm497_vm9, %vm497_vm9  ;;  %5590 = vmatpush3.bf16.msra.mxu1 %v5769_v58  ;;  %v1578_v21 = vrot.slane %v1573_v42, 4  ;;  %v1650_v40 = vsel %vm1633_vm4, %v6658_v24, 0  ;;  %v1585_v30 = vor.u32 %v1583_v48, %v6672_v0  ;;  %v7700_v20 = vsel %vm6314_vm3, %v6362_v35, 0 }
  0x84   :  { %v2014_v4 = vsel %vm1998_vm1, 65537, %v7655_v44  ;;  %5591 = vmatprep.subr.bf16.mxu1 %v5771_v51  ;;  %v4994_v47 = vcombine.low %v1649_v43, %v1650_v40  ;;  %5562 = vmatpush3.bf16.msra.mxu0 %v5772_v52  ;;  %v6689_v58 = vsel %vm6467_vm0, %v1569_v39, %v1576_v7  ;;  %v5028_v29 = vcombine.low %v7700_v20, %v2209_v56  ;;  %v5775_v52 = vld [vmem:[%s7547_s1 + $0x158] sm:$0xff]   ;;  %v5776_v39 = vld [vmem:[%s7547_s1 + $0x110] sm:$0xff]  }
  0x85   :  { %v2102_v9 = vshll.u32 %v2014_v4, 16  ;;  %v2106_v14 = vshrl.u32 %v2014_v4, 16  ;;  %7699 = vst [vmem:[#allocation25_spill] sm:$0xff] %v6689_v58  ;;  %v1474_v41 = vsel %vm6664_vm5, 65537, %v7655_v44  ;;  %v6702_v43 = vsel %vm6467_vm0, %v1578_v21, %v1585_v30  ;;  %5563 = vmatprep.subr.bf16.mxu0 %v5774_v49  ;;  %vm6718_vm5 = vmpackc.low %vm518_vm11, %vm518_vm11  ;;  %v6740_v30 = vld [vmem:[#allocation2 + $0x38] sm:$0xf] }
  0x86   :  { %7701 = vst [vmem:[#allocation26_spill] sm:$0xff] %v6702_v43  ;;  %vm7591_vm9 = vcmp.ne.s16.totalorder %v6689_v58, 0  ;;  %v1751_v48 = vshll.u32 %v4994_v47, 16  ;;  %vm7590_vm8 = vcmp.ne.s16.totalorder %v6702_v43, 0  ;;  %v1755_v42 = vshrl.u32 %v4994_v47, 16 }
  0x87   :  { %v6698_v13 = vrot.slane %v2102_v9, 5  ;;  %v2108_v46 = vrot.slane %v2106_v14, 4  ;;  %5592 = vmatpush3.bf16.msra.mxu1 %v5771_v51  ;;  %v1651_v59 = vsel %vm7591_vm9, %v6362_v35, 0  ;;  %v1652_v35 = vsel %vm7590_vm8, %v6642_v55, 0 }
  0x88   :  { %5593 = vmatprep.subr.bf16.mxu1 %v5773_v45  ;;  %v2320_v56 = vshrl.u32 %v5028_v29, 16  ;;  %v1753_v4 = vrot.slane %v1751_v48, 1  ;;  %v4995_v7 = vcombine.low %v1651_v59, %v1652_v35  ;;  %v2323_v21 = vshll.u32 %v5028_v29, 16  ;;  %5564 = vmatpush3.bf16.msra.mxu0 %v5774_v49  ;;  %v7706_v48 = vld [vmem:[#allocation11_spill] sm:$0xff] }
  0x89   :  { %v2105_v26 = vsel %vm5975_vm14, %v6220_v19, %v6698_v13  ;;  %v2109_v51 = vor.u32 %v2108_v46, %v6698_v13  ;;  %v5778_v19 = vld [vmem:[%s7547_s1 + $0x108] sm:$0xff]   ;;  %v1475_v47 = vsel %vm6718_vm5, 65537, %v7655_v44  ;;  %5565 = vmatprep.subr.bf16.mxu0 %v5776_v39  ;;  %v1592_v35 = vshll.u32 %v1474_v41, 16 }
  0x8a   :  { %vm6730_vm1 = vcmp.ne.s16.totalorder %v2105_v26, 0  ;;  %v2322_v14 = vrot.slane %v2320_v56, 3  ;;  %v1754_v20 = vsel %vm7598_vm15, %v1749_v6, %v1753_v4  ;;  %v1757_v49 = vor.u32 %v1755_v42, %v1753_v4  ;;  %v5798_v6 = vld [vmem:[%s7547_s1 + $0x1d0] sm:$0xff]  }
  0x8b   :  { %v2110_v40 = vrot.slane %v2109_v51, 4  ;;  %v2206_v9 = vsel %vm6730_vm1, %v6621_v2, 0  ;;  %5594 = vmatpush3.bf16.msra.mxu1 %v5773_v45  ;;  %v1759_v29 = vshll.u32 %v4995_v7, 16  ;;  %v2325_v46 = vrot.slane %v2323_v21, 4  ;;  %5512 = vmatmul.mubr.bf16.gmra.mxu0 %v1754_v20 }
  0x8c   :  { %v1587_v26 = vrot.slane %v6672_v0, 4  ;;  %v1589_v51 = vshrl.u32 %v1474_v41, 16  ;;  %5595 = vmatprep.subr.bf16.mxu1 %v5775_v52  ;;  %v1598_v56 = vshrl.u32 %v1475_v47, 16  ;;  %5566 = vmatpush3.bf16.msra.mxu0 %v5776_v39  ;;  %v5780_v0 = vld [vmem:[%s7547_s1 + $0x100] sm:$0xff]   ;;  %v1601_v25 = vshll.u32 %v1475_v47, 16 }
  0x8d   :  { %v2115_v59 = vsel %vm5975_vm14, %v2110_v40, %v7706_v48  ;;  %v1761_v45 = vrot.slane %v1759_v29, 1  ;;  %v6757_v42 = vor.u32 %v2325_v46, %v2322_v14  ;;  %v1763_v21 = vshrl.u32 %v4995_v7, 16  ;;  %5567 = vmatprep.subr.bf16.mxu0 %v5778_v19 }
  0x8e   :  { %vm6753_vm11 = vcmp.ne.s16.totalorder %v2115_v59, 0  ;;  %v1591_v4 = vrot.slane %v1589_v51, 7  ;;  %v6766_v29 = vrot.slane %v1598_v56, 7  ;;  %v2211_v39 = vsel %vm6407_vm12, %v6740_v30, 0 }
  0x8f   :  { %v2207_v41 = vsel %vm6753_vm11, %v6658_v24, 0  ;;  %v1762_v20 = vsel %vm7598_vm15, %v1757_v49, %v1761_v45  ;;  %5596 = vmatpush3.bf16.msra.mxu1 %v5775_v52  ;;  %v6771_v48 = vor.u32 %v1763_v21, %v1761_v45  ;;  %v7709_v7 = vsel %vm6377_vm10, %v6395_v60, 0  ;;  %v7710_v52 = vld [vmem:[#allocation12_spill] sm:$0xff] }
  0x90   :  { %v5027_v40 = vcombine.low %v2206_v9, %v2207_v41  ;;  %5515 = vmatprep.mubr.bf16.mxu0 %v1762_v20  ;;  %v1594_v14 = vor.u32 %v1592_v35, %v1591_v4  ;;  %v1596_v46 = vrot.slane %v1591_v4, 4  ;;  %v5029_v47 = vcombine.low %v7709_v7, %v2211_v39  ;;  %5597 = vmatprep.subr.bf16.mxu1 %v5777_v31  ;;  %v5779_v9 = vld [vmem:[%s7547_s1 + $0x148] sm:$0xff]   ;;  %v7711_v41 = vld [vmem:[#allocation13_spill] sm:$0xff] }
  0x91   :  { %v1603_v51 = vor.u32 %v1601_v25, %v6766_v29  ;;  %vm519_vm4 = vcmp.ne.s32.totalorder %v7710_v52, 7  ;;  %5568 = vmatpush3.bf16.msra.mxu0 %v5778_v19  ;;  %vm520_vm5 = vcmp.ne.s32.totalorder %v7711_v41, 7  ;;  %v6794_v25 = vld [vmem:[%s7547_s1 + $0x1b8] sm:$0xff]  }
  0x92   :  { %v2311_v49 = vshrl.u32 %v5027_v40, 16  ;;  %v2314_v59 = vshll.u32 %v5027_v40, 16  ;;  %v6784_v35 = vsel %vm6467_vm0, %v1587_v26, %v1594_v14  ;;  %v2329_v45 = vshrl.u32 %v5029_v47, 16  ;;  %vm6787_vm1 = vmpackc.low %vm519_vm4, %vm519_vm4  ;;  %5569 = vmatprep.subr.bf16.mxu0 %v5780_v0  ;;  %v5781_v14 = vld [vmem:[%s7547_s1 + $0x140] sm:$0xff]  }
  0x93   :  { %v2332_v56 = vshll.u32 %v5029_v47, 16  ;;  %v6798_v26 = vsel %vm6467_vm0, %v1596_v46, %v1603_v51  ;;  %vm7592_vm8 = vcmp.ne.s16.totalorder %v6784_v35, 0  ;;  %5598 = vmatpush3.bf16.msra.mxu1 %v5777_v31  ;;  %vm1461_vm9 = vmpackc.low %vm520_vm5, %vm520_vm5  ;;  %v1476_v31 = vsel %vm6787_vm1, 65537, %v7655_v44 }
  0x94   :  { %v2313_v21 = vrot.slane %v2311_v49, 3  ;;  %v2316_v19 = vrot.slane %v2314_v59, 4  ;;  %7714 = vst [vmem:[#allocation11_spill] sm:$0xff] %v6798_v26  ;;  %vm7596_vm4 = vcmp.ne.s16.totalorder %v6798_v26, 0  ;;  %v1653_v40 = vsel %vm7592_vm8, %v6395_v60, 0  ;;  %5599 = vmatprep.subr.bf16.mxu1 %v5779_v9 }
  0x95   :  { %v2331_v20 = vrot.slane %v2329_v45, 3  ;;  %v2334_v39 = vrot.slane %v2332_v56, 4  ;;  %v1654_v46 = vsel %vm7596_vm4, %v6740_v30, 0  ;;  %v1477_v47 = vsel %vm1461_vm9, 65537, %v7655_v44  ;;  %5570 = vmatpush3.bf16.msra.mxu0 %v5780_v0 }
  0x96   :  { %v2317_v7 = vor.u32 %v2316_v19, %v2313_v21  ;;  %v4996_v60 = vcombine.low %v1653_v40, %v1654_v46  ;;  %v1605_v59 = vrot.slane %v6766_v29, 4  ;;  %v1607_v51 = vshrl.u32 %v1476_v31, 16  ;;  %5619 = vmatprep.subr.bf16.mxu0 %v6794_v25  ;;  %v6828_v19 = vld [vmem:[%s7547_s1 + $0x1f8] sm:$0xff]   ;;  %v7720_v40 = vld [vmem:[#allocation15_spill] sm:$0xff] }
  0x97   :  { %v2335_v49 = vor.u32 %v2334_v39, %v2331_v20  ;;  %vm7715_vm5 = vsmask.f32 4352  ;;  %v1610_v56 = vshll.u32 %v1476_v31, 16  ;;  %v1616_v41 = vshrl.u32 %v1477_v47, 16  ;;  %5600 = vmatpush3.bf16.msra.mxu1 %v5779_v9  ;;  %v7722_v20 = vld [vmem:[#allocation14_spill] sm:$0xff] }
  0x98   :  { %v2318_v52 = vsel %vm7715_vm5, %v6605_v57, %v2317_v7  ;;  %vm7716_vm8 = vmmov %vm7715_vm5  ;;  %v1767_v4 = vshll.u32 %v4996_v60, 16  ;;  %v6823_v21 = vrot.slane %v1607_v51, 7  ;;  %v1619_v29 = vshll.u32 %v1477_v47, 16  ;;  %5601 = vmatprep.subr.bf16.mxu1 %v5781_v14 }
  0x99   :  { %v2327_v45 = vsel %vm7716_vm8, %v2317_v7, %v6757_v42  ;;  %5544 = vmatmul.mubr.bf16.gmra.mxu1 %v2318_v52  ;;  %vm7717_vm9 = vmmov %vm7715_vm5  ;;  %v1618_v57 = vrot.slane %v1616_v41, 7  ;;  %v7719_v9 = vsel %vm6453_vm2, %v6433_v1, 0  ;;  %vm7721_vm8 = vnez %v7720_v40  ;;  %v7724_v7 = vld [vmem:[#allocation18_spill] sm:$0xff] }
  0x9a   :  { %v2336_v0 = vsel %vm7717_vm9, %v6757_v42, %v2335_v49  ;;  %7718 = vst [vmem:[#allocation12_spill] sm:$0xff] %v6823_v21  ;;  %5547 = vmatprep.mubr.bf16.mxu1 %v2327_v45  ;;  %v7723_v39 = vsel %vm7721_vm8, %v7722_v20, 0  ;;  %v2347_v46 = vshrl.u32 %v7724_v7, 16  ;;  %v1769_v31 = vrot.slane %v1767_v4, 1  ;;  %v1397_v4 = vld [vmem:[#allocation2 + $0x44] sm:$0x1] }
  0x9b   :  { %v5030_v42 = vcombine.low %v7723_v39, %v7719_v9  ;;  %v1612_v47 = vor.u32 %v1610_v56, %v6823_v21  ;;  %v7600_v51 = vrot.slane %v6823_v21, 4  ;;  %v2350_v52 = vshll.u32 %v7724_v7, 16  ;;  %5602 = vmatpush3.bf16.msra.mxu1 %v5781_v14 }
  0x9c   :  { %v1621_v45 = vor.u32 %v1619_v29, %v1618_v57  ;;  %v1623_v23 = vrot.slane %v1618_v57, 4  ;;  %v1770_v33 = vsel %vm7598_vm15, %v6771_v48, %v1769_v31  ;;  %v1771_v39 = vshrl.u32 %v4996_v60, 16  ;;  %5651 = vmatprep.subr.bf16.mxu1 %v6828_v19 }
  0x9d   :  { %v2338_v41 = vshrl.u32 %v5030_v42, 16  ;;  %v2341_v38 = vshll.u32 %v5030_v42, 16  ;;  %v6846_v9 = vsel %vm6467_vm0, %v1605_v59, %v1612_v47  ;;  %v2349_v62 = vrot.slane %v2347_v46, 3  ;;  %5516 = vmatmul.mubr.bf16.gmra.mxu0 %v1770_v33  ;;  %v6871_v47 = vld [vmem:[#allocation2 + $0x10] sm:$0xf] }
  0x9e   :  { %v6853_v56 = vsel %vm6467_vm0, %v7600_v51, %v1621_v45  ;;  %vm7597_vm2 = vcmp.ne.s16.totalorder %v6846_v9, 0  ;;  %vm6860_vm5 = vcmp.ne.s16.totalorder %v1623_v23, 0  ;;  %v2352_v33 = vrot.slane %v2350_v52, 4 }
  0x9f   :  { %v2340_v14 = vrot.slane %v2338_v41, 3  ;;  %v2343_v48 = vrot.slane %v2341_v38, 4  ;;  %vm7599_vm1 = vcmp.ne.s16.totalorder %v6853_v56, 0  ;;  %v1655_v60 = vsel %vm7597_vm2, %v7722_v20, 0 }
  0xa0   :  { %v1656_v29 = vsel %vm7599_vm1, %v6433_v1, 0  ;;  %v1657_v42 = vsel %vm6860_vm5, %v1397_v4, 0  ;;  %vm505_vm9 = vcmp.ne.s32.totalorder %v6510_v8, 7  ;;  %vm7727_vm4 = vsmask.f32 4352 }
  0xa1   :  { %v2344_v57 = vor.u32 %v2343_v48, %v2340_v14  ;;  %5548 = vmatmul.mubr.bf16.gmra.mxu1 %v2336_v0  ;;  %v4997_v38 = vcombine.low %v1655_v60, %v1656_v29  ;;  %v4998_v7 = vcombine.low %v1657_v42, %v1657_v42  ;;  %v2353_v46 = vor.u32 %v2352_v33, %v2349_v62  ;;  %vm2799_vm2 = vmpackc.low %vm505_vm9, %vm505_vm9  ;;  %v6876_v1 = vld [vmem:[#allocation2 + $0x14] sm:$0xf]  ;;  %v6886_v14 = vld [vmem:[#allocation2 + $0x18] sm:$0xf] }
  0xa2   :  { %vm7728_vm15 = vcmp.ne.s16.totalorder %v6489_v32, 0  ;;  %vm7729_vm1 = vcmp.ne.s16.totalorder %v6504_v16, 0  ;;  %v1773_v45 = vor.u32 %v1771_v39, %v1769_v31  ;;  %v2815_v62 = vsel %vm2799_vm2, 65537, %v7655_v44  ;;  %v6891_v60 = vld [vmem:[#allocation2 + $0x1c] sm:$0xf] }
  0xa3   :  { %v2345_v20 = vsel %vm7727_vm4, %v2335_v49, %v2344_v57  ;;  %v2993_v52 = vsel %vm7728_vm15, %v6871_v47, 0  ;;  %v2994_v0 = vsel %vm7729_vm1, %v6876_v1, 0  ;;  %v1775_v41 = vshll.u32 %v4997_v38, 16  ;;  %v6881_v49 = vld [vmem:[#allocation2 + $0x20] sm:$0xf] }
  0xa4   :  { %5551 = vmatprep.mubr.bf16.mxu1 %v2345_v20  ;;  %v1779_v8 = vshrl.u32 %v4997_v38, 16  ;;  %v1783_v23 = vshll.u32 %v4998_v7, 16  ;;  %v6884_v4 = vcombine.low %v2993_v52, %v2994_v0  ;;  %vm7730_vm15 = vcmp.ne.s16.totalorder %v6532_v10, 0  ;;  %v6896_v38 = vld [vmem:[#allocation2 + $0x24] sm:$0xf] }
  0xa5   :  { %v2995_v48 = vsel %vm7730_vm15, %v6886_v14, 0  ;;  %vm7731_vm4 = vcmp.ne.s16.totalorder %v6546_v36, 0  ;;  %v1777_v39 = vrot.slane %v1775_v41, 1  ;;  %v2832_v29 = vshrl.u32 %v2815_v62, 16  ;;  %v5816_v20 = vld [vmem:[#allocation2 + $0xc] sm:$0xf] }
  0xa6   :  { %v2996_v31 = vsel %vm7731_vm4, %v6891_v60, 0  ;;  %v1785_v33 = vrot.slane %v1783_v23, 1  ;;  %v2835_v42 = vshll.u32 %v2815_v62, 16  ;;  %vm7732_vm2 = vsmask.f32 4352 }
  0xa7   :  { %v2354_v7 = vsel %vm7732_vm2, %v2344_v57, %v2353_v46  ;;  %v5056_v52 = vcombine.low %v6482_v12, %v5816_v20  ;;  %v5090_v0 = vcombine.low %v2995_v48, %v2996_v31  ;;  %vm7733_vm1 = vsmask.f32 7424  ;;  %v2750_v12 = vld [vmem:[#allocation2 + $0x8] sm:$0xf]  ;;  %v6913_v62 = vld [vmem:[#allocation2 + $0xc] sm:$0xf] }
  0xa8   :  { %v1778_v51 = vsel %vm7733_vm1, %v1773_v45, %v1777_v39  ;;  %v1781_v21 = vor.u32 %v1779_v8, %v1777_v39  ;;  %v2834_v10 = vrot.slane %v2832_v29, 7  ;;  %vm7734_vm9 = vcmp.ne.s16.totalorder %v6591_v37, 0  ;;  %vm7736_vm4 = vmmov %vm7733_vm1  ;;  %v7737_v48 = vld [vmem:[#allocation17_spill] sm:$0xff]  ;;  %v5818_v31 = vld [vmem:[#allocation2 + $0x14] sm:$0xf] }
  0xa9   :  { %v2997_v36 = vsel %vm7734_vm9, %v6881_v49, 0  ;;  %5519 = vmatprep.mubr.bf16.mxu0 %v1778_v51  ;;  %v3076_v41 = vshll.u32 %v6884_v4, 16  ;;  %vm7735_vm15 = vcmp.ne.s16.totalorder %v6597_v28, 0  ;;  %5552 = vmatmul.mubr.bf16.gmra.mxu1 %v2354_v7  ;;  %vm513_vm2 = vcmp.ne.s32.totalorder %v6650_v34, 7  ;;  %v6916_v51 = vld [vmem:[#allocation2 + $0x30] sm:$0xf] }
  0xaa   :  { %v2998_v23 = vsel %vm7735_vm15, %v6896_v38, 0  ;;  %v1786_v57 = vsel %vm7736_vm4, %v1781_v21, %v1785_v33  ;;  %v6909_v46 = vor.u32 %v2835_v42, %v2834_v10  ;;  %v2838_v45 = vrot.slane %v2834_v10, 4  ;;  %v5817_v21 = vld [vmem:[#allocation2 + $0x10] sm:$0xf]  ;;  %vm2807_vm9 = vmpackc.low %vm513_vm2, %vm513_vm2  ;;  %v6928_v29 = vld [vmem:[#allocation2 + $0x34] sm:$0xf] }
  0xab   :  { %v6911_v8 = vcombine.low %v2997_v36, %v2998_v23  ;;  %5520 = vmatmul.mubr.bf16.gmra.mxu0 %v1786_v57  ;;  %v5057_v10 = vcombine.low %v5817_v21, %v5818_v31  ;;  %v3084_v36 = vshll.u32 %v5090_v0, 16  ;;  %v3078_v39 = vrot.slane %v3076_v41, 1  ;;  %v6930_v42 = vld [vmem:[#allocation2 + $0x38] sm:$0xf]  ;;  %v6940_v41 = vld [vmem:[#allocation2 + $0x3c] sm:$0xf] }
  0xac   :  { %5571 = vmatprep.mubr.bf16.mxu0 %v5056_v52  ;;  %v6921_v28 = vsel %vm6467_vm0, %v2838_v45, %v7737_v48  ;;  %vm7613_vm1 = vcmp.ne.s16.totalorder %v6909_v46, 0  ;;  %v3080_v33 = vshrl.u32 %v6884_v4, 16  ;;  %v3088_v20 = vshrl.u32 %v5090_v0, 16  ;;  %v5819_v21 = vld [vmem:[#allocation2 + $0x18] sm:$0xf] }
  0xad   :  { %vm7612_vm15 = vcmp.ne.s16.totalorder %v6921_v28, 0  ;;  %v2991_v34 = vsel %vm7613_vm1, %v2750_v12, 0  ;;  %v3092_v52 = vshll.u32 %v6911_v8, 16  ;;  %v2823_v23 = vsel %vm2807_vm9, 65537, %v7655_v44  ;;  %v5820_v31 = vld [vmem:[#allocation2 + $0x1c] sm:$0xf] }
  0xae   :  { %v2992_v7 = vsel %vm7612_vm15, %v6913_v62, 0  ;;  %v2903_v45 = vshrl.u32 %v2823_v23, 16  ;;  %v2906_v48 = vshll.u32 %v2823_v23, 16  ;;  %vm7738_vm4 = vcmp.ne.s16.totalorder %v6689_v58, 0  ;;  %v5786_v44 = vld [vmem:[%s7547_s1 + $0x1b0] sm:$0xff]  }
  0xaf   :  { %v5088_v57 = vcombine.low %v2991_v34, %v2992_v7  ;;  %v3001_v4 = vsel %vm7738_vm4, %v6916_v51, 0  ;;  %v3086_v12 = vrot.slane %v3084_v36, 1  ;;  %v5058_v37 = vcombine.low %v5819_v21, %v5820_v31 }
  0xb0   :  { %vm7739_vm2 = vcmp.ne.s16.totalorder %v6702_v43, 0  ;;  %v2905_v34 = vrot.slane %v2903_v45, 7  ;;  %v3082_v23 = vor.u32 %v3080_v33, %v3078_v39  ;;  %vm7740_vm9 = vcmp.ne.s16.totalorder %v6784_v35, 0  ;;  %v5821_v45 = vld [vmem:[#allocation2 + $0x20] sm:$0xf] }
  0xb1   :  { %v3002_v0 = vsel %vm7739_vm2, %v6928_v29, 0  ;;  %v3069_v22 = vshrl.u32 %v5088_v57, 16  ;;  %v3071_v16 = vshll.u32 %v5088_v57, 16  ;;  %v3090_v58 = vor.u32 %v3088_v20, %v3086_v12  ;;  %v6960_v20 = vld [vmem:[#allocation2 + $0x28] sm:$0xf] }
  0xb2   :  { %v6948_v7 = vcombine.low %v3001_v4, %v3002_v0  ;;  %v3003_v36 = vsel %vm7740_vm9, %v6930_v42, 0  ;;  %vm7741_vm4 = vcmp.ne.s16.totalorder %v6798_v26, 0  ;;  %v3094_v57 = vrot.slane %v3092_v52, 1  ;;  %v6962_v4 = vld [vmem:[#allocation2 + $0x2c] sm:$0xf] }
  0xb3   :  { %v3004_v21 = vsel %vm7741_vm4, %v6940_v41, 0  ;;  %v3073_v31 = vrot.slane %v3071_v16, 1  ;;  %5572 = vmatmul.mubr.bf16.vlgmr.msra.gmra.mxu0 %v5057_v10  ;;  %v6956_v43 = vor.u32 %v2906_v48, %v2905_v34  ;;  %v2910_v32 = vrot.slane %v2905_v34, 4  ;;  %v6966_v16 = vld [vmem:[#allocation2 + $0x40] sm:$0xf] }
  0xb4   :  { %5620 = vmatpush3.bf16.msra.mxu0 %v6794_v25  ;;  %5575 = vmatprep.mubr.bf16.mxu0 %v5058_v37  ;;  %v5059_v33 = vcombine.low %v5821_v45, %v6621_v2  ;;  %v3096_v0 = vshrl.u32 %v6911_v8, 16  ;;  %v3108_v26 = vshll.u32 %v6948_v7, 16  ;;  %v7742_v52 = vrot.slane %v6579_v17, 4  ;;  %v5789_v25 = vld [vmem:[%s7547_s1 + $0x1a8] sm:$0xff]   ;;  %v6983_v48 = vld [vmem:[#allocation2 + $0x44] sm:$0xf] }
  0xb5   :  { %v3074_v10 = vor.u32 %v3073_v31, %v3069_v22  ;;  %5621 = vmatprep.subr.bf16.mxu0 %v5786_v44  ;;  %v6976_v2 = vsel %vm6467_vm0, %v2910_v32, %v6652_v27  ;;  %v6981_v8 = vcombine.low %v3003_v36, %v3004_v21  ;;  %vm7743_vm2 = vsmask.f32 7424  ;;  %v5822_v17 = vld [vmem:[#allocation2 + $0x2c] sm:$0xf]  ;;  %v3305_v31 = vld [vmem:[#allocation2 + $0x8] sm:$0x8] }
  0xb6   :  { %v2909_v37 = vsel %vm6467_vm0, %v7742_v52, %v6956_v43  ;;  %v3087_v22 = vsel %vm7743_vm2, %v3082_v23, %v3086_v12  ;;  %vm2983_vm4 = vcmp.ne.s16.totalorder %v6976_v2, 0  ;;  %v5060_v34 = vcombine.low %v6658_v24, %v5822_v17  ;;  %vm7744_vm15 = vmmov %vm7743_vm2  ;;  %v5787_v27 = vld [vmem:[%s7547_s1 + $0x1f0] sm:$0xff]  }
  0xb7   :  { %vm2982_vm9 = vcmp.ne.s16.totalorder %v2909_v37, 0  ;;  %v3079_v32 = vsel %vm7744_vm15, %v3074_v10, %v3078_v39  ;;  %vm7745_vm1 = vmmov %vm7743_vm2  ;;  %v3000_v12 = vsel %vm2983_vm4, %v6962_v4, 0  ;;  %v3112_v24 = vshrl.u32 %v6948_v7, 16 }
  0xb8   :  { %v3095_v36 = vsel %vm7745_vm1, %v3090_v58, %v3094_v57  ;;  %v2999_v21 = vsel %vm2982_vm9, %v6960_v20, 0  ;;  %5603 = vmatprep.mubr.bf16.mxu1 %v3079_v32  ;;  %5622 = vmatpush3.bf16.msra.mxu0 %v5786_v44  ;;  %vm7746_vm15 = vcmp.ne.s16.totalorder %v6846_v9, 0  ;;  %vm7747_vm2 = vcmp.ne.s16.totalorder %v6853_v56, 0  ;;  %v5791_v58 = vld [vmem:[%s7547_s1 + $0x1a0] sm:$0xff]  }
  0xb9   :  { %v5092_v23 = vcombine.low %v2999_v21, %v3000_v12  ;;  %v3005_v39 = vsel %vm7746_vm15, %v6966_v16, 0  ;;  %v3006_v45 = vsel %vm7747_vm2, %v6983_v48, 0  ;;  %5604 = vmatmul.mubr.bf16.vlgmr.msra.gmra.mxu1 %v3087_v22  ;;  %5623 = vmatprep.subr.bf16.mxu0 %v5789_v25  ;;  %v3110_v10 = vrot.slane %v3108_v26, 1  ;;  %v2766_v26 = vld [vmem:[#allocation2 + $0x48] sm:$0x1]  ;;  %v7749_v21 = vld [vmem:[#allocation8_spill] sm:$0xff] }
  0xba   :  { %v3116_v44 = vshll.u32 %v6981_v8, 16  ;;  %vm7748_vm1 = vcmp.ne.s16.totalorder %v6528_v5, 0  ;;  %v3564_v52 = vsel %vm6568_vm13, %v6913_v62, 0  ;;  %5652 = vmatpush3.bf16.msra.mxu1 %v6828_v19  ;;  %5607 = vmatprep.mubr.bf16.mxu1 %v3095_v36  ;;  %v3098_v37 = vor.u32 %v3096_v0, %v3094_v57  ;;  %v5823_v36 = vld [vmem:[#allocation2 + $0x34] sm:$0xf] }
  0xbb   :  { %v3563_v7 = vsel %vm7748_vm1, %v3305_v31, 0  ;;  %v3100_v22 = vshll.u32 %v5092_v23, 16  ;;  %v3104_v17 = vshrl.u32 %v5092_v23, 16  ;;  %5653 = vmatprep.subr.bf16.mxu1 %v5787_v27  ;;  %5576 = vmatmul.mubr.bf16.gmra.mxu0 %v5059_v33  ;;  %v7023_v31 = vcombine.low %v3005_v39, %v3006_v45  ;;  %v5795_v39 = vld [vmem:[%s7547_s1 + $0x198] sm:$0xff]  }
  0xbc   :  { %v5121_v32 = vcombine.low %v3563_v7, %v3564_v52  ;;  %v3649_v19 = vshrl.u32 %v7749_v21, 16  ;;  %5624 = vmatpush3.bf16.msra.mxu0 %v5789_v25  ;;  %5579 = vmatprep.mubr.bf16.mxu0 %v5060_v34  ;;  %v5061_v12 = vcombine.low %v6642_v55, %v5823_v36  ;;  %v3652_v33 = vshll.u32 %v7749_v21, 16  ;;  %v5792_v55 = vld [vmem:[%s7547_s1 + $0x1e0] sm:$0xff]  }
  0xbd   :  { %v3102_v0 = vrot.slane %v3100_v22, 1  ;;  %5625 = vmatprep.subr.bf16.mxu0 %v5791_v58  ;;  %v3114_v23 = vor.u32 %v3112_v24, %v3110_v10  ;;  %v3118_v5 = vrot.slane %v3116_v44, 1  ;;  %v3007_v45 = vsel %vm6860_vm5, %v2766_v26, 0  ;;  %v5824_v24 = vld [vmem:[#allocation2 + $0x3c] sm:$0xf] }
  0xbe   :  { %v3641_v7 = vshrl.u32 %v5121_v32, 16  ;;  %5654 = vmatpush3.bf16.msra.mxu1 %v5787_v27  ;;  %vm7750_vm13 = vsmask.f32 7424  ;;  %v3644_v52 = vshll.u32 %v5121_v32, 16  ;;  %v3651_v22 = vrot.slane %v3649_v19, 3 }
  0xbf   :  { %v3103_v25 = vsel %vm7750_vm13, %v3098_v37, %v3102_v0  ;;  %v3106_v34 = vor.u32 %v3104_v17, %v3102_v0  ;;  %5655 = vmatprep.subr.bf16.mxu1 %v5790_v61  ;;  %v5062_v44 = vcombine.low %v6740_v30, %v5824_v24  ;;  %v3120_v21 = vshrl.u32 %v6981_v8, 16  ;;  %vm7751_vm5 = vmmov %vm7750_vm13  ;;  %v7752_v17 = vld [vmem:[#allocation9_spill] sm:$0xff]  ;;  %v5797_v0 = vld [vmem:[%s7547_s1 + $0x190] sm:$0xff]  }
  0xc0   :  { %v3124_v59 = vshll.u32 %v7023_v31, 16  ;;  %v3654_v26 = vrot.slane %v3652_v33, 4  ;;  %5626 = vmatpush3.bf16.msra.mxu0 %v5791_v58  ;;  %v5096_v37 = vcombine.low %v3007_v45, %v3007_v45  ;;  %v3658_v32 = vshrl.u32 %v7752_v17, 16  ;;  %v5825_v30 = vld [vmem:[#allocation2 + $0x40] sm:$0xf]  ;;  %vm7753_vm9 = vmmov %vm7751_vm5 }
  0xc1   :  { %v3111_v27 = vsel %vm7751_vm5, %v3106_v34, %v3110_v10  ;;  %v3661_v19 = vshll.u32 %v7752_v17, 16  ;;  %5608 = vmatmul.mubr.bf16.gmra.mxu1 %v3103_v25  ;;  %5627 = vmatprep.subr.bf16.mxu0 %v5795_v39  ;;  %v5826_v36 = vld [vmem:[#allocation2 + $0x44] sm:$0xf]  ;;  %v3128_v24 = vshrl.u32 %v7023_v31, 16  ;;  %v3643_v33 = vrot.slane %v3641_v7, 3  ;;  %v5796_v25 = vld [vmem:[%s7547_s1 + $0x1d8] sm:$0xff]  }
  0xc2   :  { %v5063_v8 = vcombine.low %v5825_v30, %v5826_v36  ;;  %v3646_v58 = vrot.slane %v3644_v52, 4  ;;  %5656 = vmatpush3.bf16.msra.mxu1 %v5790_v61  ;;  %5611 = vmatprep.mubr.bf16.mxu1 %v3111_v27  ;;  %v3119_v10 = vsel %vm7753_vm9, %v3114_v23, %v3118_v5  ;;  %v3655_v45 = vor.u32 %v3654_v26, %v3651_v22  ;;  %v7754_v30 = vld [vmem:[#allocation4_spill] sm:$0xff]  ;;  %v7755_v36 = vld [vmem:[#allocation10_spill] sm:$0xff] }
  0xc3   :  { %v3660_v34 = vrot.slane %v3658_v32, 3  ;;  %v3663_v17 = vrot.slane %v3661_v19, 4  ;;  %5657 = vmatprep.subr.bf16.mxu1 %v5792_v55  ;;  %5580 = vmatmul.mubr.bf16.gmra.mxu0 %v5061_v12  ;;  %v3122_v57 = vor.u32 %v3120_v21, %v3118_v5  ;;  %v3126_v56 = vrot.slane %v3124_v59, 1  ;;  %v7756_v61 = vld [vmem:[#allocation6_spill] sm:$0xff]  ;;  %v7757_v12 = vld [vmem:[#allocation5_spill] sm:$0xff] }
  0xc4   :  { %v3460_v31 = vsel %vm5975_vm14, %v7755_v36, %v7754_v30  ;;  %v3470_v23 = vsel %vm5975_vm14, %v7756_v61, %v6698_v13  ;;  %5628 = vmatpush3.bf16.msra.mxu0 %v5795_v39  ;;  %5583 = vmatprep.mubr.bf16.mxu0 %v5062_v44  ;;  %v3132_v7 = vshll.u32 %v5096_v37, 16  ;;  %vm7758_vm15 = vnez %v7757_v12  ;;  %v5800_v5 = vld [vmem:[%s7547_s1 + $0x188] sm:$0xff]  }
  0xc5   :  { %v3937_v52 = vsel %vm7758_vm15, %v6913_v62, 0  ;;  %v3664_v22 = vor.u32 %v3663_v17, %v3660_v34  ;;  %vm3553_vm2 = vcmp.ne.s16.totalorder %v3460_v31, 0  ;;  %5629 = vmatprep.subr.bf16.mxu0 %v5797_v0  ;;  %v3647_v21 = vor.u32 %v3646_v58, %v3643_v33 }
  0xc6   :  { %v3570_v59 = vsel %vm3553_vm2, %v6896_v38, 0  ;;  %vm3554_vm1 = vcmp.ne.s16.totalorder %v3470_v23, 0  ;;  %v3572_v13 = vsel %vm6753_vm11, %v6962_v4, 0  ;;  %5658 = vmatpush3.bf16.msra.mxu1 %v5792_v55  ;;  %v3938_v62 = vsel %vm7758_vm15, %v6871_v47, 0  ;;  %vm7761_vm11 = vmmov %vm7751_vm5 }
  0xc7   :  { %vm7759_vm13 = vsmask.f32 4352  ;;  %v7760_v44 = vsel %vm6188_vm6, %v6881_v49, 0  ;;  %v3571_v27 = vsel %vm3554_vm1, %v6960_v20, 0  ;;  %5659 = vmatprep.subr.bf16.mxu1 %v5796_v25  ;;  %v3127_v55 = vsel %vm7761_vm11, %v3122_v57, %v3126_v56 }
  0xc8   :  { %v7076_v39 = vsel %vm7759_vm13, %v3655_v45, %v3664_v22  ;;  %v5124_v26 = vcombine.low %v7760_v44, %v3570_v59  ;;  %v3130_v37 = vor.u32 %v3128_v24, %v3126_v56  ;;  %v5125_v32 = vcombine.low %v3571_v27, %v3572_v13  ;;  %5630 = vmatpush3.bf16.msra.mxu0 %v5797_v0  ;;  %v5802_v56 = vld [vmem:[%s7547_s1 + $0x180] sm:$0xff]   ;;  %vm7763_vm6 = vmmov %vm7759_vm13  ;;  %v7114_v44 = vld [vmem:[%s7547_s1 + $0x238] sm:$0xff]  }
  0xc9   :  { %v3574_v47 = vsel %vm6342_vm7, %v6928_v29, 0  ;;  %v3134_v50 = vrot.slane %v3132_v7, 1  ;;  %v7762_v58 = vsel %vm6314_vm3, %v6916_v51, 0  ;;  %5612 = vmatmul.mubr.bf16.gmra.mxu1 %v3119_v10  ;;  %5631 = vmatprep.subr.bf16.mxu0 %v5800_v5  ;;  %v3656_v57 = vsel %vm7763_vm6, %v3647_v21, %v3655_v45  ;;  %v5801_v10 = vld [vmem:[%s7547_s1 + $0x1c8] sm:$0xff]   ;;  %vm7765_vm3 = vmmov %vm7751_vm5 }
  0xca   :  { %v3667_v19 = vshrl.u32 %v5124_v26, 16  ;;  %v3670_v33 = vshll.u32 %v5124_v26, 16  ;;  %v5126_v34 = vcombine.low %v7762_v58, %v3574_v47  ;;  %v3676_v24 = vshrl.u32 %v5125_v32, 16  ;;  %5660 = vmatpush3.bf16.msra.mxu1 %v5796_v25  ;;  %5615 = vmatprep.mubr.bf16.mxu1 %v3127_v55  ;;  %vm7766_vm7 = vmmov %vm7763_vm6 }
  0xcb   :  { %v3679_v15 = vshll.u32 %v5125_v32, 16  ;;  %v3576_v0 = vsel %vm6407_vm12, %v6940_v41, 0  ;;  %5661 = vmatprep.subr.bf16.mxu1 %v5798_v6  ;;  %5584 = vmatmul.mubr.bf16.gmra.mxu0 %v5063_v8  ;;  %v7764_v7 = vsel %vm6377_vm10, %v6930_v42, 0  ;;  %v3577_v25 = vsel %vm7721_vm8, %v6966_v16, 0  ;;  %v7767_v32 = vld [vmem:[#allocation16_spill] sm:$0xff]  ;;  %vm7768_vm10 = vmmov %vm7763_vm6 }
  0xcc   :  { %v3669_v11 = vrot.slane %v3667_v19, 3  ;;  %v3672_v17 = vrot.slane %v3670_v33, 4  ;;  %v3685_v36 = vshrl.u32 %v5126_v34, 16  ;;  %v3688_v31 = vshll.u32 %v5126_v34, 16  ;;  %5632 = vmatpush3.bf16.msra.mxu0 %v5800_v5  ;;  %5635 = vmatprep.mubr.bf16.mxu0 %v3656_v57  ;;  %vm7769_vm8 = vmmov %vm7763_vm6  ;;  %v4179_v57 = vld [vmem:[#allocation2 + $0xc] sm:$0xf] }
  0xcd   :  { %v3678_v23 = vrot.slane %v3676_v24, 3  ;;  %v3681_v45 = vrot.slane %v3679_v15, 4  ;;  %v5127_v63 = vcombine.low %v7764_v7, %v3576_v0  ;;  %5633 = vmatprep.subr.bf16.mxu0 %v5802_v56  ;;  %v5154_v13 = vcombine.low %v3937_v52, %v3938_v62  ;;  %v5803_v52 = vld [vmem:[%s7547_s1 + $0x1c0] sm:$0xff]   ;;  %vm7770_vm5 = vmmov %vm7763_vm6  ;;  %v4181_v7 = vld [vmem:[#allocation2 + $0x14] sm:$0xf] }
  0xce   :  { %v3673_v21 = vor.u32 %v3672_v17, %v3669_v11  ;;  %v3687_v59 = vrot.slane %v3685_v36, 3  ;;  %v3690_v8 = vrot.slane %v3688_v31, 4  ;;  %5662 = vmatpush3.bf16.msra.mxu1 %v5798_v6  ;;  %v3135_v55 = vsel %vm7765_vm3, %v3130_v37, %v3134_v50  ;;  %v7134_v50 = vld [vmem:[#allocation2 + $0x48] sm:$0xf]  ;;  %v4180_v11 = vld [vmem:[#allocation2 + $0x10] sm:$0xf]  ;;  %vm7773_vm1 = vmmov %vm7770_vm5 }
  0xcf   :  { %v3682_v18 = vor.u32 %v3681_v45, %v3678_v23  ;;  %v3694_v26 = vshrl.u32 %v5127_v63, 16  ;;  %v3697_v27 = vshll.u32 %v5127_v63, 16  ;;  %v3540_v47 = vsel %vm5975_vm14, %v7767_v32, %v7754_v30  ;;  %5663 = vmatprep.subr.bf16.mxu1 %v5801_v10  ;;  %v4182_v63 = vld [vmem:[#allocation2 + $0x18] sm:$0xf] }
  0xd0   :  { %v3674_v40 = vsel %vm7766_vm7, %v3664_v22, %v3673_v21  ;;  %v3691_v5 = vor.u32 %v3690_v8, %v3687_v59  ;;  %vm3561_vm12 = vcmp.ne.s16.totalorder %v3540_v47, 0  ;;  %5634 = vmatpush3.bf16.msra.mxu0 %v5802_v56  ;;  %vm3562_vm14 = vcmp.ne.s16.totalorder %v7756_v61, 0  ;;  %v4190_v47 = vld [vmem:[#allocation2 + $0x38] sm:$0xf] }
  0xd1   :  { %v3683_v62 = vsel %vm7768_vm10, %v3673_v21, %v3682_v18  ;;  %v3696_v19 = vrot.slane %v3694_v26, 3  ;;  %v3699_v33 = vrot.slane %v3697_v27, 4  ;;  %v3578_v22 = vsel %vm3561_vm12, %v6983_v48, 0  ;;  %5616 = vmatmul.mubr.bf16.gmra.mxu1 %v3135_v55  ;;  %5683 = vmatprep.subr.bf16.mxu0 %v7114_v44  ;;  %v4188_v21 = vld [vmem:[#allocation2 + $0x30] sm:$0xf]  ;;  %v7780_v55 = vld [vmem:[#allocation20_spill] sm:$0xff] }
  0xd2   :  { %v3692_v6 = vsel %vm7769_vm8, %v3682_v18, %v3691_v5  ;;  %v5128_v37 = vcombine.low %v3577_v25, %v3578_v22  ;;  %5664 = vmatpush3.bf16.msra.mxu1 %v5801_v10  ;;  %5667 = vmatprep.mubr.bf16.mxu1 %v5154_v13  ;;  %v3939_v58 = vsel %vm7758_vm15, %v6876_v1, 0  ;;  %v3940_v34 = vsel %vm7758_vm15, %v6886_v14, 0  ;;  %v4187_v25 = vld [vmem:[#allocation2 + $0x2c] sm:$0xf]  ;;  %v7776_v13 = vld [vmem:[#allocation3_spill] sm:$0xff] }
  0xd3   :  { %v3700_v30 = vor.u32 %v3699_v33, %v3696_v19  ;;  %v3941_v56 = vsel %vm7758_vm15, %v6891_v60, 0  ;;  %5665 = vmatprep.subr.bf16.mxu1 %v5803_v52  ;;  %5636 = vmatmul.mubr.bf16.vlgmr.msra.gmra.mxu0 %v7076_v39  ;;  %v3942_v24 = vsel %vm7758_vm15, %v6881_v49, 0  ;;  %v3579_v14 = vsel %vm3562_vm14, %v7134_v50, 0  ;;  %v7161_v49 = vld [vmem:[%s7547_s1 + $0x228] sm:$0xff]   ;;  %v7778_v26 = vld [vmem:[#allocation19_spill] sm:$0xff] }
  0xd4   :  { %v3703_v1 = vshrl.u32 %v5128_v37, 16  ;;  %v3706_v0 = vshll.u32 %v5128_v37, 16  ;;  %5684 = vmatpush3.bf16.msra.mxu0 %v7114_v44  ;;  %5639 = vmatprep.mubr.bf16.mxu0 %v3674_v40  ;;  %v5155_v60 = vcombine.low %v3939_v58, %v3940_v34  ;;  %v5156_v36 = vcombine.low %v3941_v56, %v3942_v24  ;;  %v4184_v22 = vld [vmem:[#allocation2 + $0x20] sm:$0xf]  ;;  %v4185_v37 = vld [vmem:[#allocation2 + $0x24] sm:$0xf] }
  0xd5   :  { %v7151_v15 = vsel %vm7770_vm5, %v3691_v5, %v3700_v30  ;;  %5685 = vmatprep.subr.bf16.mxu0 %v7132_v54  ;;  %vm7771_vm9 = vcmp.ne.s16.totalorder %v6909_v46, 0  ;;  %vm7772_vm2 = vcmp.ne.s16.totalorder %v6921_v28, 0  ;;  %v4354_v61 = vsel %vm6467_vm0, %v6089_v53, %v6956_v43  ;;  %v7179_v46 = vld [vmem:[%s7547_s1 + $0x220] sm:$0xff]   ;;  %v7782_v58 = vld [vmem:[#allocation7_spill] sm:$0xff] }
  0xd6   :  { %v3705_v39 = vrot.slane %v3703_v1, 3  ;;  %v3708_v17 = vrot.slane %v3706_v0, 4  ;;  %5666 = vmatpush3.bf16.msra.mxu1 %v5803_v52  ;;  %v4436_v31 = vsel %vm7771_vm9, %v4179_v57, 0  ;;  %v4437_v10 = vsel %vm7772_vm2, %v4180_v11, 0  ;;  %v7783_v34 = vld [vmem:[#allocation23_spill] sm:$0xff]  ;;  %vm7800_vm2 = vmmov %vm7773_vm1 }
  0xd7   :  { %5715 = vmatprep.subr.bf16.mxu1 %v7114_v44  ;;  %v5129_v45 = vcombine.low %v3579_v14, %v3579_v14  ;;  %v7185_v28 = vcombine.low %v4436_v31, %v4437_v10  ;;  %vm7187_vm13 = vcmp.ne.s16.totalorder %v4354_v61, 0  ;;  %v3943_v8 = vsel %vm7758_vm15, %v6896_v38, 0  ;;  %v4186_v11 = vld [vmem:[#allocation2 + $0x28] sm:$0xf]  ;;  %v7251_v61 = vld [vmem:[%s7547_s1 + $0x210] sm:$0xff]  }
  0xd8   :  { %v7172_v23 = vor.u32 %v3708_v17, %v3705_v39  ;;  %5686 = vmatpush3.bf16.msra.mxu0 %v7132_v54  ;;  %vm7777_vm11 = vnez %v7776_v13  ;;  %vm7779_vm6 = vcmp.ne.s16.totalorder %v7778_v26, 0  ;;  %vm7781_vm3 = vcmp.ne.s16.totalorder %v7780_v55, 0  ;;  %v7787_v14 = vld [vmem:[#allocation26_spill] sm:$0xff]  ;;  %v7789_v39 = vld [vmem:[#allocation21_spill] sm:$0xff]  ;;  %v4191_v55 = vld [vmem:[#allocation2 + $0x3c] sm:$0xf] }
  0xd9   :  { %5668 = vmatmul.mubr.bf16.vlgmr.msra.gmra.mxu1 %v5155_v60  ;;  %5687 = vmatprep.subr.bf16.mxu0 %v7161_v49  ;;  %v3944_v18 = vsel %vm7777_vm11, %v6960_v20, 0  ;;  %v4438_v27 = vsel %vm7779_vm6, %v4181_v7, 0  ;;  %v4439_v40 = vsel %vm7781_vm3, %v4182_v63, 0  ;;  %v3946_v38 = vsel %vm7758_vm15, %v6916_v51, 0  ;;  %v4189_v20 = vld [vmem:[#allocation2 + $0x34] sm:$0xf] }
  0xda   :  { %v7183_v43 = vsel %vm7773_vm1, %v3700_v30, %v7172_v23  ;;  %5723 = vmatpush3.bf16.msra.mxu1 %v7114_v44  ;;  %5671 = vmatprep.mubr.bf16.mxu1 %v5156_v36  ;;  %v3945_v44 = vsel %vm7758_vm15, %v6962_v4, 0  ;;  %v3712_v5 = vshrl.u32 %v5129_v45, 16  ;;  %v3715_v32 = vshll.u32 %v5129_v45, 16  ;;  %v7218_v51 = vld [vmem:[%s7547_s1 + $0x218] sm:$0xff]   ;;  %v7791_v36 = vld [vmem:[#allocation22_spill] sm:$0xff] }
  0xdb   :  { %5716 = vmatprep.subr.bf16.mxu1 %v7132_v54  ;;  %5640 = vmatmul.mubr.bf16.gmra.mxu0 %v3683_v62  ;;  %v4444_v52 = vsel %vm7187_vm13, %v4187_v25, 0  ;;  %v4445_v62 = vsel %vm2983_vm4, %v4188_v21, 0  ;;  %v5157_v19 = vcombine.low %v3943_v8, %v3944_v18  ;;  %v7220_v4 = vcombine.low %v4438_v27, %v4439_v40  ;;  %v7795_v8 = vld [vmem:[#allocation12_spill] sm:$0xff]  ;;  %v4192_v40 = vld [vmem:[#allocation2 + $0x40] sm:$0xf] }
  0xdc   :  { %5688 = vmatpush3.bf16.msra.mxu0 %v7161_v49  ;;  %5643 = vmatprep.mubr.bf16.mxu0 %v3692_v6  ;;  %v4516_v33 = vshll.u32 %v7185_v28, 16  ;;  %v4183_v6 = vld [vmem:[#allocation2 + $0x1c] sm:$0xf]  ;;  %v5158_v30 = vcombine.low %v3945_v44, %v3946_v38  ;;  %v3947_v2 = vsel %vm7758_vm15, %v6928_v29, 0  ;;  %v7784_v56 = vrot.slane %v7783_v34, 4 }
  0xdd   :  { %5689 = vmatprep.subr.bf16.mxu0 %v7179_v46  ;;  %v3714_v24 = vrot.slane %v3712_v5, 3  ;;  %v3717_v1 = vrot.slane %v3715_v32, 4  ;;  %v7233_v0 = vcombine.low %v4444_v52, %v4445_v62  ;;  %vm7788_vm10 = vcmp.ne.s16.totalorder %v7787_v14, 0  ;;  %v4193_v32 = vld [vmem:[#allocation2 + $0x44] sm:$0xf]  ;;  %v7798_v52 = vld [vmem:[#allocation11_spill] sm:$0xff] }
  0xde   :  { %5724 = vmatpush3.bf16.msra.mxu1 %v7132_v54  ;;  %v4345_v57 = vsel %vm6467_vm0, %v7784_v56, %v7782_v58  ;;  %v7785_v54 = vld [vmem:[#allocation25_spill] sm:$0xff]  ;;  %v4447_v60 = vsel %vm7788_vm10, %v4190_v47, 0  ;;  %vm7790_vm12 = vcmp.ne.s16.totalorder %v7789_v39, 0  ;;  %vm7792_vm8 = vcmp.ne.s16.totalorder %v7791_v36, 0 }
  0xdf   :  { %5717 = vmatprep.subr.bf16.mxu1 %v7161_v49  ;;  %vm4426_vm4 = vcmp.ne.s16.totalorder %v4345_v57, 0  ;;  %vm7786_vm7 = vcmp.ne.s16.totalorder %v7785_v54, 0  ;;  %v4440_v17 = vsel %vm7790_vm12, %v4183_v6, 0  ;;  %v4441_v31 = vsel %vm7792_vm8, %v4184_v22, 0 }
  0xe0   :  { %5690 = vmatpush3.bf16.msra.mxu0 %v7179_v46  ;;  %v4446_v29 = vsel %vm7786_vm7, %v4189_v20, 0  ;;  %v3948_v10 = vsel %vm7758_vm15, %v6930_v42, 0  ;;  %v4514_v45 = vshrl.u32 %v7185_v28, 16  ;;  %v4518_v7 = vrot.slane %v4516_v33, 1  ;;  %v7793_v42 = vld [vmem:[#allocation24_spill] sm:$0xff] }
  0xe1   :  { %5672 = vmatmul.mubr.bf16.gmra.mxu1 %v5157_v19  ;;  %5691 = vmatprep.subr.bf16.mxu0 %v7218_v51  ;;  %v4521_v63 = vshll.u32 %v7220_v4, 16  ;;  %v3949_v25 = vsel %vm7758_vm15, %v6940_v41, 0  ;;  %vm7794_vm14 = vcmp.ne.s16.totalorder %v7793_v42, 0  ;;  %v4443_v59 = vsel %vm4426_vm4, %v4186_v11, 0  ;;  %v4194_v20 = vld [vmem:[#allocation2 + $0x48] sm:$0xf] }
  0xe2   :  { %5725 = vmatpush3.bf16.msra.mxu1 %v7161_v49  ;;  %5675 = vmatprep.mubr.bf16.mxu1 %v5158_v30  ;;  %v4442_v21 = vsel %vm7794_vm14, %v4185_v37, 0  ;;  %v7796_v18 = vrot.slane %v7795_v8, 4  ;;  %v3950_v49 = vsel %vm7758_vm15, %v6966_v16, 0  ;;  %v7272_v41 = vcombine.low %v4446_v29, %v4447_v60  ;;  %v5811_v37 = vld [vmem:[%s7547_s1 + $0x200] sm:$0xff]   ;;  %v4195_v11 = vld [vmem:[#allocation2 + $0x4c] sm:$0x1] }
  0xe3   :  { %5718 = vmatprep.subr.bf16.mxu1 %v7179_v46  ;;  %5644 = vmatmul.mubr.bf16.gmra.mxu0 %v7151_v15  ;;  %v4545_v26 = vshll.u32 %v7233_v0, 16  ;;  %v5188_v27 = vcombine.low %v4440_v17, %v4441_v31  ;;  %v5159_v44 = vcombine.low %v3947_v2, %v3948_v10  ;;  %v3718_v3 = vor.u32 %v3717_v1, %v3714_v24  ;;  %v7280_v15 = vld [vmem:[%s7547_s1 + $0x208] sm:$0xff]  }
  0xe4   :  { %v4417_v28 = vsel %vm6467_vm0, %v7796_v18, %v7782_v58  ;;  %5692 = vmatpush3.bf16.msra.mxu0 %v7218_v51  ;;  %5647 = vmatprep.mubr.bf16.mxu0 %v7183_v43  ;;  %v4519_v16 = vor.u32 %v4518_v7, %v4514_v45  ;;  %v4523_v38 = vrot.slane %v4521_v63, 1  ;;  %v7283_v5 = vcombine.low %v4442_v21, %v4443_v59 }
  0xe5   :  { %5693 = vmatprep.subr.bf16.mxu0 %v7251_v61  ;;  %vm4434_vm0 = vcmp.ne.s16.totalorder %v4417_v28, 0  ;;  %v5160_v47 = vcombine.low %v3949_v25, %v3950_v49  ;;  %vm7797_vm5 = vcmp.ne.s16.totalorder %v6784_v35, 0  ;;  %vm7799_vm9 = vcmp.ne.s16.totalorder %v7798_v52, 0 }
  0xe6   :  { %5726 = vmatpush3.bf16.msra.mxu1 %v7179_v46  ;;  %v4448_v43 = vsel %vm7797_vm5, %v4191_v55, 0  ;;  %v4449_v62 = vsel %vm7799_vm9, %v4192_v40, 0  ;;  %v7291_v19 = vrot.slane %v4545_v26, 1  ;;  %v4549_v33 = vshrl.u32 %v7233_v0, 16 }
  0xe7   :  { %5719 = vmatprep.subr.bf16.mxu1 %v7218_v51  ;;  %v4553_v6 = vshll.u32 %v7272_v41, 16  ;;  %v4529_v22 = vshll.u32 %v5188_v27, 16  ;;  %v3719_v46 = vsel %vm7800_vm2, %v7172_v23, %v3718_v3  ;;  %v4525_v35 = vshrl.u32 %v7220_v4, 16 }
  0xe8   :  { %5694 = vmatpush3.bf16.msra.mxu0 %v7251_v61  ;;  %vm7801_vm1 = vcmp.ne.s16.totalorder %v6846_v9, 0  ;;  %v4451_v2 = vsel %vm4434_vm0, %v4194_v20, 0  ;;  %vm7802_vm13 = vsmask.f32 7424  ;;  %v5192_v34 = vcombine.low %v4448_v43, %v4449_v62 }
  0xe9   :  { %v4450_v30 = vsel %vm7801_vm1, %v4193_v32, 0  ;;  %5676 = vmatmul.mubr.bf16.gmra.mxu1 %v5159_v44  ;;  %5695 = vmatprep.subr.bf16.mxu0 %v7280_v15  ;;  %v4524_v58 = vsel %vm7802_vm13, %v4519_v16, %v4523_v38  ;;  %v4533_v56 = vshrl.u32 %v5188_v27, 16  ;;  %v4537_v57 = vshll.u32 %v7283_v5, 16 }
  0xea   :  { %5727 = vmatpush3.bf16.msra.mxu1 %v7218_v51  ;;  %5679 = vmatprep.mubr.bf16.mxu1 %v5160_v47  ;;  %v3951_v9 = vsel %vm7758_vm15, %v6983_v48, 0  ;;  %v3952_v23 = vsel %vm7777_vm11, %v7134_v50, 0  ;;  %v4551_v4 = vor.u32 %v4549_v33, %v7291_v19  ;;  %v4555_v24 = vrot.slane %v4553_v6, 1  ;;  %v5445_v48 = vpop.f32.mrf.mxu0  ;;  %vm7803_vm15 = vmmov %vm7802_vm13 }
  0xeb   :  { %5720 = vmatprep.subr.bf16.mxu1 %v7251_v61  ;;  %5648 = vmatmul.mubr.bf16.gmra.mxu0 %v3719_v46  ;;  %v4531_v1 = vrot.slane %v4529_v22, 1  ;;  %v5193_v0 = vcombine.low %v4450_v30, %v4451_v2  ;;  %v4527_v51 = vor.u32 %v4525_v35, %v4523_v38  ;;  %vm4435_vm6 = vcmp.ne.s16.totalorder %v6089_v53, 0  ;;  %vm7804_vm11 = vmmov %vm7802_vm13 }
  0xec   :  { %5696 = vmatpush3.bf16.msra.mxu0 %v7280_v15  ;;  %5699 = vmatprep.mubr.bf16.mxu0 %v4524_v58  ;;  %v5161_v12 = vcombine.low %v3951_v9, %v3952_v23  ;;  %v4561_v13 = vshll.u32 %v5192_v34, 16  ;;  %v4539_v54 = vrot.slane %v4537_v57, 1  ;;  %v4557_v29 = vshrl.u32 %v7272_v41, 16  ;;  %v1041_v31 = vpop.f32.mrf.mxu0  ;;  %vm7805_vm3 = vmmov %vm7804_vm11 }
  0xed   :  { %5697 = vmatprep.subr.bf16.mxu0 %v5811_v37  ;;  %v4535_v50 = vor.u32 %v4533_v56, %v4531_v1  ;;  %v4556_v14 = vsel %vm7803_vm15, %v4551_v4, %v4555_v24  ;;  %v4565_v60 = vshrl.u32 %v5192_v34, 16  ;;  %v4569_v39 = vshll.u32 %v5193_v0, 16  ;;  %vm7806_vm4 = vmmov %vm7805_vm3 }
  0xee   :  { %5728 = vmatpush3.bf16.msra.mxu1 %v7251_v61  ;;  %v4452_v17 = vsel %vm4435_vm6, %v4195_v11, 0  ;;  %v4532_v53 = vsel %vm7804_vm11, %v4527_v51, %v4531_v1  ;;  %v4541_v36 = vshrl.u32 %v7283_v5, 16  ;;  %v4563_v10 = vrot.slane %v4561_v13, 1  ;;  %v5446_v21 = vpop.f32.mrf.mxu0  ;;  %vm7807_vm7 = vmmov %vm7805_vm3 }
  0xef   :  { %5721 = vmatprep.subr.bf16.mxu1 %v7280_v15  ;;  %v4540_v45 = vsel %vm7805_vm3, %v4535_v50, %v4539_v54  ;;  %v4559_v61 = vor.u32 %v4557_v29, %v4555_v24  ;;  %v5194_v7 = vcombine.low %v4452_v17, %v4452_v17  ;;  %v4571_v25 = vrot.slane %v4569_v39, 1  ;;  %vm7808_vm10 = vmmov %vm7805_vm3 }
  0xf0   :  { %5698 = vmatpush3.bf16.msra.mxu0 %v5811_v37  ;;  %v4567_v63 = vor.u32 %v4565_v60, %v4563_v10  ;;  %v4543_v42 = vor.u32 %v4541_v36, %v4539_v54  ;;  %v4573_v8 = vshrl.u32 %v5193_v0, 16  ;;  %v1044_v26 = vpop.f32.mrf.mxu0  ;;  %vm7809_vm12 = vmmov %vm7805_vm3 }
  0xf1   :  { %5680 = vmatmul.mubr.bf16.gmra.mxu1 %v5161_v12  ;;  %v4564_v59 = vsel %vm7806_vm4, %v4559_v61, %v4563_v10  ;;  %v4577_v18 = vshll.u32 %v5194_v7, 16 }
  0xf2   :  { %5729 = vmatpush3.bf16.msra.mxu1 %v7280_v15  ;;  %5707 = vmatprep.mubr.bf16.mxu1 %v4556_v14  ;;  %v4572_v28 = vsel %vm7807_vm7, %v4567_v63, %v4571_v25  ;;  %v4548_v49 = vsel %vm7808_vm10, %v4543_v42, %v7291_v19  ;;  %v4575_v55 = vor.u32 %v4573_v8, %v4571_v25  ;;  %v5449_v16 = vpop.f32.mrf.mxu0 }
  0xf3   :  { %5722 = vmatprep.subr.bf16.mxu1 %v5811_v37  ;;  %5700 = vmatmul.mubr.bf16.vlgmr.msra.gmra.mxu0 %v4532_v53  ;;  %v4579_v40 = vrot.slane %v4577_v18, 1 }
  0xf4   :  { %5703 = vmatprep.mubr.bf16.mxu0 %v4540_v45  ;;  %v5477_v41 = vpop.f32.mrf.mxu1  ;;  %v1057_v47 = vpop.f32.mrf.mxu0 }
  0xf5   :  { %v1327_v27 = vadd.f32 %v5477_v41, %v5445_v48  ;;  %v4580_v5 = vsel %vm7809_vm12, %v4575_v55, %v4579_v40 }
  0xf6   :  { %5730 = vmatpush3.bf16.msra.mxu1 %v5811_v37  ;;  %v1318_v44 = vpop.f32.mrf.mxu1  ;;  %v5450_v52 = vpop.f32.mrf.mxu0 }
  0xf7   :  { %v1319_v3 = vadd.f32 %v1318_v44, %v1041_v31 }
  0xf8   :  { %v5478_v15 = vpop.f32.mrf.mxu1  ;;  %v1060_v22 = vpop.f32.mrf.mxu0 }
  0xf9   :  { %5708 = vmatmul.mubr.bf16.vlgmr.msra.gmra.mxu1 %v4564_v59  ;;  %v1330_v38 = vadd.f32 %v5478_v15, %v5446_v21 }
  0xfa   :  { %5711 = vmatprep.mubr.bf16.mxu1 %v4572_v28  ;;  %v1321_v32 = vpop.f32.mrf.mxu1 }
  0xfb   :  { %5704 = vmatmul.mubr.bf16.gmra.mxu0 %v4548_v49  ;;  %v1322_v20 = vadd.f32 %v1321_v32, %v1044_v26 }
 0x100   :  { %v5481_v43 = vpop.f32.mrf.mxu1 }
 0x101   :  { %5712 = vmatmul.mubr.bf16.gmra.mxu1 %v4580_v5  ;;  %v1343_v62 = vadd.f32 %v5481_v43, %v5449_v16 }
 0x102   :  { %v1334_v19 = vpop.f32.mrf.mxu1 }
 0x103   :  { %v1335_v33 = vadd.f32 %v1334_v19, %v1057_v47  ;;  %v5453_v2 = vpop.f32.mrf.mxu0 }
 0x104   :  { %v5482_v6 = vpop.f32.mrf.mxu1 }
 0x105   :  { %v1346_v46 = vadd.f32 %v5482_v6, %v5450_v52  ;;  %v1073_v37 = vpop.f32.mrf.mxu0 }
 0x106   :  { %v1337_v35 = vpop.f32.mrf.mxu1 }
 0x107   :  { %v1338_v30 = vadd.f32 %v1337_v35, %v1060_v22  ;;  %v5454_v58 = vpop.f32.mrf.mxu0 }
 0x109   :  { %v1076_v34 = vpop.f32.mrf.mxu0 }
 0x115   :  { %v5457_v57 = vpop.f32.mrf.mxu0 }
 0x117   :  { %v1089_v1 = vpop.f32.mrf.mxu0 }
 0x119   :  { %v5485_v56 = vpop.f32.mrf.mxu1  ;;  %v5458_v12 = vpop.f32.mrf.mxu0 }
 0x11a   :  { %v1359_v9 = vadd.f32 %v5485_v56, %v5453_v2 }
 0x11b   :  { %v1350_v23 = vpop.f32.mrf.mxu1  ;;  %v1092_v14 = vpop.f32.mrf.mxu0 }
 0x11c   :  { %v1351_v4 = vadd.f32 %v1350_v23, %v1073_v37 }
 0x11d   :  { %v5486_v24 = vpop.f32.mrf.mxu1 }
 0x11e   :  { %v1362_v0 = vadd.f32 %v5486_v24, %v5454_v58 }
 0x11f   :  { %v1353_v51 = vpop.f32.mrf.mxu1 }
 0x120   :  { %v1354_v11 = vadd.f32 %v1353_v51, %v1076_v34 }
 0x123   :  { %v5489_v48 = vpop.f32.mrf.mxu1 }
 0x124   :  { %v1375_v13 = vadd.f32 %v5489_v48, %v5457_v57 }
 0x125   :  { %v1366_v50 = vpop.f32.mrf.mxu1 }
 0x126   :  { %v1367_v54 = vadd.f32 %v1366_v50, %v1089_v1 }
 0x127   :  { %v5490_v29 = vpop.f32.mrf.mxu1 }
 0x128   :  { %v1378_v60 = vadd.f32 %v5490_v29, %v5458_v12 }
 0x129   :  { %v1369_v39 = vpop.f32.mrf.mxu1 }
 0x12a   :  { %v1370_v17 = vadd.f32 %v1369_v39, %v1092_v14 }
 0x137   :  { %v5509_v53 = vpop.f32.mrf.mxu0 }
 0x138   :  { %v1942_v36 = vadd.f32 %v5509_v53, %v1327_v27 }
 0x139   :  { %v1877_v31 = vpop.f32.mrf.mxu0 }
 0x13a   :  { %v1940_v10 = vadd.f32 %v1877_v31, %v1319_v3 }
 0x13b   :  { %v5510_v45 = vpop.f32.mrf.mxu0 }
 0x13c   :  { %v1943_v61 = vadd.f32 %v5510_v45, %v1330_v38 }
 0x13d   :  { %v1880_v63 = vpop.f32.mrf.mxu0 }
 0x13e   :  { %v5541_v7 = vpop.f32.mrf.mxu1  ;;  %v1941_v42 = vadd.f32 %v1880_v63, %v1322_v20 }
 0x13f   :  { %v7331_v25 = vadd.f32 %v5541_v7, %v1942_v36 }
 0x140   :  { %v2445_v21 = vpop.f32.mrf.mxu1 }
 0x141   :  { %v7333_v59 = vadd.f32 %v2445_v21, %v1940_v10 }
 0x142   :  { %v5542_v8 = vpop.f32.mrf.mxu1 }
 0x143   :  { %v7335_v18 = vadd.f32 %v5542_v8, %v1943_v61 }
 0x144   :  { %v2448_v28 = vpop.f32.mrf.mxu1 }
 0x145   :  { %v7337_v49 = vadd.f32 %v2448_v28, %v1941_v42 }
 0x14b   :  { %v5513_v41 = vpop.f32.mrf.mxu0 }
 0x14c   :  { %v1946_v26 = vadd.f32 %v5513_v41, %v1343_v62 }
 0x14d   :  { %v1893_v27 = vpop.f32.mrf.mxu0 }
 0x14e   :  { %v1944_v55 = vadd.f32 %v1893_v27, %v1335_v33 }
 0x14f   :  { %v5514_v40 = vpop.f32.mrf.mxu0 }
 0x150   :  { %v1947_v44 = vadd.f32 %v5514_v40, %v1346_v46 }
 0x151   :  { %v1896_v3 = vpop.f32.mrf.mxu0 }
 0x152   :  { %v1945_v15 = vadd.f32 %v1896_v3, %v1338_v30 }
 0x159   :  { %v5545_v16 = vpop.f32.mrf.mxu1 }
 0x15a   :  { %v7339_v38 = vadd.f32 %v5545_v16, %v1946_v26 }
 0x15b   :  { %v2461_v5 = vpop.f32.mrf.mxu1 }
 0x15c   :  { %v7341_v32 = vadd.f32 %v2461_v5, %v1944_v55 }
 0x15d   :  { %v5546_v20 = vpop.f32.mrf.mxu1  ;;  %v5517_v43 = vpop.f32.mrf.mxu0 }
 0x15e   :  { %v7343_v47 = vadd.f32 %v5546_v20, %v1947_v44  ;;  %v1950_v19 = vadd.f32 %v5517_v43, %v1359_v9 }
 0x15f   :  { %v2464_v52 = vpop.f32.mrf.mxu1  ;;  %v1909_v62 = vpop.f32.mrf.mxu0 }
 0x160   :  { %v7345_v6 = vadd.f32 %v2464_v52, %v1945_v15  ;;  %v1948_v22 = vadd.f32 %v1909_v62, %v1351_v4 }
 0x161   :  { %v5549_v33 = vpop.f32.mrf.mxu1  ;;  %v5518_v35 = vpop.f32.mrf.mxu0 }
 0x162   :  { %v7347_v46 = vadd.f32 %v5549_v33, %v1950_v19  ;;  %v1951_v2 = vadd.f32 %v5518_v35, %v1362_v0 }
 0x163   :  { %v2477_v30 = vpop.f32.mrf.mxu1  ;;  %v1912_v58 = vpop.f32.mrf.mxu0 }
 0x164   :  { %v7349_v37 = vadd.f32 %v2477_v30, %v1948_v22  ;;  %v1949_v56 = vadd.f32 %v1912_v58, %v1354_v11 }
 0x165   :  { %v5550_v34 = vpop.f32.mrf.mxu1 }
 0x166   :  { %v7351_v57 = vadd.f32 %v5550_v34, %v1951_v2 }
 0x167   :  { %v2480_v23 = vpop.f32.mrf.mxu1 }
 0x168   :  { %v7353_v24 = vadd.f32 %v2480_v23, %v1949_v56 }
 0x169   :  { %v5553_v9 = vpop.f32.mrf.mxu1 }
 0x16b   :  { %v5521_v1 = vpop.f32.mrf.mxu0  ;;  %v2493_v48 = vpop.f32.mrf.mxu1 }
 0x16c   :  { %v1954_v51 = vadd.f32 %v5521_v1, %v1375_v13 }
 0x16d   :  { %v1925_v4 = vpop.f32.mrf.mxu0  ;;  %v5554_v0 = vpop.f32.mrf.mxu1 }
 0x16e   :  { %v7355_v12 = vadd.f32 %v5553_v9, %v1954_v51  ;;  %v1952_v50 = vadd.f32 %v1925_v4, %v1367_v54 }
 0x16f   :  { %v5522_v29 = vpop.f32.mrf.mxu0  ;;  %v2496_v31 = vpop.f32.mrf.mxu1 }
 0x170   :  { %v7357_v14 = vadd.f32 %v2493_v48, %v1952_v50  ;;  %v1955_v39 = vadd.f32 %v5522_v29, %v1378_v60 }
 0x171   :  { %v1928_v53 = vpop.f32.mrf.mxu0 }
 0x172   :  { %v7359_v11 = vadd.f32 %v5554_v0, %v1955_v39  ;;  %v1953_v36 = vadd.f32 %v1928_v53, %v1370_v17 }
 0x173   :  { %v5573_v10 = vpop.f32.mrf.mxu0 }
 0x174   :  { %v7361_v45 = vadd.f32 %v2496_v31, %v1953_v36 }
 0x175   :  { %v2671_v61 = vpop.f32.mrf.mxu0 }
 0x176   :  { %7810 = vst [vmem:[#allocation13_spill] sm:$0xff] %v7361_v45 }
 0x177   :  { %v5574_v13 = vpop.f32.mrf.mxu0 }
 0x179   :  { %v5605_v7 = vpop.f32.mrf.mxu1  ;;  %v2674_v63 = vpop.f32.mrf.mxu0 }
 0x17b   :  { %v3226_v42 = vpop.f32.mrf.mxu1  ;;  %v5577_v21 = vpop.f32.mrf.mxu0 }
 0x17d   :  { %v7363_v54 = vpop.f32.mrf.mxu1  ;;  %v2687_v8 = vpop.f32.mrf.mxu0 }
 0x17f   :  { %v7365_v28 = vpop.f32.mrf.mxu1  ;;  %v5578_v60 = vpop.f32.mrf.mxu0 }
 0x181   :  { %v7367_v41 = vpop.f32.mrf.mxu1  ;;  %v2690_v26 = vpop.f32.mrf.mxu0 }
 0x183   :  { %v7369_v17 = vpop.f32.mrf.mxu1  ;;  %v5581_v27 = vpop.f32.mrf.mxu0 }
 0x185   :  { %v7371_v55 = vpop.f32.mrf.mxu1  ;;  %v2703_v40 = vpop.f32.mrf.mxu0 }
 0x187   :  { %v7373_v44 = vpop.f32.mrf.mxu1  ;;  %v5582_v3 = vpop.f32.mrf.mxu0 }
 0x189   :  { %v7375_v15 = vpop.f32.mrf.mxu1  ;;  %v2706_v16 = vpop.f32.mrf.mxu0 }
 0x18b   :  { %v7377_v5 = vpop.f32.mrf.mxu1  ;;  %v5585_v20 = vpop.f32.mrf.mxu0 }
 0x18d   :  { %v7379_v43 = vpop.f32.mrf.mxu1  ;;  %v2719_v52 = vpop.f32.mrf.mxu0 }
 0x18f   :  { %v7381_v19 = vpop.f32.mrf.mxu1  ;;  %v5586_v62 = vpop.f32.mrf.mxu0 }
 0x191   :  { %v7383_v33 = vpop.f32.mrf.mxu1  ;;  %v7385_v22 = vpop.f32.mrf.mxu0 }
 0x192   :  { %7811 = vst [vmem:[#allocation15_spill] sm:$0xff] %v7385_v22 }
 0x193   :  { %v7387_v35 = vpop.f32.mrf.mxu1  ;;  %v5637_v30 = vpop.f32.mrf.mxu0 }
 0x194   :  { %7812 = vst [vmem:[#allocation14_spill] sm:$0xff] %v7387_v35 }
 0x195   :  { %v7389_v2 = vpop.f32.mrf.mxu1  ;;  %v3810_v58 = vpop.f32.mrf.mxu0 }
 0x196   :  { %7813 = vst [vmem:[#allocation18_spill] sm:$0xff] %v7389_v2 }
 0x197   :  { %v7391_v34 = vpop.f32.mrf.mxu1  ;;  %v5638_v56 = vpop.f32.mrf.mxu0 }
 0x198   :  { %7814 = vst [vmem:[#allocation17_spill] sm:$0xff] %v7391_v34 }
 0x199   :  { %v5669_v23 = vpop.f32.mrf.mxu1  ;;  %v3813_v9 = vpop.f32.mrf.mxu0 }
 0x19b   :  { %v4100_v1 = vpop.f32.mrf.mxu1  ;;  %v5641_v51 = vpop.f32.mrf.mxu0 }
 0x19d   :  { %v7393_v48 = vpop.f32.mrf.mxu1  ;;  %v3826_v4 = vpop.f32.mrf.mxu0 }
 0x19e   :  { %7815 = vst [vmem:[#allocation8_spill] sm:$0xff] %v7393_v48 }
 0x19f   :  { %v7395_v50 = vpop.f32.mrf.mxu1  ;;  %v7397_v29 = vpop.f32.mrf.mxu0 }
 0x1a0   :  { %7816 = vst [vmem:[#allocation9_spill] sm:$0xff] %v7395_v50  ;;  %7817 = vst [vmem:[#allocation4_spill] sm:$0xff] %v7397_v29  ;;  %v2736_v50 = vadd.f32 %v5573_v10, %v7331_v25  ;;  %v2739_v10 = vadd.f32 %v2690_v26, %v7345_v6 }
 0x1a1   :  { %v7399_v0 = vpop.f32.mrf.mxu1  ;;  %v7401_v39 = vpop.f32.mrf.mxu0 }
 0x1a2   :  { %7818 = vst [vmem:[#allocation10_spill] sm:$0xff] %v7399_v0  ;;  %7819 = vst [vmem:[#allocation6_spill] sm:$0xff] %v7401_v39  ;;  %v2734_v0 = vadd.f32 %v2671_v61, %v7333_v59  ;;  %v3291_v25 = vadd.f32 %v5605_v7, %v2736_v50  ;;  %v2744_v61 = vadd.f32 %v5581_v27, %v7347_v46 }
 0x1a3   :  { %v7403_v53 = vpop.f32.mrf.mxu1  ;;  %v5645_v36 = vpop.f32.mrf.mxu0 }
 0x1a4   :  { %7820 = vst [vmem:[#allocation5_spill] sm:$0xff] %v7403_v53  ;;  %v2737_v53 = vadd.f32 %v5574_v13, %v7335_v18  ;;  %v3289_v59 = vadd.f32 %v3226_v42, %v2734_v0  ;;  %v2742_v18 = vadd.f32 %v2703_v40, %v7349_v37  ;;  %v3875_v42 = vadd.f32 %v5637_v30, %v3291_v25  ;;  %v7826_v40 = vld [vmem:[#allocation13_spill] sm:$0xff] }
 0x1a5   :  { %v7405_v31 = vpop.f32.mrf.mxu1  ;;  %v7407_v34 = vpop.f32.mrf.mxu0 }
 0x1a6   :  { %7821 = vst [vmem:[#allocation16_spill] sm:$0xff] %v7405_v31  ;;  %7822 = vst [vmem:[#allocation3_spill] sm:$0xff] %v7407_v34  ;;  %v2735_v31 = vadd.f32 %v2674_v63, %v7337_v49  ;;  %v2740_v34 = vadd.f32 %v5577_v21, %v7339_v38  ;;  %v2745_v49 = vadd.f32 %v5582_v3, %v7351_v57  ;;  %v7827_v3 = vld [vmem:[#allocation15_spill] sm:$0xff] }
 0x1a7   :  { %v7409_v2 = vpop.f32.mrf.mxu1  ;;  %v5646_v35 = vpop.f32.mrf.mxu0  ;;  %v2743_v38 = vadd.f32 %v2706_v16, %v7353_v24  ;;  %v3292_v63 = vadd.f32 %v7363_v54, %v2737_v53  ;;  %v3873_v6 = vadd.f32 %v3810_v58, %v3289_v59  ;;  %v2746_v24 = vadd.f32 %v2719_v52, %v7357_v14  ;;  %v7828_v52 = vld [vmem:[#allocation14_spill] sm:$0xff]  ;;  %v7831_v50 = vld [vmem:[#allocation4_spill] sm:$0xff] }
 0x1a8   :  { %7823 = vst [vmem:[#allocation19_spill] sm:$0xff] %v7409_v2  ;;  %v2738_v2 = vadd.f32 %v2687_v8, %v7341_v32  ;;  %v2748_v32 = vadd.f32 %v5585_v20, %v7355_v12  ;;  %v3290_v7 = vadd.f32 %v7365_v28, %v2735_v31  ;;  %v3295_v46 = vadd.f32 %v7367_v41, %v2740_v34 }
 0x1a9   :  { %v7411_v48 = vpop.f32.mrf.mxu1  ;;  %v7413_v22 = vpop.f32.mrf.mxu0  ;;  %v3294_v8 = vadd.f32 %v7373_v44, %v2739_v10  ;;  %v2749_v54 = vadd.f32 %v5586_v62, %v7359_v11  ;;  %v3876_v26 = vadd.f32 %v5638_v56, %v3292_v63  ;;  %v3297_v28 = vadd.f32 %v7377_v5, %v2742_v18  ;;  %v7832_v53 = vld [vmem:[#allocation6_spill] sm:$0xff]  ;;  %v7835_v10 = vld [vmem:[#allocation9_spill] sm:$0xff] }
 0x1aa   :  { %7824 = vst [vmem:[#allocation20_spill] sm:$0xff] %v7411_v48  ;;  %7825 = vst [vmem:[#allocation7_spill] sm:$0xff] %v7413_v22  ;;  %v2741_v48 = vadd.f32 %v5578_v60, %v7343_v47  ;;  %v3293_v37 = vadd.f32 %v7369_v17, %v2738_v2  ;;  %v3299_v60 = vadd.f32 %v7375_v15, %v2744_v61 }
 0x1ab   :  { %v7417_v29 = vpop.f32.mrf.mxu1  ;;  %v7419_v39 = vpop.f32.mrf.mxu0  ;;  %v3300_v27 = vadd.f32 %v7379_v43, %v2745_v49  ;;  %v3298_v41 = vadd.f32 %v7381_v19, %v2743_v38  ;;  %v3303_v17 = vadd.f32 %v7383_v33, %v2748_v32  ;;  %v2747_v16 = vadd.f32 %v7827_v3, %v7826_v40  ;;  %v7829_v19 = vld [vmem:[#allocation18_spill] sm:$0xff]  ;;  %v7830_v33 = vld [vmem:[#allocation8_spill] sm:$0xff] }
 0x1ac   :  { %v3296_v57 = vadd.f32 %v7371_v55, %v2741_v48  ;;  %v4165_v44 = vadd.f32 %v5669_v23, %v3875_v42  ;;  %v4163_v20 = vadd.f32 %v4100_v1, %v3873_v6  ;;  %v3874_v15 = vadd.f32 %v3813_v9, %v3290_v7  ;;  %v7837_v32 = vld [vmem:[#allocation10_spill] sm:$0xff]  ;;  %v7838_v7 = vld [vmem:[#allocation5_spill] sm:$0xff] }
 0x1ad   :  { %v7426_v45 = vpop.f32.mrf.mxu1  ;;  %v7428_v22 = vpop.f32.mrf.mxu0  ;;  %v3301_v11 = vadd.f32 %v7828_v52, %v2746_v24  ;;  %v3879_v62 = vadd.f32 %v5641_v51, %v3295_v46  ;;  %v3877_v30 = vadd.f32 %v3826_v4, %v3293_v37  ;;  %v3883_v5 = vadd.f32 %v5645_v36, %v3299_v60  ;;  %v7833_v1 = vld [vmem:[#allocation3_spill] sm:$0xff]  ;;  %v7470_v51 = vld [vmem:[%s7549_s2] ss:$0 sm:$0xff] }
 0x1ae   :  { %v3304_v58 = vadd.f32 %v7829_v19, %v2749_v54  ;;  %v4166_v34 = vadd.f32 %v7830_v33, %v3876_v26  ;;  %v3880_v0 = vadd.f32 %v7831_v50, %v3296_v57  ;;  %v3878_v23 = vadd.f32 %v7832_v53, %v3294_v8  ;;  %v7834_v36 = vld [vmem:[#allocation17_spill] sm:$0xff]  ;;  %v7840_v26 = vld [vmem:[#allocation16_spill] sm:$0xff] }
 0x1af   :  { %v7436_v13 = vpop.f32.mrf.mxu1  ;;  %v7438_v47 = vpop.f32.mrf.mxu0  ;;  %v3881_v9 = vadd.f32 %v7833_v1, %v3297_v28  ;;  %v3884_v31 = vadd.f32 %v5646_v35, %v3300_v27  ;;  %v3302_v59 = vadd.f32 %v7834_v36, %v2747_v16  ;;  %v4164_v61 = vadd.f32 %v7835_v10, %v3874_v15  ;;  %v7841_v27 = vld [vmem:[#allocation19_spill] sm:$0xff] }
 0x1b0   :  { %v4169_v63 = vadd.f32 %v7837_v32, %v3879_v62  ;;  %v4167_v42 = vadd.f32 %v7838_v7, %v3877_v30  ;;  %v3887_v46 = vadd.f32 %v7419_v39, %v3303_v17  ;;  %v4170_v28 = vadd.f32 %v7840_v26, %v3880_v0 }
 0x1b1   :  { %v5681_v21 = vpop.f32.mrf.mxu1  ;;  %v3861_v12 = vpop.f32.mrf.mxu0  ;;  %v7836_v18 = vld [vmem:[#allocation7_spill] sm:$0xff]  ;;  %v7839_v35 = vld [vmem:[#allocation20_spill] sm:$0xff]  ;;  %v4174_v40 = vadd.f32 %v7426_v45, %v3884_v31  ;;  %v3885_v17 = vadd.f32 %v7428_v22, %v3301_v11  ;;  %v3888_v52 = vadd.f32 %v7438_v47, %v3304_v58 }
 0x1b2   :  { %v3882_v49 = vadd.f32 %v7836_v18, %v3298_v41  ;;  %v4173_v6 = vadd.f32 %v7839_v35, %v3883_v5  ;;  %v4168_v41 = vadd.f32 %v7841_v27, %v3878_v23  ;;  %v4177_v15 = vadd.f32 %v5681_v21, %v3887_v46 }
 0x1b3   :  { %v7453_v55 = vpop.f32.mrf.mxu1  ;;  %v5701_v14 = vpop.f32.mrf.mxu0  ;;  %v3886_v62 = vadd.f32 %v3861_v12, %v3302_v59 }
 0x1b4   :  { %v4736_v56 = vadd.f32 %v5701_v14, %v4165_v44  ;;  %v4171_v14 = vadd.f32 %v7417_v29, %v3881_v9  ;;  %v4172_v39 = vadd.f32 %v7436_v13, %v3882_v49  ;;  %v4175_v32 = vadd.f32 %v7453_v55, %v3885_v17 }
 0x1b5   :  { %v7458_v2 = vpop.f32.mrf.mxu1  ;;  %v4671_v43 = vpop.f32.mrf.mxu0 }
 0x1b6   :  { %v4734_v48 = vadd.f32 %v4671_v43, %v4163_v20  ;;  %v4759_v24 = vadd.f32 %v7470_v51, %v4736_v56 }
 0x1b7   :  { %v7465_v25 = vpop.f32.mrf.mxu1  ;;  %v5702_v4 = vpop.f32.mrf.mxu0 }
 0x1b8   :  { %v4737_v38 = vadd.f32 %v5702_v4, %v4166_v34  ;;  %v4757_v8 = vadd.f32 %v7470_v51, %v4734_v48  ;;  %v4877_v47 = vmul.f32 %v4759_v24, %v4759_v24 }
 0x1b9   :  { %v5709_v37 = vpop.f32.mrf.mxu1  ;;  %v4674_v57 = vpop.f32.mrf.mxu0 }
 0x1ba   :  { %v4760_v60 = vadd.f32 %v7470_v51, %v4737_v38  ;;  %v4735_v54 = vadd.f32 %v4674_v57, %v4164_v61  ;;  %v4744_v44 = vadd.f32 %v5709_v37, %v4173_v6  ;;  %v4875_v19 = vmul.f32 %v4757_v8, %v4757_v8 }
 0x1bb   :  { %v4703_v3 = vpop.f32.mrf.mxu1  ;;  %v5705_v16 = vpop.f32.mrf.mxu0 }
 0x1bc   :  { %v5244_v20 = vpack.c.bf16 %v4760_v60, %v4759_v24  ;;  %v4758_v5 = vadd.f32 %v7470_v51, %v4735_v54  ;;  %v4742_v29 = vadd.f32 %v4703_v3, %v4171_v14  ;;  %v4740_v21 = vadd.f32 %v5705_v16, %v4169_v63 }
 0x1bd   :  { %v5710_v30 = vpop.f32.mrf.mxu1  ;;  %v4687_v43 = vpop.f32.mrf.mxu0  ;;  %v7494_v12 = vadd.f32 %v7470_v51, %v4744_v44  ;;  %v4878_v31 = vmul.f32 %v4760_v60, %v4760_v60  ;;  %v4178_v63 = vadd.f32 %v7458_v2, %v3888_v52 }
 0x1be   :  { %5276 = vst [vmem:[%s7550_s3 + $0x8] sm:$0xff] %v5244_v20   ;;  %v4745_v45 = vadd.f32 %v5710_v30, %v4174_v40  ;;  %v4738_v13 = vadd.f32 %v4687_v43, %v4167_v42  ;;  %v5239_v33 = vpack.c.bf16 %v4758_v5, %v4757_v8  ;;  %v4853_v22 = vadd.f32 %v4758_v5, %v4757_v8 }
 0x1bf   :  { %v4876_v11 = vmul.f32 %v4758_v5, %v4758_v5  ;;  %v4706_v34 = vpop.f32.mrf.mxu1  ;;  %v5706_v56 = vpop.f32.mrf.mxu0  ;;  %v4765_v9 = vadd.f32 %v7470_v51, %v4742_v29  ;;  %v4763_v10 = vadd.f32 %v7470_v51, %v4740_v21 }
 0x1c0   :  { %v7497_v58 = vadd.f32 %v7470_v51, %v4745_v45  ;;  %v4743_v48 = vadd.f32 %v4706_v34, %v4172_v39  ;;  %5240 = vst [vmem:[%s7550_s3] sm:$0xff] %v5239_v33   ;;  %v4854_v50 = vadd.f32 %v4853_v22, %v4759_v24  ;;  %v4761_v23 = vadd.f32 %v7470_v51, %v4738_v13 }
 0x1c1   :  { %v4891_v0 = vadd.f32 %v4876_v11, %v4875_v19  ;;  %v5713_v53 = vpop.f32.mrf.mxu1  ;;  %v4741_v1 = vadd.f32 %v5706_v56, %v4170_v28  ;;  %v4690_v38 = vpop.f32.mrf.mxu0  ;;  %v4176_v24 = vadd.f32 %v7465_v25, %v3886_v62  ;;  %v4881_v44 = vmul.f32 %v4763_v10, %v4763_v10 }
 0x1c2   :  { %v5264_v4 = vpack.c.bf16 %v7497_v58, %v7494_v12  ;;  %v4766_v36 = vadd.f32 %v7470_v51, %v4743_v48  ;;  %v4855_v61 = vadd.f32 %v4854_v50, %v4760_v60  ;;  %v4748_v42 = vadd.f32 %v5713_v53, %v4177_v15 }
 0x1c3   :  { %v4892_v59 = vadd.f32 %v4891_v0, %v4877_v47  ;;  %v4719_v18 = vpop.f32.mrf.mxu1  ;;  %v4764_v49 = vadd.f32 %v7470_v51, %v4741_v1  ;;  %v4879_v6 = vmul.f32 %v4761_v23, %v4761_v23  ;;  %v4739_v8 = vadd.f32 %v4690_v38, %v4168_v41 }
 0x1c4   :  { %5280 = vst [vmem:[%s7550_s3 + $0x28] sm:$0xff] %v5264_v4   ;;  %v5259_v7 = vpack.c.bf16 %v4766_v36, %v4765_v9  ;;  %v4856_v35 = vadd.f32 %v4855_v61, %v4761_v23  ;;  %v4746_v60 = vadd.f32 %v4719_v18, %v4175_v32  ;;  %v4771_v26 = vadd.f32 %v7470_v51, %v4748_v42 }
 0x1c5   :  { %v4893_v46 = vadd.f32 %v4892_v59, %v4878_v31  ;;  %v5254_v37 = vpack.c.bf16 %v4764_v49, %v4763_v10  ;;  %v5714_v57 = vpop.f32.mrf.mxu1  ;;  %v4762_v27 = vadd.f32 %v7470_v51, %v4739_v8  ;;  %v4882_v62 = vmul.f32 %v4764_v49, %v4764_v49 }
 0x1c6   :  { %5279 = vst [vmem:[%s7550_s3 + $0x20] sm:$0xff] %v5259_v7   ;;  %v4749_v55 = vadd.f32 %v5714_v57, %v4178_v63  ;;  %v4769_v16 = vadd.f32 %v7470_v51, %v4746_v60  ;;  %v4883_v5 = vmul.f32 %v4765_v9, %v4765_v9  ;;  %v4884_v29 = vmul.f32 %v4766_v36, %v4766_v36 }
 0x1c7   :  { %v4894_v2 = vadd.f32 %v4893_v46, %v4879_v6  ;;  %5278 = vst [vmem:[%s7550_s3 + $0x18] sm:$0xff] %v5254_v37   ;;  %v4722_v54 = vpop.f32.mrf.mxu1  ;;  %v5249_v40 = vpack.c.bf16 %v4762_v27, %v4761_v23  ;;  %v4857_v3 = vadd.f32 %v4856_v35, %v4762_v27  ;;  %v4880_v41 = vmul.f32 %v4762_v27, %v4762_v27 }
 0x1c8   :  { %v4772_v28 = vadd.f32 %v7470_v51, %v4749_v55  ;;  %v4747_v25 = vadd.f32 %v4722_v54, %v4176_v24  ;;  %v4885_v33 = vmul.f32 %v7494_v12, %v7494_v12  ;;  %v4886_v34 = vmul.f32 %v7497_v58, %v7497_v58 }
 0x1c9   :  { %5277 = vst [vmem:[%s7550_s3 + $0x10] sm:$0xff] %v5249_v40   ;;  %v4858_v17 = vadd.f32 %v4857_v3, %v4763_v10  ;;  %v4895_v20 = vadd.f32 %v4894_v2, %v4880_v41  ;;  %v4887_v47 = vmul.f32 %v4769_v16, %v4769_v16  ;;  %v4889_v1 = vmul.f32 %v4771_v26, %v4771_v26 }
 0x1ca   :  { %v5274_v14 = vpack.c.bf16 %v4772_v28, %v4771_v26  ;;  %v4770_v39 = vadd.f32 %v7470_v51, %v4747_v25  ;;  %v4890_v4 = vmul.f32 %v4772_v28, %v4772_v28 }
 0x1cb   :  { %v4859_v52 = vadd.f32 %v4858_v17, %v4764_v49  ;;  %v4896_v30 = vadd.f32 %v4895_v20, %v4881_v44 }
 0x1cc   :  { %5282 = vst [vmem:[%s7550_s3 + $0x38] sm:$0xff] %v5274_v14   ;;  %v5269_v15 = vpack.c.bf16 %v4770_v39, %v4769_v16  ;;  %v4888_v0 = vmul.f32 %v4770_v39, %v4770_v39 }
 0x1cd   :  { %v4860_v51 = vadd.f32 %v4859_v52, %v4765_v9  ;;  %v4897_v43 = vadd.f32 %v4896_v30, %v4882_v62 }
 0x1ce   :  { %5281 = vst [vmem:[%s7550_s3 + $0x30] sm:$0xff] %v5269_v15  }
 0x1cf   :  { %v4861_v19 = vadd.f32 %v4860_v51, %v4766_v36  ;;  %v4898_v45 = vadd.f32 %v4897_v43, %v4883_v5 }
 0x1d1   :  { %v4862_v13 = vadd.f32 %v4861_v19, %v7494_v12  ;;  %v4899_v22 = vadd.f32 %v4898_v45, %v4884_v29 }
 0x1d3   :  { %v4863_v11 = vadd.f32 %v4862_v13, %v7497_v58  ;;  %v4900_v21 = vadd.f32 %v4899_v22, %v4885_v33 }
 0x1d5   :  { %v4864_v56 = vadd.f32 %v4863_v11, %v4769_v16  ;;  %v4901_v48 = vadd.f32 %v4900_v21, %v4886_v34 }
 0x1d7   :  { %v4865_v50 = vadd.f32 %v4864_v56, %v4770_v39  ;;  %v4902_v53 = vadd.f32 %v4901_v48, %v4887_v47 }
 0x1d9   :  { %v4866_v23 = vadd.f32 %v4865_v50, %v4771_v26  ;;  %v4903_v9 = vadd.f32 %v4902_v53, %v4888_v0 }
 0x1db   :  { %v4867_v31 = vadd.f32 %v4866_v23, %v4772_v28  ;;  %v4904_v36 = vadd.f32 %v4903_v9, %v4889_v1 }
 0x1dd   :  { %v4868_v12 = vrot.slane %v4867_v31, 4  ;;  %v4905_v59 = vadd.f32 %v4904_v36, %v4890_v4 }
 0x1df   :  { %v4869_v10 = vadd.f32 %v4868_v12, %v4867_v31  ;;  %v4906_v61 = vrot.slane %v4905_v59, 4 }
 0x1e1   :  { %v4870_v18 = vrot.slane %v4869_v10, 2  ;;  %v4907_v49 = vadd.f32 %v4906_v61, %v4905_v59 }
 0x1e3   :  { %v4871_v58 = vadd.f32 %v4870_v18, %v4869_v10  ;;  %v4908_v38 = vrot.slane %v4907_v49, 2 }
 0x1e5   :  { %v4872_v32 = vrot.slane %v4871_v58, 1  ;;  %v4909_v63 = vadd.f32 %v4908_v38, %v4907_v49 }
 0x1e7   :  { %v4873_v7 = vadd.f32 %v4872_v32, %v4871_v58  ;;  %v4910_v42 = vrot.slane %v4909_v63, 1 }
 0x1e9   :  { %4874 = vst [vmem:[%s7551_s4] sm:$0x1] %v4873_v7  ;;  %v4911_v35 = vadd.f32 %v4910_v42, %v4909_v63 }
 0x1eb   :  { %4912 = vst [vmem:[%s7552_s5] sm:$0x1] %v4911_v35 }

</bundles_post_ra>
